<compile_context>
chip_gen: v6e
topology: v6e:2x2x1
jax: 0.10.0
libtpu: 0.0.40
codegen_flags: <defaults>
</compile_context>

<pallas_src>
import jax
import jax.numpy as jnp
import numpy as np
from jax import lax
from jax.experimental import pallas as pl
from jax.experimental.pallas import tpu as pltpu


ENC_CHUNK = 4  # encoder steps per fori_loop iteration -> ENC_CHUNK*bs = 8 rows = one aligned store


# ---------------------------------------------------------------------------
# Fused-gate LSTM cell.  `pre` already contains x*W_ih^T + (b_ih + b_hh).
# Gate columns are packed [i, f, o, g]: one sigmoid over 3H, one tanh over H.
# ---------------------------------------------------------------------------
def _fused_lstm_cell(pre, h, c, w_hh_t, H):
    gates = pre + jnp.dot(h, w_hh_t, preferred_element_type=jnp.float32)
    sig = jax.nn.sigmoid(gates[:, : 3 * H])
    g = jnp.tanh(gates[:, 3 * H:])
    i = sig[:, :H]
    f = sig[:, H: 2 * H]
    o = sig[:, 2 * H: 3 * H]
    c_new = f * c + i * g
    h_new = o * jnp.tanh(c_new)
    return h_new, c_new


# ---------------------------------------------------------------------------
# The Pallas kernel: encoder LSTM, attention decoder loop, final linear.
# ---------------------------------------------------------------------------
def _seq2seq_kernel(xwb_ref, ewhh_ref,
                    dwih_ref, dwhh_ref, db_ref,
                    wenc_ref, wdec_ref, wval_ref, finw_ref, finb_ref,
                    decx0_ref, onehot_ref, onehotT_ref, ssel_ref, sselT_ref,
                    out_ref, attn_ref,
                    enc_scr, proj_scr):
    f32 = jnp.float32
    S, bs, H4 = xwb_ref.shape
    H = H4 // 4
    T = out_ref.shape[1]

    ewhh = ewhh_ref[...]

    # ------------- Encoder LSTM (stores time-major rows r = t*bs + b) -------------
    def enc_block(blk, carry):
        h, c = carry
        hs = []
        for k in range(ENC_CHUNK):
            h, c = _fused_lstm_cell(xwb_ref[blk * ENC_CHUNK + k], h, c, ewhh, H)
            hs.append(h)
        base = pl.multiple_of(blk * (ENC_CHUNK * bs), ENC_CHUNK * bs)
        enc_scr[pl.ds(base, ENC_CHUNK * bs), :] = jnp.concatenate(hs, axis=0)
        return (h, c)

    h0 = jnp.zeros((bs, H), f32)
    c0 = jnp.zeros((bs, H), f32)
    h, c = lax.fori_loop(0, S // ENC_CHUNK, enc_block, (h0, c0))

    # encoder_weight(encoder_output): ONE (bs*S, H) @ (H, H) matmul, reused by every step.
    proj_scr[...] = jnp.dot(enc_scr[...], wenc_ref[...], preferred_element_type=f32)

    # ------------- Decoder loop over target_len -------------
    dwih = dwih_ref[...]
    dwhh = dwhh_ref[...]
    db = db_ref[...]
    wdec = wdec_ref[...]
    wval = wval_ref[...]
    finw = finw_ref[...]
    finb = finb_ref[...]

    hd, cd = h, c
    dec_x = decx0_ref[...]                                   # (bs, 1)  = inputs[:, -1, :]
    total_attn = jnp.zeros((bs, S), f32)
    fins = []

    for _t in range(T):
        onehot = onehot_ref[...]                             # (bs*S, bs)
        onehot_t = onehotT_ref[...]                          # (bs, bs*S)
        ssel = ssel_ref[...]                                 # (bs*S, S)
        ssel_t = sselT_ref[...]                              # (S, bs*S)
        enc_all = enc_scr[...]                               # (bs*S, H)
        enc_proj = proj_scr[...]                             # (bs*S, H)

        # ----- attention scores, all batches at once -----
        dproj = jnp.dot(hd, wdec, preferred_element_type=f32)              # (bs, H)
        dproj_rows = jnp.dot(onehot, dproj, preferred_element_type=f32)    # (bs*S, H)
        e = jnp.tanh(enc_proj + dproj_rows)                                # (bs*S, H)
        # value_weight (out width 1): VPU multiply + lane reduce instead of an N=1 matmul
        scores_col = jnp.sum(e * wval, axis=1, keepdims=True)              # (bs*S, 1)
        # scatter into lane-dense (bs, S) and do the softmax along the lane axis
        scores_bs = jnp.dot(onehot_t, ssel * scores_col,
                            preferred_element_type=f32)                    # (bs, S)
        m = jnp.max(scores_bs, axis=1, keepdims=True)
        p = jnp.exp(scores_bs - m)
        denom = jnp.sum(p, axis=1, keepdims=True)
        attn_bs = p * pl.reciprocal(denom, approx=True)                    # (bs, S)
        total_attn = total_attn + attn_bs

        # context[b, :] = sum_s attn[b, s] * enc_out[b, s, :]
        attn_rows_t = onehot_t * jnp.dot(attn_bs, ssel_t,
                                         preferred_element_type=f32)       # (bs, bs*S)
        context = jnp.dot(attn_rows_t, enc_all,
                          preferred_element_type=f32)                      # (bs, H)

        # ----- decoder LSTM over the (H+1)-long sequence cat(context, x) -----
        dec_in = jnp.concatenate([context, dec_x], axis=1)                 # (bs, H+1)
        for j in range(H + 1):
            pre = dec_in[:, j: j + 1] * dwih + db                          # (bs, 4H)
            hd, cd = _fused_lstm_cell(pre, hd, cd, dwhh, H)

        # fin_linear (out width 1): VPU multiply + lane reduce
        fin = jnp.sum(hd * finw, axis=1, keepdims=True) + finb             # (bs, 1)
        fins.append(fin)
        dec_x = fin

    out_ref[...] = jnp.concatenate(fins, axis=1)                           # (bs, T)  single store
    attn_ref[...] = total_attn                                             # (bs, S)  single store


# ---------------------------------------------------------------------------
# Wrapper: parameter packing (gate reorder) + pallas_call
# ---------------------------------------------------------------------------
def _pack_lstm(w_ih, w_hh, b_ih, b_hh):
    """PyTorch LSTM params -> kernel layout with gate order [i, f, o, g]."""
    def perm(m):  # reorder packed gate blocks i,f,g,o -> i,f,o,g along the last axis
        i, f, g, o = jnp.split(m, 4, axis=-1)
        return jnp.concatenate([i, f, o, g], axis=-1)
    w_ih_row = perm(w_ih.T)                      # (input_size(=1), 4H)
    w_hh_t = perm(w_hh.T)                        # (H, 4H)
    b = perm((b_ih + b_hh)[None, :])             # (1, 4H)
    return w_ih_row, w_hh_t, b


def attention_seq2seq_forward(inputs, params, target_len):
    """inputs: (bs, S, 1) float32 -> (outputs (bs, T, 1), total_attn (bs, S))."""
    bs, S, in_sz = inputs.shape
    assert in_sz == 1, "model only type-checks for input_size == 1 (see Decoder.forward)"
    assert S % ENC_CHUNK == 0
    H = params["enc_w_hh"].shape[1]

    ewih, ewhh, eb = _pack_lstm(params["enc_w_ih"], params["enc_w_hh"],
                                params["enc_b_ih"], params["enc_b_hh"])
    dwih, dwhh, db = _pack_lstm(params["dec_w_ih"], params["dec_w_hh"],
                                params["dec_b_ih"], params["dec_b_hh"])

    x2d = inputs[:, :, 0].astype(jnp.float32)                           # (bs, S)
    # Encoder input contribution x*W_ih^T + b precomputed per (t, b), gate-permuted.
    xwb = x2d.T[:, :, None] * ewih.reshape(1, 1, 4 * H) + eb.reshape(1, 1, 4 * H)  # (S, bs, 4H)
    decx0 = x2d[:, -1:]                                                 # (bs, 1)

    wenc = params["w_enc"].T                                            # (H, H)
    wdec = params["w_dec"].T                                            # (H, H)
    wval = params["w_val"]                                              # (1, H) row
    finw = params["fin_w"]                                              # (1, H) row
    finb = params["fin_b"][None, :]                                     # (1, 1)

    # Constant 0/1 selector matrices mapping row r = t*bs + b  <->  (batch b, time t).
    r = np.arange(bs * S)
    onehot = jnp.asarray(r[:, None] % bs == np.arange(bs)[None, :], jnp.float32)   # (bs*S, bs)
    ssel = jnp.asarray(r[:, None] // bs == np.arange(S)[None, :], jnp.float32)     # (bs*S, S)
    onehot_t = onehot.T
    ssel_t = ssel.T

    vmem = pl.BlockSpec(memory_space=pltpu.MemorySpace.VMEM)
    out2d, attn = pl.pallas_call(
        _seq2seq_kernel,
        out_shape=(jax.ShapeDtypeStruct((bs, target_len), jnp.float32),
                   jax.ShapeDtypeStruct((bs, S), jnp.float32)),
        in_specs=[vmem] * 15,
        out_specs=(vmem, vmem),
        scratch_shapes=[pltpu.VMEM((bs * S, H), jnp.float32),   # encoder hidden states
                        pltpu.VMEM((bs * S, H), jnp.float32)],  # encoder_weight projection
    )(xwb, ewhh, dwih, dwhh, db, wenc, wdec, wval, finw, finb,
      decx0, onehot, onehot_t, ssel, ssel_t)

    return out2d[:, :, None], attn


# ---------------------------------------------------------------------------
# Deterministic parameter init (PyTorch-style uniform(-1/sqrt(H), 1/sqrt(H))).
# ---------------------------------------------------------------------------
def init_params(key, input_size, hidden_size):
    H = hidden_size
    k = 1.0 / np.sqrt(H)
    ks = jax.random.split(key, 13)
    u = lambda kk, shape: jax.random.uniform(kk, shape, jnp.float32, -k, k)
    return {
        "enc_w_ih": u(ks[0], (4 * H, input_size)),
        "enc_w_hh": u(ks[1], (4 * H, H)),
        "enc_b_ih": u(ks[2], (4 * H,)),
        "enc_b_hh": u(ks[3], (4 * H,)),
        "dec_w_ih": u(ks[4], (4 * H, input_size)),
        "dec_w_hh": u(ks[5], (4 * H, H)),
        "dec_b_ih": u(ks[6], (4 * H,)),
        "dec_b_hh": u(ks[7], (4 * H,)),
        "w_enc": u(ks[8], (H, H)),
        "w_dec": u(ks[9], (H, H)),
        "w_val": u(ks[10], (1, H)),
        "fin_w": u(ks[11], (input_size, H)),
        "fin_b": u(ks[12], (input_size,)),
    }


# ---------------------------------------------------------------------------
# Pure-JAX reference mirroring the PyTorch forward (for correctness check).
# ---------------------------------------------------------------------------
def reference_forward(inputs, p, target_len):
    bs, S, _ = inputs.shape
    H = p["enc_w_hh"].shape[1]

    def cell(x, h, c, wih, whh, bih, bhh):
        gates = x @ wih.T + h @ whh.T + bih + bhh
        i = jax.nn.sigmoid(gates[:, 0:H])
        f = jax.nn.sigmoid(gates[:, H:2 * H])
        g = jnp.tanh(gates[:, 2 * H:3 * H])
        o = jax.nn.sigmoid(gates[:, 3 * H:4 * H])
        c_new = f * c + i * g
        return o * jnp.tanh(c_new), c_new

    h = jnp.zeros((bs, H), jnp.float32)
    c = jnp.zeros((bs, H), jnp.float32)
    enc = []
    for t in range(S):
        h, c = cell(inputs[:, t, :], h, c, p["enc_w_ih"], p["enc_w_hh"],
                    p["enc_b_ih"], p["enc_b_hh"])
        enc.append(h)
    enc_out = jnp.stack(enc, axis=1)                                   # (bs, S, H)

    dec_x = inputs[:, -1, :]
    hd, cd = h, c
    outputs = []
    total = jnp.zeros((bs, S), jnp.float32)
    for _ in range(target_len):
        scores = jnp.einsum(
            "bsh,h->bs",
            jnp.tanh(enc_out @ p["w_enc"].T + (hd @ p["w_dec"].T)[:, None, :]),
            p["w_val"][0])
        attn = jax.nn.softmax(scores, axis=1)
        context = jnp.einsum("bs,bsh->bh", attn, enc_out)
        new_in = jnp.concatenate([context, dec_x], axis=1)
        for j in range(H + 1):
            hd, cd = cell(new_in[:, j:j + 1], hd, cd, p["dec_w_ih"], p["dec_w_hh"],
                          p["dec_b_ih"], p["dec_b_hh"])
        fin = hd @ p["fin_w"].T + p["fin_b"]
        outputs.append(fin)
        dec_x = fin
        total = total + attn
    return jnp.stack(outputs, axis=1), total


if __name__ == "__main__":
    BS, SEQ, INPUT_SIZE, HIDDEN, TARGET_LEN = 2, 60, 1, 16, 4  # SEQ=60 hard-coded in the module

    key = jax.random.PRNGKey(0)
    pkey, xkey = jax.random.split(key)
    params = init_params(pkey, INPUT_SIZE, HIDDEN)
    inputs = jax.random.normal(xkey, (BS, SEQ, INPUT_SIZE), jnp.float32)

    outputs, total_attn = attention_seq2seq_forward(inputs, params, TARGET_LEN)
    jax.block_until_ready((outputs, total_attn))

    assert outputs.shape == (BS, TARGET_LEN, INPUT_SIZE)
    assert total_attn.shape == (BS, SEQ)

    with jax.default_matmul_precision("highest"):
        ref_out, ref_attn = reference_forward(inputs, params, TARGET_LEN)

    np.testing.assert_allclose(np.asarray(outputs), np.asarray(ref_out), atol=2e-2, rtol=2e-2)
    np.testing.assert_allclose(np.asarray(total_attn), np.asarray(ref_attn), atol=2e-2, rtol=2e-2)

    print("KERNEL_OK")
</pallas_src>

<mosaic_0001>
module attributes {stable_mosaic.version = 11 : i64} {
  func.func @_seq2seq_kernel(%arg0: memref<60x2x64xf32, #tpu.memory_space<vmem>>, %arg1: memref<16x64xf32, #tpu.memory_space<vmem>>, %arg2: memref<1x64xf32, #tpu.memory_space<vmem>>, %arg3: memref<16x64xf32, #tpu.memory_space<vmem>>, %arg4: memref<1x64xf32, #tpu.memory_space<vmem>>, %arg5: memref<16x16xf32, #tpu.memory_space<vmem>>, %arg6: memref<16x16xf32, #tpu.memory_space<vmem>>, %arg7: memref<1x16xf32, #tpu.memory_space<vmem>>, %arg8: memref<1x16xf32, #tpu.memory_space<vmem>>, %arg9: memref<1x1xf32, #tpu.memory_space<vmem>>, %arg10: memref<2x1xf32, #tpu.memory_space<vmem>>, %arg11: memref<120x2xf32, #tpu.memory_space<vmem>>, %arg12: memref<2x120xf32, #tpu.memory_space<vmem>>, %arg13: memref<120x60xf32, #tpu.memory_space<vmem>>, %arg14: memref<60x120xf32, #tpu.memory_space<vmem>>, %arg15: memref<2x4xf32, #tpu.memory_space<vmem>>, %arg16: memref<2x60xf32, #tpu.memory_space<vmem>>, %arg17: memref<120x16xf32, #tpu.memory_space<vmem>>, %arg18: memref<120x16xf32, #tpu.memory_space<vmem>>) attributes {dimension_semantics = [], scalar_prefetch = 0 : i64, scratch_operands = 2 : i64, tpu.core_type = #tpu.core_type<tc>} {
    %c0 = arith.constant 0 : index
    %c0_0 = arith.constant 0 : index
    %0 = vector.load %arg1[%c0, %c0_0] : memref<16x64xf32, #tpu.memory_space<vmem>>, vector<16x64xf32>
    %cst = arith.constant 0.000000e+00 : f32
    %1 = vector.broadcast %cst : f32 to vector<2x16xf32>
    %cst_1 = arith.constant 0.000000e+00 : f32
    %2 = vector.broadcast %cst_1 : f32 to vector<2x16xf32>
    %c0_i32 = arith.constant 0 : i32
    %c15_i32 = arith.constant 15 : i32
    %3 = arith.addi %c0_i32, %c15_i32 : i32
    %c1_i32 = arith.constant 1 : i32
    %4:2 = scf.for %arg19 = %c0_i32 to %3 step %c1_i32 iter_args(%arg20 = %1, %arg21 = %2) -> (vector<2x16xf32>, vector<2x16xf32>)  : i32 {
      %c4_i32 = arith.constant 4 : i32
      %1805 = arith.muli %arg19, %c4_i32 : i32
      %c0_i32_251 = arith.constant 0 : i32
      %1806 = arith.addi %1805, %c0_i32_251 : i32
      %1807 = arith.index_cast %1806 : i32 to index
      %c0_252 = arith.constant 0 : index
      %c0_253 = arith.constant 0 : index
      %1808 = vector.load %arg0[%1807, %c0_252, %c0_253] : memref<60x2x64xf32, #tpu.memory_space<vmem>>, vector<1x2x64xf32>
      %1809 = vector.shape_cast %1808 : vector<1x2x64xf32> to vector<2x64xf32>
      %cst_254 = arith.constant dense<0.000000e+00> : vector<2x64xf32>
      %1810 = tpu.matmul %arg20, %0, %cst_254 {dimension_numbers = #tpu.dot_dimension_numbers<[1], [0], [0], [1], [0, 0, 1, 1], [], []>} : vector<2x16xf32>, vector<16x64xf32>, vector<2x64xf32> -> vector<2x64xf32>
      %1811 = arith.addf %1809, %1810 : vector<2x64xf32>
      %1812 = vector.extract_strided_slice %1811 {offsets = [0, 0], sizes = [2, 48], strides = [1, 1]} : vector<2x64xf32> to vector<2x48xf32>
      %1813 = arith.negf %1812 : vector<2x48xf32>
      %1814 = math.exp %1813 : vector<2x48xf32>
      %cst_255 = arith.constant 1.000000e+00 : f32
      %1815 = vector.broadcast %cst_255 : f32 to vector<2x48xf32>
      %1816 = arith.addf %1815, %1814 : vector<2x48xf32>
      %1817 = arith.divf %1815, %1816 : vector<2x48xf32>
      %1818 = vector.extract_strided_slice %1811 {offsets = [0, 48], sizes = [2, 16], strides = [1, 1]} : vector<2x64xf32> to vector<2x16xf32>
      %1819 = math.tanh %1818 : vector<2x16xf32>
      %1820 = vector.extract_strided_slice %1817 {offsets = [0, 0], sizes = [2, 16], strides = [1, 1]} : vector<2x48xf32> to vector<2x16xf32>
      %1821 = vector.extract_strided_slice %1817 {offsets = [0, 16], sizes = [2, 16], strides = [1, 1]} : vector<2x48xf32> to vector<2x16xf32>
      %1822 = vector.extract_strided_slice %1817 {offsets = [0, 32], sizes = [2, 16], strides = [1, 1]} : vector<2x48xf32> to vector<2x16xf32>
      %1823 = arith.mulf %1821, %arg21 : vector<2x16xf32>
      %1824 = arith.mulf %1820, %1819 : vector<2x16xf32>
      %1825 = arith.addf %1823, %1824 : vector<2x16xf32>
      %1826 = math.tanh %1825 : vector<2x16xf32>
      %1827 = arith.mulf %1822, %1826 : vector<2x16xf32>
      %c4_i32_256 = arith.constant 4 : i32
      %1828 = arith.muli %arg19, %c4_i32_256 : i32
      %c1_i32_257 = arith.constant 1 : i32
      %1829 = arith.addi %1828, %c1_i32_257 : i32
      %1830 = arith.index_cast %1829 : i32 to index
      %c0_258 = arith.constant 0 : index
      %c0_259 = arith.constant 0 : index
      %1831 = vector.load %arg0[%1830, %c0_258, %c0_259] : memref<60x2x64xf32, #tpu.memory_space<vmem>>, vector<1x2x64xf32>
      %1832 = vector.shape_cast %1831 : vector<1x2x64xf32> to vector<2x64xf32>
      %cst_260 = arith.constant dense<0.000000e+00> : vector<2x64xf32>
      %1833 = tpu.matmul %1827, %0, %cst_260 {dimension_numbers = #tpu.dot_dimension_numbers<[1], [0], [0], [1], [0, 0, 1, 1], [], []>} : vector<2x16xf32>, vector<16x64xf32>, vector<2x64xf32> -> vector<2x64xf32>
      %1834 = arith.addf %1832, %1833 : vector<2x64xf32>
      %1835 = vector.extract_strided_slice %1834 {offsets = [0, 0], sizes = [2, 48], strides = [1, 1]} : vector<2x64xf32> to vector<2x48xf32>
      %1836 = arith.negf %1835 : vector<2x48xf32>
      %1837 = math.exp %1836 : vector<2x48xf32>
      %cst_261 = arith.constant 1.000000e+00 : f32
      %1838 = vector.broadcast %cst_261 : f32 to vector<2x48xf32>
      %1839 = arith.addf %1838, %1837 : vector<2x48xf32>
      %1840 = arith.divf %1838, %1839 : vector<2x48xf32>
      %1841 = vector.extract_strided_slice %1834 {offsets = [0, 48], sizes = [2, 16], strides = [1, 1]} : vector<2x64xf32> to vector<2x16xf32>
      %1842 = math.tanh %1841 : vector<2x16xf32>
      %1843 = vector.extract_strided_slice %1840 {offsets = [0, 0], sizes = [2, 16], strides = [1, 1]} : vector<2x48xf32> to vector<2x16xf32>
      %1844 = vector.extract_strided_slice %1840 {offsets = [0, 16], sizes = [2, 16], strides = [1, 1]} : vector<2x48xf32> to vector<2x16xf32>
      %1845 = vector.extract_strided_slice %1840 {offsets = [0, 32], sizes = [2, 16], strides = [1, 1]} : vector<2x48xf32> to vector<2x16xf32>
      %1846 = arith.mulf %1844, %1825 : vector<2x16xf32>
      %1847 = arith.mulf %1843, %1842 : vector<2x16xf32>
      %1848 = arith.addf %1846, %1847 : vector<2x16xf32>
      %1849 = math.tanh %1848 : vector<2x16xf32>
      %1850 = arith.mulf %1845, %1849 : vector<2x16xf32>
      %c4_i32_262 = arith.constant 4 : i32
      %1851 = arith.muli %arg19, %c4_i32_262 : i32
      %c2_i32 = arith.constant 2 : i32
      %1852 = arith.addi %1851, %c2_i32 : i32
      %1853 = arith.index_cast %1852 : i32 to index
      %c0_263 = arith.constant 0 : index
      %c0_264 = arith.constant 0 : index
      %1854 = vector.load %arg0[%1853, %c0_263, %c0_264] : memref<60x2x64xf32, #tpu.memory_space<vmem>>, vector<1x2x64xf32>
      %1855 = vector.shape_cast %1854 : vector<1x2x64xf32> to vector<2x64xf32>
      %cst_265 = arith.constant dense<0.000000e+00> : vector<2x64xf32>
      %1856 = tpu.matmul %1850, %0, %cst_265 {dimension_numbers = #tpu.dot_dimension_numbers<[1], [0], [0], [1], [0, 0, 1, 1], [], []>} : vector<2x16xf32>, vector<16x64xf32>, vector<2x64xf32> -> vector<2x64xf32>
      %1857 = arith.addf %1855, %1856 : vector<2x64xf32>
      %1858 = vector.extract_strided_slice %1857 {offsets = [0, 0], sizes = [2, 48], strides = [1, 1]} : vector<2x64xf32> to vector<2x48xf32>
      %1859 = arith.negf %1858 : vector<2x48xf32>
      %1860 = math.exp %1859 : vector<2x48xf32>
      %cst_266 = arith.constant 1.000000e+00 : f32
      %1861 = vector.broadcast %cst_266 : f32 to vector<2x48xf32>
      %1862 = arith.addf %1861, %1860 : vector<2x48xf32>
      %1863 = arith.divf %1861, %1862 : vector<2x48xf32>
      %1864 = vector.extract_strided_slice %1857 {offsets = [0, 48], sizes = [2, 16], strides = [1, 1]} : vector<2x64xf32> to vector<2x16xf32>
      %1865 = math.tanh %1864 : vector<2x16xf32>
      %1866 = vector.extract_strided_slice %1863 {offsets = [0, 0], sizes = [2, 16], strides = [1, 1]} : vector<2x48xf32> to vector<2x16xf32>
      %1867 = vector.extract_strided_slice %1863 {offsets = [0, 16], sizes = [2, 16], strides = [1, 1]} : vector<2x48xf32> to vector<2x16xf32>
      %1868 = vector.extract_strided_slice %1863 {offsets = [0, 32], sizes = [2, 16], strides = [1, 1]} : vector<2x48xf32> to vector<2x16xf32>
      %1869 = arith.mulf %1867, %1848 : vector<2x16xf32>
      %1870 = arith.mulf %1866, %1865 : vector<2x16xf32>
      %1871 = arith.addf %1869, %1870 : vector<2x16xf32>
      %1872 = math.tanh %1871 : vector<2x16xf32>
      %1873 = arith.mulf %1868, %1872 : vector<2x16xf32>
      %c4_i32_267 = arith.constant 4 : i32
      %1874 = arith.muli %arg19, %c4_i32_267 : i32
      %c3_i32 = arith.constant 3 : i32
      %1875 = arith.addi %1874, %c3_i32 : i32
      %1876 = arith.index_cast %1875 : i32 to index
      %c0_268 = arith.constant 0 : index
      %c0_269 = arith.constant 0 : index
      %1877 = vector.load %arg0[%1876, %c0_268, %c0_269] : memref<60x2x64xf32, #tpu.memory_space<vmem>>, vector<1x2x64xf32>
      %1878 = vector.shape_cast %1877 : vector<1x2x64xf32> to vector<2x64xf32>
      %cst_270 = arith.constant dense<0.000000e+00> : vector<2x64xf32>
      %1879 = tpu.matmul %1873, %0, %cst_270 {dimension_numbers = #tpu.dot_dimension_numbers<[1], [0], [0], [1], [0, 0, 1, 1], [], []>} : vector<2x16xf32>, vector<16x64xf32>, vector<2x64xf32> -> vector<2x64xf32>
      %1880 = arith.addf %1878, %1879 : vector<2x64xf32>
      %1881 = vector.extract_strided_slice %1880 {offsets = [0, 0], sizes = [2, 48], strides = [1, 1]} : vector<2x64xf32> to vector<2x48xf32>
      %1882 = arith.negf %1881 : vector<2x48xf32>
      %1883 = math.exp %1882 : vector<2x48xf32>
      %cst_271 = arith.constant 1.000000e+00 : f32
      %1884 = vector.broadcast %cst_271 : f32 to vector<2x48xf32>
      %1885 = arith.addf %1884, %1883 : vector<2x48xf32>
      %1886 = arith.divf %1884, %1885 : vector<2x48xf32>
      %1887 = vector.extract_strided_slice %1880 {offsets = [0, 48], sizes = [2, 16], strides = [1, 1]} : vector<2x64xf32> to vector<2x16xf32>
      %1888 = math.tanh %1887 : vector<2x16xf32>
      %1889 = vector.extract_strided_slice %1886 {offsets = [0, 0], sizes = [2, 16], strides = [1, 1]} : vector<2x48xf32> to vector<2x16xf32>
      %1890 = vector.extract_strided_slice %1886 {offsets = [0, 16], sizes = [2, 16], strides = [1, 1]} : vector<2x48xf32> to vector<2x16xf32>
      %1891 = vector.extract_strided_slice %1886 {offsets = [0, 32], sizes = [2, 16], strides = [1, 1]} : vector<2x48xf32> to vector<2x16xf32>
      %1892 = arith.mulf %1890, %1871 : vector<2x16xf32>
      %1893 = arith.mulf %1889, %1888 : vector<2x16xf32>
      %1894 = arith.addf %1892, %1893 : vector<2x16xf32>
      %1895 = math.tanh %1894 : vector<2x16xf32>
      %1896 = arith.mulf %1891, %1895 : vector<2x16xf32>
      %c8_i32 = arith.constant 8 : i32
      %1897 = arith.muli %arg19, %c8_i32 : i32
      %1898 = tpu.assume_multiple %1897, 8 : i32
      %1899 = tpu.concatenate %1827, %1850, %1873, %1896 in 0 : vector<2x16xf32>, vector<2x16xf32>, vector<2x16xf32>, vector<2x16xf32> -> vector<8x16xf32>
      %1900 = arith.index_cast %1898 : i32 to index
      %c0_272 = arith.constant 0 : index
      %1901 = vector.load %arg17[%1900, %c0_272] : memref<120x16xf32, #tpu.memory_space<vmem>>, vector<8x16xf32>
      tpu.vector_store %arg17[%1900, %c0_272], %1899 {strides = array<i32>} : memref<120x16xf32, #tpu.memory_space<vmem>>, vector<8x16xf32>,
      scf.yield %1896, %1894 : vector<2x16xf32>, vector<2x16xf32>
    }
    %c15_i32_2 = arith.constant 15 : i32
    %c0_3 = arith.constant 0 : index
    %c0_4 = arith.constant 0 : index
    %5 = vector.load %arg17[%c0_3, %c0_4] : memref<120x16xf32, #tpu.memory_space<vmem>>, vector<120x16xf32>
    %c0_5 = arith.constant 0 : index
    %c0_6 = arith.constant 0 : index
    %6 = vector.load %arg5[%c0_5, %c0_6] : memref<16x16xf32, #tpu.memory_space<vmem>>, vector<16x16xf32>
    %cst_7 = arith.constant dense<0.000000e+00> : vector<120x16xf32>
    %7 = tpu.matmul %5, %6, %cst_7 {dimension_numbers = #tpu.dot_dimension_numbers<[1], [0], [0], [1], [0, 0, 1, 1], [], []>} : vector<120x16xf32>, vector<16x16xf32>, vector<120x16xf32> -> vector<120x16xf32>
    %c0_8 = arith.constant 0 : index
    %c0_9 = arith.constant 0 : index
    %8 = vector.load %arg18[%c0_8, %c0_9] : memref<120x16xf32, #tpu.memory_space<vmem>>, vector<120x16xf32>
    tpu.vector_store %arg18[%c0_8, %c0_9], %7 {strides = array<i32>} : memref<120x16xf32, #tpu.memory_space<vmem>>, vector<120x16xf32>,
    %c0_10 = arith.constant 0 : index
    %c0_11 = arith.constant 0 : index
    %9 = vector.load %arg2[%c0_10, %c0_11] : memref<1x64xf32, #tpu.memory_space<vmem>>, vector<1x64xf32>
    %c0_12 = arith.constant 0 : index
    %c0_13 = arith.constant 0 : index
    %10 = vector.load %arg3[%c0_12, %c0_13] : memref<16x64xf32, #tpu.memory_space<vmem>>, vector<16x64xf32>
    %c0_14 = arith.constant 0 : index
    %c0_15 = arith.constant 0 : index
    %11 = vector.load %arg4[%c0_14, %c0_15] : memref<1x64xf32, #tpu.memory_space<vmem>>, vector<1x64xf32>
    %c0_16 = arith.constant 0 : index
    %c0_17 = arith.constant 0 : index
    %12 = vector.load %arg6[%c0_16, %c0_17] : memref<16x16xf32, #tpu.memory_space<vmem>>, vector<16x16xf32>
    %c0_18 = arith.constant 0 : index
    %c0_19 = arith.constant 0 : index
    %13 = vector.load %arg7[%c0_18, %c0_19] : memref<1x16xf32, #tpu.memory_space<vmem>>, vector<1x16xf32>
    %c0_20 = arith.constant 0 : index
    %c0_21 = arith.constant 0 : index
    %14 = vector.load %arg8[%c0_20, %c0_21] : memref<1x16xf32, #tpu.memory_space<vmem>>, vector<1x16xf32>
    %c0_22 = arith.constant 0 : index
    %c0_23 = arith.constant 0 : index
    %15 = vector.load %arg9[%c0_22, %c0_23] : memref<1x1xf32, #tpu.memory_space<vmem>>, vector<1x1xf32>
    %c0_24 = arith.constant 0 : index
    %c0_25 = arith.constant 0 : index
    %16 = vector.load %arg10[%c0_24, %c0_25] : memref<2x1xf32, #tpu.memory_space<vmem>>, vector<2x1xf32>
    %cst_26 = arith.constant 0.000000e+00 : f32
    %17 = vector.broadcast %cst_26 : f32 to vector<2x60xf32>
    %c0_27 = arith.constant 0 : index
    %c0_28 = arith.constant 0 : index
    %18 = vector.load %arg11[%c0_27, %c0_28] : memref<120x2xf32, #tpu.memory_space<vmem>>, vector<120x2xf32>
    %c0_29 = arith.constant 0 : index
    %c0_30 = arith.constant 0 : index
    %19 = vector.load %arg12[%c0_29, %c0_30] : memref<2x120xf32, #tpu.memory_space<vmem>>, vector<2x120xf32>
    %c0_31 = arith.constant 0 : index
    %c0_32 = arith.constant 0 : index
    %20 = vector.load %arg13[%c0_31, %c0_32] : memref<120x60xf32, #tpu.memory_space<vmem>>, vector<120x60xf32>
    %c0_33 = arith.constant 0 : index
    %c0_34 = arith.constant 0 : index
    %21 = vector.load %arg14[%c0_33, %c0_34] : memref<60x120xf32, #tpu.memory_space<vmem>>, vector<60x120xf32>
    %c0_35 = arith.constant 0 : index
    %c0_36 = arith.constant 0 : index
    %22 = vector.load %arg17[%c0_35, %c0_36] : memref<120x16xf32, #tpu.memory_space<vmem>>, vector<120x16xf32>
    %c0_37 = arith.constant 0 : index
    %c0_38 = arith.constant 0 : index
    %23 = vector.load %arg18[%c0_37, %c0_38] : memref<120x16xf32, #tpu.memory_space<vmem>>, vector<120x16xf32>
    %cst_39 = arith.constant dense<0.000000e+00> : vector<2x16xf32>
    %24 = tpu.matmul %4#0, %12, %cst_39 {dimension_numbers = #tpu.dot_dimension_numbers<[1], [0], [0], [1], [0, 0, 1, 1], [], []>} : vector<2x16xf32>, vector<16x16xf32>, vector<2x16xf32> -> vector<2x16xf32>
    %cst_40 = arith.constant dense<0.000000e+00> : vector<120x16xf32>
    %25 = tpu.matmul %18, %24, %cst_40 {dimension_numbers = #tpu.dot_dimension_numbers<[1], [0], [0], [1], [0, 0, 1, 1], [], []>} : vector<120x2xf32>, vector<2x16xf32>, vector<120x16xf32> -> vector<120x16xf32>
    %26 = arith.addf %23, %25 : vector<120x16xf32>
    %27 = math.tanh %26 : vector<120x16xf32>
    %28 = vector.broadcast %13 : vector<1x16xf32> to vector<120x16xf32>
    %29 = arith.mulf %27, %28 : vector<120x16xf32>
    %cst_41 = arith.constant dense<0.000000e+00> : vector<120xf32>
    %30 = vector.multi_reduction <add>, %29, %cst_41 [1] : vector<120x16xf32> to vector<120xf32>
    %31 = vector.shape_cast %30 : vector<120xf32> to vector<120x1xf32>
    %32 = vector.broadcast %31 : vector<120x1xf32> to vector<120x60xf32>
    %33 = arith.mulf %20, %32 : vector<120x60xf32>
    %cst_42 = arith.constant dense<0.000000e+00> : vector<2x60xf32>
    %34 = tpu.matmul %19, %33, %cst_42 {dimension_numbers = #tpu.dot_dimension_numbers<[1], [0], [0], [1], [0, 0, 1, 1], [], []>} : vector<2x120xf32>, vector<120x60xf32>, vector<2x60xf32> -> vector<2x60xf32>
    %cst_43 = arith.constant dense<0xFF800000> : vector<2xf32>
    %35 = vector.multi_reduction <maximumf>, %34, %cst_43 [1] : vector<2x60xf32> to vector<2xf32>
    %36 = vector.shape_cast %35 : vector<2xf32> to vector<2x1xf32>
    %37 = vector.broadcast %36 : vector<2x1xf32> to vector<2x60xf32>
    %38 = arith.subf %34, %37 : vector<2x60xf32>
    %39 = math.exp %38 : vector<2x60xf32>
    %cst_44 = arith.constant dense<0.000000e+00> : vector<2xf32>
    %40 = vector.multi_reduction <add>, %39, %cst_44 [1] : vector<2x60xf32> to vector<2xf32>
    %41 = vector.shape_cast %40 : vector<2xf32> to vector<2x1xf32>
    %42 = tpu.reciprocal %41 {approx = true} : vector<2x1xf32> -> vector<2x1xf32>
    %43 = vector.broadcast %42 : vector<2x1xf32> to vector<2x60xf32>
    %44 = arith.mulf %39, %43 : vector<2x60xf32>
    %45 = arith.addf %17, %44 : vector<2x60xf32>
    %cst_45 = arith.constant dense<0.000000e+00> : vector<2x120xf32>
    %46 = tpu.matmul %44, %21, %cst_45 {dimension_numbers = #tpu.dot_dimension_numbers<[1], [0], [0], [1], [0, 0, 1, 1], [], []>} : vector<2x60xf32>, vector<60x120xf32>, vector<2x120xf32> -> vector<2x120xf32>
    %47 = arith.mulf %19, %46 : vector<2x120xf32>
    %cst_46 = arith.constant dense<0.000000e+00> : vector<2x16xf32>
    %48 = tpu.matmul %47, %22, %cst_46 {dimension_numbers = #tpu.dot_dimension_numbers<[1], [0], [0], [1], [0, 0, 1, 1], [], []>} : vector<2x120xf32>, vector<120x16xf32>, vector<2x16xf32> -> vector<2x16xf32>
    %49 = tpu.concatenate %48, %16 in 1 : vector<2x16xf32>, vector<2x1xf32> -> vector<2x17xf32>
    %50 = vector.extract_strided_slice %49 {offsets = [0, 0], sizes = [2, 1], strides = [1, 1]} : vector<2x17xf32> to vector<2x1xf32>
    %51 = vector.broadcast %50 : vector<2x1xf32> to vector<2x64xf32>
    %52 = vector.broadcast %9 : vector<1x64xf32> to vector<2x64xf32>
    %53 = arith.mulf %51, %52 : vector<2x64xf32>
    %54 = vector.broadcast %11 : vector<1x64xf32> to vector<2x64xf32>
    %55 = arith.addf %53, %54 : vector<2x64xf32>
    %cst_47 = arith.constant dense<0.000000e+00> : vector<2x64xf32>
    %56 = tpu.matmul %4#0, %10, %cst_47 {dimension_numbers = #tpu.dot_dimension_numbers<[1], [0], [0], [1], [0, 0, 1, 1], [], []>} : vector<2x16xf32>, vector<16x64xf32>, vector<2x64xf32> -> vector<2x64xf32>
    %57 = arith.addf %55, %56 : vector<2x64xf32>
    %58 = vector.extract_strided_slice %57 {offsets = [0, 0], sizes = [2, 48], strides = [1, 1]} : vector<2x64xf32> to vector<2x48xf32>
    %59 = arith.negf %58 : vector<2x48xf32>
    %60 = math.exp %59 : vector<2x48xf32>
    %cst_48 = arith.constant 1.000000e+00 : f32
    %61 = vector.broadcast %cst_48 : f32 to vector<2x48xf32>
    %62 = arith.addf %61, %60 : vector<2x48xf32>
    %63 = arith.divf %61, %62 : vector<2x48xf32>
    %64 = vector.extract_strided_slice %57 {offsets = [0, 48], sizes = [2, 16], strides = [1, 1]} : vector<2x64xf32> to vector<2x16xf32>
    %65 = math.tanh %64 : vector<2x16xf32>
    %66 = vector.extract_strided_slice %63 {offsets = [0, 0], sizes = [2, 16], strides = [1, 1]} : vector<2x48xf32> to vector<2x16xf32>
    %67 = vector.extract_strided_slice %63 {offsets = [0, 16], sizes = [2, 16], strides = [1, 1]} : vector<2x48xf32> to vector<2x16xf32>
    %68 = vector.extract_strided_slice %63 {offsets = [0, 32], sizes = [2, 16], strides = [1, 1]} : vector<2x48xf32> to vector<2x16xf32>
    %69 = arith.mulf %67, %4#1 : vector<2x16xf32>
    %70 = arith.mulf %66, %65 : vector<2x16xf32>
    %71 = arith.addf %69, %70 : vector<2x16xf32>
    %72 = math.tanh %71 : vector<2x16xf32>
    %73 = arith.mulf %68, %72 : vector<2x16xf32>
    %74 = vector.extract_strided_slice %49 {offsets = [0, 1], sizes = [2, 1], strides = [1, 1]} : vector<2x17xf32> to vector<2x1xf32>
    %75 = vector.broadcast %74 : vector<2x1xf32> to vector<2x64xf32>
    %76 = vector.broadcast %9 : vector<1x64xf32> to vector<2x64xf32>
    %77 = arith.mulf %75, %76 : vector<2x64xf32>
    %78 = vector.broadcast %11 : vector<1x64xf32> to vector<2x64xf32>
    %79 = arith.addf %77, %78 : vector<2x64xf32>
    %cst_49 = arith.constant dense<0.000000e+00> : vector<2x64xf32>
    %80 = tpu.matmul %73, %10, %cst_49 {dimension_numbers = #tpu.dot_dimension_numbers<[1], [0], [0], [1], [0, 0, 1, 1], [], []>} : vector<2x16xf32>, vector<16x64xf32>, vector<2x64xf32> -> vector<2x64xf32>
    %81 = arith.addf %79, %80 : vector<2x64xf32>
    %82 = vector.extract_strided_slice %81 {offsets = [0, 0], sizes = [2, 48], strides = [1, 1]} : vector<2x64xf32> to vector<2x48xf32>
    %83 = arith.negf %82 : vector<2x48xf32>
    %84 = math.exp %83 : vector<2x48xf32>
    %cst_50 = arith.constant 1.000000e+00 : f32
    %85 = vector.broadcast %cst_50 : f32 to vector<2x48xf32>
    %86 = arith.addf %85, %84 : vector<2x48xf32>
    %87 = arith.divf %85, %86 : vector<2x48xf32>
    %88 = vector.extract_strided_slice %81 {offsets = [0, 48], sizes = [2, 16], strides = [1, 1]} : vector<2x64xf32> to vector<2x16xf32>
    %89 = math.tanh %88 : vector<2x16xf32>
    %90 = vector.extract_strided_slice %87 {offsets = [0, 0], sizes = [2, 16], strides = [1, 1]} : vector<2x48xf32> to vector<2x16xf32>
    %91 = vector.extract_strided_slice %87 {offsets = [0, 16], sizes = [2, 16], strides = [1, 1]} : vector<2x48xf32> to vector<2x16xf32>
    %92 = vector.extract_strided_slice %87 {offsets = [0, 32], sizes = [2, 16], strides = [1, 1]} : vector<2x48xf32> to vector<2x16xf32>
    %93 = arith.mulf %91, %71 : vector<2x16xf32>
    %94 = arith.mulf %90, %89 : vector<2x16xf32>
    %95 = arith.addf %93, %94 : vector<2x16xf32>
    %96 = math.tanh %95 : vector<2x16xf32>
    %97 = arith.mulf %92, %96 : vector<2x16xf32>
    %98 = vector.extract_strided_slice %49 {offsets = [0, 2], sizes = [2, 1], strides = [1, 1]} : vector<2x17xf32> to vector<2x1xf32>
    %99 = vector.broadcast %98 : vector<2x1xf32> to vector<2x64xf32>
    %100 = vector.broadcast %9 : vector<1x64xf32> to vector<2x64xf32>
    %101 = arith.mulf %99, %100 : vector<2x64xf32>
    %102 = vector.broadcast %11 : vector<1x64xf32> to vector<2x64xf32>
    %103 = arith.addf %101, %102 : vector<2x64xf32>
    %cst_51 = arith.constant dense<0.000000e+00> : vector<2x64xf32>
    %104 = tpu.matmul %97, %10, %cst_51 {dimension_numbers = #tpu.dot_dimension_numbers<[1], [0], [0], [1], [0, 0, 1, 1], [], []>} : vector<2x16xf32>, vector<16x64xf32>, vector<2x64xf32> -> vector<2x64xf32>
    %105 = arith.addf %103, %104 : vector<2x64xf32>
    %106 = vector.extract_strided_slice %105 {offsets = [0, 0], sizes = [2, 48], strides = [1, 1]} : vector<2x64xf32> to vector<2x48xf32>
    %107 = arith.negf %106 : vector<2x48xf32>
    %108 = math.exp %107 : vector<2x48xf32>
    %cst_52 = arith.constant 1.000000e+00 : f32
    %109 = vector.broadcast %cst_52 : f32 to vector<2x48xf32>
    %110 = arith.addf %109, %108 : vector<2x48xf32>
    %111 = arith.divf %109, %110 : vector<2x48xf32>
    %112 = vector.extract_strided_slice %105 {offsets = [0, 48], sizes = [2, 16], strides = [1, 1]} : vector<2x64xf32> to vector<2x16xf32>
    %113 = math.tanh %112 : vector<2x16xf32>
    %114 = vector.extract_strided_slice %111 {offsets = [0, 0], sizes = [2, 16], strides = [1, 1]} : vector<2x48xf32> to vector<2x16xf32>
    %115 = vector.extract_strided_slice %111 {offsets = [0, 16], sizes = [2, 16], strides = [1, 1]} : vector<2x48xf32> to vector<2x16xf32>
    %116 = vector.extract_strided_slice %111 {offsets = [0, 32], sizes = [2, 16], strides = [1, 1]} : vector<2x48xf32> to vector<2x16xf32>
    %117 = arith.mulf %115, %95 : vector<2x16xf32>
    %118 = arith.mulf %114, %113 : vector<2x16xf32>
    %119 = arith.addf %117, %118 : vector<2x16xf32>
    %120 = math.tanh %119 : vector<2x16xf32>
    %121 = arith.mulf %116, %120 : vector<2x16xf32>
    %122 = vector.extract_strided_slice %49 {offsets = [0, 3], sizes = [2, 1], strides = [1, 1]} : vector<2x17xf32> to vector<2x1xf32>
    %123 = vector.broadcast %122 : vector<2x1xf32> to vector<2x64xf32>
    %124 = vector.broadcast %9 : vector<1x64xf32> to vector<2x64xf32>
    %125 = arith.mulf %123, %124 : vector<2x64xf32>
    %126 = vector.broadcast %11 : vector<1x64xf32> to vector<2x64xf32>
    %127 = arith.addf %125, %126 : vector<2x64xf32>
    %cst_53 = arith.constant dense<0.000000e+00> : vector<2x64xf32>
    %128 = tpu.matmul %121, %10, %cst_53 {dimension_numbers = #tpu.dot_dimension_numbers<[1], [0], [0], [1], [0, 0, 1, 1], [], []>} : vector<2x16xf32>, vector<16x64xf32>, vector<2x64xf32> -> vector<2x64xf32>
    %129 = arith.addf %127, %128 : vector<2x64xf32>
    %130 = vector.extract_strided_slice %129 {offsets = [0, 0], sizes = [2, 48], strides = [1, 1]} : vector<2x64xf32> to vector<2x48xf32>
    %131 = arith.negf %130 : vector<2x48xf32>
    %132 = math.exp %131 : vector<2x48xf32>
    %cst_54 = arith.constant 1.000000e+00 : f32
    %133 = vector.broadcast %cst_54 : f32 to vector<2x48xf32>
    %134 = arith.addf %133, %132 : vector<2x48xf32>
    %135 = arith.divf %133, %134 : vector<2x48xf32>
    %136 = vector.extract_strided_slice %129 {offsets = [0, 48], sizes = [2, 16], strides = [1, 1]} : vector<2x64xf32> to vector<2x16xf32>
    %137 = math.tanh %136 : vector<2x16xf32>
    %138 = vector.extract_strided_slice %135 {offsets = [0, 0], sizes = [2, 16], strides = [1, 1]} : vector<2x48xf32> to vector<2x16xf32>
    %139 = vector.extract_strided_slice %135 {offsets = [0, 16], sizes = [2, 16], strides = [1, 1]} : vector<2x48xf32> to vector<2x16xf32>
    %140 = vector.extract_strided_slice %135 {offsets = [0, 32], sizes = [2, 16], strides = [1, 1]} : vector<2x48xf32> to vector<2x16xf32>
    %141 = arith.mulf %139, %119 : vector<2x16xf32>
    %142 = arith.mulf %138, %137 : vector<2x16xf32>
    %143 = arith.addf %141, %142 : vector<2x16xf32>
    %144 = math.tanh %143 : vector<2x16xf32>
    %145 = arith.mulf %140, %144 : vector<2x16xf32>
    %146 = vector.extract_strided_slice %49 {offsets = [0, 4], sizes = [2, 1], strides = [1, 1]} : vector<2x17xf32> to vector<2x1xf32>
    %147 = vector.broadcast %146 : vector<2x1xf32> to vector<2x64xf32>
    %148 = vector.broadcast %9 : vector<1x64xf32> to vector<2x64xf32>
    %149 = arith.mulf %147, %148 : vector<2x64xf32>
    %150 = vector.broadcast %11 : vector<1x64xf32> to vector<2x64xf32>
    %151 = arith.addf %149, %150 : vector<2x64xf32>
    %cst_55 = arith.constant dense<0.000000e+00> : vector<2x64xf32>
    %152 = tpu.matmul %145, %10, %cst_55 {dimension_numbers = #tpu.dot_dimension_numbers<[1], [0], [0], [1], [0, 0, 1, 1], [], []>} : vector<2x16xf32>, vector<16x64xf32>, vector<2x64xf32> -> vector<2x64xf32>
    %153 = arith.addf %151, %152 : vector<2x64xf32>
    %154 = vector.extract_strided_slice %153 {offsets = [0, 0], sizes = [2, 48], strides = [1, 1]} : vector<2x64xf32> to vector<2x48xf32>
    %155 = arith.negf %154 : vector<2x48xf32>
    %156 = math.exp %155 : vector<2x48xf32>
    %cst_56 = arith.constant 1.000000e+00 : f32
    %157 = vector.broadcast %cst_56 : f32 to vector<2x48xf32>
    %158 = arith.addf %157, %156 : vector<2x48xf32>
    %159 = arith.divf %157, %158 : vector<2x48xf32>
    %160 = vector.extract_strided_slice %153 {offsets = [0, 48], sizes = [2, 16], strides = [1, 1]} : vector<2x64xf32> to vector<2x16xf32>
    %161 = math.tanh %160 : vector<2x16xf32>
    %162 = vector.extract_strided_slice %159 {offsets = [0, 0], sizes = [2, 16], strides = [1, 1]} : vector<2x48xf32> to vector<2x16xf32>
    %163 = vector.extract_strided_slice %159 {offsets = [0, 16], sizes = [2, 16], strides = [1, 1]} : vector<2x48xf32> to vector<2x16xf32>
    %164 = vector.extract_strided_slice %159 {offsets = [0, 32], sizes = [2, 16], strides = [1, 1]} : vector<2x48xf32> to vector<2x16xf32>
    %165 = arith.mulf %163, %143 : vector<2x16xf32>
    %166 = arith.mulf %162, %161 : vector<2x16xf32>
    %167 = arith.addf %165, %166 : vector<2x16xf32>
    %168 = math.tanh %167 : vector<2x16xf32>
    %169 = arith.mulf %164, %168 : vector<2x16xf32>
    %170 = vector.extract_strided_slice %49 {offsets = [0, 5], sizes = [2, 1], strides = [1, 1]} : vector<2x17xf32> to vector<2x1xf32>
    %171 = vector.broadcast %170 : vector<2x1xf32> to vector<2x64xf32>
    %172 = vector.broadcast %9 : vector<1x64xf32> to vector<2x64xf32>
    %173 = arith.mulf %171, %172 : vector<2x64xf32>
    %174 = vector.broadcast %11 : vector<1x64xf32> to vector<2x64xf32>
    %175 = arith.addf %173, %174 : vector<2x64xf32>
    %cst_57 = arith.constant dense<0.000000e+00> : vector<2x64xf32>
    %176 = tpu.matmul %169, %10, %cst_57 {dimension_numbers = #tpu.dot_dimension_numbers<[1], [0], [0], [1], [0, 0, 1, 1], [], []>} : vector<2x16xf32>, vector<16x64xf32>, vector<2x64xf32> -> vector<2x64xf32>
    %177 = arith.addf %175, %176 : vector<2x64xf32>
    %178 = vector.extract_strided_slice %177 {offsets = [0, 0], sizes = [2, 48], strides = [1, 1]} : vector<2x64xf32> to vector<2x48xf32>
    %179 = arith.negf %178 : vector<2x48xf32>
    %180 = math.exp %179 : vector<2x48xf32>
    %cst_58 = arith.constant 1.000000e+00 : f32
    %181 = vector.broadcast %cst_58 : f32 to vector<2x48xf32>
    %182 = arith.addf %181, %180 : vector<2x48xf32>
    %183 = arith.divf %181, %182 : vector<2x48xf32>
    %184 = vector.extract_strided_slice %177 {offsets = [0, 48], sizes = [2, 16], strides = [1, 1]} : vector<2x64xf32> to vector<2x16xf32>
    %185 = math.tanh %184 : vector<2x16xf32>
    %186 = vector.extract_strided_slice %183 {offsets = [0, 0], sizes = [2, 16], strides = [1, 1]} : vector<2x48xf32> to vector<2x16xf32>
    %187 = vector.extract_strided_slice %183 {offsets = [0, 16], sizes = [2, 16], strides = [1, 1]} : vector<2x48xf32> to vector<2x16xf32>
    %188 = vector.extract_strided_slice %183 {offsets = [0, 32], sizes = [2, 16], strides = [1, 1]} : vector<2x48xf32> to vector<2x16xf32>
    %189 = arith.mulf %187, %167 : vector<2x16xf32>
    %190 = arith.mulf %186, %185 : vector<2x16xf32>
    %191 = arith.addf %189, %190 : vector<2x16xf32>
    %192 = math.tanh %191 : vector<2x16xf32>
    %193 = arith.mulf %188, %192 : vector<2x16xf32>
    %194 = vector.extract_strided_slice %49 {offsets = [0, 6], sizes = [2, 1], strides = [1, 1]} : vector<2x17xf32> to vector<2x1xf32>
    %195 = vector.broadcast %194 : vector<2x1xf32> to vector<2x64xf32>
    %196 = vector.broadcast %9 : vector<1x64xf32> to vector<2x64xf32>
    %197 = arith.mulf %195, %196 : vector<2x64xf32>
    %198 = vector.broadcast %11 : vector<1x64xf32> to vector<2x64xf32>
    %199 = arith.addf %197, %198 : vector<2x64xf32>
    %cst_59 = arith.constant dense<0.000000e+00> : vector<2x64xf32>
    %200 = tpu.matmul %193, %10, %cst_59 {dimension_numbers = #tpu.dot_dimension_numbers<[1], [0], [0], [1], [0, 0, 1, 1], [], []>} : vector<2x16xf32>, vector<16x64xf32>, vector<2x64xf32> -> vector<2x64xf32>
    %201 = arith.addf %199, %200 : vector<2x64xf32>
    %202 = vector.extract_strided_slice %201 {offsets = [0, 0], sizes = [2, 48], strides = [1, 1]} : vector<2x64xf32> to vector<2x48xf32>
    %203 = arith.negf %202 : vector<2x48xf32>
    %204 = math.exp %203 : vector<2x48xf32>
    %cst_60 = arith.constant 1.000000e+00 : f32
    %205 = vector.broadcast %cst_60 : f32 to vector<2x48xf32>
    %206 = arith.addf %205, %204 : vector<2x48xf32>
    %207 = arith.divf %205, %206 : vector<2x48xf32>
    %208 = vector.extract_strided_slice %201 {offsets = [0, 48], sizes = [2, 16], strides = [1, 1]} : vector<2x64xf32> to vector<2x16xf32>
    %209 = math.tanh %208 : vector<2x16xf32>
    %210 = vector.extract_strided_slice %207 {offsets = [0, 0], sizes = [2, 16], strides = [1, 1]} : vector<2x48xf32> to vector<2x16xf32>
    %211 = vector.extract_strided_slice %207 {offsets = [0, 16], sizes = [2, 16], strides = [1, 1]} : vector<2x48xf32> to vector<2x16xf32>
    %212 = vector.extract_strided_slice %207 {offsets = [0, 32], sizes = [2, 16], strides = [1, 1]} : vector<2x48xf32> to vector<2x16xf32>
    %213 = arith.mulf %211, %191 : vector<2x16xf32>
    %214 = arith.mulf %210, %209 : vector<2x16xf32>
    %215 = arith.addf %213, %214 : vector<2x16xf32>
    %216 = math.tanh %215 : vector<2x16xf32>
    %217 = arith.mulf %212, %216 : vector<2x16xf32>
    %218 = vector.extract_strided_slice %49 {offsets = [0, 7], sizes = [2, 1], strides = [1, 1]} : vector<2x17xf32> to vector<2x1xf32>
    %219 = vector.broadcast %218 : vector<2x1xf32> to vector<2x64xf32>
    %220 = vector.broadcast %9 : vector<1x64xf32> to vector<2x64xf32>
    %221 = arith.mulf %219, %220 : vector<2x64xf32>
    %222 = vector.broadcast %11 : vector<1x64xf32> to vector<2x64xf32>
    %223 = arith.addf %221, %222 : vector<2x64xf32>
    %cst_61 = arith.constant dense<0.000000e+00> : vector<2x64xf32>
    %224 = tpu.matmul %217, %10, %cst_61 {dimension_numbers = #tpu.dot_dimension_numbers<[1], [0], [0], [1], [0, 0, 1, 1], [], []>} : vector<2x16xf32>, vector<16x64xf32>, vector<2x64xf32> -> vector<2x64xf32>
    %225 = arith.addf %223, %224 : vector<2x64xf32>
    %226 = vector.extract_strided_slice %225 {offsets = [0, 0], sizes = [2, 48], strides = [1, 1]} : vector<2x64xf32> to vector<2x48xf32>
    %227 = arith.negf %226 : vector<2x48xf32>
    %228 = math.exp %227 : vector<2x48xf32>
    %cst_62 = arith.constant 1.000000e+00 : f32
    %229 = vector.broadcast %cst_62 : f32 to vector<2x48xf32>
    %230 = arith.addf %229, %228 : vector<2x48xf32>
    %231 = arith.divf %229, %230 : vector<2x48xf32>
    %232 = vector.extract_strided_slice %225 {offsets = [0, 48], sizes = [2, 16], strides = [1, 1]} : vector<2x64xf32> to vector<2x16xf32>
    %233 = math.tanh %232 : vector<2x16xf32>
    %234 = vector.extract_strided_slice %231 {offsets = [0, 0], sizes = [2, 16], strides = [1, 1]} : vector<2x48xf32> to vector<2x16xf32>
    %235 = vector.extract_strided_slice %231 {offsets = [0, 16], sizes = [2, 16], strides = [1, 1]} : vector<2x48xf32> to vector<2x16xf32>
    %236 = vector.extract_strided_slice %231 {offsets = [0, 32], sizes = [2, 16], strides = [1, 1]} : vector<2x48xf32> to vector<2x16xf32>
    %237 = arith.mulf %235, %215 : vector<2x16xf32>
    %238 = arith.mulf %234, %233 : vector<2x16xf32>
    %239 = arith.addf %237, %238 : vector<2x16xf32>
    %240 = math.tanh %239 : vector<2x16xf32>
    %241 = arith.mulf %236, %240 : vector<2x16xf32>
    %242 = vector.extract_strided_slice %49 {offsets = [0, 8], sizes = [2, 1], strides = [1, 1]} : vector<2x17xf32> to vector<2x1xf32>
    %243 = vector.broadcast %242 : vector<2x1xf32> to vector<2x64xf32>
    %244 = vector.broadcast %9 : vector<1x64xf32> to vector<2x64xf32>
    %245 = arith.mulf %243, %244 : vector<2x64xf32>
    %246 = vector.broadcast %11 : vector<1x64xf32> to vector<2x64xf32>
    %247 = arith.addf %245, %246 : vector<2x64xf32>
    %cst_63 = arith.constant dense<0.000000e+00> : vector<2x64xf32>
    %248 = tpu.matmul %241, %10, %cst_63 {dimension_numbers = #tpu.dot_dimension_numbers<[1], [0], [0], [1], [0, 0, 1, 1], [], []>} : vector<2x16xf32>, vector<16x64xf32>, vector<2x64xf32> -> vector<2x64xf32>
    %249 = arith.addf %247, %248 : vector<2x64xf32>
    %250 = vector.extract_strided_slice %249 {offsets = [0, 0], sizes = [2, 48], strides = [1, 1]} : vector<2x64xf32> to vector<2x48xf32>
    %251 = arith.negf %250 : vector<2x48xf32>
    %252 = math.exp %251 : vector<2x48xf32>
    %cst_64 = arith.constant 1.000000e+00 : f32
    %253 = vector.broadcast %cst_64 : f32 to vector<2x48xf32>
    %254 = arith.addf %253, %252 : vector<2x48xf32>
    %255 = arith.divf %253, %254 : vector<2x48xf32>
    %256 = vector.extract_strided_slice %249 {offsets = [0, 48], sizes = [2, 16], strides = [1, 1]} : vector<2x64xf32> to vector<2x16xf32>
    %257 = math.tanh %256 : vector<2x16xf32>
    %258 = vector.extract_strided_slice %255 {offsets = [0, 0], sizes = [2, 16], strides = [1, 1]} : vector<2x48xf32> to vector<2x16xf32>
    %259 = vector.extract_strided_slice %255 {offsets = [0, 16], sizes = [2, 16], strides = [1, 1]} : vector<2x48xf32> to vector<2x16xf32>
    %260 = vector.extract_strided_slice %255 {offsets = [0, 32], sizes = [2, 16], strides = [1, 1]} : vector<2x48xf32> to vector<2x16xf32>
    %261 = arith.mulf %259, %239 : vector<2x16xf32>
    %262 = arith.mulf %258, %257 : vector<2x16xf32>
    %263 = arith.addf %261, %262 : vector<2x16xf32>
    %264 = math.tanh %263 : vector<2x16xf32>
    %265 = arith.mulf %260, %264 : vector<2x16xf32>
    %266 = vector.extract_strided_slice %49 {offsets = [0, 9], sizes = [2, 1], strides = [1, 1]} : vector<2x17xf32> to vector<2x1xf32>
    %267 = vector.broadcast %266 : vector<2x1xf32> to vector<2x64xf32>
    %268 = vector.broadcast %9 : vector<1x64xf32> to vector<2x64xf32>
    %269 = arith.mulf %267, %268 : vector<2x64xf32>
    %270 = vector.broadcast %11 : vector<1x64xf32> to vector<2x64xf32>
    %271 = arith.addf %269, %270 : vector<2x64xf32>
    %cst_65 = arith.constant dense<0.000000e+00> : vector<2x64xf32>
    %272 = tpu.matmul %265, %10, %cst_65 {dimension_numbers = #tpu.dot_dimension_numbers<[1], [0], [0], [1], [0, 0, 1, 1], [], []>} : vector<2x16xf32>, vector<16x64xf32>, vector<2x64xf32> -> vector<2x64xf32>
    %273 = arith.addf %271, %272 : vector<2x64xf32>
    %274 = vector.extract_strided_slice %273 {offsets = [0, 0], sizes = [2, 48], strides = [1, 1]} : vector<2x64xf32> to vector<2x48xf32>
    %275 = arith.negf %274 : vector<2x48xf32>
    %276 = math.exp %275 : vector<2x48xf32>
    %cst_66 = arith.constant 1.000000e+00 : f32
    %277 = vector.broadcast %cst_66 : f32 to vector<2x48xf32>
    %278 = arith.addf %277, %276 : vector<2x48xf32>
    %279 = arith.divf %277, %278 : vector<2x48xf32>
    %280 = vector.extract_strided_slice %273 {offsets = [0, 48], sizes = [2, 16], strides = [1, 1]} : vector<2x64xf32> to vector<2x16xf32>
    %281 = math.tanh %280 : vector<2x16xf32>
    %282 = vector.extract_strided_slice %279 {offsets = [0, 0], sizes = [2, 16], strides = [1, 1]} : vector<2x48xf32> to vector<2x16xf32>
    %283 = vector.extract_strided_slice %279 {offsets = [0, 16], sizes = [2, 16], strides = [1, 1]} : vector<2x48xf32> to vector<2x16xf32>
    %284 = vector.extract_strided_slice %279 {offsets = [0, 32], sizes = [2, 16], strides = [1, 1]} : vector<2x48xf32> to vector<2x16xf32>
    %285 = arith.mulf %283, %263 : vector<2x16xf32>
    %286 = arith.mulf %282, %281 : vector<2x16xf32>
    %287 = arith.addf %285, %286 : vector<2x16xf32>
    %288 = math.tanh %287 : vector<2x16xf32>
    %289 = arith.mulf %284, %288 : vector<2x16xf32>
    %290 = vector.extract_strided_slice %49 {offsets = [0, 10], sizes = [2, 1], strides = [1, 1]} : vector<2x17xf32> to vector<2x1xf32>
    %291 = vector.broadcast %290 : vector<2x1xf32> to vector<2x64xf32>
    %292 = vector.broadcast %9 : vector<1x64xf32> to vector<2x64xf32>
    %293 = arith.mulf %291, %292 : vector<2x64xf32>
    %294 = vector.broadcast %11 : vector<1x64xf32> to vector<2x64xf32>
    %295 = arith.addf %293, %294 : vector<2x64xf32>
    %cst_67 = arith.constant dense<0.000000e+00> : vector<2x64xf32>
    %296 = tpu.matmul %289, %10, %cst_67 {dimension_numbers = #tpu.dot_dimension_numbers<[1], [0], [0], [1], [0, 0, 1, 1], [], []>} : vector<2x16xf32>, vector<16x64xf32>, vector<2x64xf32> -> vector<2x64xf32>
    %297 = arith.addf %295, %296 : vector<2x64xf32>
    %298 = vector.extract_strided_slice %297 {offsets = [0, 0], sizes = [2, 48], strides = [1, 1]} : vector<2x64xf32> to vector<2x48xf32>
    %299 = arith.negf %298 : vector<2x48xf32>
    %300 = math.exp %299 : vector<2x48xf32>
    %cst_68 = arith.constant 1.000000e+00 : f32
    %301 = vector.broadcast %cst_68 : f32 to vector<2x48xf32>
    %302 = arith.addf %301, %300 : vector<2x48xf32>
    %303 = arith.divf %301, %302 : vector<2x48xf32>
    %304 = vector.extract_strided_slice %297 {offsets = [0, 48], sizes = [2, 16], strides = [1, 1]} : vector<2x64xf32> to vector<2x16xf32>
    %305 = math.tanh %304 : vector<2x16xf32>
    %306 = vector.extract_strided_slice %303 {offsets = [0, 0], sizes = [2, 16], strides = [1, 1]} : vector<2x48xf32> to vector<2x16xf32>
    %307 = vector.extract_strided_slice %303 {offsets = [0, 16], sizes = [2, 16], strides = [1, 1]} : vector<2x48xf32> to vector<2x16xf32>
    %308 = vector.extract_strided_slice %303 {offsets = [0, 32], sizes = [2, 16], strides = [1, 1]} : vector<2x48xf32> to vector<2x16xf32>
    %309 = arith.mulf %307, %287 : vector<2x16xf32>
    %310 = arith.mulf %306, %305 : vector<2x16xf32>
    %311 = arith.addf %309, %310 : vector<2x16xf32>
    %312 = math.tanh %311 : vector<2x16xf32>
    %313 = arith.mulf %308, %312 : vector<2x16xf32>
    %314 = vector.extract_strided_slice %49 {offsets = [0, 11], sizes = [2, 1], strides = [1, 1]} : vector<2x17xf32> to vector<2x1xf32>
    %315 = vector.broadcast %314 : vector<2x1xf32> to vector<2x64xf32>
    %316 = vector.broadcast %9 : vector<1x64xf32> to vector<2x64xf32>
    %317 = arith.mulf %315, %316 : vector<2x64xf32>
    %318 = vector.broadcast %11 : vector<1x64xf32> to vector<2x64xf32>
    %319 = arith.addf %317, %318 : vector<2x64xf32>
    %cst_69 = arith.constant dense<0.000000e+00> : vector<2x64xf32>
    %320 = tpu.matmul %313, %10, %cst_69 {dimension_numbers = #tpu.dot_dimension_numbers<[1], [0], [0], [1], [0, 0, 1, 1], [], []>} : vector<2x16xf32>, vector<16x64xf32>, vector<2x64xf32> -> vector<2x64xf32>
    %321 = arith.addf %319, %320 : vector<2x64xf32>
    %322 = vector.extract_strided_slice %321 {offsets = [0, 0], sizes = [2, 48], strides = [1, 1]} : vector<2x64xf32> to vector<2x48xf32>
    %323 = arith.negf %322 : vector<2x48xf32>
    %324 = math.exp %323 : vector<2x48xf32>
    %cst_70 = arith.constant 1.000000e+00 : f32
    %325 = vector.broadcast %cst_70 : f32 to vector<2x48xf32>
    %326 = arith.addf %325, %324 : vector<2x48xf32>
    %327 = arith.divf %325, %326 : vector<2x48xf32>
    %328 = vector.extract_strided_slice %321 {offsets = [0, 48], sizes = [2, 16], strides = [1, 1]} : vector<2x64xf32> to vector<2x16xf32>
    %329 = math.tanh %328 : vector<2x16xf32>
    %330 = vector.extract_strided_slice %327 {offsets = [0, 0], sizes = [2, 16], strides = [1, 1]} : vector<2x48xf32> to vector<2x16xf32>
    %331 = vector.extract_strided_slice %327 {offsets = [0, 16], sizes = [2, 16], strides = [1, 1]} : vector<2x48xf32> to vector<2x16xf32>
    %332 = vector.extract_strided_slice %327 {offsets = [0, 32], sizes = [2, 16], strides = [1, 1]} : vector<2x48xf32> to vector<2x16xf32>
    %333 = arith.mulf %331, %311 : vector<2x16xf32>
    %334 = arith.mulf %330, %329 : vector<2x16xf32>
    %335 = arith.addf %333, %334 : vector<2x16xf32>
    %336 = math.tanh %335 : vector<2x16xf32>
    %337 = arith.mulf %332, %336 : vector<2x16xf32>
    %338 = vector.extract_strided_slice %49 {offsets = [0, 12], sizes = [2, 1], strides = [1, 1]} : vector<2x17xf32> to vector<2x1xf32>
    %339 = vector.broadcast %338 : vector<2x1xf32> to vector<2x64xf32>
    %340 = vector.broadcast %9 : vector<1x64xf32> to vector<2x64xf32>
    %341 = arith.mulf %339, %340 : vector<2x64xf32>
    %342 = vector.broadcast %11 : vector<1x64xf32> to vector<2x64xf32>
    %343 = arith.addf %341, %342 : vector<2x64xf32>
    %cst_71 = arith.constant dense<0.000000e+00> : vector<2x64xf32>
    %344 = tpu.matmul %337, %10, %cst_71 {dimension_numbers = #tpu.dot_dimension_numbers<[1], [0], [0], [1], [0, 0, 1, 1], [], []>} : vector<2x16xf32>, vector<16x64xf32>, vector<2x64xf32> -> vector<2x64xf32>
    %345 = arith.addf %343, %344 : vector<2x64xf32>
    %346 = vector.extract_strided_slice %345 {offsets = [0, 0], sizes = [2, 48], strides = [1, 1]} : vector<2x64xf32> to vector<2x48xf32>
    %347 = arith.negf %346 : vector<2x48xf32>
    %348 = math.exp %347 : vector<2x48xf32>
    %cst_72 = arith.constant 1.000000e+00 : f32
    %349 = vector.broadcast %cst_72 : f32 to vector<2x48xf32>
    %350 = arith.addf %349, %348 : vector<2x48xf32>
    %351 = arith.divf %349, %350 : vector<2x48xf32>
    %352 = vector.extract_strided_slice %345 {offsets = [0, 48], sizes = [2, 16], strides = [1, 1]} : vector<2x64xf32> to vector<2x16xf32>
    %353 = math.tanh %352 : vector<2x16xf32>
    %354 = vector.extract_strided_slice %351 {offsets = [0, 0], sizes = [2, 16], strides = [1, 1]} : vector<2x48xf32> to vector<2x16xf32>
    %355 = vector.extract_strided_slice %351 {offsets = [0, 16], sizes = [2, 16], strides = [1, 1]} : vector<2x48xf32> to vector<2x16xf32>
    %356 = vector.extract_strided_slice %351 {offsets = [0, 32], sizes = [2, 16], strides = [1, 1]} : vector<2x48xf32> to vector<2x16xf32>
    %357 = arith.mulf %355, %335 : vector<2x16xf32>
    %358 = arith.mulf %354, %353 : vector<2x16xf32>
    %359 = arith.addf %357, %358 : vector<2x16xf32>
    %360 = math.tanh %359 : vector<2x16xf32>
    %361 = arith.mulf %356, %360 : vector<2x16xf32>
    %362 = vector.extract_strided_slice %49 {offsets = [0, 13], sizes = [2, 1], strides = [1, 1]} : vector<2x17xf32> to vector<2x1xf32>
    %363 = vector.broadcast %362 : vector<2x1xf32> to vector<2x64xf32>
    %364 = vector.broadcast %9 : vector<1x64xf32> to vector<2x64xf32>
    %365 = arith.mulf %363, %364 : vector<2x64xf32>
    %366 = vector.broadcast %11 : vector<1x64xf32> to vector<2x64xf32>
    %367 = arith.addf %365, %366 : vector<2x64xf32>
    %cst_73 = arith.constant dense<0.000000e+00> : vector<2x64xf32>
    %368 = tpu.matmul %361, %10, %cst_73 {dimension_numbers = #tpu.dot_dimension_numbers<[1], [0], [0], [1], [0, 0, 1, 1], [], []>} : vector<2x16xf32>, vector<16x64xf32>, vector<2x64xf32> -> vector<2x64xf32>
    %369 = arith.addf %367, %368 : vector<2x64xf32>
    %370 = vector.extract_strided_slice %369 {offsets = [0, 0], sizes = [2, 48], strides = [1, 1]} : vector<2x64xf32> to vector<2x48xf32>
    %371 = arith.negf %370 : vector<2x48xf32>
    %372 = math.exp %371 : vector<2x48xf32>
    %cst_74 = arith.constant 1.000000e+00 : f32
    %373 = vector.broadcast %cst_74 : f32 to vector<2x48xf32>
    %374 = arith.addf %373, %372 : vector<2x48xf32>
    %375 = arith.divf %373, %374 : vector<2x48xf32>
    %376 = vector.extract_strided_slice %369 {offsets = [0, 48], sizes = [2, 16], strides = [1, 1]} : vector<2x64xf32> to vector<2x16xf32>
    %377 = math.tanh %376 : vector<2x16xf32>
    %378 = vector.extract_strided_slice %375 {offsets = [0, 0], sizes = [2, 16], strides = [1, 1]} : vector<2x48xf32> to vector<2x16xf32>
    %379 = vector.extract_strided_slice %375 {offsets = [0, 16], sizes = [2, 16], strides = [1, 1]} : vector<2x48xf32> to vector<2x16xf32>
    %380 = vector.extract_strided_slice %375 {offsets = [0, 32], sizes = [2, 16], strides = [1, 1]} : vector<2x48xf32> to vector<2x16xf32>
    %381 = arith.mulf %379, %359 : vector<2x16xf32>
    %382 = arith.mulf %378, %377 : vector<2x16xf32>
    %383 = arith.addf %381, %382 : vector<2x16xf32>
    %384 = math.tanh %383 : vector<2x16xf32>
    %385 = arith.mulf %380, %384 : vector<2x16xf32>
    %386 = vector.extract_strided_slice %49 {offsets = [0, 14], sizes = [2, 1], strides = [1, 1]} : vector<2x17xf32> to vector<2x1xf32>
    %387 = vector.broadcast %386 : vector<2x1xf32> to vector<2x64xf32>
    %388 = vector.broadcast %9 : vector<1x64xf32> to vector<2x64xf32>
    %389 = arith.mulf %387, %388 : vector<2x64xf32>
    %390 = vector.broadcast %11 : vector<1x64xf32> to vector<2x64xf32>
    %391 = arith.addf %389, %390 : vector<2x64xf32>
    %cst_75 = arith.constant dense<0.000000e+00> : vector<2x64xf32>
    %392 = tpu.matmul %385, %10, %cst_75 {dimension_numbers = #tpu.dot_dimension_numbers<[1], [0], [0], [1], [0, 0, 1, 1], [], []>} : vector<2x16xf32>, vector<16x64xf32>, vector<2x64xf32> -> vector<2x64xf32>
    %393 = arith.addf %391, %392 : vector<2x64xf32>
    %394 = vector.extract_strided_slice %393 {offsets = [0, 0], sizes = [2, 48], strides = [1, 1]} : vector<2x64xf32> to vector<2x48xf32>
    %395 = arith.negf %394 : vector<2x48xf32>
    %396 = math.exp %395 : vector<2x48xf32>
    %cst_76 = arith.constant 1.000000e+00 : f32
    %397 = vector.broadcast %cst_76 : f32 to vector<2x48xf32>
    %398 = arith.addf %397, %396 : vector<2x48xf32>
    %399 = arith.divf %397, %398 : vector<2x48xf32>
    %400 = vector.extract_strided_slice %393 {offsets = [0, 48], sizes = [2, 16], strides = [1, 1]} : vector<2x64xf32> to vector<2x16xf32>
    %401 = math.tanh %400 : vector<2x16xf32>
    %402 = vector.extract_strided_slice %399 {offsets = [0, 0], sizes = [2, 16], strides = [1, 1]} : vector<2x48xf32> to vector<2x16xf32>
    %403 = vector.extract_strided_slice %399 {offsets = [0, 16], sizes = [2, 16], strides = [1, 1]} : vector<2x48xf32> to vector<2x16xf32>
    %404 = vector.extract_strided_slice %399 {offsets = [0, 32], sizes = [2, 16], strides = [1, 1]} : vector<2x48xf32> to vector<2x16xf32>
    %405 = arith.mulf %403, %383 : vector<2x16xf32>
    %406 = arith.mulf %402, %401 : vector<2x16xf32>
    %407 = arith.addf %405, %406 : vector<2x16xf32>
    %408 = math.tanh %407 : vector<2x16xf32>
    %409 = arith.mulf %404, %408 : vector<2x16xf32>
    %410 = vector.extract_strided_slice %49 {offsets = [0, 15], sizes = [2, 1], strides = [1, 1]} : vector<2x17xf32> to vector<2x1xf32>
    %411 = vector.broadcast %410 : vector<2x1xf32> to vector<2x64xf32>
    %412 = vector.broadcast %9 : vector<1x64xf32> to vector<2x64xf32>
    %413 = arith.mulf %411, %412 : vector<2x64xf32>
    %414 = vector.broadcast %11 : vector<1x64xf32> to vector<2x64xf32>
    %415 = arith.addf %413, %414 : vector<2x64xf32>
    %cst_77 = arith.constant dense<0.000000e+00> : vector<2x64xf32>
    %416 = tpu.matmul %409, %10, %cst_77 {dimension_numbers = #tpu.dot_dimension_numbers<[1], [0], [0], [1], [0, 0, 1, 1], [], []>} : vector<2x16xf32>, vector<16x64xf32>, vector<2x64xf32> -> vector<2x64xf32>
    %417 = arith.addf %415, %416 : vector<2x64xf32>
    %418 = vector.extract_strided_slice %417 {offsets = [0, 0], sizes = [2, 48], strides = [1, 1]} : vector<2x64xf32> to vector<2x48xf32>
    %419 = arith.negf %418 : vector<2x48xf32>
    %420 = math.exp %419 : vector<2x48xf32>
    %cst_78 = arith.constant 1.000000e+00 : f32
    %421 = vector.broadcast %cst_78 : f32 to vector<2x48xf32>
    %422 = arith.addf %421, %420 : vector<2x48xf32>
    %423 = arith.divf %421, %422 : vector<2x48xf32>
    %424 = vector.extract_strided_slice %417 {offsets = [0, 48], sizes = [2, 16], strides = [1, 1]} : vector<2x64xf32> to vector<2x16xf32>
    %425 = math.tanh %424 : vector<2x16xf32>
    %426 = vector.extract_strided_slice %423 {offsets = [0, 0], sizes = [2, 16], strides = [1, 1]} : vector<2x48xf32> to vector<2x16xf32>
    %427 = vector.extract_strided_slice %423 {offsets = [0, 16], sizes = [2, 16], strides = [1, 1]} : vector<2x48xf32> to vector<2x16xf32>
    %428 = vector.extract_strided_slice %423 {offsets = [0, 32], sizes = [2, 16], strides = [1, 1]} : vector<2x48xf32> to vector<2x16xf32>
    %429 = arith.mulf %427, %407 : vector<2x16xf32>
    %430 = arith.mulf %426, %425 : vector<2x16xf32>
    %431 = arith.addf %429, %430 : vector<2x16xf32>
    %432 = math.tanh %431 : vector<2x16xf32>
    %433 = arith.mulf %428, %432 : vector<2x16xf32>
    %434 = vector.extract_strided_slice %49 {offsets = [0, 16], sizes = [2, 1], strides = [1, 1]} : vector<2x17xf32> to vector<2x1xf32>
    %435 = vector.broadcast %434 : vector<2x1xf32> to vector<2x64xf32>
    %436 = vector.broadcast %9 : vector<1x64xf32> to vector<2x64xf32>
    %437 = arith.mulf %435, %436 : vector<2x64xf32>
    %438 = vector.broadcast %11 : vector<1x64xf32> to vector<2x64xf32>
    %439 = arith.addf %437, %438 : vector<2x64xf32>
    %cst_79 = arith.constant dense<0.000000e+00> : vector<2x64xf32>
    %440 = tpu.matmul %433, %10, %cst_79 {dimension_numbers = #tpu.dot_dimension_numbers<[1], [0], [0], [1], [0, 0, 1, 1], [], []>} : vector<2x16xf32>, vector<16x64xf32>, vector<2x64xf32> -> vector<2x64xf32>
    %441 = arith.addf %439, %440 : vector<2x64xf32>
    %442 = vector.extract_strided_slice %441 {offsets = [0, 0], sizes = [2, 48], strides = [1, 1]} : vector<2x64xf32> to vector<2x48xf32>
    %443 = arith.negf %442 : vector<2x48xf32>
    %444 = math.exp %443 : vector<2x48xf32>
    %cst_80 = arith.constant 1.000000e+00 : f32
    %445 = vector.broadcast %cst_80 : f32 to vector<2x48xf32>
    %446 = arith.addf %445, %444 : vector<2x48xf32>
    %447 = arith.divf %445, %446 : vector<2x48xf32>
    %448 = vector.extract_strided_slice %441 {offsets = [0, 48], sizes = [2, 16], strides = [1, 1]} : vector<2x64xf32> to vector<2x16xf32>
    %449 = math.tanh %448 : vector<2x16xf32>
    %450 = vector.extract_strided_slice %447 {offsets = [0, 0], sizes = [2, 16], strides = [1, 1]} : vector<2x48xf32> to vector<2x16xf32>
    %451 = vector.extract_strided_slice %447 {offsets = [0, 16], sizes = [2, 16], strides = [1, 1]} : vector<2x48xf32> to vector<2x16xf32>
    %452 = vector.extract_strided_slice %447 {offsets = [0, 32], sizes = [2, 16], strides = [1, 1]} : vector<2x48xf32> to vector<2x16xf32>
    %453 = arith.mulf %451, %431 : vector<2x16xf32>
    %454 = arith.mulf %450, %449 : vector<2x16xf32>
    %455 = arith.addf %453, %454 : vector<2x16xf32>
    %456 = math.tanh %455 : vector<2x16xf32>
    %457 = arith.mulf %452, %456 : vector<2x16xf32>
    %458 = vector.broadcast %14 : vector<1x16xf32> to vector<2x16xf32>
    %459 = arith.mulf %457, %458 : vector<2x16xf32>
    %cst_81 = arith.constant dense<0.000000e+00> : vector<2xf32>
    %460 = vector.multi_reduction <add>, %459, %cst_81 [1] : vector<2x16xf32> to vector<2xf32>
    %461 = vector.shape_cast %460 : vector<2xf32> to vector<2x1xf32>
    %462 = vector.broadcast %15 : vector<1x1xf32> to vector<2x1xf32>
    %463 = arith.addf %461, %462 : vector<2x1xf32>
    %c0_82 = arith.constant 0 : index
    %c0_83 = arith.constant 0 : index
    %464 = vector.load %arg11[%c0_82, %c0_83] : memref<120x2xf32, #tpu.memory_space<vmem>>, vector<120x2xf32>
    %c0_84 = arith.constant 0 : index
    %c0_85 = arith.constant 0 : index
    %465 = vector.load %arg12[%c0_84, %c0_85] : memref<2x120xf32, #tpu.memory_space<vmem>>, vector<2x120xf32>
    %c0_86 = arith.constant 0 : index
    %c0_87 = arith.constant 0 : index
    %466 = vector.load %arg13[%c0_86, %c0_87] : memref<120x60xf32, #tpu.memory_space<vmem>>, vector<120x60xf32>
    %c0_88 = arith.constant 0 : index
    %c0_89 = arith.constant 0 : index
    %467 = vector.load %arg14[%c0_88, %c0_89] : memref<60x120xf32, #tpu.memory_space<vmem>>, vector<60x120xf32>
    %c0_90 = arith.constant 0 : index
    %c0_91 = arith.constant 0 : index
    %468 = vector.load %arg17[%c0_90, %c0_91] : memref<120x16xf32, #tpu.memory_space<vmem>>, vector<120x16xf32>
    %c0_92 = arith.constant 0 : index
    %c0_93 = arith.constant 0 : index
    %469 = vector.load %arg18[%c0_92, %c0_93] : memref<120x16xf32, #tpu.memory_space<vmem>>, vector<120x16xf32>
    %cst_94 = arith.constant dense<0.000000e+00> : vector<2x16xf32>
    %470 = tpu.matmul %457, %12, %cst_94 {dimension_numbers = #tpu.dot_dimension_numbers<[1], [0], [0], [1], [0, 0, 1, 1], [], []>} : vector<2x16xf32>, vector<16x16xf32>, vector<2x16xf32> -> vector<2x16xf32>
    %cst_95 = arith.constant dense<0.000000e+00> : vector<120x16xf32>
    %471 = tpu.matmul %464, %470, %cst_95 {dimension_numbers = #tpu.dot_dimension_numbers<[1], [0], [0], [1], [0, 0, 1, 1], [], []>} : vector<120x2xf32>, vector<2x16xf32>, vector<120x16xf32> -> vector<120x16xf32>
    %472 = arith.addf %469, %471 : vector<120x16xf32>
    %473 = math.tanh %472 : vector<120x16xf32>
    %474 = vector.broadcast %13 : vector<1x16xf32> to vector<120x16xf32>
    %475 = arith.mulf %473, %474 : vector<120x16xf32>
    %cst_96 = arith.constant dense<0.000000e+00> : vector<120xf32>
    %476 = vector.multi_reduction <add>, %475, %cst_96 [1] : vector<120x16xf32> to vector<120xf32>
    %477 = vector.shape_cast %476 : vector<120xf32> to vector<120x1xf32>
    %478 = vector.broadcast %477 : vector<120x1xf32> to vector<120x60xf32>
    %479 = arith.mulf %466, %478 : vector<120x60xf32>
    %cst_97 = arith.constant dense<0.000000e+00> : vector<2x60xf32>
    %480 = tpu.matmul %465, %479, %cst_97 {dimension_numbers = #tpu.dot_dimension_numbers<[1], [0], [0], [1], [0, 0, 1, 1], [], []>} : vector<2x120xf32>, vector<120x60xf32>, vector<2x60xf32> -> vector<2x60xf32>
    %cst_98 = arith.constant dense<0xFF800000> : vector<2xf32>
    %481 = vector.multi_reduction <maximumf>, %480, %cst_98 [1] : vector<2x60xf32> to vector<2xf32>
    %482 = vector.shape_cast %481 : vector<2xf32> to vector<2x1xf32>
    %483 = vector.broadcast %482 : vector<2x1xf32> to vector<2x60xf32>
    %484 = arith.subf %480, %483 : vector<2x60xf32>
    %485 = math.exp %484 : vector<2x60xf32>
    %cst_99 = arith.constant dense<0.000000e+00> : vector<2xf32>
    %486 = vector.multi_reduction <add>, %485, %cst_99 [1] : vector<2x60xf32> to vector<2xf32>
    %487 = vector.shape_cast %486 : vector<2xf32> to vector<2x1xf32>
    %488 = tpu.reciprocal %487 {approx = true} : vector<2x1xf32> -> vector<2x1xf32>
    %489 = vector.broadcast %488 : vector<2x1xf32> to vector<2x60xf32>
    %490 = arith.mulf %485, %489 : vector<2x60xf32>
    %491 = arith.addf %45, %490 : vector<2x60xf32>
    %cst_100 = arith.constant dense<0.000000e+00> : vector<2x120xf32>
    %492 = tpu.matmul %490, %467, %cst_100 {dimension_numbers = #tpu.dot_dimension_numbers<[1], [0], [0], [1], [0, 0, 1, 1], [], []>} : vector<2x60xf32>, vector<60x120xf32>, vector<2x120xf32> -> vector<2x120xf32>
    %493 = arith.mulf %465, %492 : vector<2x120xf32>
    %cst_101 = arith.constant dense<0.000000e+00> : vector<2x16xf32>
    %494 = tpu.matmul %493, %468, %cst_101 {dimension_numbers = #tpu.dot_dimension_numbers<[1], [0], [0], [1], [0, 0, 1, 1], [], []>} : vector<2x120xf32>, vector<120x16xf32>, vector<2x16xf32> -> vector<2x16xf32>
    %495 = tpu.concatenate %494, %463 in 1 : vector<2x16xf32>, vector<2x1xf32> -> vector<2x17xf32>
    %496 = vector.extract_strided_slice %495 {offsets = [0, 0], sizes = [2, 1], strides = [1, 1]} : vector<2x17xf32> to vector<2x1xf32>
    %497 = vector.broadcast %496 : vector<2x1xf32> to vector<2x64xf32>
    %498 = vector.broadcast %9 : vector<1x64xf32> to vector<2x64xf32>
    %499 = arith.mulf %497, %498 : vector<2x64xf32>
    %500 = vector.broadcast %11 : vector<1x64xf32> to vector<2x64xf32>
    %501 = arith.addf %499, %500 : vector<2x64xf32>
    %cst_102 = arith.constant dense<0.000000e+00> : vector<2x64xf32>
    %502 = tpu.matmul %457, %10, %cst_102 {dimension_numbers = #tpu.dot_dimension_numbers<[1], [0], [0], [1], [0, 0, 1, 1], [], []>} : vector<2x16xf32>, vector<16x64xf32>, vector<2x64xf32> -> vector<2x64xf32>
    %503 = arith.addf %501, %502 : vector<2x64xf32>
    %504 = vector.extract_strided_slice %503 {offsets = [0, 0], sizes = [2, 48], strides = [1, 1]} : vector<2x64xf32> to vector<2x48xf32>
    %505 = arith.negf %504 : vector<2x48xf32>
    %506 = math.exp %505 : vector<2x48xf32>
    %cst_103 = arith.constant 1.000000e+00 : f32
    %507 = vector.broadcast %cst_103 : f32 to vector<2x48xf32>
    %508 = arith.addf %507, %506 : vector<2x48xf32>
    %509 = arith.divf %507, %508 : vector<2x48xf32>
    %510 = vector.extract_strided_slice %503 {offsets = [0, 48], sizes = [2, 16], strides = [1, 1]} : vector<2x64xf32> to vector<2x16xf32>
    %511 = math.tanh %510 : vector<2x16xf32>
    %512 = vector.extract_strided_slice %509 {offsets = [0, 0], sizes = [2, 16], strides = [1, 1]} : vector<2x48xf32> to vector<2x16xf32>
    %513 = vector.extract_strided_slice %509 {offsets = [0, 16], sizes = [2, 16], strides = [1, 1]} : vector<2x48xf32> to vector<2x16xf32>
    %514 = vector.extract_strided_slice %509 {offsets = [0, 32], sizes = [2, 16], strides = [1, 1]} : vector<2x48xf32> to vector<2x16xf32>
    %515 = arith.mulf %513, %455 : vector<2x16xf32>
    %516 = arith.mulf %512, %511 : vector<2x16xf32>
    %517 = arith.addf %515, %516 : vector<2x16xf32>
    %518 = math.tanh %517 : vector<2x16xf32>
    %519 = arith.mulf %514, %518 : vector<2x16xf32>
    %520 = vector.extract_strided_slice %495 {offsets = [0, 1], sizes = [2, 1], strides = [1, 1]} : vector<2x17xf32> to vector<2x1xf32>
    %521 = vector.broadcast %520 : vector<2x1xf32> to vector<2x64xf32>
    %522 = vector.broadcast %9 : vector<1x64xf32> to vector<2x64xf32>
    %523 = arith.mulf %521, %522 : vector<2x64xf32>
    %524 = vector.broadcast %11 : vector<1x64xf32> to vector<2x64xf32>
    %525 = arith.addf %523, %524 : vector<2x64xf32>
    %cst_104 = arith.constant dense<0.000000e+00> : vector<2x64xf32>
    %526 = tpu.matmul %519, %10, %cst_104 {dimension_numbers = #tpu.dot_dimension_numbers<[1], [0], [0], [1], [0, 0, 1, 1], [], []>} : vector<2x16xf32>, vector<16x64xf32>, vector<2x64xf32> -> vector<2x64xf32>
    %527 = arith.addf %525, %526 : vector<2x64xf32>
    %528 = vector.extract_strided_slice %527 {offsets = [0, 0], sizes = [2, 48], strides = [1, 1]} : vector<2x64xf32> to vector<2x48xf32>
    %529 = arith.negf %528 : vector<2x48xf32>
    %530 = math.exp %529 : vector<2x48xf32>
    %cst_105 = arith.constant 1.000000e+00 : f32
    %531 = vector.broadcast %cst_105 : f32 to vector<2x48xf32>
    %532 = arith.addf %531, %530 : vector<2x48xf32>
    %533 = arith.divf %531, %532 : vector<2x48xf32>
    %534 = vector.extract_strided_slice %527 {offsets = [0, 48], sizes = [2, 16], strides = [1, 1]} : vector<2x64xf32> to vector<2x16xf32>
    %535 = math.tanh %534 : vector<2x16xf32>
    %536 = vector.extract_strided_slice %533 {offsets = [0, 0], sizes = [2, 16], strides = [1, 1]} : vector<2x48xf32> to vector<2x16xf32>
    %537 = vector.extract_strided_slice %533 {offsets = [0, 16], sizes = [2, 16], strides = [1, 1]} : vector<2x48xf32> to vector<2x16xf32>
    %538 = vector.extract_strided_slice %533 {offsets = [0, 32], sizes = [2, 16], strides = [1, 1]} : vector<2x48xf32> to vector<2x16xf32>
    %539 = arith.mulf %537, %517 : vector<2x16xf32>
    %540 = arith.mulf %536, %535 : vector<2x16xf32>
    %541 = arith.addf %539, %540 : vector<2x16xf32>
    %542 = math.tanh %541 : vector<2x16xf32>
    %543 = arith.mulf %538, %542 : vector<2x16xf32>
    %544 = vector.extract_strided_slice %495 {offsets = [0, 2], sizes = [2, 1], strides = [1, 1]} : vector<2x17xf32> to vector<2x1xf32>
    %545 = vector.broadcast %544 : vector<2x1xf32> to vector<2x64xf32>
    %546 = vector.broadcast %9 : vector<1x64xf32> to vector<2x64xf32>
    %547 = arith.mulf %545, %546 : vector<2x64xf32>
    %548 = vector.broadcast %11 : vector<1x64xf32> to vector<2x64xf32>
    %549 = arith.addf %547, %548 : vector<2x64xf32>
    %cst_106 = arith.constant dense<0.000000e+00> : vector<2x64xf32>
    %550 = tpu.matmul %543, %10, %cst_106 {dimension_numbers = #tpu.dot_dimension_numbers<[1], [0], [0], [1], [0, 0, 1, 1], [], []>} : vector<2x16xf32>, vector<16x64xf32>, vector<2x64xf32> -> vector<2x64xf32>
    %551 = arith.addf %549, %550 : vector<2x64xf32>
    %552 = vector.extract_strided_slice %551 {offsets = [0, 0], sizes = [2, 48], strides = [1, 1]} : vector<2x64xf32> to vector<2x48xf32>
    %553 = arith.negf %552 : vector<2x48xf32>
    %554 = math.exp %553 : vector<2x48xf32>
    %cst_107 = arith.constant 1.000000e+00 : f32
    %555 = vector.broadcast %cst_107 : f32 to vector<2x48xf32>
    %556 = arith.addf %555, %554 : vector<2x48xf32>
    %557 = arith.divf %555, %556 : vector<2x48xf32>
    %558 = vector.extract_strided_slice %551 {offsets = [0, 48], sizes = [2, 16], strides = [1, 1]} : vector<2x64xf32> to vector<2x16xf32>
    %559 = math.tanh %558 : vector<2x16xf32>
    %560 = vector.extract_strided_slice %557 {offsets = [0, 0], sizes = [2, 16], strides = [1, 1]} : vector<2x48xf32> to vector<2x16xf32>
    %561 = vector.extract_strided_slice %557 {offsets = [0, 16], sizes = [2, 16], strides = [1, 1]} : vector<2x48xf32> to vector<2x16xf32>
    %562 = vector.extract_strided_slice %557 {offsets = [0, 32], sizes = [2, 16], strides = [1, 1]} : vector<2x48xf32> to vector<2x16xf32>
    %563 = arith.mulf %561, %541 : vector<2x16xf32>
    %564 = arith.mulf %560, %559 : vector<2x16xf32>
    %565 = arith.addf %563, %564 : vector<2x16xf32>
    %566 = math.tanh %565 : vector<2x16xf32>
    %567 = arith.mulf %562, %566 : vector<2x16xf32>
    %568 = vector.extract_strided_slice %495 {offsets = [0, 3], sizes = [2, 1], strides = [1, 1]} : vector<2x17xf32> to vector<2x1xf32>
    %569 = vector.broadcast %568 : vector<2x1xf32> to vector<2x64xf32>
    %570 = vector.broadcast %9 : vector<1x64xf32> to vector<2x64xf32>
    %571 = arith.mulf %569, %570 : vector<2x64xf32>
    %572 = vector.broadcast %11 : vector<1x64xf32> to vector<2x64xf32>
    %573 = arith.addf %571, %572 : vector<2x64xf32>
    %cst_108 = arith.constant dense<0.000000e+00> : vector<2x64xf32>
    %574 = tpu.matmul %567, %10, %cst_108 {dimension_numbers = #tpu.dot_dimension_numbers<[1], [0], [0], [1], [0, 0, 1, 1], [], []>} : vector<2x16xf32>, vector<16x64xf32>, vector<2x64xf32> -> vector<2x64xf32>
    %575 = arith.addf %573, %574 : vector<2x64xf32>
    %576 = vector.extract_strided_slice %575 {offsets = [0, 0], sizes = [2, 48], strides = [1, 1]} : vector<2x64xf32> to vector<2x48xf32>
    %577 = arith.negf %576 : vector<2x48xf32>
    %578 = math.exp %577 : vector<2x48xf32>
    %cst_109 = arith.constant 1.000000e+00 : f32
    %579 = vector.broadcast %cst_109 : f32 to vector<2x48xf32>
    %580 = arith.addf %579, %578 : vector<2x48xf32>
    %581 = arith.divf %579, %580 : vector<2x48xf32>
    %582 = vector.extract_strided_slice %575 {offsets = [0, 48], sizes = [2, 16], strides = [1, 1]} : vector<2x64xf32> to vector<2x16xf32>
    %583 = math.tanh %582 : vector<2x16xf32>
    %584 = vector.extract_strided_slice %581 {offsets = [0, 0], sizes = [2, 16], strides = [1, 1]} : vector<2x48xf32> to vector<2x16xf32>
    %585 = vector.extract_strided_slice %581 {offsets = [0, 16], sizes = [2, 16], strides = [1, 1]} : vector<2x48xf32> to vector<2x16xf32>
    %586 = vector.extract_strided_slice %581 {offsets = [0, 32], sizes = [2, 16], strides = [1, 1]} : vector<2x48xf32> to vector<2x16xf32>
    %587 = arith.mulf %585, %565 : vector<2x16xf32>
    %588 = arith.mulf %584, %583 : vector<2x16xf32>
    %589 = arith.addf %587, %588 : vector<2x16xf32>
    %590 = math.tanh %589 : vector<2x16xf32>
    %591 = arith.mulf %586, %590 : vector<2x16xf32>
    %592 = vector.extract_strided_slice %495 {offsets = [0, 4], sizes = [2, 1], strides = [1, 1]} : vector<2x17xf32> to vector<2x1xf32>
    %593 = vector.broadcast %592 : vector<2x1xf32> to vector<2x64xf32>
    %594 = vector.broadcast %9 : vector<1x64xf32> to vector<2x64xf32>
    %595 = arith.mulf %593, %594 : vector<2x64xf32>
    %596 = vector.broadcast %11 : vector<1x64xf32> to vector<2x64xf32>
    %597 = arith.addf %595, %596 : vector<2x64xf32>
    %cst_110 = arith.constant dense<0.000000e+00> : vector<2x64xf32>
    %598 = tpu.matmul %591, %10, %cst_110 {dimension_numbers = #tpu.dot_dimension_numbers<[1], [0], [0], [1], [0, 0, 1, 1], [], []>} : vector<2x16xf32>, vector<16x64xf32>, vector<2x64xf32> -> vector<2x64xf32>
    %599 = arith.addf %597, %598 : vector<2x64xf32>
    %600 = vector.extract_strided_slice %599 {offsets = [0, 0], sizes = [2, 48], strides = [1, 1]} : vector<2x64xf32> to vector<2x48xf32>
    %601 = arith.negf %600 : vector<2x48xf32>
    %602 = math.exp %601 : vector<2x48xf32>
    %cst_111 = arith.constant 1.000000e+00 : f32
    %603 = vector.broadcast %cst_111 : f32 to vector<2x48xf32>
    %604 = arith.addf %603, %602 : vector<2x48xf32>
    %605 = arith.divf %603, %604 : vector<2x48xf32>
    %606 = vector.extract_strided_slice %599 {offsets = [0, 48], sizes = [2, 16], strides = [1, 1]} : vector<2x64xf32> to vector<2x16xf32>
    %607 = math.tanh %606 : vector<2x16xf32>
    %608 = vector.extract_strided_slice %605 {offsets = [0, 0], sizes = [2, 16], strides = [1, 1]} : vector<2x48xf32> to vector<2x16xf32>
    %609 = vector.extract_strided_slice %605 {offsets = [0, 16], sizes = [2, 16], strides = [1, 1]} : vector<2x48xf32> to vector<2x16xf32>
    %610 = vector.extract_strided_slice %605 {offsets = [0, 32], sizes = [2, 16], strides = [1, 1]} : vector<2x48xf32> to vector<2x16xf32>
    %611 = arith.mulf %609, %589 : vector<2x16xf32>
    %612 = arith.mulf %608, %607 : vector<2x16xf32>
    %613 = arith.addf %611, %612 : vector<2x16xf32>
    %614 = math.tanh %613 : vector<2x16xf32>
    %615 = arith.mulf %610, %614 : vector<2x16xf32>
    %616 = vector.extract_strided_slice %495 {offsets = [0, 5], sizes = [2, 1], strides = [1, 1]} : vector<2x17xf32> to vector<2x1xf32>
    %617 = vector.broadcast %616 : vector<2x1xf32> to vector<2x64xf32>
    %618 = vector.broadcast %9 : vector<1x64xf32> to vector<2x64xf32>
    %619 = arith.mulf %617, %618 : vector<2x64xf32>
    %620 = vector.broadcast %11 : vector<1x64xf32> to vector<2x64xf32>
    %621 = arith.addf %619, %620 : vector<2x64xf32>
    %cst_112 = arith.constant dense<0.000000e+00> : vector<2x64xf32>
    %622 = tpu.matmul %615, %10, %cst_112 {dimension_numbers = #tpu.dot_dimension_numbers<[1], [0], [0], [1], [0, 0, 1, 1], [], []>} : vector<2x16xf32>, vector<16x64xf32>, vector<2x64xf32> -> vector<2x64xf32>
    %623 = arith.addf %621, %622 : vector<2x64xf32>
    %624 = vector.extract_strided_slice %623 {offsets = [0, 0], sizes = [2, 48], strides = [1, 1]} : vector<2x64xf32> to vector<2x48xf32>
    %625 = arith.negf %624 : vector<2x48xf32>
    %626 = math.exp %625 : vector<2x48xf32>
    %cst_113 = arith.constant 1.000000e+00 : f32
    %627 = vector.broadcast %cst_113 : f32 to vector<2x48xf32>
    %628 = arith.addf %627, %626 : vector<2x48xf32>
    %629 = arith.divf %627, %628 : vector<2x48xf32>
    %630 = vector.extract_strided_slice %623 {offsets = [0, 48], sizes = [2, 16], strides = [1, 1]} : vector<2x64xf32> to vector<2x16xf32>
    %631 = math.tanh %630 : vector<2x16xf32>
    %632 = vector.extract_strided_slice %629 {offsets = [0, 0], sizes = [2, 16], strides = [1, 1]} : vector<2x48xf32> to vector<2x16xf32>
    %633 = vector.extract_strided_slice %629 {offsets = [0, 16], sizes = [2, 16], strides = [1, 1]} : vector<2x48xf32> to vector<2x16xf32>
    %634 = vector.extract_strided_slice %629 {offsets = [0, 32], sizes = [2, 16], strides = [1, 1]} : vector<2x48xf32> to vector<2x16xf32>
    %635 = arith.mulf %633, %613 : vector<2x16xf32>
    %636 = arith.mulf %632, %631 : vector<2x16xf32>
    %637 = arith.addf %635, %636 : vector<2x16xf32>
    %638 = math.tanh %637 : vector<2x16xf32>
    %639 = arith.mulf %634, %638 : vector<2x16xf32>
    %640 = vector.extract_strided_slice %495 {offsets = [0, 6], sizes = [2, 1], strides = [1, 1]} : vector<2x17xf32> to vector<2x1xf32>
    %641 = vector.broadcast %640 : vector<2x1xf32> to vector<2x64xf32>
    %642 = vector.broadcast %9 : vector<1x64xf32> to vector<2x64xf32>
    %643 = arith.mulf %641, %642 : vector<2x64xf32>
    %644 = vector.broadcast %11 : vector<1x64xf32> to vector<2x64xf32>
    %645 = arith.addf %643, %644 : vector<2x64xf32>
    %cst_114 = arith.constant dense<0.000000e+00> : vector<2x64xf32>
    %646 = tpu.matmul %639, %10, %cst_114 {dimension_numbers = #tpu.dot_dimension_numbers<[1], [0], [0], [1], [0, 0, 1, 1], [], []>} : vector<2x16xf32>, vector<16x64xf32>, vector<2x64xf32> -> vector<2x64xf32>
    %647 = arith.addf %645, %646 : vector<2x64xf32>
    %648 = vector.extract_strided_slice %647 {offsets = [0, 0], sizes = [2, 48], strides = [1, 1]} : vector<2x64xf32> to vector<2x48xf32>
    %649 = arith.negf %648 : vector<2x48xf32>
    %650 = math.exp %649 : vector<2x48xf32>
    %cst_115 = arith.constant 1.000000e+00 : f32
    %651 = vector.broadcast %cst_115 : f32 to vector<2x48xf32>
    %652 = arith.addf %651, %650 : vector<2x48xf32>
    %653 = arith.divf %651, %652 : vector<2x48xf32>
    %654 = vector.extract_strided_slice %647 {offsets = [0, 48], sizes = [2, 16], strides = [1, 1]} : vector<2x64xf32> to vector<2x16xf32>
    %655 = math.tanh %654 : vector<2x16xf32>
    %656 = vector.extract_strided_slice %653 {offsets = [0, 0], sizes = [2, 16], strides = [1, 1]} : vector<2x48xf32> to vector<2x16xf32>
    %657 = vector.extract_strided_slice %653 {offsets = [0, 16], sizes = [2, 16], strides = [1, 1]} : vector<2x48xf32> to vector<2x16xf32>
    %658 = vector.extract_strided_slice %653 {offsets = [0, 32], sizes = [2, 16], strides = [1, 1]} : vector<2x48xf32> to vector<2x16xf32>
    %659 = arith.mulf %657, %637 : vector<2x16xf32>
    %660 = arith.mulf %656, %655 : vector<2x16xf32>
    %661 = arith.addf %659, %660 : vector<2x16xf32>
    %662 = math.tanh %661 : vector<2x16xf32>
    %663 = arith.mulf %658, %662 : vector<2x16xf32>
    %664 = vector.extract_strided_slice %495 {offsets = [0, 7], sizes = [2, 1], strides = [1, 1]} : vector<2x17xf32> to vector<2x1xf32>
    %665 = vector.broadcast %664 : vector<2x1xf32> to vector<2x64xf32>
    %666 = vector.broadcast %9 : vector<1x64xf32> to vector<2x64xf32>
    %667 = arith.mulf %665, %666 : vector<2x64xf32>
    %668 = vector.broadcast %11 : vector<1x64xf32> to vector<2x64xf32>
    %669 = arith.addf %667, %668 : vector<2x64xf32>
    %cst_116 = arith.constant dense<0.000000e+00> : vector<2x64xf32>
    %670 = tpu.matmul %663, %10, %cst_116 {dimension_numbers = #tpu.dot_dimension_numbers<[1], [0], [0], [1], [0, 0, 1, 1], [], []>} : vector<2x16xf32>, vector<16x64xf32>, vector<2x64xf32> -> vector<2x64xf32>
    %671 = arith.addf %669, %670 : vector<2x64xf32>
    %672 = vector.extract_strided_slice %671 {offsets = [0, 0], sizes = [2, 48], strides = [1, 1]} : vector<2x64xf32> to vector<2x48xf32>
    %673 = arith.negf %672 : vector<2x48xf32>
    %674 = math.exp %673 : vector<2x48xf32>
    %cst_117 = arith.constant 1.000000e+00 : f32
    %675 = vector.broadcast %cst_117 : f32 to vector<2x48xf32>
    %676 = arith.addf %675, %674 : vector<2x48xf32>
    %677 = arith.divf %675, %676 : vector<2x48xf32>
    %678 = vector.extract_strided_slice %671 {offsets = [0, 48], sizes = [2, 16], strides = [1, 1]} : vector<2x64xf32> to vector<2x16xf32>
    %679 = math.tanh %678 : vector<2x16xf32>
    %680 = vector.extract_strided_slice %677 {offsets = [0, 0], sizes = [2, 16], strides = [1, 1]} : vector<2x48xf32> to vector<2x16xf32>
    %681 = vector.extract_strided_slice %677 {offsets = [0, 16], sizes = [2, 16], strides = [1, 1]} : vector<2x48xf32> to vector<2x16xf32>
    %682 = vector.extract_strided_slice %677 {offsets = [0, 32], sizes = [2, 16], strides = [1, 1]} : vector<2x48xf32> to vector<2x16xf32>
    %683 = arith.mulf %681, %661 : vector<2x16xf32>
    %684 = arith.mulf %680, %679 : vector<2x16xf32>
    %685 = arith.addf %683, %684 : vector<2x16xf32>
    %686 = math.tanh %685 : vector<2x16xf32>
    %687 = arith.mulf %682, %686 : vector<2x16xf32>
    %688 = vector.extract_strided_slice %495 {offsets = [0, 8], sizes = [2, 1], strides = [1, 1]} : vector<2x17xf32> to vector<2x1xf32>
    %689 = vector.broadcast %688 : vector<2x1xf32> to vector<2x64xf32>
    %690 = vector.broadcast %9 : vector<1x64xf32> to vector<2x64xf32>
    %691 = arith.mulf %689, %690 : vector<2x64xf32>
    %692 = vector.broadcast %11 : vector<1x64xf32> to vector<2x64xf32>
    %693 = arith.addf %691, %692 : vector<2x64xf32>
    %cst_118 = arith.constant dense<0.000000e+00> : vector<2x64xf32>
    %694 = tpu.matmul %687, %10, %cst_118 {dimension_numbers = #tpu.dot_dimension_numbers<[1], [0], [0], [1], [0, 0, 1, 1], [], []>} : vector<2x16xf32>, vector<16x64xf32>, vector<2x64xf32> -> vector<2x64xf32>
    %695 = arith.addf %693, %694 : vector<2x64xf32>
    %696 = vector.extract_strided_slice %695 {offsets = [0, 0], sizes = [2, 48], strides = [1, 1]} : vector<2x64xf32> to vector<2x48xf32>
    %697 = arith.negf %696 : vector<2x48xf32>
    %698 = math.exp %697 : vector<2x48xf32>
    %cst_119 = arith.constant 1.000000e+00 : f32
    %699 = vector.broadcast %cst_119 : f32 to vector<2x48xf32>
    %700 = arith.addf %699, %698 : vector<2x48xf32>
    %701 = arith.divf %699, %700 : vector<2x48xf32>
    %702 = vector.extract_strided_slice %695 {offsets = [0, 48], sizes = [2, 16], strides = [1, 1]} : vector<2x64xf32> to vector<2x16xf32>
    %703 = math.tanh %702 : vector<2x16xf32>
    %704 = vector.extract_strided_slice %701 {offsets = [0, 0], sizes = [2, 16], strides = [1, 1]} : vector<2x48xf32> to vector<2x16xf32>
    %705 = vector.extract_strided_slice %701 {offsets = [0, 16], sizes = [2, 16], strides = [1, 1]} : vector<2x48xf32> to vector<2x16xf32>
    %706 = vector.extract_strided_slice %701 {offsets = [0, 32], sizes = [2, 16], strides = [1, 1]} : vector<2x48xf32> to vector<2x16xf32>
    %707 = arith.mulf %705, %685 : vector<2x16xf32>
    %708 = arith.mulf %704, %703 : vector<2x16xf32>
    %709 = arith.addf %707, %708 : vector<2x16xf32>
    %710 = math.tanh %709 : vector<2x16xf32>
    %711 = arith.mulf %706, %710 : vector<2x16xf32>
    %712 = vector.extract_strided_slice %495 {offsets = [0, 9], sizes = [2, 1], strides = [1, 1]} : vector<2x17xf32> to vector<2x1xf32>
    %713 = vector.broadcast %712 : vector<2x1xf32> to vector<2x64xf32>
    %714 = vector.broadcast %9 : vector<1x64xf32> to vector<2x64xf32>
    %715 = arith.mulf %713, %714 : vector<2x64xf32>
    %716 = vector.broadcast %11 : vector<1x64xf32> to vector<2x64xf32>
    %717 = arith.addf %715, %716 : vector<2x64xf32>
    %cst_120 = arith.constant dense<0.000000e+00> : vector<2x64xf32>
    %718 = tpu.matmul %711, %10, %cst_120 {dimension_numbers = #tpu.dot_dimension_numbers<[1], [0], [0], [1], [0, 0, 1, 1], [], []>} : vector<2x16xf32>, vector<16x64xf32>, vector<2x64xf32> -> vector<2x64xf32>
    %719 = arith.addf %717, %718 : vector<2x64xf32>
    %720 = vector.extract_strided_slice %719 {offsets = [0, 0], sizes = [2, 48], strides = [1, 1]} : vector<2x64xf32> to vector<2x48xf32>
    %721 = arith.negf %720 : vector<2x48xf32>
    %722 = math.exp %721 : vector<2x48xf32>
    %cst_121 = arith.constant 1.000000e+00 : f32
    %723 = vector.broadcast %cst_121 : f32 to vector<2x48xf32>
    %724 = arith.addf %723, %722 : vector<2x48xf32>
    %725 = arith.divf %723, %724 : vector<2x48xf32>
    %726 = vector.extract_strided_slice %719 {offsets = [0, 48], sizes = [2, 16], strides = [1, 1]} : vector<2x64xf32> to vector<2x16xf32>
    %727 = math.tanh %726 : vector<2x16xf32>
    %728 = vector.extract_strided_slice %725 {offsets = [0, 0], sizes = [2, 16], strides = [1, 1]} : vector<2x48xf32> to vector<2x16xf32>
    %729 = vector.extract_strided_slice %725 {offsets = [0, 16], sizes = [2, 16], strides = [1, 1]} : vector<2x48xf32> to vector<2x16xf32>
    %730 = vector.extract_strided_slice %725 {offsets = [0, 32], sizes = [2, 16], strides = [1, 1]} : vector<2x48xf32> to vector<2x16xf32>
    %731 = arith.mulf %729, %709 : vector<2x16xf32>
    %732 = arith.mulf %728, %727 : vector<2x16xf32>
    %733 = arith.addf %731, %732 : vector<2x16xf32>
    %734 = math.tanh %733 : vector<2x16xf32>
    %735 = arith.mulf %730, %734 : vector<2x16xf32>
    %736 = vector.extract_strided_slice %495 {offsets = [0, 10], sizes = [2, 1], strides = [1, 1]} : vector<2x17xf32> to vector<2x1xf32>
    %737 = vector.broadcast %736 : vector<2x1xf32> to vector<2x64xf32>
    %738 = vector.broadcast %9 : vector<1x64xf32> to vector<2x64xf32>
    %739 = arith.mulf %737, %738 : vector<2x64xf32>
    %740 = vector.broadcast %11 : vector<1x64xf32> to vector<2x64xf32>
    %741 = arith.addf %739, %740 : vector<2x64xf32>
    %cst_122 = arith.constant dense<0.000000e+00> : vector<2x64xf32>
    %742 = tpu.matmul %735, %10, %cst_122 {dimension_numbers = #tpu.dot_dimension_numbers<[1], [0], [0], [1], [0, 0, 1, 1], [], []>} : vector<2x16xf32>, vector<16x64xf32>, vector<2x64xf32> -> vector<2x64xf32>
    %743 = arith.addf %741, %742 : vector<2x64xf32>
    %744 = vector.extract_strided_slice %743 {offsets = [0, 0], sizes = [2, 48], strides = [1, 1]} : vector<2x64xf32> to vector<2x48xf32>
    %745 = arith.negf %744 : vector<2x48xf32>
    %746 = math.exp %745 : vector<2x48xf32>
    %cst_123 = arith.constant 1.000000e+00 : f32
    %747 = vector.broadcast %cst_123 : f32 to vector<2x48xf32>
    %748 = arith.addf %747, %746 : vector<2x48xf32>
    %749 = arith.divf %747, %748 : vector<2x48xf32>
    %750 = vector.extract_strided_slice %743 {offsets = [0, 48], sizes = [2, 16], strides = [1, 1]} : vector<2x64xf32> to vector<2x16xf32>
    %751 = math.tanh %750 : vector<2x16xf32>
    %752 = vector.extract_strided_slice %749 {offsets = [0, 0], sizes = [2, 16], strides = [1, 1]} : vector<2x48xf32> to vector<2x16xf32>
    %753 = vector.extract_strided_slice %749 {offsets = [0, 16], sizes = [2, 16], strides = [1, 1]} : vector<2x48xf32> to vector<2x16xf32>
    %754 = vector.extract_strided_slice %749 {offsets = [0, 32], sizes = [2, 16], strides = [1, 1]} : vector<2x48xf32> to vector<2x16xf32>
    %755 = arith.mulf %753, %733 : vector<2x16xf32>
    %756 = arith.mulf %752, %751 : vector<2x16xf32>
    %757 = arith.addf %755, %756 : vector<2x16xf32>
    %758 = math.tanh %757 : vector<2x16xf32>
    %759 = arith.mulf %754, %758 : vector<2x16xf32>
    %760 = vector.extract_strided_slice %495 {offsets = [0, 11], sizes = [2, 1], strides = [1, 1]} : vector<2x17xf32> to vector<2x1xf32>
    %761 = vector.broadcast %760 : vector<2x1xf32> to vector<2x64xf32>
    %762 = vector.broadcast %9 : vector<1x64xf32> to vector<2x64xf32>
    %763 = arith.mulf %761, %762 : vector<2x64xf32>
    %764 = vector.broadcast %11 : vector<1x64xf32> to vector<2x64xf32>
    %765 = arith.addf %763, %764 : vector<2x64xf32>
    %cst_124 = arith.constant dense<0.000000e+00> : vector<2x64xf32>
    %766 = tpu.matmul %759, %10, %cst_124 {dimension_numbers = #tpu.dot_dimension_numbers<[1], [0], [0], [1], [0, 0, 1, 1], [], []>} : vector<2x16xf32>, vector<16x64xf32>, vector<2x64xf32> -> vector<2x64xf32>
    %767 = arith.addf %765, %766 : vector<2x64xf32>
    %768 = vector.extract_strided_slice %767 {offsets = [0, 0], sizes = [2, 48], strides = [1, 1]} : vector<2x64xf32> to vector<2x48xf32>
    %769 = arith.negf %768 : vector<2x48xf32>
    %770 = math.exp %769 : vector<2x48xf32>
    %cst_125 = arith.constant 1.000000e+00 : f32
    %771 = vector.broadcast %cst_125 : f32 to vector<2x48xf32>
    %772 = arith.addf %771, %770 : vector<2x48xf32>
    %773 = arith.divf %771, %772 : vector<2x48xf32>
    %774 = vector.extract_strided_slice %767 {offsets = [0, 48], sizes = [2, 16], strides = [1, 1]} : vector<2x64xf32> to vector<2x16xf32>
    %775 = math.tanh %774 : vector<2x16xf32>
    %776 = vector.extract_strided_slice %773 {offsets = [0, 0], sizes = [2, 16], strides = [1, 1]} : vector<2x48xf32> to vector<2x16xf32>
    %777 = vector.extract_strided_slice %773 {offsets = [0, 16], sizes = [2, 16], strides = [1, 1]} : vector<2x48xf32> to vector<2x16xf32>
    %778 = vector.extract_strided_slice %773 {offsets = [0, 32], sizes = [2, 16], strides = [1, 1]} : vector<2x48xf32> to vector<2x16xf32>
    %779 = arith.mulf %777, %757 : vector<2x16xf32>
    %780 = arith.mulf %776, %775 : vector<2x16xf32>
    %781 = arith.addf %779, %780 : vector<2x16xf32>
    %782 = math.tanh %781 : vector<2x16xf32>
    %783 = arith.mulf %778, %782 : vector<2x16xf32>
    %784 = vector.extract_strided_slice %495 {offsets = [0, 12], sizes = [2, 1], strides = [1, 1]} : vector<2x17xf32> to vector<2x1xf32>
    %785 = vector.broadcast %784 : vector<2x1xf32> to vector<2x64xf32>
    %786 = vector.broadcast %9 : vector<1x64xf32> to vector<2x64xf32>
    %787 = arith.mulf %785, %786 : vector<2x64xf32>
    %788 = vector.broadcast %11 : vector<1x64xf32> to vector<2x64xf32>
    %789 = arith.addf %787, %788 : vector<2x64xf32>
    %cst_126 = arith.constant dense<0.000000e+00> : vector<2x64xf32>
    %790 = tpu.matmul %783, %10, %cst_126 {dimension_numbers = #tpu.dot_dimension_numbers<[1], [0], [0], [1], [0, 0, 1, 1], [], []>} : vector<2x16xf32>, vector<16x64xf32>, vector<2x64xf32> -> vector<2x64xf32>
    %791 = arith.addf %789, %790 : vector<2x64xf32>
    %792 = vector.extract_strided_slice %791 {offsets = [0, 0], sizes = [2, 48], strides = [1, 1]} : vector<2x64xf32> to vector<2x48xf32>
    %793 = arith.negf %792 : vector<2x48xf32>
    %794 = math.exp %793 : vector<2x48xf32>
    %cst_127 = arith.constant 1.000000e+00 : f32
    %795 = vector.broadcast %cst_127 : f32 to vector<2x48xf32>
    %796 = arith.addf %795, %794 : vector<2x48xf32>
    %797 = arith.divf %795, %796 : vector<2x48xf32>
    %798 = vector.extract_strided_slice %791 {offsets = [0, 48], sizes = [2, 16], strides = [1, 1]} : vector<2x64xf32> to vector<2x16xf32>
    %799 = math.tanh %798 : vector<2x16xf32>
    %800 = vector.extract_strided_slice %797 {offsets = [0, 0], sizes = [2, 16], strides = [1, 1]} : vector<2x48xf32> to vector<2x16xf32>
    %801 = vector.extract_strided_slice %797 {offsets = [0, 16], sizes = [2, 16], strides = [1, 1]} : vector<2x48xf32> to vector<2x16xf32>
    %802 = vector.extract_strided_slice %797 {offsets = [0, 32], sizes = [2, 16], strides = [1, 1]} : vector<2x48xf32> to vector<2x16xf32>
    %803 = arith.mulf %801, %781 : vector<2x16xf32>
    %804 = arith.mulf %800, %799 : vector<2x16xf32>
    %805 = arith.addf %803, %804 : vector<2x16xf32>
    %806 = math.tanh %805 : vector<2x16xf32>
    %807 = arith.mulf %802, %806 : vector<2x16xf32>
    %808 = vector.extract_strided_slice %495 {offsets = [0, 13], sizes = [2, 1], strides = [1, 1]} : vector<2x17xf32> to vector<2x1xf32>
    %809 = vector.broadcast %808 : vector<2x1xf32> to vector<2x64xf32>
    %810 = vector.broadcast %9 : vector<1x64xf32> to vector<2x64xf32>
    %811 = arith.mulf %809, %810 : vector<2x64xf32>
    %812 = vector.broadcast %11 : vector<1x64xf32> to vector<2x64xf32>
    %813 = arith.addf %811, %812 : vector<2x64xf32>
    %cst_128 = arith.constant dense<0.000000e+00> : vector<2x64xf32>
    %814 = tpu.matmul %807, %10, %cst_128 {dimension_numbers = #tpu.dot_dimension_numbers<[1], [0], [0], [1], [0, 0, 1, 1], [], []>} : vector<2x16xf32>, vector<16x64xf32>, vector<2x64xf32> -> vector<2x64xf32>
    %815 = arith.addf %813, %814 : vector<2x64xf32>
    %816 = vector.extract_strided_slice %815 {offsets = [0, 0], sizes = [2, 48], strides = [1, 1]} : vector<2x64xf32> to vector<2x48xf32>
    %817 = arith.negf %816 : vector<2x48xf32>
    %818 = math.exp %817 : vector<2x48xf32>
    %cst_129 = arith.constant 1.000000e+00 : f32
    %819 = vector.broadcast %cst_129 : f32 to vector<2x48xf32>
    %820 = arith.addf %819, %818 : vector<2x48xf32>
    %821 = arith.divf %819, %820 : vector<2x48xf32>
    %822 = vector.extract_strided_slice %815 {offsets = [0, 48], sizes = [2, 16], strides = [1, 1]} : vector<2x64xf32> to vector<2x16xf32>
    %823 = math.tanh %822 : vector<2x16xf32>
    %824 = vector.extract_strided_slice %821 {offsets = [0, 0], sizes = [2, 16], strides = [1, 1]} : vector<2x48xf32> to vector<2x16xf32>
    %825 = vector.extract_strided_slice %821 {offsets = [0, 16], sizes = [2, 16], strides = [1, 1]} : vector<2x48xf32> to vector<2x16xf32>
    %826 = vector.extract_strided_slice %821 {offsets = [0, 32], sizes = [2, 16], strides = [1, 1]} : vector<2x48xf32> to vector<2x16xf32>
    %827 = arith.mulf %825, %805 : vector<2x16xf32>
    %828 = arith.mulf %824, %823 : vector<2x16xf32>
    %829 = arith.addf %827, %828 : vector<2x16xf32>
    %830 = math.tanh %829 : vector<2x16xf32>
    %831 = arith.mulf %826, %830 : vector<2x16xf32>
    %832 = vector.extract_strided_slice %495 {offsets = [0, 14], sizes = [2, 1], strides = [1, 1]} : vector<2x17xf32> to vector<2x1xf32>
    %833 = vector.broadcast %832 : vector<2x1xf32> to vector<2x64xf32>
    %834 = vector.broadcast %9 : vector<1x64xf32> to vector<2x64xf32>
    %835 = arith.mulf %833, %834 : vector<2x64xf32>
    %836 = vector.broadcast %11 : vector<1x64xf32> to vector<2x64xf32>
    %837 = arith.addf %835, %836 : vector<2x64xf32>
    %cst_130 = arith.constant dense<0.000000e+00> : vector<2x64xf32>
    %838 = tpu.matmul %831, %10, %cst_130 {dimension_numbers = #tpu.dot_dimension_numbers<[1], [0], [0], [1], [0, 0, 1, 1], [], []>} : vector<2x16xf32>, vector<16x64xf32>, vector<2x64xf32> -> vector<2x64xf32>
    %839 = arith.addf %837, %838 : vector<2x64xf32>
    %840 = vector.extract_strided_slice %839 {offsets = [0, 0], sizes = [2, 48], strides = [1, 1]} : vector<2x64xf32> to vector<2x48xf32>
    %841 = arith.negf %840 : vector<2x48xf32>
    %842 = math.exp %841 : vector<2x48xf32>
    %cst_131 = arith.constant 1.000000e+00 : f32
    %843 = vector.broadcast %cst_131 : f32 to vector<2x48xf32>
    %844 = arith.addf %843, %842 : vector<2x48xf32>
    %845 = arith.divf %843, %844 : vector<2x48xf32>
    %846 = vector.extract_strided_slice %839 {offsets = [0, 48], sizes = [2, 16], strides = [1, 1]} : vector<2x64xf32> to vector<2x16xf32>
    %847 = math.tanh %846 : vector<2x16xf32>
    %848 = vector.extract_strided_slice %845 {offsets = [0, 0], sizes = [2, 16], strides = [1, 1]} : vector<2x48xf32> to vector<2x16xf32>
    %849 = vector.extract_strided_slice %845 {offsets = [0, 16], sizes = [2, 16], strides = [1, 1]} : vector<2x48xf32> to vector<2x16xf32>
    %850 = vector.extract_strided_slice %845 {offsets = [0, 32], sizes = [2, 16], strides = [1, 1]} : vector<2x48xf32> to vector<2x16xf32>
    %851 = arith.mulf %849, %829 : vector<2x16xf32>
    %852 = arith.mulf %848, %847 : vector<2x16xf32>
    %853 = arith.addf %851, %852 : vector<2x16xf32>
    %854 = math.tanh %853 : vector<2x16xf32>
    %855 = arith.mulf %850, %854 : vector<2x16xf32>
    %856 = vector.extract_strided_slice %495 {offsets = [0, 15], sizes = [2, 1], strides = [1, 1]} : vector<2x17xf32> to vector<2x1xf32>
    %857 = vector.broadcast %856 : vector<2x1xf32> to vector<2x64xf32>
    %858 = vector.broadcast %9 : vector<1x64xf32> to vector<2x64xf32>
    %859 = arith.mulf %857, %858 : vector<2x64xf32>
    %860 = vector.broadcast %11 : vector<1x64xf32> to vector<2x64xf32>
    %861 = arith.addf %859, %860 : vector<2x64xf32>
    %cst_132 = arith.constant dense<0.000000e+00> : vector<2x64xf32>
    %862 = tpu.matmul %855, %10, %cst_132 {dimension_numbers = #tpu.dot_dimension_numbers<[1], [0], [0], [1], [0, 0, 1, 1], [], []>} : vector<2x16xf32>, vector<16x64xf32>, vector<2x64xf32> -> vector<2x64xf32>
    %863 = arith.addf %861, %862 : vector<2x64xf32>
    %864 = vector.extract_strided_slice %863 {offsets = [0, 0], sizes = [2, 48], strides = [1, 1]} : vector<2x64xf32> to vector<2x48xf32>
    %865 = arith.negf %864 : vector<2x48xf32>
    %866 = math.exp %865 : vector<2x48xf32>
    %cst_133 = arith.constant 1.000000e+00 : f32
    %867 = vector.broadcast %cst_133 : f32 to vector<2x48xf32>
    %868 = arith.addf %867, %866 : vector<2x48xf32>
    %869 = arith.divf %867, %868 : vector<2x48xf32>
    %870 = vector.extract_strided_slice %863 {offsets = [0, 48], sizes = [2, 16], strides = [1, 1]} : vector<2x64xf32> to vector<2x16xf32>
    %871 = math.tanh %870 : vector<2x16xf32>
    %872 = vector.extract_strided_slice %869 {offsets = [0, 0], sizes = [2, 16], strides = [1, 1]} : vector<2x48xf32> to vector<2x16xf32>
    %873 = vector.extract_strided_slice %869 {offsets = [0, 16], sizes = [2, 16], strides = [1, 1]} : vector<2x48xf32> to vector<2x16xf32>
    %874 = vector.extract_strided_slice %869 {offsets = [0, 32], sizes = [2, 16], strides = [1, 1]} : vector<2x48xf32> to vector<2x16xf32>
    %875 = arith.mulf %873, %853 : vector<2x16xf32>
    %876 = arith.mulf %872, %871 : vector<2x16xf32>
    %877 = arith.addf %875, %876 : vector<2x16xf32>
    %878 = math.tanh %877 : vector<2x16xf32>
    %879 = arith.mulf %874, %878 : vector<2x16xf32>
    %880 = vector.extract_strided_slice %495 {offsets = [0, 16], sizes = [2, 1], strides = [1, 1]} : vector<2x17xf32> to vector<2x1xf32>
    %881 = vector.broadcast %880 : vector<2x1xf32> to vector<2x64xf32>
    %882 = vector.broadcast %9 : vector<1x64xf32> to vector<2x64xf32>
    %883 = arith.mulf %881, %882 : vector<2x64xf32>
    %884 = vector.broadcast %11 : vector<1x64xf32> to vector<2x64xf32>
    %885 = arith.addf %883, %884 : vector<2x64xf32>
    %cst_134 = arith.constant dense<0.000000e+00> : vector<2x64xf32>
    %886 = tpu.matmul %879, %10, %cst_134 {dimension_numbers = #tpu.dot_dimension_numbers<[1], [0], [0], [1], [0, 0, 1, 1], [], []>} : vector<2x16xf32>, vector<16x64xf32>, vector<2x64xf32> -> vector<2x64xf32>
    %887 = arith.addf %885, %886 : vector<2x64xf32>
    %888 = vector.extract_strided_slice %887 {offsets = [0, 0], sizes = [2, 48], strides = [1, 1]} : vector<2x64xf32> to vector<2x48xf32>
    %889 = arith.negf %888 : vector<2x48xf32>
    %890 = math.exp %889 : vector<2x48xf32>
    %cst_135 = arith.constant 1.000000e+00 : f32
    %891 = vector.broadcast %cst_135 : f32 to vector<2x48xf32>
    %892 = arith.addf %891, %890 : vector<2x48xf32>
    %893 = arith.divf %891, %892 : vector<2x48xf32>
    %894 = vector.extract_strided_slice %887 {offsets = [0, 48], sizes = [2, 16], strides = [1, 1]} : vector<2x64xf32> to vector<2x16xf32>
    %895 = math.tanh %894 : vector<2x16xf32>
    %896 = vector.extract_strided_slice %893 {offsets = [0, 0], sizes = [2, 16], strides = [1, 1]} : vector<2x48xf32> to vector<2x16xf32>
    %897 = vector.extract_strided_slice %893 {offsets = [0, 16], sizes = [2, 16], strides = [1, 1]} : vector<2x48xf32> to vector<2x16xf32>
    %898 = vector.extract_strided_slice %893 {offsets = [0, 32], sizes = [2, 16], strides = [1, 1]} : vector<2x48xf32> to vector<2x16xf32>
    %899 = arith.mulf %897, %877 : vector<2x16xf32>
    %900 = arith.mulf %896, %895 : vector<2x16xf32>
    %901 = arith.addf %899, %900 : vector<2x16xf32>
    %902 = math.tanh %901 : vector<2x16xf32>
    %903 = arith.mulf %898, %902 : vector<2x16xf32>
    %904 = vector.broadcast %14 : vector<1x16xf32> to vector<2x16xf32>
    %905 = arith.mulf %903, %904 : vector<2x16xf32>
    %cst_136 = arith.constant dense<0.000000e+00> : vector<2xf32>
    %906 = vector.multi_reduction <add>, %905, %cst_136 [1] : vector<2x16xf32> to vector<2xf32>
    %907 = vector.shape_cast %906 : vector<2xf32> to vector<2x1xf32>
    %908 = vector.broadcast %15 : vector<1x1xf32> to vector<2x1xf32>
    %909 = arith.addf %907, %908 : vector<2x1xf32>
    %c0_137 = arith.constant 0 : index
    %c0_138 = arith.constant 0 : index
    %910 = vector.load %arg11[%c0_137, %c0_138] : memref<120x2xf32, #tpu.memory_space<vmem>>, vector<120x2xf32>
    %c0_139 = arith.constant 0 : index
    %c0_140 = arith.constant 0 : index
    %911 = vector.load %arg12[%c0_139, %c0_140] : memref<2x120xf32, #tpu.memory_space<vmem>>, vector<2x120xf32>
    %c0_141 = arith.constant 0 : index
    %c0_142 = arith.constant 0 : index
    %912 = vector.load %arg13[%c0_141, %c0_142] : memref<120x60xf32, #tpu.memory_space<vmem>>, vector<120x60xf32>
    %c0_143 = arith.constant 0 : index
    %c0_144 = arith.constant 0 : index
    %913 = vector.load %arg14[%c0_143, %c0_144] : memref<60x120xf32, #tpu.memory_space<vmem>>, vector<60x120xf32>
    %c0_145 = arith.constant 0 : index
    %c0_146 = arith.constant 0 : index
    %914 = vector.load %arg17[%c0_145, %c0_146] : memref<120x16xf32, #tpu.memory_space<vmem>>, vector<120x16xf32>
    %c0_147 = arith.constant 0 : index
    %c0_148 = arith.constant 0 : index
    %915 = vector.load %arg18[%c0_147, %c0_148] : memref<120x16xf32, #tpu.memory_space<vmem>>, vector<120x16xf32>
    %cst_149 = arith.constant dense<0.000000e+00> : vector<2x16xf32>
    %916 = tpu.matmul %903, %12, %cst_149 {dimension_numbers = #tpu.dot_dimension_numbers<[1], [0], [0], [1], [0, 0, 1, 1], [], []>} : vector<2x16xf32>, vector<16x16xf32>, vector<2x16xf32> -> vector<2x16xf32>
    %cst_150 = arith.constant dense<0.000000e+00> : vector<120x16xf32>
    %917 = tpu.matmul %910, %916, %cst_150 {dimension_numbers = #tpu.dot_dimension_numbers<[1], [0], [0], [1], [0, 0, 1, 1], [], []>} : vector<120x2xf32>, vector<2x16xf32>, vector<120x16xf32> -> vector<120x16xf32>
    %918 = arith.addf %915, %917 : vector<120x16xf32>
    %919 = math.tanh %918 : vector<120x16xf32>
    %920 = vector.broadcast %13 : vector<1x16xf32> to vector<120x16xf32>
    %921 = arith.mulf %919, %920 : vector<120x16xf32>
    %cst_151 = arith.constant dense<0.000000e+00> : vector<120xf32>
    %922 = vector.multi_reduction <add>, %921, %cst_151 [1] : vector<120x16xf32> to vector<120xf32>
    %923 = vector.shape_cast %922 : vector<120xf32> to vector<120x1xf32>
    %924 = vector.broadcast %923 : vector<120x1xf32> to vector<120x60xf32>
    %925 = arith.mulf %912, %924 : vector<120x60xf32>
    %cst_152 = arith.constant dense<0.000000e+00> : vector<2x60xf32>
    %926 = tpu.matmul %911, %925, %cst_152 {dimension_numbers = #tpu.dot_dimension_numbers<[1], [0], [0], [1], [0, 0, 1, 1], [], []>} : vector<2x120xf32>, vector<120x60xf32>, vector<2x60xf32> -> vector<2x60xf32>
    %cst_153 = arith.constant dense<0xFF800000> : vector<2xf32>
    %927 = vector.multi_reduction <maximumf>, %926, %cst_153 [1] : vector<2x60xf32> to vector<2xf32>
    %928 = vector.shape_cast %927 : vector<2xf32> to vector<2x1xf32>
    %929 = vector.broadcast %928 : vector<2x1xf32> to vector<2x60xf32>
    %930 = arith.subf %926, %929 : vector<2x60xf32>
    %931 = math.exp %930 : vector<2x60xf32>
    %cst_154 = arith.constant dense<0.000000e+00> : vector<2xf32>
    %932 = vector.multi_reduction <add>, %931, %cst_154 [1] : vector<2x60xf32> to vector<2xf32>
    %933 = vector.shape_cast %932 : vector<2xf32> to vector<2x1xf32>
    %934 = tpu.reciprocal %933 {approx = true} : vector<2x1xf32> -> vector<2x1xf32>
    %935 = vector.broadcast %934 : vector<2x1xf32> to vector<2x60xf32>
    %936 = arith.mulf %931, %935 : vector<2x60xf32>
    %937 = arith.addf %491, %936 : vector<2x60xf32>
    %cst_155 = arith.constant dense<0.000000e+00> : vector<2x120xf32>
    %938 = tpu.matmul %936, %913, %cst_155 {dimension_numbers = #tpu.dot_dimension_numbers<[1], [0], [0], [1], [0, 0, 1, 1], [], []>} : vector<2x60xf32>, vector<60x120xf32>, vector<2x120xf32> -> vector<2x120xf32>
    %939 = arith.mulf %911, %938 : vector<2x120xf32>
    %cst_156 = arith.constant dense<0.000000e+00> : vector<2x16xf32>
    %940 = tpu.matmul %939, %914, %cst_156 {dimension_numbers = #tpu.dot_dimension_numbers<[1], [0], [0], [1], [0, 0, 1, 1], [], []>} : vector<2x120xf32>, vector<120x16xf32>, vector<2x16xf32> -> vector<2x16xf32>
    %941 = tpu.concatenate %940, %909 in 1 : vector<2x16xf32>, vector<2x1xf32> -> vector<2x17xf32>
    %942 = vector.extract_strided_slice %941 {offsets = [0, 0], sizes = [2, 1], strides = [1, 1]} : vector<2x17xf32> to vector<2x1xf32>
    %943 = vector.broadcast %942 : vector<2x1xf32> to vector<2x64xf32>
    %944 = vector.broadcast %9 : vector<1x64xf32> to vector<2x64xf32>
    %945 = arith.mulf %943, %944 : vector<2x64xf32>
    %946 = vector.broadcast %11 : vector<1x64xf32> to vector<2x64xf32>
    %947 = arith.addf %945, %946 : vector<2x64xf32>
    %cst_157 = arith.constant dense<0.000000e+00> : vector<2x64xf32>
    %948 = tpu.matmul %903, %10, %cst_157 {dimension_numbers = #tpu.dot_dimension_numbers<[1], [0], [0], [1], [0, 0, 1, 1], [], []>} : vector<2x16xf32>, vector<16x64xf32>, vector<2x64xf32> -> vector<2x64xf32>
    %949 = arith.addf %947, %948 : vector<2x64xf32>
    %950 = vector.extract_strided_slice %949 {offsets = [0, 0], sizes = [2, 48], strides = [1, 1]} : vector<2x64xf32> to vector<2x48xf32>
    %951 = arith.negf %950 : vector<2x48xf32>
    %952 = math.exp %951 : vector<2x48xf32>
    %cst_158 = arith.constant 1.000000e+00 : f32
    %953 = vector.broadcast %cst_158 : f32 to vector<2x48xf32>
    %954 = arith.addf %953, %952 : vector<2x48xf32>
    %955 = arith.divf %953, %954 : vector<2x48xf32>
    %956 = vector.extract_strided_slice %949 {offsets = [0, 48], sizes = [2, 16], strides = [1, 1]} : vector<2x64xf32> to vector<2x16xf32>
    %957 = math.tanh %956 : vector<2x16xf32>
    %958 = vector.extract_strided_slice %955 {offsets = [0, 0], sizes = [2, 16], strides = [1, 1]} : vector<2x48xf32> to vector<2x16xf32>
    %959 = vector.extract_strided_slice %955 {offsets = [0, 16], sizes = [2, 16], strides = [1, 1]} : vector<2x48xf32> to vector<2x16xf32>
    %960 = vector.extract_strided_slice %955 {offsets = [0, 32], sizes = [2, 16], strides = [1, 1]} : vector<2x48xf32> to vector<2x16xf32>
    %961 = arith.mulf %959, %901 : vector<2x16xf32>
    %962 = arith.mulf %958, %957 : vector<2x16xf32>
    %963 = arith.addf %961, %962 : vector<2x16xf32>
    %964 = math.tanh %963 : vector<2x16xf32>
    %965 = arith.mulf %960, %964 : vector<2x16xf32>
    %966 = vector.extract_strided_slice %941 {offsets = [0, 1], sizes = [2, 1], strides = [1, 1]} : vector<2x17xf32> to vector<2x1xf32>
    %967 = vector.broadcast %966 : vector<2x1xf32> to vector<2x64xf32>
    %968 = vector.broadcast %9 : vector<1x64xf32> to vector<2x64xf32>
    %969 = arith.mulf %967, %968 : vector<2x64xf32>
    %970 = vector.broadcast %11 : vector<1x64xf32> to vector<2x64xf32>
    %971 = arith.addf %969, %970 : vector<2x64xf32>
    %cst_159 = arith.constant dense<0.000000e+00> : vector<2x64xf32>
    %972 = tpu.matmul %965, %10, %cst_159 {dimension_numbers = #tpu.dot_dimension_numbers<[1], [0], [0], [1], [0, 0, 1, 1], [], []>} : vector<2x16xf32>, vector<16x64xf32>, vector<2x64xf32> -> vector<2x64xf32>
    %973 = arith.addf %971, %972 : vector<2x64xf32>
    %974 = vector.extract_strided_slice %973 {offsets = [0, 0], sizes = [2, 48], strides = [1, 1]} : vector<2x64xf32> to vector<2x48xf32>
    %975 = arith.negf %974 : vector<2x48xf32>
    %976 = math.exp %975 : vector<2x48xf32>
    %cst_160 = arith.constant 1.000000e+00 : f32
    %977 = vector.broadcast %cst_160 : f32 to vector<2x48xf32>
    %978 = arith.addf %977, %976 : vector<2x48xf32>
    %979 = arith.divf %977, %978 : vector<2x48xf32>
    %980 = vector.extract_strided_slice %973 {offsets = [0, 48], sizes = [2, 16], strides = [1, 1]} : vector<2x64xf32> to vector<2x16xf32>
    %981 = math.tanh %980 : vector<2x16xf32>
    %982 = vector.extract_strided_slice %979 {offsets = [0, 0], sizes = [2, 16], strides = [1, 1]} : vector<2x48xf32> to vector<2x16xf32>
    %983 = vector.extract_strided_slice %979 {offsets = [0, 16], sizes = [2, 16], strides = [1, 1]} : vector<2x48xf32> to vector<2x16xf32>
    %984 = vector.extract_strided_slice %979 {offsets = [0, 32], sizes = [2, 16], strides = [1, 1]} : vector<2x48xf32> to vector<2x16xf32>
    %985 = arith.mulf %983, %963 : vector<2x16xf32>
    %986 = arith.mulf %982, %981 : vector<2x16xf32>
    %987 = arith.addf %985, %986 : vector<2x16xf32>
    %988 = math.tanh %987 : vector<2x16xf32>
    %989 = arith.mulf %984, %988 : vector<2x16xf32>
    %990 = vector.extract_strided_slice %941 {offsets = [0, 2], sizes = [2, 1], strides = [1, 1]} : vector<2x17xf32> to vector<2x1xf32>
    %991 = vector.broadcast %990 : vector<2x1xf32> to vector<2x64xf32>
    %992 = vector.broadcast %9 : vector<1x64xf32> to vector<2x64xf32>
    %993 = arith.mulf %991, %992 : vector<2x64xf32>
    %994 = vector.broadcast %11 : vector<1x64xf32> to vector<2x64xf32>
    %995 = arith.addf %993, %994 : vector<2x64xf32>
    %cst_161 = arith.constant dense<0.000000e+00> : vector<2x64xf32>
    %996 = tpu.matmul %989, %10, %cst_161 {dimension_numbers = #tpu.dot_dimension_numbers<[1], [0], [0], [1], [0, 0, 1, 1], [], []>} : vector<2x16xf32>, vector<16x64xf32>, vector<2x64xf32> -> vector<2x64xf32>
    %997 = arith.addf %995, %996 : vector<2x64xf32>
    %998 = vector.extract_strided_slice %997 {offsets = [0, 0], sizes = [2, 48], strides = [1, 1]} : vector<2x64xf32> to vector<2x48xf32>
    %999 = arith.negf %998 : vector<2x48xf32>
    %1000 = math.exp %999 : vector<2x48xf32>
    %cst_162 = arith.constant 1.000000e+00 : f32
    %1001 = vector.broadcast %cst_162 : f32 to vector<2x48xf32>
    %1002 = arith.addf %1001, %1000 : vector<2x48xf32>
    %1003 = arith.divf %1001, %1002 : vector<2x48xf32>
    %1004 = vector.extract_strided_slice %997 {offsets = [0, 48], sizes = [2, 16], strides = [1, 1]} : vector<2x64xf32> to vector<2x16xf32>
    %1005 = math.tanh %1004 : vector<2x16xf32>
    %1006 = vector.extract_strided_slice %1003 {offsets = [0, 0], sizes = [2, 16], strides = [1, 1]} : vector<2x48xf32> to vector<2x16xf32>
    %1007 = vector.extract_strided_slice %1003 {offsets = [0, 16], sizes = [2, 16], strides = [1, 1]} : vector<2x48xf32> to vector<2x16xf32>
    %1008 = vector.extract_strided_slice %1003 {offsets = [0, 32], sizes = [2, 16], strides = [1, 1]} : vector<2x48xf32> to vector<2x16xf32>
    %1009 = arith.mulf %1007, %987 : vector<2x16xf32>
    %1010 = arith.mulf %1006, %1005 : vector<2x16xf32>
    %1011 = arith.addf %1009, %1010 : vector<2x16xf32>
    %1012 = math.tanh %1011 : vector<2x16xf32>
    %1013 = arith.mulf %1008, %1012 : vector<2x16xf32>
    %1014 = vector.extract_strided_slice %941 {offsets = [0, 3], sizes = [2, 1], strides = [1, 1]} : vector<2x17xf32> to vector<2x1xf32>
    %1015 = vector.broadcast %1014 : vector<2x1xf32> to vector<2x64xf32>
    %1016 = vector.broadcast %9 : vector<1x64xf32> to vector<2x64xf32>
    %1017 = arith.mulf %1015, %1016 : vector<2x64xf32>
    %1018 = vector.broadcast %11 : vector<1x64xf32> to vector<2x64xf32>
    %1019 = arith.addf %1017, %1018 : vector<2x64xf32>
    %cst_163 = arith.constant dense<0.000000e+00> : vector<2x64xf32>
    %1020 = tpu.matmul %1013, %10, %cst_163 {dimension_numbers = #tpu.dot_dimension_numbers<[1], [0], [0], [1], [0, 0, 1, 1], [], []>} : vector<2x16xf32>, vector<16x64xf32>, vector<2x64xf32> -> vector<2x64xf32>
    %1021 = arith.addf %1019, %1020 : vector<2x64xf32>
    %1022 = vector.extract_strided_slice %1021 {offsets = [0, 0], sizes = [2, 48], strides = [1, 1]} : vector<2x64xf32> to vector<2x48xf32>
    %1023 = arith.negf %1022 : vector<2x48xf32>
    %1024 = math.exp %1023 : vector<2x48xf32>
    %cst_164 = arith.constant 1.000000e+00 : f32
    %1025 = vector.broadcast %cst_164 : f32 to vector<2x48xf32>
    %1026 = arith.addf %1025, %1024 : vector<2x48xf32>
    %1027 = arith.divf %1025, %1026 : vector<2x48xf32>
    %1028 = vector.extract_strided_slice %1021 {offsets = [0, 48], sizes = [2, 16], strides = [1, 1]} : vector<2x64xf32> to vector<2x16xf32>
    %1029 = math.tanh %1028 : vector<2x16xf32>
    %1030 = vector.extract_strided_slice %1027 {offsets = [0, 0], sizes = [2, 16], strides = [1, 1]} : vector<2x48xf32> to vector<2x16xf32>
    %1031 = vector.extract_strided_slice %1027 {offsets = [0, 16], sizes = [2, 16], strides = [1, 1]} : vector<2x48xf32> to vector<2x16xf32>
    %1032 = vector.extract_strided_slice %1027 {offsets = [0, 32], sizes = [2, 16], strides = [1, 1]} : vector<2x48xf32> to vector<2x16xf32>
    %1033 = arith.mulf %1031, %1011 : vector<2x16xf32>
    %1034 = arith.mulf %1030, %1029 : vector<2x16xf32>
    %1035 = arith.addf %1033, %1034 : vector<2x16xf32>
    %1036 = math.tanh %1035 : vector<2x16xf32>
    %1037 = arith.mulf %1032, %1036 : vector<2x16xf32>
    %1038 = vector.extract_strided_slice %941 {offsets = [0, 4], sizes = [2, 1], strides = [1, 1]} : vector<2x17xf32> to vector<2x1xf32>
    %1039 = vector.broadcast %1038 : vector<2x1xf32> to vector<2x64xf32>
    %1040 = vector.broadcast %9 : vector<1x64xf32> to vector<2x64xf32>
    %1041 = arith.mulf %1039, %1040 : vector<2x64xf32>
    %1042 = vector.broadcast %11 : vector<1x64xf32> to vector<2x64xf32>
    %1043 = arith.addf %1041, %1042 : vector<2x64xf32>
    %cst_165 = arith.constant dense<0.000000e+00> : vector<2x64xf32>
    %1044 = tpu.matmul %1037, %10, %cst_165 {dimension_numbers = #tpu.dot_dimension_numbers<[1], [0], [0], [1], [0, 0, 1, 1], [], []>} : vector<2x16xf32>, vector<16x64xf32>, vector<2x64xf32> -> vector<2x64xf32>
    %1045 = arith.addf %1043, %1044 : vector<2x64xf32>
    %1046 = vector.extract_strided_slice %1045 {offsets = [0, 0], sizes = [2, 48], strides = [1, 1]} : vector<2x64xf32> to vector<2x48xf32>
    %1047 = arith.negf %1046 : vector<2x48xf32>
    %1048 = math.exp %1047 : vector<2x48xf32>
    %cst_166 = arith.constant 1.000000e+00 : f32
    %1049 = vector.broadcast %cst_166 : f32 to vector<2x48xf32>
    %1050 = arith.addf %1049, %1048 : vector<2x48xf32>
    %1051 = arith.divf %1049, %1050 : vector<2x48xf32>
    %1052 = vector.extract_strided_slice %1045 {offsets = [0, 48], sizes = [2, 16], strides = [1, 1]} : vector<2x64xf32> to vector<2x16xf32>
    %1053 = math.tanh %1052 : vector<2x16xf32>
    %1054 = vector.extract_strided_slice %1051 {offsets = [0, 0], sizes = [2, 16], strides = [1, 1]} : vector<2x48xf32> to vector<2x16xf32>
    %1055 = vector.extract_strided_slice %1051 {offsets = [0, 16], sizes = [2, 16], strides = [1, 1]} : vector<2x48xf32> to vector<2x16xf32>
    %1056 = vector.extract_strided_slice %1051 {offsets = [0, 32], sizes = [2, 16], strides = [1, 1]} : vector<2x48xf32> to vector<2x16xf32>
    %1057 = arith.mulf %1055, %1035 : vector<2x16xf32>
    %1058 = arith.mulf %1054, %1053 : vector<2x16xf32>
    %1059 = arith.addf %1057, %1058 : vector<2x16xf32>
    %1060 = math.tanh %1059 : vector<2x16xf32>
    %1061 = arith.mulf %1056, %1060 : vector<2x16xf32>
    %1062 = vector.extract_strided_slice %941 {offsets = [0, 5], sizes = [2, 1], strides = [1, 1]} : vector<2x17xf32> to vector<2x1xf32>
    %1063 = vector.broadcast %1062 : vector<2x1xf32> to vector<2x64xf32>
    %1064 = vector.broadcast %9 : vector<1x64xf32> to vector<2x64xf32>
    %1065 = arith.mulf %1063, %1064 : vector<2x64xf32>
    %1066 = vector.broadcast %11 : vector<1x64xf32> to vector<2x64xf32>
    %1067 = arith.addf %1065, %1066 : vector<2x64xf32>
    %cst_167 = arith.constant dense<0.000000e+00> : vector<2x64xf32>
    %1068 = tpu.matmul %1061, %10, %cst_167 {dimension_numbers = #tpu.dot_dimension_numbers<[1], [0], [0], [1], [0, 0, 1, 1], [], []>} : vector<2x16xf32>, vector<16x64xf32>, vector<2x64xf32> -> vector<2x64xf32>
    %1069 = arith.addf %1067, %1068 : vector<2x64xf32>
    %1070 = vector.extract_strided_slice %1069 {offsets = [0, 0], sizes = [2, 48], strides = [1, 1]} : vector<2x64xf32> to vector<2x48xf32>
    %1071 = arith.negf %1070 : vector<2x48xf32>
    %1072 = math.exp %1071 : vector<2x48xf32>
    %cst_168 = arith.constant 1.000000e+00 : f32
    %1073 = vector.broadcast %cst_168 : f32 to vector<2x48xf32>
    %1074 = arith.addf %1073, %1072 : vector<2x48xf32>
    %1075 = arith.divf %1073, %1074 : vector<2x48xf32>
    %1076 = vector.extract_strided_slice %1069 {offsets = [0, 48], sizes = [2, 16], strides = [1, 1]} : vector<2x64xf32> to vector<2x16xf32>
    %1077 = math.tanh %1076 : vector<2x16xf32>
    %1078 = vector.extract_strided_slice %1075 {offsets = [0, 0], sizes = [2, 16], strides = [1, 1]} : vector<2x48xf32> to vector<2x16xf32>
    %1079 = vector.extract_strided_slice %1075 {offsets = [0, 16], sizes = [2, 16], strides = [1, 1]} : vector<2x48xf32> to vector<2x16xf32>
    %1080 = vector.extract_strided_slice %1075 {offsets = [0, 32], sizes = [2, 16], strides = [1, 1]} : vector<2x48xf32> to vector<2x16xf32>
    %1081 = arith.mulf %1079, %1059 : vector<2x16xf32>
    %1082 = arith.mulf %1078, %1077 : vector<2x16xf32>
    %1083 = arith.addf %1081, %1082 : vector<2x16xf32>
    %1084 = math.tanh %1083 : vector<2x16xf32>
    %1085 = arith.mulf %1080, %1084 : vector<2x16xf32>
    %1086 = vector.extract_strided_slice %941 {offsets = [0, 6], sizes = [2, 1], strides = [1, 1]} : vector<2x17xf32> to vector<2x1xf32>
    %1087 = vector.broadcast %1086 : vector<2x1xf32> to vector<2x64xf32>
    %1088 = vector.broadcast %9 : vector<1x64xf32> to vector<2x64xf32>
    %1089 = arith.mulf %1087, %1088 : vector<2x64xf32>
    %1090 = vector.broadcast %11 : vector<1x64xf32> to vector<2x64xf32>
    %1091 = arith.addf %1089, %1090 : vector<2x64xf32>
    %cst_169 = arith.constant dense<0.000000e+00> : vector<2x64xf32>
    %1092 = tpu.matmul %1085, %10, %cst_169 {dimension_numbers = #tpu.dot_dimension_numbers<[1], [0], [0], [1], [0, 0, 1, 1], [], []>} : vector<2x16xf32>, vector<16x64xf32>, vector<2x64xf32> -> vector<2x64xf32>
    %1093 = arith.addf %1091, %1092 : vector<2x64xf32>
    %1094 = vector.extract_strided_slice %1093 {offsets = [0, 0], sizes = [2, 48], strides = [1, 1]} : vector<2x64xf32> to vector<2x48xf32>
    %1095 = arith.negf %1094 : vector<2x48xf32>
    %1096 = math.exp %1095 : vector<2x48xf32>
    %cst_170 = arith.constant 1.000000e+00 : f32
    %1097 = vector.broadcast %cst_170 : f32 to vector<2x48xf32>
    %1098 = arith.addf %1097, %1096 : vector<2x48xf32>
    %1099 = arith.divf %1097, %1098 : vector<2x48xf32>
    %1100 = vector.extract_strided_slice %1093 {offsets = [0, 48], sizes = [2, 16], strides = [1, 1]} : vector<2x64xf32> to vector<2x16xf32>
    %1101 = math.tanh %1100 : vector<2x16xf32>
    %1102 = vector.extract_strided_slice %1099 {offsets = [0, 0], sizes = [2, 16], strides = [1, 1]} : vector<2x48xf32> to vector<2x16xf32>
    %1103 = vector.extract_strided_slice %1099 {offsets = [0, 16], sizes = [2, 16], strides = [1, 1]} : vector<2x48xf32> to vector<2x16xf32>
    %1104 = vector.extract_strided_slice %1099 {offsets = [0, 32], sizes = [2, 16], strides = [1, 1]} : vector<2x48xf32> to vector<2x16xf32>
    %1105 = arith.mulf %1103, %1083 : vector<2x16xf32>
    %1106 = arith.mulf %1102, %1101 : vector<2x16xf32>
    %1107 = arith.addf %1105, %1106 : vector<2x16xf32>
    %1108 = math.tanh %1107 : vector<2x16xf32>
    %1109 = arith.mulf %1104, %1108 : vector<2x16xf32>
    %1110 = vector.extract_strided_slice %941 {offsets = [0, 7], sizes = [2, 1], strides = [1, 1]} : vector<2x17xf32> to vector<2x1xf32>
    %1111 = vector.broadcast %1110 : vector<2x1xf32> to vector<2x64xf32>
    %1112 = vector.broadcast %9 : vector<1x64xf32> to vector<2x64xf32>
    %1113 = arith.mulf %1111, %1112 : vector<2x64xf32>
    %1114 = vector.broadcast %11 : vector<1x64xf32> to vector<2x64xf32>
    %1115 = arith.addf %1113, %1114 : vector<2x64xf32>
    %cst_171 = arith.constant dense<0.000000e+00> : vector<2x64xf32>
    %1116 = tpu.matmul %1109, %10, %cst_171 {dimension_numbers = #tpu.dot_dimension_numbers<[1], [0], [0], [1], [0, 0, 1, 1], [], []>} : vector<2x16xf32>, vector<16x64xf32>, vector<2x64xf32> -> vector<2x64xf32>
    %1117 = arith.addf %1115, %1116 : vector<2x64xf32>
    %1118 = vector.extract_strided_slice %1117 {offsets = [0, 0], sizes = [2, 48], strides = [1, 1]} : vector<2x64xf32> to vector<2x48xf32>
    %1119 = arith.negf %1118 : vector<2x48xf32>
    %1120 = math.exp %1119 : vector<2x48xf32>
    %cst_172 = arith.constant 1.000000e+00 : f32
    %1121 = vector.broadcast %cst_172 : f32 to vector<2x48xf32>
    %1122 = arith.addf %1121, %1120 : vector<2x48xf32>
    %1123 = arith.divf %1121, %1122 : vector<2x48xf32>
    %1124 = vector.extract_strided_slice %1117 {offsets = [0, 48], sizes = [2, 16], strides = [1, 1]} : vector<2x64xf32> to vector<2x16xf32>
    %1125 = math.tanh %1124 : vector<2x16xf32>
    %1126 = vector.extract_strided_slice %1123 {offsets = [0, 0], sizes = [2, 16], strides = [1, 1]} : vector<2x48xf32> to vector<2x16xf32>
    %1127 = vector.extract_strided_slice %1123 {offsets = [0, 16], sizes = [2, 16], strides = [1, 1]} : vector<2x48xf32> to vector<2x16xf32>
    %1128 = vector.extract_strided_slice %1123 {offsets = [0, 32], sizes = [2, 16], strides = [1, 1]} : vector<2x48xf32> to vector<2x16xf32>
    %1129 = arith.mulf %1127, %1107 : vector<2x16xf32>
    %1130 = arith.mulf %1126, %1125 : vector<2x16xf32>
    %1131 = arith.addf %1129, %1130 : vector<2x16xf32>
    %1132 = math.tanh %1131 : vector<2x16xf32>
    %1133 = arith.mulf %1128, %1132 : vector<2x16xf32>
    %1134 = vector.extract_strided_slice %941 {offsets = [0, 8], sizes = [2, 1], strides = [1, 1]} : vector<2x17xf32> to vector<2x1xf32>
    %1135 = vector.broadcast %1134 : vector<2x1xf32> to vector<2x64xf32>
    %1136 = vector.broadcast %9 : vector<1x64xf32> to vector<2x64xf32>
    %1137 = arith.mulf %1135, %1136 : vector<2x64xf32>
    %1138 = vector.broadcast %11 : vector<1x64xf32> to vector<2x64xf32>
    %1139 = arith.addf %1137, %1138 : vector<2x64xf32>
    %cst_173 = arith.constant dense<0.000000e+00> : vector<2x64xf32>
    %1140 = tpu.matmul %1133, %10, %cst_173 {dimension_numbers = #tpu.dot_dimension_numbers<[1], [0], [0], [1], [0, 0, 1, 1], [], []>} : vector<2x16xf32>, vector<16x64xf32>, vector<2x64xf32> -> vector<2x64xf32>
    %1141 = arith.addf %1139, %1140 : vector<2x64xf32>
    %1142 = vector.extract_strided_slice %1141 {offsets = [0, 0], sizes = [2, 48], strides = [1, 1]} : vector<2x64xf32> to vector<2x48xf32>
    %1143 = arith.negf %1142 : vector<2x48xf32>
    %1144 = math.exp %1143 : vector<2x48xf32>
    %cst_174 = arith.constant 1.000000e+00 : f32
    %1145 = vector.broadcast %cst_174 : f32 to vector<2x48xf32>
    %1146 = arith.addf %1145, %1144 : vector<2x48xf32>
    %1147 = arith.divf %1145, %1146 : vector<2x48xf32>
    %1148 = vector.extract_strided_slice %1141 {offsets = [0, 48], sizes = [2, 16], strides = [1, 1]} : vector<2x64xf32> to vector<2x16xf32>
    %1149 = math.tanh %1148 : vector<2x16xf32>
    %1150 = vector.extract_strided_slice %1147 {offsets = [0, 0], sizes = [2, 16], strides = [1, 1]} : vector<2x48xf32> to vector<2x16xf32>
    %1151 = vector.extract_strided_slice %1147 {offsets = [0, 16], sizes = [2, 16], strides = [1, 1]} : vector<2x48xf32> to vector<2x16xf32>
    %1152 = vector.extract_strided_slice %1147 {offsets = [0, 32], sizes = [2, 16], strides = [1, 1]} : vector<2x48xf32> to vector<2x16xf32>
    %1153 = arith.mulf %1151, %1131 : vector<2x16xf32>
    %1154 = arith.mulf %1150, %1149 : vector<2x16xf32>
    %1155 = arith.addf %1153, %1154 : vector<2x16xf32>
    %1156 = math.tanh %1155 : vector<2x16xf32>
    %1157 = arith.mulf %1152, %1156 : vector<2x16xf32>
    %1158 = vector.extract_strided_slice %941 {offsets = [0, 9], sizes = [2, 1], strides = [1, 1]} : vector<2x17xf32> to vector<2x1xf32>
    %1159 = vector.broadcast %1158 : vector<2x1xf32> to vector<2x64xf32>
    %1160 = vector.broadcast %9 : vector<1x64xf32> to vector<2x64xf32>
    %1161 = arith.mulf %1159, %1160 : vector<2x64xf32>
    %1162 = vector.broadcast %11 : vector<1x64xf32> to vector<2x64xf32>
    %1163 = arith.addf %1161, %1162 : vector<2x64xf32>
    %cst_175 = arith.constant dense<0.000000e+00> : vector<2x64xf32>
    %1164 = tpu.matmul %1157, %10, %cst_175 {dimension_numbers = #tpu.dot_dimension_numbers<[1], [0], [0], [1], [0, 0, 1, 1], [], []>} : vector<2x16xf32>, vector<16x64xf32>, vector<2x64xf32> -> vector<2x64xf32>
    %1165 = arith.addf %1163, %1164 : vector<2x64xf32>
    %1166 = vector.extract_strided_slice %1165 {offsets = [0, 0], sizes = [2, 48], strides = [1, 1]} : vector<2x64xf32> to vector<2x48xf32>
    %1167 = arith.negf %1166 : vector<2x48xf32>
    %1168 = math.exp %1167 : vector<2x48xf32>
    %cst_176 = arith.constant 1.000000e+00 : f32
    %1169 = vector.broadcast %cst_176 : f32 to vector<2x48xf32>
    %1170 = arith.addf %1169, %1168 : vector<2x48xf32>
    %1171 = arith.divf %1169, %1170 : vector<2x48xf32>
    %1172 = vector.extract_strided_slice %1165 {offsets = [0, 48], sizes = [2, 16], strides = [1, 1]} : vector<2x64xf32> to vector<2x16xf32>
    %1173 = math.tanh %1172 : vector<2x16xf32>
    %1174 = vector.extract_strided_slice %1171 {offsets = [0, 0], sizes = [2, 16], strides = [1, 1]} : vector<2x48xf32> to vector<2x16xf32>
    %1175 = vector.extract_strided_slice %1171 {offsets = [0, 16], sizes = [2, 16], strides = [1, 1]} : vector<2x48xf32> to vector<2x16xf32>
    %1176 = vector.extract_strided_slice %1171 {offsets = [0, 32], sizes = [2, 16], strides = [1, 1]} : vector<2x48xf32> to vector<2x16xf32>
    %1177 = arith.mulf %1175, %1155 : vector<2x16xf32>
    %1178 = arith.mulf %1174, %1173 : vector<2x16xf32>
    %1179 = arith.addf %1177, %1178 : vector<2x16xf32>
    %1180 = math.tanh %1179 : vector<2x16xf32>
    %1181 = arith.mulf %1176, %1180 : vector<2x16xf32>
    %1182 = vector.extract_strided_slice %941 {offsets = [0, 10], sizes = [2, 1], strides = [1, 1]} : vector<2x17xf32> to vector<2x1xf32>
    %1183 = vector.broadcast %1182 : vector<2x1xf32> to vector<2x64xf32>
    %1184 = vector.broadcast %9 : vector<1x64xf32> to vector<2x64xf32>
    %1185 = arith.mulf %1183, %1184 : vector<2x64xf32>
    %1186 = vector.broadcast %11 : vector<1x64xf32> to vector<2x64xf32>
    %1187 = arith.addf %1185, %1186 : vector<2x64xf32>
    %cst_177 = arith.constant dense<0.000000e+00> : vector<2x64xf32>
    %1188 = tpu.matmul %1181, %10, %cst_177 {dimension_numbers = #tpu.dot_dimension_numbers<[1], [0], [0], [1], [0, 0, 1, 1], [], []>} : vector<2x16xf32>, vector<16x64xf32>, vector<2x64xf32> -> vector<2x64xf32>
    %1189 = arith.addf %1187, %1188 : vector<2x64xf32>
    %1190 = vector.extract_strided_slice %1189 {offsets = [0, 0], sizes = [2, 48], strides = [1, 1]} : vector<2x64xf32> to vector<2x48xf32>
    %1191 = arith.negf %1190 : vector<2x48xf32>
    %1192 = math.exp %1191 : vector<2x48xf32>
    %cst_178 = arith.constant 1.000000e+00 : f32
    %1193 = vector.broadcast %cst_178 : f32 to vector<2x48xf32>
    %1194 = arith.addf %1193, %1192 : vector<2x48xf32>
    %1195 = arith.divf %1193, %1194 : vector<2x48xf32>
    %1196 = vector.extract_strided_slice %1189 {offsets = [0, 48], sizes = [2, 16], strides = [1, 1]} : vector<2x64xf32> to vector<2x16xf32>
    %1197 = math.tanh %1196 : vector<2x16xf32>
    %1198 = vector.extract_strided_slice %1195 {offsets = [0, 0], sizes = [2, 16], strides = [1, 1]} : vector<2x48xf32> to vector<2x16xf32>
    %1199 = vector.extract_strided_slice %1195 {offsets = [0, 16], sizes = [2, 16], strides = [1, 1]} : vector<2x48xf32> to vector<2x16xf32>
    %1200 = vector.extract_strided_slice %1195 {offsets = [0, 32], sizes = [2, 16], strides = [1, 1]} : vector<2x48xf32> to vector<2x16xf32>
    %1201 = arith.mulf %1199, %1179 : vector<2x16xf32>
    %1202 = arith.mulf %1198, %1197 : vector<2x16xf32>
    %1203 = arith.addf %1201, %1202 : vector<2x16xf32>
    %1204 = math.tanh %1203 : vector<2x16xf32>
    %1205 = arith.mulf %1200, %1204 : vector<2x16xf32>
    %1206 = vector.extract_strided_slice %941 {offsets = [0, 11], sizes = [2, 1], strides = [1, 1]} : vector<2x17xf32> to vector<2x1xf32>
    %1207 = vector.broadcast %1206 : vector<2x1xf32> to vector<2x64xf32>
    %1208 = vector.broadcast %9 : vector<1x64xf32> to vector<2x64xf32>
    %1209 = arith.mulf %1207, %1208 : vector<2x64xf32>
    %1210 = vector.broadcast %11 : vector<1x64xf32> to vector<2x64xf32>
    %1211 = arith.addf %1209, %1210 : vector<2x64xf32>
    %cst_179 = arith.constant dense<0.000000e+00> : vector<2x64xf32>
    %1212 = tpu.matmul %1205, %10, %cst_179 {dimension_numbers = #tpu.dot_dimension_numbers<[1], [0], [0], [1], [0, 0, 1, 1], [], []>} : vector<2x16xf32>, vector<16x64xf32>, vector<2x64xf32> -> vector<2x64xf32>
    %1213 = arith.addf %1211, %1212 : vector<2x64xf32>
    %1214 = vector.extract_strided_slice %1213 {offsets = [0, 0], sizes = [2, 48], strides = [1, 1]} : vector<2x64xf32> to vector<2x48xf32>
    %1215 = arith.negf %1214 : vector<2x48xf32>
    %1216 = math.exp %1215 : vector<2x48xf32>
    %cst_180 = arith.constant 1.000000e+00 : f32
    %1217 = vector.broadcast %cst_180 : f32 to vector<2x48xf32>
    %1218 = arith.addf %1217, %1216 : vector<2x48xf32>
    %1219 = arith.divf %1217, %1218 : vector<2x48xf32>
    %1220 = vector.extract_strided_slice %1213 {offsets = [0, 48], sizes = [2, 16], strides = [1, 1]} : vector<2x64xf32> to vector<2x16xf32>
    %1221 = math.tanh %1220 : vector<2x16xf32>
    %1222 = vector.extract_strided_slice %1219 {offsets = [0, 0], sizes = [2, 16], strides = [1, 1]} : vector<2x48xf32> to vector<2x16xf32>
    %1223 = vector.extract_strided_slice %1219 {offsets = [0, 16], sizes = [2, 16], strides = [1, 1]} : vector<2x48xf32> to vector<2x16xf32>
    %1224 = vector.extract_strided_slice %1219 {offsets = [0, 32], sizes = [2, 16], strides = [1, 1]} : vector<2x48xf32> to vector<2x16xf32>
    %1225 = arith.mulf %1223, %1203 : vector<2x16xf32>
    %1226 = arith.mulf %1222, %1221 : vector<2x16xf32>
    %1227 = arith.addf %1225, %1226 : vector<2x16xf32>
    %1228 = math.tanh %1227 : vector<2x16xf32>
    %1229 = arith.mulf %1224, %1228 : vector<2x16xf32>
    %1230 = vector.extract_strided_slice %941 {offsets = [0, 12], sizes = [2, 1], strides = [1, 1]} : vector<2x17xf32> to vector<2x1xf32>
    %1231 = vector.broadcast %1230 : vector<2x1xf32> to vector<2x64xf32>
    %1232 = vector.broadcast %9 : vector<1x64xf32> to vector<2x64xf32>
    %1233 = arith.mulf %1231, %1232 : vector<2x64xf32>
    %1234 = vector.broadcast %11 : vector<1x64xf32> to vector<2x64xf32>
    %1235 = arith.addf %1233, %1234 : vector<2x64xf32>
    %cst_181 = arith.constant dense<0.000000e+00> : vector<2x64xf32>
    %1236 = tpu.matmul %1229, %10, %cst_181 {dimension_numbers = #tpu.dot_dimension_numbers<[1], [0], [0], [1], [0, 0, 1, 1], [], []>} : vector<2x16xf32>, vector<16x64xf32>, vector<2x64xf32> -> vector<2x64xf32>
    %1237 = arith.addf %1235, %1236 : vector<2x64xf32>
    %1238 = vector.extract_strided_slice %1237 {offsets = [0, 0], sizes = [2, 48], strides = [1, 1]} : vector<2x64xf32> to vector<2x48xf32>
    %1239 = arith.negf %1238 : vector<2x48xf32>
    %1240 = math.exp %1239 : vector<2x48xf32>
    %cst_182 = arith.constant 1.000000e+00 : f32
    %1241 = vector.broadcast %cst_182 : f32 to vector<2x48xf32>
    %1242 = arith.addf %1241, %1240 : vector<2x48xf32>
    %1243 = arith.divf %1241, %1242 : vector<2x48xf32>
    %1244 = vector.extract_strided_slice %1237 {offsets = [0, 48], sizes = [2, 16], strides = [1, 1]} : vector<2x64xf32> to vector<2x16xf32>
    %1245 = math.tanh %1244 : vector<2x16xf32>
    %1246 = vector.extract_strided_slice %1243 {offsets = [0, 0], sizes = [2, 16], strides = [1, 1]} : vector<2x48xf32> to vector<2x16xf32>
    %1247 = vector.extract_strided_slice %1243 {offsets = [0, 16], sizes = [2, 16], strides = [1, 1]} : vector<2x48xf32> to vector<2x16xf32>
    %1248 = vector.extract_strided_slice %1243 {offsets = [0, 32], sizes = [2, 16], strides = [1, 1]} : vector<2x48xf32> to vector<2x16xf32>
    %1249 = arith.mulf %1247, %1227 : vector<2x16xf32>
    %1250 = arith.mulf %1246, %1245 : vector<2x16xf32>
    %1251 = arith.addf %1249, %1250 : vector<2x16xf32>
    %1252 = math.tanh %1251 : vector<2x16xf32>
    %1253 = arith.mulf %1248, %1252 : vector<2x16xf32>
    %1254 = vector.extract_strided_slice %941 {offsets = [0, 13], sizes = [2, 1], strides = [1, 1]} : vector<2x17xf32> to vector<2x1xf32>
    %1255 = vector.broadcast %1254 : vector<2x1xf32> to vector<2x64xf32>
    %1256 = vector.broadcast %9 : vector<1x64xf32> to vector<2x64xf32>
    %1257 = arith.mulf %1255, %1256 : vector<2x64xf32>
    %1258 = vector.broadcast %11 : vector<1x64xf32> to vector<2x64xf32>
    %1259 = arith.addf %1257, %1258 : vector<2x64xf32>
    %cst_183 = arith.constant dense<0.000000e+00> : vector<2x64xf32>
    %1260 = tpu.matmul %1253, %10, %cst_183 {dimension_numbers = #tpu.dot_dimension_numbers<[1], [0], [0], [1], [0, 0, 1, 1], [], []>} : vector<2x16xf32>, vector<16x64xf32>, vector<2x64xf32> -> vector<2x64xf32>
    %1261 = arith.addf %1259, %1260 : vector<2x64xf32>
    %1262 = vector.extract_strided_slice %1261 {offsets = [0, 0], sizes = [2, 48], strides = [1, 1]} : vector<2x64xf32> to vector<2x48xf32>
    %1263 = arith.negf %1262 : vector<2x48xf32>
    %1264 = math.exp %1263 : vector<2x48xf32>
    %cst_184 = arith.constant 1.000000e+00 : f32
    %1265 = vector.broadcast %cst_184 : f32 to vector<2x48xf32>
    %1266 = arith.addf %1265, %1264 : vector<2x48xf32>
    %1267 = arith.divf %1265, %1266 : vector<2x48xf32>
    %1268 = vector.extract_strided_slice %1261 {offsets = [0, 48], sizes = [2, 16], strides = [1, 1]} : vector<2x64xf32> to vector<2x16xf32>
    %1269 = math.tanh %1268 : vector<2x16xf32>
    %1270 = vector.extract_strided_slice %1267 {offsets = [0, 0], sizes = [2, 16], strides = [1, 1]} : vector<2x48xf32> to vector<2x16xf32>
    %1271 = vector.extract_strided_slice %1267 {offsets = [0, 16], sizes = [2, 16], strides = [1, 1]} : vector<2x48xf32> to vector<2x16xf32>
    %1272 = vector.extract_strided_slice %1267 {offsets = [0, 32], sizes = [2, 16], strides = [1, 1]} : vector<2x48xf32> to vector<2x16xf32>
    %1273 = arith.mulf %1271, %1251 : vector<2x16xf32>
    %1274 = arith.mulf %1270, %1269 : vector<2x16xf32>
    %1275 = arith.addf %1273, %1274 : vector<2x16xf32>
    %1276 = math.tanh %1275 : vector<2x16xf32>
    %1277 = arith.mulf %1272, %1276 : vector<2x16xf32>
    %1278 = vector.extract_strided_slice %941 {offsets = [0, 14], sizes = [2, 1], strides = [1, 1]} : vector<2x17xf32> to vector<2x1xf32>
    %1279 = vector.broadcast %1278 : vector<2x1xf32> to vector<2x64xf32>
    %1280 = vector.broadcast %9 : vector<1x64xf32> to vector<2x64xf32>
    %1281 = arith.mulf %1279, %1280 : vector<2x64xf32>
    %1282 = vector.broadcast %11 : vector<1x64xf32> to vector<2x64xf32>
    %1283 = arith.addf %1281, %1282 : vector<2x64xf32>
    %cst_185 = arith.constant dense<0.000000e+00> : vector<2x64xf32>
    %1284 = tpu.matmul %1277, %10, %cst_185 {dimension_numbers = #tpu.dot_dimension_numbers<[1], [0], [0], [1], [0, 0, 1, 1], [], []>} : vector<2x16xf32>, vector<16x64xf32>, vector<2x64xf32> -> vector<2x64xf32>
    %1285 = arith.addf %1283, %1284 : vector<2x64xf32>
    %1286 = vector.extract_strided_slice %1285 {offsets = [0, 0], sizes = [2, 48], strides = [1, 1]} : vector<2x64xf32> to vector<2x48xf32>
    %1287 = arith.negf %1286 : vector<2x48xf32>
    %1288 = math.exp %1287 : vector<2x48xf32>
    %cst_186 = arith.constant 1.000000e+00 : f32
    %1289 = vector.broadcast %cst_186 : f32 to vector<2x48xf32>
    %1290 = arith.addf %1289, %1288 : vector<2x48xf32>
    %1291 = arith.divf %1289, %1290 : vector<2x48xf32>
    %1292 = vector.extract_strided_slice %1285 {offsets = [0, 48], sizes = [2, 16], strides = [1, 1]} : vector<2x64xf32> to vector<2x16xf32>
    %1293 = math.tanh %1292 : vector<2x16xf32>
    %1294 = vector.extract_strided_slice %1291 {offsets = [0, 0], sizes = [2, 16], strides = [1, 1]} : vector<2x48xf32> to vector<2x16xf32>
    %1295 = vector.extract_strided_slice %1291 {offsets = [0, 16], sizes = [2, 16], strides = [1, 1]} : vector<2x48xf32> to vector<2x16xf32>
    %1296 = vector.extract_strided_slice %1291 {offsets = [0, 32], sizes = [2, 16], strides = [1, 1]} : vector<2x48xf32> to vector<2x16xf32>
    %1297 = arith.mulf %1295, %1275 : vector<2x16xf32>
    %1298 = arith.mulf %1294, %1293 : vector<2x16xf32>
    %1299 = arith.addf %1297, %1298 : vector<2x16xf32>
    %1300 = math.tanh %1299 : vector<2x16xf32>
    %1301 = arith.mulf %1296, %1300 : vector<2x16xf32>
    %1302 = vector.extract_strided_slice %941 {offsets = [0, 15], sizes = [2, 1], strides = [1, 1]} : vector<2x17xf32> to vector<2x1xf32>
    %1303 = vector.broadcast %1302 : vector<2x1xf32> to vector<2x64xf32>
    %1304 = vector.broadcast %9 : vector<1x64xf32> to vector<2x64xf32>
    %1305 = arith.mulf %1303, %1304 : vector<2x64xf32>
    %1306 = vector.broadcast %11 : vector<1x64xf32> to vector<2x64xf32>
    %1307 = arith.addf %1305, %1306 : vector<2x64xf32>
    %cst_187 = arith.constant dense<0.000000e+00> : vector<2x64xf32>
    %1308 = tpu.matmul %1301, %10, %cst_187 {dimension_numbers = #tpu.dot_dimension_numbers<[1], [0], [0], [1], [0, 0, 1, 1], [], []>} : vector<2x16xf32>, vector<16x64xf32>, vector<2x64xf32> -> vector<2x64xf32>
    %1309 = arith.addf %1307, %1308 : vector<2x64xf32>
    %1310 = vector.extract_strided_slice %1309 {offsets = [0, 0], sizes = [2, 48], strides = [1, 1]} : vector<2x64xf32> to vector<2x48xf32>
    %1311 = arith.negf %1310 : vector<2x48xf32>
    %1312 = math.exp %1311 : vector<2x48xf32>
    %cst_188 = arith.constant 1.000000e+00 : f32
    %1313 = vector.broadcast %cst_188 : f32 to vector<2x48xf32>
    %1314 = arith.addf %1313, %1312 : vector<2x48xf32>
    %1315 = arith.divf %1313, %1314 : vector<2x48xf32>
    %1316 = vector.extract_strided_slice %1309 {offsets = [0, 48], sizes = [2, 16], strides = [1, 1]} : vector<2x64xf32> to vector<2x16xf32>
    %1317 = math.tanh %1316 : vector<2x16xf32>
    %1318 = vector.extract_strided_slice %1315 {offsets = [0, 0], sizes = [2, 16], strides = [1, 1]} : vector<2x48xf32> to vector<2x16xf32>
    %1319 = vector.extract_strided_slice %1315 {offsets = [0, 16], sizes = [2, 16], strides = [1, 1]} : vector<2x48xf32> to vector<2x16xf32>
    %1320 = vector.extract_strided_slice %1315 {offsets = [0, 32], sizes = [2, 16], strides = [1, 1]} : vector<2x48xf32> to vector<2x16xf32>
    %1321 = arith.mulf %1319, %1299 : vector<2x16xf32>
    %1322 = arith.mulf %1318, %1317 : vector<2x16xf32>
    %1323 = arith.addf %1321, %1322 : vector<2x16xf32>
    %1324 = math.tanh %1323 : vector<2x16xf32>
    %1325 = arith.mulf %1320, %1324 : vector<2x16xf32>
    %1326 = vector.extract_strided_slice %941 {offsets = [0, 16], sizes = [2, 1], strides = [1, 1]} : vector<2x17xf32> to vector<2x1xf32>
    %1327 = vector.broadcast %1326 : vector<2x1xf32> to vector<2x64xf32>
    %1328 = vector.broadcast %9 : vector<1x64xf32> to vector<2x64xf32>
    %1329 = arith.mulf %1327, %1328 : vector<2x64xf32>
    %1330 = vector.broadcast %11 : vector<1x64xf32> to vector<2x64xf32>
    %1331 = arith.addf %1329, %1330 : vector<2x64xf32>
    %cst_189 = arith.constant dense<0.000000e+00> : vector<2x64xf32>
    %1332 = tpu.matmul %1325, %10, %cst_189 {dimension_numbers = #tpu.dot_dimension_numbers<[1], [0], [0], [1], [0, 0, 1, 1], [], []>} : vector<2x16xf32>, vector<16x64xf32>, vector<2x64xf32> -> vector<2x64xf32>
    %1333 = arith.addf %1331, %1332 : vector<2x64xf32>
    %1334 = vector.extract_strided_slice %1333 {offsets = [0, 0], sizes = [2, 48], strides = [1, 1]} : vector<2x64xf32> to vector<2x48xf32>
    %1335 = arith.negf %1334 : vector<2x48xf32>
    %1336 = math.exp %1335 : vector<2x48xf32>
    %cst_190 = arith.constant 1.000000e+00 : f32
    %1337 = vector.broadcast %cst_190 : f32 to vector<2x48xf32>
    %1338 = arith.addf %1337, %1336 : vector<2x48xf32>
    %1339 = arith.divf %1337, %1338 : vector<2x48xf32>
    %1340 = vector.extract_strided_slice %1333 {offsets = [0, 48], sizes = [2, 16], strides = [1, 1]} : vector<2x64xf32> to vector<2x16xf32>
    %1341 = math.tanh %1340 : vector<2x16xf32>
    %1342 = vector.extract_strided_slice %1339 {offsets = [0, 0], sizes = [2, 16], strides = [1, 1]} : vector<2x48xf32> to vector<2x16xf32>
    %1343 = vector.extract_strided_slice %1339 {offsets = [0, 16], sizes = [2, 16], strides = [1, 1]} : vector<2x48xf32> to vector<2x16xf32>
    %1344 = vector.extract_strided_slice %1339 {offsets = [0, 32], sizes = [2, 16], strides = [1, 1]} : vector<2x48xf32> to vector<2x16xf32>
    %1345 = arith.mulf %1343, %1323 : vector<2x16xf32>
    %1346 = arith.mulf %1342, %1341 : vector<2x16xf32>
    %1347 = arith.addf %1345, %1346 : vector<2x16xf32>
    %1348 = math.tanh %1347 : vector<2x16xf32>
    %1349 = arith.mulf %1344, %1348 : vector<2x16xf32>
    %1350 = vector.broadcast %14 : vector<1x16xf32> to vector<2x16xf32>
    %1351 = arith.mulf %1349, %1350 : vector<2x16xf32>
    %cst_191 = arith.constant dense<0.000000e+00> : vector<2xf32>
    %1352 = vector.multi_reduction <add>, %1351, %cst_191 [1] : vector<2x16xf32> to vector<2xf32>
    %1353 = vector.shape_cast %1352 : vector<2xf32> to vector<2x1xf32>
    %1354 = vector.broadcast %15 : vector<1x1xf32> to vector<2x1xf32>
    %1355 = arith.addf %1353, %1354 : vector<2x1xf32>
    %c0_192 = arith.constant 0 : index
    %c0_193 = arith.constant 0 : index
    %1356 = vector.load %arg11[%c0_192, %c0_193] : memref<120x2xf32, #tpu.memory_space<vmem>>, vector<120x2xf32>
    %c0_194 = arith.constant 0 : index
    %c0_195 = arith.constant 0 : index
    %1357 = vector.load %arg12[%c0_194, %c0_195] : memref<2x120xf32, #tpu.memory_space<vmem>>, vector<2x120xf32>
    %c0_196 = arith.constant 0 : index
    %c0_197 = arith.constant 0 : index
    %1358 = vector.load %arg13[%c0_196, %c0_197] : memref<120x60xf32, #tpu.memory_space<vmem>>, vector<120x60xf32>
    %c0_198 = arith.constant 0 : index
    %c0_199 = arith.constant 0 : index
    %1359 = vector.load %arg14[%c0_198, %c0_199] : memref<60x120xf32, #tpu.memory_space<vmem>>, vector<60x120xf32>
    %c0_200 = arith.constant 0 : index
    %c0_201 = arith.constant 0 : index
    %1360 = vector.load %arg17[%c0_200, %c0_201] : memref<120x16xf32, #tpu.memory_space<vmem>>, vector<120x16xf32>
    %c0_202 = arith.constant 0 : index
    %c0_203 = arith.constant 0 : index
    %1361 = vector.load %arg18[%c0_202, %c0_203] : memref<120x16xf32, #tpu.memory_space<vmem>>, vector<120x16xf32>
    %cst_204 = arith.constant dense<0.000000e+00> : vector<2x16xf32>
    %1362 = tpu.matmul %1349, %12, %cst_204 {dimension_numbers = #tpu.dot_dimension_numbers<[1], [0], [0], [1], [0, 0, 1, 1], [], []>} : vector<2x16xf32>, vector<16x16xf32>, vector<2x16xf32> -> vector<2x16xf32>
    %cst_205 = arith.constant dense<0.000000e+00> : vector<120x16xf32>
    %1363 = tpu.matmul %1356, %1362, %cst_205 {dimension_numbers = #tpu.dot_dimension_numbers<[1], [0], [0], [1], [0, 0, 1, 1], [], []>} : vector<120x2xf32>, vector<2x16xf32>, vector<120x16xf32> -> vector<120x16xf32>
    %1364 = arith.addf %1361, %1363 : vector<120x16xf32>
    %1365 = math.tanh %1364 : vector<120x16xf32>
    %1366 = vector.broadcast %13 : vector<1x16xf32> to vector<120x16xf32>
    %1367 = arith.mulf %1365, %1366 : vector<120x16xf32>
    %cst_206 = arith.constant dense<0.000000e+00> : vector<120xf32>
    %1368 = vector.multi_reduction <add>, %1367, %cst_206 [1] : vector<120x16xf32> to vector<120xf32>
    %1369 = vector.shape_cast %1368 : vector<120xf32> to vector<120x1xf32>
    %1370 = vector.broadcast %1369 : vector<120x1xf32> to vector<120x60xf32>
    %1371 = arith.mulf %1358, %1370 : vector<120x60xf32>
    %cst_207 = arith.constant dense<0.000000e+00> : vector<2x60xf32>
    %1372 = tpu.matmul %1357, %1371, %cst_207 {dimension_numbers = #tpu.dot_dimension_numbers<[1], [0], [0], [1], [0, 0, 1, 1], [], []>} : vector<2x120xf32>, vector<120x60xf32>, vector<2x60xf32> -> vector<2x60xf32>
    %cst_208 = arith.constant dense<0xFF800000> : vector<2xf32>
    %1373 = vector.multi_reduction <maximumf>, %1372, %cst_208 [1] : vector<2x60xf32> to vector<2xf32>
    %1374 = vector.shape_cast %1373 : vector<2xf32> to vector<2x1xf32>
    %1375 = vector.broadcast %1374 : vector<2x1xf32> to vector<2x60xf32>
    %1376 = arith.subf %1372, %1375 : vector<2x60xf32>
    %1377 = math.exp %1376 : vector<2x60xf32>
    %cst_209 = arith.constant dense<0.000000e+00> : vector<2xf32>
    %1378 = vector.multi_reduction <add>, %1377, %cst_209 [1] : vector<2x60xf32> to vector<2xf32>
    %1379 = vector.shape_cast %1378 : vector<2xf32> to vector<2x1xf32>
    %1380 = tpu.reciprocal %1379 {approx = true} : vector<2x1xf32> -> vector<2x1xf32>
    %1381 = vector.broadcast %1380 : vector<2x1xf32> to vector<2x60xf32>
    %1382 = arith.mulf %1377, %1381 : vector<2x60xf32>
    %1383 = arith.addf %937, %1382 : vector<2x60xf32>
    %cst_210 = arith.constant dense<0.000000e+00> : vector<2x120xf32>
    %1384 = tpu.matmul %1382, %1359, %cst_210 {dimension_numbers = #tpu.dot_dimension_numbers<[1], [0], [0], [1], [0, 0, 1, 1], [], []>} : vector<2x60xf32>, vector<60x120xf32>, vector<2x120xf32> -> vector<2x120xf32>
    %1385 = arith.mulf %1357, %1384 : vector<2x120xf32>
    %cst_211 = arith.constant dense<0.000000e+00> : vector<2x16xf32>
    %1386 = tpu.matmul %1385, %1360, %cst_211 {dimension_numbers = #tpu.dot_dimension_numbers<[1], [0], [0], [1], [0, 0, 1, 1], [], []>} : vector<2x120xf32>, vector<120x16xf32>, vector<2x16xf32> -> vector<2x16xf32>
    %1387 = tpu.concatenate %1386, %1355 in 1 : vector<2x16xf32>, vector<2x1xf32> -> vector<2x17xf32>
    %1388 = vector.extract_strided_slice %1387 {offsets = [0, 0], sizes = [2, 1], strides = [1, 1]} : vector<2x17xf32> to vector<2x1xf32>
    %1389 = vector.broadcast %1388 : vector<2x1xf32> to vector<2x64xf32>
    %1390 = vector.broadcast %9 : vector<1x64xf32> to vector<2x64xf32>
    %1391 = arith.mulf %1389, %1390 : vector<2x64xf32>
    %1392 = vector.broadcast %11 : vector<1x64xf32> to vector<2x64xf32>
    %1393 = arith.addf %1391, %1392 : vector<2x64xf32>
    %cst_212 = arith.constant dense<0.000000e+00> : vector<2x64xf32>
    %1394 = tpu.matmul %1349, %10, %cst_212 {dimension_numbers = #tpu.dot_dimension_numbers<[1], [0], [0], [1], [0, 0, 1, 1], [], []>} : vector<2x16xf32>, vector<16x64xf32>, vector<2x64xf32> -> vector<2x64xf32>
    %1395 = arith.addf %1393, %1394 : vector<2x64xf32>
    %1396 = vector.extract_strided_slice %1395 {offsets = [0, 0], sizes = [2, 48], strides = [1, 1]} : vector<2x64xf32> to vector<2x48xf32>
    %1397 = arith.negf %1396 : vector<2x48xf32>
    %1398 = math.exp %1397 : vector<2x48xf32>
    %cst_213 = arith.constant 1.000000e+00 : f32
    %1399 = vector.broadcast %cst_213 : f32 to vector<2x48xf32>
    %1400 = arith.addf %1399, %1398 : vector<2x48xf32>
    %1401 = arith.divf %1399, %1400 : vector<2x48xf32>
    %1402 = vector.extract_strided_slice %1395 {offsets = [0, 48], sizes = [2, 16], strides = [1, 1]} : vector<2x64xf32> to vector<2x16xf32>
    %1403 = math.tanh %1402 : vector<2x16xf32>
    %1404 = vector.extract_strided_slice %1401 {offsets = [0, 0], sizes = [2, 16], strides = [1, 1]} : vector<2x48xf32> to vector<2x16xf32>
    %1405 = vector.extract_strided_slice %1401 {offsets = [0, 16], sizes = [2, 16], strides = [1, 1]} : vector<2x48xf32> to vector<2x16xf32>
    %1406 = vector.extract_strided_slice %1401 {offsets = [0, 32], sizes = [2, 16], strides = [1, 1]} : vector<2x48xf32> to vector<2x16xf32>
    %1407 = arith.mulf %1405, %1347 : vector<2x16xf32>
    %1408 = arith.mulf %1404, %1403 : vector<2x16xf32>
    %1409 = arith.addf %1407, %1408 : vector<2x16xf32>
    %1410 = math.tanh %1409 : vector<2x16xf32>
    %1411 = arith.mulf %1406, %1410 : vector<2x16xf32>
    %1412 = vector.extract_strided_slice %1387 {offsets = [0, 1], sizes = [2, 1], strides = [1, 1]} : vector<2x17xf32> to vector<2x1xf32>
    %1413 = vector.broadcast %1412 : vector<2x1xf32> to vector<2x64xf32>
    %1414 = vector.broadcast %9 : vector<1x64xf32> to vector<2x64xf32>
    %1415 = arith.mulf %1413, %1414 : vector<2x64xf32>
    %1416 = vector.broadcast %11 : vector<1x64xf32> to vector<2x64xf32>
    %1417 = arith.addf %1415, %1416 : vector<2x64xf32>
    %cst_214 = arith.constant dense<0.000000e+00> : vector<2x64xf32>
    %1418 = tpu.matmul %1411, %10, %cst_214 {dimension_numbers = #tpu.dot_dimension_numbers<[1], [0], [0], [1], [0, 0, 1, 1], [], []>} : vector<2x16xf32>, vector<16x64xf32>, vector<2x64xf32> -> vector<2x64xf32>
    %1419 = arith.addf %1417, %1418 : vector<2x64xf32>
    %1420 = vector.extract_strided_slice %1419 {offsets = [0, 0], sizes = [2, 48], strides = [1, 1]} : vector<2x64xf32> to vector<2x48xf32>
    %1421 = arith.negf %1420 : vector<2x48xf32>
    %1422 = math.exp %1421 : vector<2x48xf32>
    %cst_215 = arith.constant 1.000000e+00 : f32
    %1423 = vector.broadcast %cst_215 : f32 to vector<2x48xf32>
    %1424 = arith.addf %1423, %1422 : vector<2x48xf32>
    %1425 = arith.divf %1423, %1424 : vector<2x48xf32>
    %1426 = vector.extract_strided_slice %1419 {offsets = [0, 48], sizes = [2, 16], strides = [1, 1]} : vector<2x64xf32> to vector<2x16xf32>
    %1427 = math.tanh %1426 : vector<2x16xf32>
    %1428 = vector.extract_strided_slice %1425 {offsets = [0, 0], sizes = [2, 16], strides = [1, 1]} : vector<2x48xf32> to vector<2x16xf32>
    %1429 = vector.extract_strided_slice %1425 {offsets = [0, 16], sizes = [2, 16], strides = [1, 1]} : vector<2x48xf32> to vector<2x16xf32>
    %1430 = vector.extract_strided_slice %1425 {offsets = [0, 32], sizes = [2, 16], strides = [1, 1]} : vector<2x48xf32> to vector<2x16xf32>
    %1431 = arith.mulf %1429, %1409 : vector<2x16xf32>
    %1432 = arith.mulf %1428, %1427 : vector<2x16xf32>
    %1433 = arith.addf %1431, %1432 : vector<2x16xf32>
    %1434 = math.tanh %1433 : vector<2x16xf32>
    %1435 = arith.mulf %1430, %1434 : vector<2x16xf32>
    %1436 = vector.extract_strided_slice %1387 {offsets = [0, 2], sizes = [2, 1], strides = [1, 1]} : vector<2x17xf32> to vector<2x1xf32>
    %1437 = vector.broadcast %1436 : vector<2x1xf32> to vector<2x64xf32>
    %1438 = vector.broadcast %9 : vector<1x64xf32> to vector<2x64xf32>
    %1439 = arith.mulf %1437, %1438 : vector<2x64xf32>
    %1440 = vector.broadcast %11 : vector<1x64xf32> to vector<2x64xf32>
    %1441 = arith.addf %1439, %1440 : vector<2x64xf32>
    %cst_216 = arith.constant dense<0.000000e+00> : vector<2x64xf32>
    %1442 = tpu.matmul %1435, %10, %cst_216 {dimension_numbers = #tpu.dot_dimension_numbers<[1], [0], [0], [1], [0, 0, 1, 1], [], []>} : vector<2x16xf32>, vector<16x64xf32>, vector<2x64xf32> -> vector<2x64xf32>
    %1443 = arith.addf %1441, %1442 : vector<2x64xf32>
    %1444 = vector.extract_strided_slice %1443 {offsets = [0, 0], sizes = [2, 48], strides = [1, 1]} : vector<2x64xf32> to vector<2x48xf32>
    %1445 = arith.negf %1444 : vector<2x48xf32>
    %1446 = math.exp %1445 : vector<2x48xf32>
    %cst_217 = arith.constant 1.000000e+00 : f32
    %1447 = vector.broadcast %cst_217 : f32 to vector<2x48xf32>
    %1448 = arith.addf %1447, %1446 : vector<2x48xf32>
    %1449 = arith.divf %1447, %1448 : vector<2x48xf32>
    %1450 = vector.extract_strided_slice %1443 {offsets = [0, 48], sizes = [2, 16], strides = [1, 1]} : vector<2x64xf32> to vector<2x16xf32>
    %1451 = math.tanh %1450 : vector<2x16xf32>
    %1452 = vector.extract_strided_slice %1449 {offsets = [0, 0], sizes = [2, 16], strides = [1, 1]} : vector<2x48xf32> to vector<2x16xf32>
    %1453 = vector.extract_strided_slice %1449 {offsets = [0, 16], sizes = [2, 16], strides = [1, 1]} : vector<2x48xf32> to vector<2x16xf32>
    %1454 = vector.extract_strided_slice %1449 {offsets = [0, 32], sizes = [2, 16], strides = [1, 1]} : vector<2x48xf32> to vector<2x16xf32>
    %1455 = arith.mulf %1453, %1433 : vector<2x16xf32>
    %1456 = arith.mulf %1452, %1451 : vector<2x16xf32>
    %1457 = arith.addf %1455, %1456 : vector<2x16xf32>
    %1458 = math.tanh %1457 : vector<2x16xf32>
    %1459 = arith.mulf %1454, %1458 : vector<2x16xf32>
    %1460 = vector.extract_strided_slice %1387 {offsets = [0, 3], sizes = [2, 1], strides = [1, 1]} : vector<2x17xf32> to vector<2x1xf32>
    %1461 = vector.broadcast %1460 : vector<2x1xf32> to vector<2x64xf32>
    %1462 = vector.broadcast %9 : vector<1x64xf32> to vector<2x64xf32>
    %1463 = arith.mulf %1461, %1462 : vector<2x64xf32>
    %1464 = vector.broadcast %11 : vector<1x64xf32> to vector<2x64xf32>
    %1465 = arith.addf %1463, %1464 : vector<2x64xf32>
    %cst_218 = arith.constant dense<0.000000e+00> : vector<2x64xf32>
    %1466 = tpu.matmul %1459, %10, %cst_218 {dimension_numbers = #tpu.dot_dimension_numbers<[1], [0], [0], [1], [0, 0, 1, 1], [], []>} : vector<2x16xf32>, vector<16x64xf32>, vector<2x64xf32> -> vector<2x64xf32>
    %1467 = arith.addf %1465, %1466 : vector<2x64xf32>
    %1468 = vector.extract_strided_slice %1467 {offsets = [0, 0], sizes = [2, 48], strides = [1, 1]} : vector<2x64xf32> to vector<2x48xf32>
    %1469 = arith.negf %1468 : vector<2x48xf32>
    %1470 = math.exp %1469 : vector<2x48xf32>
    %cst_219 = arith.constant 1.000000e+00 : f32
    %1471 = vector.broadcast %cst_219 : f32 to vector<2x48xf32>
    %1472 = arith.addf %1471, %1470 : vector<2x48xf32>
    %1473 = arith.divf %1471, %1472 : vector<2x48xf32>
    %1474 = vector.extract_strided_slice %1467 {offsets = [0, 48], sizes = [2, 16], strides = [1, 1]} : vector<2x64xf32> to vector<2x16xf32>
    %1475 = math.tanh %1474 : vector<2x16xf32>
    %1476 = vector.extract_strided_slice %1473 {offsets = [0, 0], sizes = [2, 16], strides = [1, 1]} : vector<2x48xf32> to vector<2x16xf32>
    %1477 = vector.extract_strided_slice %1473 {offsets = [0, 16], sizes = [2, 16], strides = [1, 1]} : vector<2x48xf32> to vector<2x16xf32>
    %1478 = vector.extract_strided_slice %1473 {offsets = [0, 32], sizes = [2, 16], strides = [1, 1]} : vector<2x48xf32> to vector<2x16xf32>
    %1479 = arith.mulf %1477, %1457 : vector<2x16xf32>
    %1480 = arith.mulf %1476, %1475 : vector<2x16xf32>
    %1481 = arith.addf %1479, %1480 : vector<2x16xf32>
    %1482 = math.tanh %1481 : vector<2x16xf32>
    %1483 = arith.mulf %1478, %1482 : vector<2x16xf32>
    %1484 = vector.extract_strided_slice %1387 {offsets = [0, 4], sizes = [2, 1], strides = [1, 1]} : vector<2x17xf32> to vector<2x1xf32>
    %1485 = vector.broadcast %1484 : vector<2x1xf32> to vector<2x64xf32>
    %1486 = vector.broadcast %9 : vector<1x64xf32> to vector<2x64xf32>
    %1487 = arith.mulf %1485, %1486 : vector<2x64xf32>
    %1488 = vector.broadcast %11 : vector<1x64xf32> to vector<2x64xf32>
    %1489 = arith.addf %1487, %1488 : vector<2x64xf32>
    %cst_220 = arith.constant dense<0.000000e+00> : vector<2x64xf32>
    %1490 = tpu.matmul %1483, %10, %cst_220 {dimension_numbers = #tpu.dot_dimension_numbers<[1], [0], [0], [1], [0, 0, 1, 1], [], []>} : vector<2x16xf32>, vector<16x64xf32>, vector<2x64xf32> -> vector<2x64xf32>
    %1491 = arith.addf %1489, %1490 : vector<2x64xf32>
    %1492 = vector.extract_strided_slice %1491 {offsets = [0, 0], sizes = [2, 48], strides = [1, 1]} : vector<2x64xf32> to vector<2x48xf32>
    %1493 = arith.negf %1492 : vector<2x48xf32>
    %1494 = math.exp %1493 : vector<2x48xf32>
    %cst_221 = arith.constant 1.000000e+00 : f32
    %1495 = vector.broadcast %cst_221 : f32 to vector<2x48xf32>
    %1496 = arith.addf %1495, %1494 : vector<2x48xf32>
    %1497 = arith.divf %1495, %1496 : vector<2x48xf32>
    %1498 = vector.extract_strided_slice %1491 {offsets = [0, 48], sizes = [2, 16], strides = [1, 1]} : vector<2x64xf32> to vector<2x16xf32>
    %1499 = math.tanh %1498 : vector<2x16xf32>
    %1500 = vector.extract_strided_slice %1497 {offsets = [0, 0], sizes = [2, 16], strides = [1, 1]} : vector<2x48xf32> to vector<2x16xf32>
    %1501 = vector.extract_strided_slice %1497 {offsets = [0, 16], sizes = [2, 16], strides = [1, 1]} : vector<2x48xf32> to vector<2x16xf32>
    %1502 = vector.extract_strided_slice %1497 {offsets = [0, 32], sizes = [2, 16], strides = [1, 1]} : vector<2x48xf32> to vector<2x16xf32>
    %1503 = arith.mulf %1501, %1481 : vector<2x16xf32>
    %1504 = arith.mulf %1500, %1499 : vector<2x16xf32>
    %1505 = arith.addf %1503, %1504 : vector<2x16xf32>
    %1506 = math.tanh %1505 : vector<2x16xf32>
    %1507 = arith.mulf %1502, %1506 : vector<2x16xf32>
    %1508 = vector.extract_strided_slice %1387 {offsets = [0, 5], sizes = [2, 1], strides = [1, 1]} : vector<2x17xf32> to vector<2x1xf32>
    %1509 = vector.broadcast %1508 : vector<2x1xf32> to vector<2x64xf32>
    %1510 = vector.broadcast %9 : vector<1x64xf32> to vector<2x64xf32>
    %1511 = arith.mulf %1509, %1510 : vector<2x64xf32>
    %1512 = vector.broadcast %11 : vector<1x64xf32> to vector<2x64xf32>
    %1513 = arith.addf %1511, %1512 : vector<2x64xf32>
    %cst_222 = arith.constant dense<0.000000e+00> : vector<2x64xf32>
    %1514 = tpu.matmul %1507, %10, %cst_222 {dimension_numbers = #tpu.dot_dimension_numbers<[1], [0], [0], [1], [0, 0, 1, 1], [], []>} : vector<2x16xf32>, vector<16x64xf32>, vector<2x64xf32> -> vector<2x64xf32>
    %1515 = arith.addf %1513, %1514 : vector<2x64xf32>
    %1516 = vector.extract_strided_slice %1515 {offsets = [0, 0], sizes = [2, 48], strides = [1, 1]} : vector<2x64xf32> to vector<2x48xf32>
    %1517 = arith.negf %1516 : vector<2x48xf32>
    %1518 = math.exp %1517 : vector<2x48xf32>
    %cst_223 = arith.constant 1.000000e+00 : f32
    %1519 = vector.broadcast %cst_223 : f32 to vector<2x48xf32>
    %1520 = arith.addf %1519, %1518 : vector<2x48xf32>
    %1521 = arith.divf %1519, %1520 : vector<2x48xf32>
    %1522 = vector.extract_strided_slice %1515 {offsets = [0, 48], sizes = [2, 16], strides = [1, 1]} : vector<2x64xf32> to vector<2x16xf32>
    %1523 = math.tanh %1522 : vector<2x16xf32>
    %1524 = vector.extract_strided_slice %1521 {offsets = [0, 0], sizes = [2, 16], strides = [1, 1]} : vector<2x48xf32> to vector<2x16xf32>
    %1525 = vector.extract_strided_slice %1521 {offsets = [0, 16], sizes = [2, 16], strides = [1, 1]} : vector<2x48xf32> to vector<2x16xf32>
    %1526 = vector.extract_strided_slice %1521 {offsets = [0, 32], sizes = [2, 16], strides = [1, 1]} : vector<2x48xf32> to vector<2x16xf32>
    %1527 = arith.mulf %1525, %1505 : vector<2x16xf32>
    %1528 = arith.mulf %1524, %1523 : vector<2x16xf32>
    %1529 = arith.addf %1527, %1528 : vector<2x16xf32>
    %1530 = math.tanh %1529 : vector<2x16xf32>
    %1531 = arith.mulf %1526, %1530 : vector<2x16xf32>
    %1532 = vector.extract_strided_slice %1387 {offsets = [0, 6], sizes = [2, 1], strides = [1, 1]} : vector<2x17xf32> to vector<2x1xf32>
    %1533 = vector.broadcast %1532 : vector<2x1xf32> to vector<2x64xf32>
    %1534 = vector.broadcast %9 : vector<1x64xf32> to vector<2x64xf32>
    %1535 = arith.mulf %1533, %1534 : vector<2x64xf32>
    %1536 = vector.broadcast %11 : vector<1x64xf32> to vector<2x64xf32>
    %1537 = arith.addf %1535, %1536 : vector<2x64xf32>
    %cst_224 = arith.constant dense<0.000000e+00> : vector<2x64xf32>
    %1538 = tpu.matmul %1531, %10, %cst_224 {dimension_numbers = #tpu.dot_dimension_numbers<[1], [0], [0], [1], [0, 0, 1, 1], [], []>} : vector<2x16xf32>, vector<16x64xf32>, vector<2x64xf32> -> vector<2x64xf32>
    %1539 = arith.addf %1537, %1538 : vector<2x64xf32>
    %1540 = vector.extract_strided_slice %1539 {offsets = [0, 0], sizes = [2, 48], strides = [1, 1]} : vector<2x64xf32> to vector<2x48xf32>
    %1541 = arith.negf %1540 : vector<2x48xf32>
    %1542 = math.exp %1541 : vector<2x48xf32>
    %cst_225 = arith.constant 1.000000e+00 : f32
    %1543 = vector.broadcast %cst_225 : f32 to vector<2x48xf32>
    %1544 = arith.addf %1543, %1542 : vector<2x48xf32>
    %1545 = arith.divf %1543, %1544 : vector<2x48xf32>
    %1546 = vector.extract_strided_slice %1539 {offsets = [0, 48], sizes = [2, 16], strides = [1, 1]} : vector<2x64xf32> to vector<2x16xf32>
    %1547 = math.tanh %1546 : vector<2x16xf32>
    %1548 = vector.extract_strided_slice %1545 {offsets = [0, 0], sizes = [2, 16], strides = [1, 1]} : vector<2x48xf32> to vector<2x16xf32>
    %1549 = vector.extract_strided_slice %1545 {offsets = [0, 16], sizes = [2, 16], strides = [1, 1]} : vector<2x48xf32> to vector<2x16xf32>
    %1550 = vector.extract_strided_slice %1545 {offsets = [0, 32], sizes = [2, 16], strides = [1, 1]} : vector<2x48xf32> to vector<2x16xf32>
    %1551 = arith.mulf %1549, %1529 : vector<2x16xf32>
    %1552 = arith.mulf %1548, %1547 : vector<2x16xf32>
    %1553 = arith.addf %1551, %1552 : vector<2x16xf32>
    %1554 = math.tanh %1553 : vector<2x16xf32>
    %1555 = arith.mulf %1550, %1554 : vector<2x16xf32>
    %1556 = vector.extract_strided_slice %1387 {offsets = [0, 7], sizes = [2, 1], strides = [1, 1]} : vector<2x17xf32> to vector<2x1xf32>
    %1557 = vector.broadcast %1556 : vector<2x1xf32> to vector<2x64xf32>
    %1558 = vector.broadcast %9 : vector<1x64xf32> to vector<2x64xf32>
    %1559 = arith.mulf %1557, %1558 : vector<2x64xf32>
    %1560 = vector.broadcast %11 : vector<1x64xf32> to vector<2x64xf32>
    %1561 = arith.addf %1559, %1560 : vector<2x64xf32>
    %cst_226 = arith.constant dense<0.000000e+00> : vector<2x64xf32>
    %1562 = tpu.matmul %1555, %10, %cst_226 {dimension_numbers = #tpu.dot_dimension_numbers<[1], [0], [0], [1], [0, 0, 1, 1], [], []>} : vector<2x16xf32>, vector<16x64xf32>, vector<2x64xf32> -> vector<2x64xf32>
    %1563 = arith.addf %1561, %1562 : vector<2x64xf32>
    %1564 = vector.extract_strided_slice %1563 {offsets = [0, 0], sizes = [2, 48], strides = [1, 1]} : vector<2x64xf32> to vector<2x48xf32>
    %1565 = arith.negf %1564 : vector<2x48xf32>
    %1566 = math.exp %1565 : vector<2x48xf32>
    %cst_227 = arith.constant 1.000000e+00 : f32
    %1567 = vector.broadcast %cst_227 : f32 to vector<2x48xf32>
    %1568 = arith.addf %1567, %1566 : vector<2x48xf32>
    %1569 = arith.divf %1567, %1568 : vector<2x48xf32>
    %1570 = vector.extract_strided_slice %1563 {offsets = [0, 48], sizes = [2, 16], strides = [1, 1]} : vector<2x64xf32> to vector<2x16xf32>
    %1571 = math.tanh %1570 : vector<2x16xf32>
    %1572 = vector.extract_strided_slice %1569 {offsets = [0, 0], sizes = [2, 16], strides = [1, 1]} : vector<2x48xf32> to vector<2x16xf32>
    %1573 = vector.extract_strided_slice %1569 {offsets = [0, 16], sizes = [2, 16], strides = [1, 1]} : vector<2x48xf32> to vector<2x16xf32>
    %1574 = vector.extract_strided_slice %1569 {offsets = [0, 32], sizes = [2, 16], strides = [1, 1]} : vector<2x48xf32> to vector<2x16xf32>
    %1575 = arith.mulf %1573, %1553 : vector<2x16xf32>
    %1576 = arith.mulf %1572, %1571 : vector<2x16xf32>
    %1577 = arith.addf %1575, %1576 : vector<2x16xf32>
    %1578 = math.tanh %1577 : vector<2x16xf32>
    %1579 = arith.mulf %1574, %1578 : vector<2x16xf32>
    %1580 = vector.extract_strided_slice %1387 {offsets = [0, 8], sizes = [2, 1], strides = [1, 1]} : vector<2x17xf32> to vector<2x1xf32>
    %1581 = vector.broadcast %1580 : vector<2x1xf32> to vector<2x64xf32>
    %1582 = vector.broadcast %9 : vector<1x64xf32> to vector<2x64xf32>
    %1583 = arith.mulf %1581, %1582 : vector<2x64xf32>
    %1584 = vector.broadcast %11 : vector<1x64xf32> to vector<2x64xf32>
    %1585 = arith.addf %1583, %1584 : vector<2x64xf32>
    %cst_228 = arith.constant dense<0.000000e+00> : vector<2x64xf32>
    %1586 = tpu.matmul %1579, %10, %cst_228 {dimension_numbers = #tpu.dot_dimension_numbers<[1], [0], [0], [1], [0, 0, 1, 1], [], []>} : vector<2x16xf32>, vector<16x64xf32>, vector<2x64xf32> -> vector<2x64xf32>
    %1587 = arith.addf %1585, %1586 : vector<2x64xf32>
    %1588 = vector.extract_strided_slice %1587 {offsets = [0, 0], sizes = [2, 48], strides = [1, 1]} : vector<2x64xf32> to vector<2x48xf32>
    %1589 = arith.negf %1588 : vector<2x48xf32>
    %1590 = math.exp %1589 : vector<2x48xf32>
    %cst_229 = arith.constant 1.000000e+00 : f32
    %1591 = vector.broadcast %cst_229 : f32 to vector<2x48xf32>
    %1592 = arith.addf %1591, %1590 : vector<2x48xf32>
    %1593 = arith.divf %1591, %1592 : vector<2x48xf32>
    %1594 = vector.extract_strided_slice %1587 {offsets = [0, 48], sizes = [2, 16], strides = [1, 1]} : vector<2x64xf32> to vector<2x16xf32>
    %1595 = math.tanh %1594 : vector<2x16xf32>
    %1596 = vector.extract_strided_slice %1593 {offsets = [0, 0], sizes = [2, 16], strides = [1, 1]} : vector<2x48xf32> to vector<2x16xf32>
    %1597 = vector.extract_strided_slice %1593 {offsets = [0, 16], sizes = [2, 16], strides = [1, 1]} : vector<2x48xf32> to vector<2x16xf32>
    %1598 = vector.extract_strided_slice %1593 {offsets = [0, 32], sizes = [2, 16], strides = [1, 1]} : vector<2x48xf32> to vector<2x16xf32>
    %1599 = arith.mulf %1597, %1577 : vector<2x16xf32>
    %1600 = arith.mulf %1596, %1595 : vector<2x16xf32>
    %1601 = arith.addf %1599, %1600 : vector<2x16xf32>
    %1602 = math.tanh %1601 : vector<2x16xf32>
    %1603 = arith.mulf %1598, %1602 : vector<2x16xf32>
    %1604 = vector.extract_strided_slice %1387 {offsets = [0, 9], sizes = [2, 1], strides = [1, 1]} : vector<2x17xf32> to vector<2x1xf32>
    %1605 = vector.broadcast %1604 : vector<2x1xf32> to vector<2x64xf32>
    %1606 = vector.broadcast %9 : vector<1x64xf32> to vector<2x64xf32>
    %1607 = arith.mulf %1605, %1606 : vector<2x64xf32>
    %1608 = vector.broadcast %11 : vector<1x64xf32> to vector<2x64xf32>
    %1609 = arith.addf %1607, %1608 : vector<2x64xf32>
    %cst_230 = arith.constant dense<0.000000e+00> : vector<2x64xf32>
    %1610 = tpu.matmul %1603, %10, %cst_230 {dimension_numbers = #tpu.dot_dimension_numbers<[1], [0], [0], [1], [0, 0, 1, 1], [], []>} : vector<2x16xf32>, vector<16x64xf32>, vector<2x64xf32> -> vector<2x64xf32>
    %1611 = arith.addf %1609, %1610 : vector<2x64xf32>
    %1612 = vector.extract_strided_slice %1611 {offsets = [0, 0], sizes = [2, 48], strides = [1, 1]} : vector<2x64xf32> to vector<2x48xf32>
    %1613 = arith.negf %1612 : vector<2x48xf32>
    %1614 = math.exp %1613 : vector<2x48xf32>
    %cst_231 = arith.constant 1.000000e+00 : f32
    %1615 = vector.broadcast %cst_231 : f32 to vector<2x48xf32>
    %1616 = arith.addf %1615, %1614 : vector<2x48xf32>
    %1617 = arith.divf %1615, %1616 : vector<2x48xf32>
    %1618 = vector.extract_strided_slice %1611 {offsets = [0, 48], sizes = [2, 16], strides = [1, 1]} : vector<2x64xf32> to vector<2x16xf32>
    %1619 = math.tanh %1618 : vector<2x16xf32>
    %1620 = vector.extract_strided_slice %1617 {offsets = [0, 0], sizes = [2, 16], strides = [1, 1]} : vector<2x48xf32> to vector<2x16xf32>
    %1621 = vector.extract_strided_slice %1617 {offsets = [0, 16], sizes = [2, 16], strides = [1, 1]} : vector<2x48xf32> to vector<2x16xf32>
    %1622 = vector.extract_strided_slice %1617 {offsets = [0, 32], sizes = [2, 16], strides = [1, 1]} : vector<2x48xf32> to vector<2x16xf32>
    %1623 = arith.mulf %1621, %1601 : vector<2x16xf32>
    %1624 = arith.mulf %1620, %1619 : vector<2x16xf32>
    %1625 = arith.addf %1623, %1624 : vector<2x16xf32>
    %1626 = math.tanh %1625 : vector<2x16xf32>
    %1627 = arith.mulf %1622, %1626 : vector<2x16xf32>
    %1628 = vector.extract_strided_slice %1387 {offsets = [0, 10], sizes = [2, 1], strides = [1, 1]} : vector<2x17xf32> to vector<2x1xf32>
    %1629 = vector.broadcast %1628 : vector<2x1xf32> to vector<2x64xf32>
    %1630 = vector.broadcast %9 : vector<1x64xf32> to vector<2x64xf32>
    %1631 = arith.mulf %1629, %1630 : vector<2x64xf32>
    %1632 = vector.broadcast %11 : vector<1x64xf32> to vector<2x64xf32>
    %1633 = arith.addf %1631, %1632 : vector<2x64xf32>
    %cst_232 = arith.constant dense<0.000000e+00> : vector<2x64xf32>
    %1634 = tpu.matmul %1627, %10, %cst_232 {dimension_numbers = #tpu.dot_dimension_numbers<[1], [0], [0], [1], [0, 0, 1, 1], [], []>} : vector<2x16xf32>, vector<16x64xf32>, vector<2x64xf32> -> vector<2x64xf32>
    %1635 = arith.addf %1633, %1634 : vector<2x64xf32>
    %1636 = vector.extract_strided_slice %1635 {offsets = [0, 0], sizes = [2, 48], strides = [1, 1]} : vector<2x64xf32> to vector<2x48xf32>
    %1637 = arith.negf %1636 : vector<2x48xf32>
    %1638 = math.exp %1637 : vector<2x48xf32>
    %cst_233 = arith.constant 1.000000e+00 : f32
    %1639 = vector.broadcast %cst_233 : f32 to vector<2x48xf32>
    %1640 = arith.addf %1639, %1638 : vector<2x48xf32>
    %1641 = arith.divf %1639, %1640 : vector<2x48xf32>
    %1642 = vector.extract_strided_slice %1635 {offsets = [0, 48], sizes = [2, 16], strides = [1, 1]} : vector<2x64xf32> to vector<2x16xf32>
    %1643 = math.tanh %1642 : vector<2x16xf32>
    %1644 = vector.extract_strided_slice %1641 {offsets = [0, 0], sizes = [2, 16], strides = [1, 1]} : vector<2x48xf32> to vector<2x16xf32>
    %1645 = vector.extract_strided_slice %1641 {offsets = [0, 16], sizes = [2, 16], strides = [1, 1]} : vector<2x48xf32> to vector<2x16xf32>
    %1646 = vector.extract_strided_slice %1641 {offsets = [0, 32], sizes = [2, 16], strides = [1, 1]} : vector<2x48xf32> to vector<2x16xf32>
    %1647 = arith.mulf %1645, %1625 : vector<2x16xf32>
    %1648 = arith.mulf %1644, %1643 : vector<2x16xf32>
    %1649 = arith.addf %1647, %1648 : vector<2x16xf32>
    %1650 = math.tanh %1649 : vector<2x16xf32>
    %1651 = arith.mulf %1646, %1650 : vector<2x16xf32>
    %1652 = vector.extract_strided_slice %1387 {offsets = [0, 11], sizes = [2, 1], strides = [1, 1]} : vector<2x17xf32> to vector<2x1xf32>
    %1653 = vector.broadcast %1652 : vector<2x1xf32> to vector<2x64xf32>
    %1654 = vector.broadcast %9 : vector<1x64xf32> to vector<2x64xf32>
    %1655 = arith.mulf %1653, %1654 : vector<2x64xf32>
    %1656 = vector.broadcast %11 : vector<1x64xf32> to vector<2x64xf32>
    %1657 = arith.addf %1655, %1656 : vector<2x64xf32>
    %cst_234 = arith.constant dense<0.000000e+00> : vector<2x64xf32>
    %1658 = tpu.matmul %1651, %10, %cst_234 {dimension_numbers = #tpu.dot_dimension_numbers<[1], [0], [0], [1], [0, 0, 1, 1], [], []>} : vector<2x16xf32>, vector<16x64xf32>, vector<2x64xf32> -> vector<2x64xf32>
    %1659 = arith.addf %1657, %1658 : vector<2x64xf32>
    %1660 = vector.extract_strided_slice %1659 {offsets = [0, 0], sizes = [2, 48], strides = [1, 1]} : vector<2x64xf32> to vector<2x48xf32>
    %1661 = arith.negf %1660 : vector<2x48xf32>
    %1662 = math.exp %1661 : vector<2x48xf32>
    %cst_235 = arith.constant 1.000000e+00 : f32
    %1663 = vector.broadcast %cst_235 : f32 to vector<2x48xf32>
    %1664 = arith.addf %1663, %1662 : vector<2x48xf32>
    %1665 = arith.divf %1663, %1664 : vector<2x48xf32>
    %1666 = vector.extract_strided_slice %1659 {offsets = [0, 48], sizes = [2, 16], strides = [1, 1]} : vector<2x64xf32> to vector<2x16xf32>
    %1667 = math.tanh %1666 : vector<2x16xf32>
    %1668 = vector.extract_strided_slice %1665 {offsets = [0, 0], sizes = [2, 16], strides = [1, 1]} : vector<2x48xf32> to vector<2x16xf32>
    %1669 = vector.extract_strided_slice %1665 {offsets = [0, 16], sizes = [2, 16], strides = [1, 1]} : vector<2x48xf32> to vector<2x16xf32>
    %1670 = vector.extract_strided_slice %1665 {offsets = [0, 32], sizes = [2, 16], strides = [1, 1]} : vector<2x48xf32> to vector<2x16xf32>
    %1671 = arith.mulf %1669, %1649 : vector<2x16xf32>
    %1672 = arith.mulf %1668, %1667 : vector<2x16xf32>
    %1673 = arith.addf %1671, %1672 : vector<2x16xf32>
    %1674 = math.tanh %1673 : vector<2x16xf32>
    %1675 = arith.mulf %1670, %1674 : vector<2x16xf32>
    %1676 = vector.extract_strided_slice %1387 {offsets = [0, 12], sizes = [2, 1], strides = [1, 1]} : vector<2x17xf32> to vector<2x1xf32>
    %1677 = vector.broadcast %1676 : vector<2x1xf32> to vector<2x64xf32>
    %1678 = vector.broadcast %9 : vector<1x64xf32> to vector<2x64xf32>
    %1679 = arith.mulf %1677, %1678 : vector<2x64xf32>
    %1680 = vector.broadcast %11 : vector<1x64xf32> to vector<2x64xf32>
    %1681 = arith.addf %1679, %1680 : vector<2x64xf32>
    %cst_236 = arith.constant dense<0.000000e+00> : vector<2x64xf32>
    %1682 = tpu.matmul %1675, %10, %cst_236 {dimension_numbers = #tpu.dot_dimension_numbers<[1], [0], [0], [1], [0, 0, 1, 1], [], []>} : vector<2x16xf32>, vector<16x64xf32>, vector<2x64xf32> -> vector<2x64xf32>
    %1683 = arith.addf %1681, %1682 : vector<2x64xf32>
    %1684 = vector.extract_strided_slice %1683 {offsets = [0, 0], sizes = [2, 48], strides = [1, 1]} : vector<2x64xf32> to vector<2x48xf32>
    %1685 = arith.negf %1684 : vector<2x48xf32>
    %1686 = math.exp %1685 : vector<2x48xf32>
    %cst_237 = arith.constant 1.000000e+00 : f32
    %1687 = vector.broadcast %cst_237 : f32 to vector<2x48xf32>
    %1688 = arith.addf %1687, %1686 : vector<2x48xf32>
    %1689 = arith.divf %1687, %1688 : vector<2x48xf32>
    %1690 = vector.extract_strided_slice %1683 {offsets = [0, 48], sizes = [2, 16], strides = [1, 1]} : vector<2x64xf32> to vector<2x16xf32>
    %1691 = math.tanh %1690 : vector<2x16xf32>
    %1692 = vector.extract_strided_slice %1689 {offsets = [0, 0], sizes = [2, 16], strides = [1, 1]} : vector<2x48xf32> to vector<2x16xf32>
    %1693 = vector.extract_strided_slice %1689 {offsets = [0, 16], sizes = [2, 16], strides = [1, 1]} : vector<2x48xf32> to vector<2x16xf32>
    %1694 = vector.extract_strided_slice %1689 {offsets = [0, 32], sizes = [2, 16], strides = [1, 1]} : vector<2x48xf32> to vector<2x16xf32>
    %1695 = arith.mulf %1693, %1673 : vector<2x16xf32>
    %1696 = arith.mulf %1692, %1691 : vector<2x16xf32>
    %1697 = arith.addf %1695, %1696 : vector<2x16xf32>
    %1698 = math.tanh %1697 : vector<2x16xf32>
    %1699 = arith.mulf %1694, %1698 : vector<2x16xf32>
    %1700 = vector.extract_strided_slice %1387 {offsets = [0, 13], sizes = [2, 1], strides = [1, 1]} : vector<2x17xf32> to vector<2x1xf32>
    %1701 = vector.broadcast %1700 : vector<2x1xf32> to vector<2x64xf32>
    %1702 = vector.broadcast %9 : vector<1x64xf32> to vector<2x64xf32>
    %1703 = arith.mulf %1701, %1702 : vector<2x64xf32>
    %1704 = vector.broadcast %11 : vector<1x64xf32> to vector<2x64xf32>
    %1705 = arith.addf %1703, %1704 : vector<2x64xf32>
    %cst_238 = arith.constant dense<0.000000e+00> : vector<2x64xf32>
    %1706 = tpu.matmul %1699, %10, %cst_238 {dimension_numbers = #tpu.dot_dimension_numbers<[1], [0], [0], [1], [0, 0, 1, 1], [], []>} : vector<2x16xf32>, vector<16x64xf32>, vector<2x64xf32> -> vector<2x64xf32>
    %1707 = arith.addf %1705, %1706 : vector<2x64xf32>
    %1708 = vector.extract_strided_slice %1707 {offsets = [0, 0], sizes = [2, 48], strides = [1, 1]} : vector<2x64xf32> to vector<2x48xf32>
    %1709 = arith.negf %1708 : vector<2x48xf32>
    %1710 = math.exp %1709 : vector<2x48xf32>
    %cst_239 = arith.constant 1.000000e+00 : f32
    %1711 = vector.broadcast %cst_239 : f32 to vector<2x48xf32>
    %1712 = arith.addf %1711, %1710 : vector<2x48xf32>
    %1713 = arith.divf %1711, %1712 : vector<2x48xf32>
    %1714 = vector.extract_strided_slice %1707 {offsets = [0, 48], sizes = [2, 16], strides = [1, 1]} : vector<2x64xf32> to vector<2x16xf32>
    %1715 = math.tanh %1714 : vector<2x16xf32>
    %1716 = vector.extract_strided_slice %1713 {offsets = [0, 0], sizes = [2, 16], strides = [1, 1]} : vector<2x48xf32> to vector<2x16xf32>
    %1717 = vector.extract_strided_slice %1713 {offsets = [0, 16], sizes = [2, 16], strides = [1, 1]} : vector<2x48xf32> to vector<2x16xf32>
    %1718 = vector.extract_strided_slice %1713 {offsets = [0, 32], sizes = [2, 16], strides = [1, 1]} : vector<2x48xf32> to vector<2x16xf32>
    %1719 = arith.mulf %1717, %1697 : vector<2x16xf32>
    %1720 = arith.mulf %1716, %1715 : vector<2x16xf32>
    %1721 = arith.addf %1719, %1720 : vector<2x16xf32>
    %1722 = math.tanh %1721 : vector<2x16xf32>
    %1723 = arith.mulf %1718, %1722 : vector<2x16xf32>
    %1724 = vector.extract_strided_slice %1387 {offsets = [0, 14], sizes = [2, 1], strides = [1, 1]} : vector<2x17xf32> to vector<2x1xf32>
    %1725 = vector.broadcast %1724 : vector<2x1xf32> to vector<2x64xf32>
    %1726 = vector.broadcast %9 : vector<1x64xf32> to vector<2x64xf32>
    %1727 = arith.mulf %1725, %1726 : vector<2x64xf32>
    %1728 = vector.broadcast %11 : vector<1x64xf32> to vector<2x64xf32>
    %1729 = arith.addf %1727, %1728 : vector<2x64xf32>
    %cst_240 = arith.constant dense<0.000000e+00> : vector<2x64xf32>
    %1730 = tpu.matmul %1723, %10, %cst_240 {dimension_numbers = #tpu.dot_dimension_numbers<[1], [0], [0], [1], [0, 0, 1, 1], [], []>} : vector<2x16xf32>, vector<16x64xf32>, vector<2x64xf32> -> vector<2x64xf32>
    %1731 = arith.addf %1729, %1730 : vector<2x64xf32>
    %1732 = vector.extract_strided_slice %1731 {offsets = [0, 0], sizes = [2, 48], strides = [1, 1]} : vector<2x64xf32> to vector<2x48xf32>
    %1733 = arith.negf %1732 : vector<2x48xf32>
    %1734 = math.exp %1733 : vector<2x48xf32>
    %cst_241 = arith.constant 1.000000e+00 : f32
    %1735 = vector.broadcast %cst_241 : f32 to vector<2x48xf32>
    %1736 = arith.addf %1735, %1734 : vector<2x48xf32>
    %1737 = arith.divf %1735, %1736 : vector<2x48xf32>
    %1738 = vector.extract_strided_slice %1731 {offsets = [0, 48], sizes = [2, 16], strides = [1, 1]} : vector<2x64xf32> to vector<2x16xf32>
    %1739 = math.tanh %1738 : vector<2x16xf32>
    %1740 = vector.extract_strided_slice %1737 {offsets = [0, 0], sizes = [2, 16], strides = [1, 1]} : vector<2x48xf32> to vector<2x16xf32>
    %1741 = vector.extract_strided_slice %1737 {offsets = [0, 16], sizes = [2, 16], strides = [1, 1]} : vector<2x48xf32> to vector<2x16xf32>
    %1742 = vector.extract_strided_slice %1737 {offsets = [0, 32], sizes = [2, 16], strides = [1, 1]} : vector<2x48xf32> to vector<2x16xf32>
    %1743 = arith.mulf %1741, %1721 : vector<2x16xf32>
    %1744 = arith.mulf %1740, %1739 : vector<2x16xf32>
    %1745 = arith.addf %1743, %1744 : vector<2x16xf32>
    %1746 = math.tanh %1745 : vector<2x16xf32>
    %1747 = arith.mulf %1742, %1746 : vector<2x16xf32>
    %1748 = vector.extract_strided_slice %1387 {offsets = [0, 15], sizes = [2, 1], strides = [1, 1]} : vector<2x17xf32> to vector<2x1xf32>
    %1749 = vector.broadcast %1748 : vector<2x1xf32> to vector<2x64xf32>
    %1750 = vector.broadcast %9 : vector<1x64xf32> to vector<2x64xf32>
    %1751 = arith.mulf %1749, %1750 : vector<2x64xf32>
    %1752 = vector.broadcast %11 : vector<1x64xf32> to vector<2x64xf32>
    %1753 = arith.addf %1751, %1752 : vector<2x64xf32>
    %cst_242 = arith.constant dense<0.000000e+00> : vector<2x64xf32>
    %1754 = tpu.matmul %1747, %10, %cst_242 {dimension_numbers = #tpu.dot_dimension_numbers<[1], [0], [0], [1], [0, 0, 1, 1], [], []>} : vector<2x16xf32>, vector<16x64xf32>, vector<2x64xf32> -> vector<2x64xf32>
    %1755 = arith.addf %1753, %1754 : vector<2x64xf32>
    %1756 = vector.extract_strided_slice %1755 {offsets = [0, 0], sizes = [2, 48], strides = [1, 1]} : vector<2x64xf32> to vector<2x48xf32>
    %1757 = arith.negf %1756 : vector<2x48xf32>
    %1758 = math.exp %1757 : vector<2x48xf32>
    %cst_243 = arith.constant 1.000000e+00 : f32
    %1759 = vector.broadcast %cst_243 : f32 to vector<2x48xf32>
    %1760 = arith.addf %1759, %1758 : vector<2x48xf32>
    %1761 = arith.divf %1759, %1760 : vector<2x48xf32>
    %1762 = vector.extract_strided_slice %1755 {offsets = [0, 48], sizes = [2, 16], strides = [1, 1]} : vector<2x64xf32> to vector<2x16xf32>
    %1763 = math.tanh %1762 : vector<2x16xf32>
    %1764 = vector.extract_strided_slice %1761 {offsets = [0, 0], sizes = [2, 16], strides = [1, 1]} : vector<2x48xf32> to vector<2x16xf32>
    %1765 = vector.extract_strided_slice %1761 {offsets = [0, 16], sizes = [2, 16], strides = [1, 1]} : vector<2x48xf32> to vector<2x16xf32>
    %1766 = vector.extract_strided_slice %1761 {offsets = [0, 32], sizes = [2, 16], strides = [1, 1]} : vector<2x48xf32> to vector<2x16xf32>
    %1767 = arith.mulf %1765, %1745 : vector<2x16xf32>
    %1768 = arith.mulf %1764, %1763 : vector<2x16xf32>
    %1769 = arith.addf %1767, %1768 : vector<2x16xf32>
    %1770 = math.tanh %1769 : vector<2x16xf32>
    %1771 = arith.mulf %1766, %1770 : vector<2x16xf32>
    %1772 = vector.extract_strided_slice %1387 {offsets = [0, 16], sizes = [2, 1], strides = [1, 1]} : vector<2x17xf32> to vector<2x1xf32>
    %1773 = vector.broadcast %1772 : vector<2x1xf32> to vector<2x64xf32>
    %1774 = vector.broadcast %9 : vector<1x64xf32> to vector<2x64xf32>
    %1775 = arith.mulf %1773, %1774 : vector<2x64xf32>
    %1776 = vector.broadcast %11 : vector<1x64xf32> to vector<2x64xf32>
    %1777 = arith.addf %1775, %1776 : vector<2x64xf32>
    %cst_244 = arith.constant dense<0.000000e+00> : vector<2x64xf32>
    %1778 = tpu.matmul %1771, %10, %cst_244 {dimension_numbers = #tpu.dot_dimension_numbers<[1], [0], [0], [1], [0, 0, 1, 1], [], []>} : vector<2x16xf32>, vector<16x64xf32>, vector<2x64xf32> -> vector<2x64xf32>
    %1779 = arith.addf %1777, %1778 : vector<2x64xf32>
    %1780 = vector.extract_strided_slice %1779 {offsets = [0, 0], sizes = [2, 48], strides = [1, 1]} : vector<2x64xf32> to vector<2x48xf32>
    %1781 = arith.negf %1780 : vector<2x48xf32>
    %1782 = math.exp %1781 : vector<2x48xf32>
    %cst_245 = arith.constant 1.000000e+00 : f32
    %1783 = vector.broadcast %cst_245 : f32 to vector<2x48xf32>
    %1784 = arith.addf %1783, %1782 : vector<2x48xf32>
    %1785 = arith.divf %1783, %1784 : vector<2x48xf32>
    %1786 = vector.extract_strided_slice %1779 {offsets = [0, 48], sizes = [2, 16], strides = [1, 1]} : vector<2x64xf32> to vector<2x16xf32>
    %1787 = math.tanh %1786 : vector<2x16xf32>
    %1788 = vector.extract_strided_slice %1785 {offsets = [0, 0], sizes = [2, 16], strides = [1, 1]} : vector<2x48xf32> to vector<2x16xf32>
    %1789 = vector.extract_strided_slice %1785 {offsets = [0, 16], sizes = [2, 16], strides = [1, 1]} : vector<2x48xf32> to vector<2x16xf32>
    %1790 = vector.extract_strided_slice %1785 {offsets = [0, 32], sizes = [2, 16], strides = [1, 1]} : vector<2x48xf32> to vector<2x16xf32>
    %1791 = arith.mulf %1789, %1769 : vector<2x16xf32>
    %1792 = arith.mulf %1788, %1787 : vector<2x16xf32>
    %1793 = arith.addf %1791, %1792 : vector<2x16xf32>
    %1794 = math.tanh %1793 : vector<2x16xf32>
    %1795 = arith.mulf %1790, %1794 : vector<2x16xf32>
    %1796 = vector.broadcast %14 : vector<1x16xf32> to vector<2x16xf32>
    %1797 = arith.mulf %1795, %1796 : vector<2x16xf32>
    %cst_246 = arith.constant dense<0.000000e+00> : vector<2xf32>
    %1798 = vector.multi_reduction <add>, %1797, %cst_246 [1] : vector<2x16xf32> to vector<2xf32>
    %1799 = vector.shape_cast %1798 : vector<2xf32> to vector<2x1xf32>
    %1800 = vector.broadcast %15 : vector<1x1xf32> to vector<2x1xf32>
    %1801 = arith.addf %1799, %1800 : vector<2x1xf32>
    %1802 = tpu.concatenate %463, %909, %1355, %1801 in 1 : vector<2x1xf32>, vector<2x1xf32>, vector<2x1xf32>, vector<2x1xf32> -> vector<2x4xf32>
    %c0_247 = arith.constant 0 : index
    %c0_248 = arith.constant 0 : index
    %1803 = vector.load %arg15[%c0_247, %c0_248] : memref<2x4xf32, #tpu.memory_space<vmem>>, vector<2x4xf32>
    tpu.vector_store %arg15[%c0_247, %c0_248], %1802 {strides = array<i32>} : memref<2x4xf32, #tpu.memory_space<vmem>>, vector<2x4xf32>,
    %c0_249 = arith.constant 0 : index
    %c0_250 = arith.constant 0 : index
    %1804 = vector.load %arg16[%c0_249, %c0_250] : memref<2x60xf32, #tpu.memory_space<vmem>>, vector<2x60xf32>
    tpu.vector_store %arg16[%c0_249, %c0_250], %1383 {strides = array<i32>} : memref<2x60xf32, #tpu.memory_space<vmem>>, vector<2x60xf32>,
    return
  }
}

</mosaic_0001>

<bundles_post_ra>
// kernel: tpu_custom_call.1
= control target key start
LH: loop header
LB: loop body
LE: loop exit
PB: predicated region body
PF: predicated region fallthrough
CT: control target
= control target key end

     0   :  { %s16106_s0 = inlined_call_operand.vmem [shape: f32[60,2,64], index: 0, kind: input, shape index: {}]   ;;  %s16107_s1 = inlined_call_operand.vmem [shape: f32[16,64], index: 1, kind: input, shape index: {}]   ;;  %s16108_s2 = inlined_call_operand.hbm [shape: f32[1,64], index: 2, kind: input, shape index: {}]   ;;  %s16109_s3 = inlined_call_operand.vmem [shape: f32[16,64], index: 3, kind: input, shape index: {}]   ;;  %s16110_s4 = inlined_call_operand.vmem [shape: f32[1,64], index: 4, kind: input, shape index: {}]   ;;  %s16111_s5 = inlined_call_operand.vmem [shape: f32[16,16], index: 5, kind: input, shape index: {}]   ;;  %s16112_s6 = inlined_call_operand.vmem [shape: f32[16,16], index: 6, kind: input, shape index: {}]   ;;  %s16113_s7 = inlined_call_operand.vmem [shape: f32[1,16], index: 7, kind: input, shape index: {}]   ;;  %s16114_s8 = inlined_call_operand.vmem [shape: f32[1,16], index: 8, kind: input, shape index: {}]   ;;  %s16115_s9 = inlined_call_operand.<no memory space> [shape: f32[1,1], index: 9, kind: input, shape index: {}]   ;;  %s16116_s10 = inlined_call_operand.vmem [shape: f32[2,1], index: 10, kind: input, shape index: {}]   ;;  %s16117_s11 = inlined_call_operand.vmem [shape: f32[120,2], index: 11, kind: input, shape index: {}]   ;;  %s16118_s12 = inlined_call_operand.vmem [shape: f32[2,120], index: 12, kind: input, shape index: {}]   ;;  %s16119_s13 = inlined_call_operand.vmem [shape: f32[120,60], index: 13, kind: input, shape index: {}]   ;;  %s16120_s14 = inlined_call_operand.vmem [shape: f32[60,120], index: 14, kind: input, shape index: {}]   ;;  %s16121_s15 = inlined_call_operand.hbm [shape: f32[2,4], index: 15, kind: output, shape index: {0}]   ;;  %s16122_s16 = inlined_call_operand.hbm [shape: f32[2,60], index: 16, kind: output, shape index: {1}]  }
   0x1   :  { %16123 = sst [smem:[#allocation14_spill]] %s16106_s0  ;;  %v22_v0 = vstv %s16115_s9 }
   0x2   :  { %23 = vst [vmem:[#allocation4] sm:$0x1] %v22_v0 }
   0x3   :  { %24 = vsyncpa [#allocation6], 0 }
   0x4   :  { %25 = vsyncpa [#allocation7], 0 }
   0x5   :  { %26 = vsyncpa [#allocation10], 0  ;;  %s13445_s23 = smov [#allocation5]  }
   0x6   :  { %s37_s24 = sshll.u32 %s13445_s23, 4  ;;  %s38_s24 = int_to_ptr.vmem [resolvable:$true] %s37_s24 }
   0x7   :  { %s13363_s25 = scalar_lea.vmem %s38_s24, 16  ;;  %s13367_s26 = scalar_lea.vmem %s38_s24, 32 }
   0x8   :  { %p13364_p0 = scmp.ne.s32.totalorder %s38_s24, %s13363_s25  ;;  %p13368_p1 = scmp.lt.s32.totalorder %s38_s24, %s38_s24 }
   0x9   :  { %p13369_p2 = scmp.lt.s32.totalorder %s13367_s26, %s13363_s25 }
   0xb   :  { %p13370_p3 = por %p13369_p2, %p13368_p1 }
   0xd   :  { %p13371_p4 = pnand %p13370_p3, %p13364_p0 }
   0xf   :  { %13374 = shalt.err (!%p13371_p4)
}
  0x10   :  { %40 = dma.hbm_to_vmem [thread:$0]  %s16108_s2, 16, %s38_s24, [#allocation6]  }
  0x11   :  { %13427 = dma.done.wait [#allocation6], 16  }
  0x12   :  { %13428 = vsyncadd [#allocation6], 4294967280  ;;  %v13573_v1 = vld [vmem:[%s16107_s1] sm:$0xff]  ;;  %v13578_v2 = vld [vmem:[%s16107_s1 + $0x8] sm:$0xff]  ;;  %v13580_v3 = vmov 0.0   ;;  %v13582_v4 = vmov 0.0  }
  0x13   :  { %s13584_s17 = smov 0  }
  0x14 LB: > { %v13446_v5 = vmov 0.0   ;;  %vm13447_vm0 = vmmov 0   ;;  %s13448_s1 = smov 96   ;;  %vm85_vm1 = vcmask 130048   ;;  %s10692_s2 = sshll.u32 %s13443_s17, 3  ;;  %vm503_vm2 = vcmask 1041408   ;;  %s13443_s17 = sphi %s13584_s17, %s75_s17   ;;  %v13439_v4 = vphi %v13582_v4, %v16127_v4   ;;  %v13435_v3 = vphi %v13580_v3, %v16126_v3  }
  0x15   : > { %11169 = vmatprep.subr.mxu0 %v13446_v5  ;;  %11173 = vmatprep.mubr.msk.f32.mxu0 %vm13447_vm0, %v13446_v5  ;;  %s16124_s20 = sld [smem:[#allocation14_spill]]  ;;  %s13449_s22 = smov 80   ;;  %vm505_vm3 = vcmask 1043456   ;;  %vm507_vm4 = vcmask 1045504  }
  0x16   : > { %83 = vrot.lane.b32.xlu0 %v13439_v4, %s13448_s1  ;;  %11170 = vmatpush3.msra.mxu0 %v13578_v2  ;;  %s13450_s23 = smov 16   ;;  %s513_s24 = scalar_lea.vmem [#allocation2], %s10692_s2 }
  0x17   : > { %11171 = vmatprep.subr.mxu0 %v13446_v5  ;;  %11176 = vmatprep.subr.mxu1 %v13446_v5  ;;  %s75_s17 = sadd.s32 1, %s13443_s17  }
  0x18   : > { %11172 = vmatpush3.msra.mxu0 %v13573_v1  ;;  %11177 = vmatpush3.msra.mxu1 %v13578_v2  ;;  %p72_p5 = scmp.ge.s32.totalorder %s75_s17, 15  }
  0x19   : > { %11178 = vmatprep.subr.mxu1 %v13446_v5  ;;  %11180 = vmatprep.mubr.msk.f32.mxu1 %vm13447_vm0, %v13446_v5  ;;  %s13451_s27 = smov (%p72_p5), 96   ;;  %vm13453_vm5 = vmmov (%p72_p5), 0   ;;  %vm887_vm6 = vcmask (%p72_p5), 15360   ;;  %vm1188_vm7 = vcmask (%p72_p5), 982016   ;;  %vm1262_vm8 = vcmask (%p72_p5), 484352   ;;  %s13454_s29 = smov (%p72_p5), 16  }
  0x1a   : > { %11179 = vmatpush3.msra.mxu1 %v13573_v1  ;;  %11183 = vmatprep.subr.mxu0 %v13446_v5  ;;  %vm1275_vm9 = vcmask (%p72_p5), 490496   ;;  %s13456_s0 = smov (%p72_p5), 80   ;;  %vm3255_vm10 = vcmask (%p72_p5), 123904  }
  0x1b   : > { %11190 = vmatprep.subr.mxu1 %v13446_v5  ;;  %s13608_s21 = scalar_lea.vmem %s16124_s20, %s10692_s2 }
  0x1c   : > { %v81_v7 = vld [vmem:[%s13608_s21] sm:$0x3]  ;;  %v10438_v25 = vld [vmem:[%s13608_s21 + $0x2] sm:$0x3]  ;;  %v10443_v43 = vld [vmem:[%s13608_s21 + $0x4] sm:$0x3] }
  0x88   : > { %v84_v6 = vpop.permute.xlu0 %83 }
  0x89   : > { %11174 = vmatmul.mubr.msk.f32.vlgmr.msra.gmra.mxu0 %vm85_vm1, %v84_v6 }
  0x8a   : > { %11184 = vmatpush3.msra.mxu0 %v13578_v2  ;;  %11187 = vmatprep.mubr.msk.f32.mxu0 %vm13447_vm0, %v13446_v5 }
  0x8b   : > { %11185 = vmatprep.subr.mxu0 %v13446_v5 }
  0x8c   : > { %11186 = vmatpush3.msra.mxu0 %v13573_v1 }
 0x149   : > { %v154_v8 = vpop.f32.mrf.mxu0 }
 0x14a   : > { %v158_v9 = vadd.f32 %v154_v8, %v81_v7 }
 0x14b   : > { %v11175_v10 = vpop.f32.mrf.mxu0 }
 0x14c   : > { %12336 = vtanh.f32 %v158_v9  ;;  %v10435_v12 = vmul.f32 -1.442695, %v158_v9 }
 0x14e   : > { %12338 = vpow2.f32 %v10435_v12 }
 0x159   : > { %v12337_v11 = vpop.eup %12336 }
 0x15a   : > { %168 = vrot.lane.b32.xlu0 %v12337_v11, %s13449_s22 }
 0x15b   : > { %v12339_v13 = vpop.eup %12338 }
 0x15c   : > { %v162_v14 = vadd.f32 1.0, %v12339_v13 }
 0x15e   : > { %12340 = vrcp.f32 %v162_v14 }
 0x16b   : > { %v12341_v15 = vpop.eup %12340 }
 0x16c   : > { %v166_v18 = vmul.f32 %v13435_v3, %v12341_v15  ;;  %v10448_v3 = vld [vmem:[%s13608_s21 + $0x6] sm:$0x3]  ;;  %s13473_s21 = smov (%p72_p5), 32  }
 0x1cc   : > { %v169_v16 = vpop.permute.xlu0 %168 }
 0x1cd   : > { %v171_v17 = vmul.f32 %v12341_v15, %v169_v16 }
 0x1cf   : > { %173 = vrot.lane.b32.xlu1 %v171_v17, %s13450_s23 }
 0x241   : > { %v174_v19 = vpop.permute.xlu1 %173 }
 0x242   : > { %v176_v20 = vadd.f32 %v174_v19, %v166_v18 }
 0x244   : > { %12342 = vtanh.f32 %v176_v20 }
 0x251   : > { %v12343_v21 = vpop.eup %12342 }
 0x252   : > { %179 = vrot.lane.b32.xlu1 %v12343_v21, %s13450_s23 }
 0x2c4   : > { %v180_v22 = vpop.permute.xlu1 %179 }
 0x2c5   : > { %v13614_v23 = vmul.f32 %v12341_v15, %v180_v22 }
 0x2c7   : > { %188 = vrot.lane.b32.xlu0 %v13614_v23, %s13448_s1 }
 0x339   : > { %v189_v24 = vpop.permute.xlu0 %188 }
 0x33a   : > { %11181 = vmatmul.mubr.msk.f32.vlgmr.msra.gmra.mxu1 %vm85_vm1, %v189_v24  ;;  %v13452_v24 = vmov (%p72_p5), 0.0  }
 0x33b   : > { %11191 = vmatpush3.msra.mxu1 %v13578_v2  ;;  %11194 = vmatprep.mubr.msk.f32.mxu1 %vm13447_vm0, %v13446_v5 }
 0x33c   : > { %11192 = vmatprep.subr.mxu1 %v13446_v5  ;;  %11197 = vmatprep.subr.mxu0 (%p72_p5), %v13452_v24 }
 0x33d   : > { %11193 = vmatpush3.msra.mxu1 %v13573_v1  ;;  %v530_v1 = vld [vmem:[%s16111_s5] sm:$0xff] (%p72_p5) }
 0x33e   :  { %11246 = vmatprep.subr.mxu1 (%p72_p5), %v13452_v24 }
 0x3fa   : > { %v258_v26 = vpop.f32.mrf.mxu1 }
 0x3fb   : > { %v262_v27 = vadd.f32 %v10438_v25, %v258_v26  ;;  %v737_v25 = vld [vmem:[%s16112_s6] sm:$0xff] (%p72_p5)  ;;  %v531_v26 = vld [vmem:[%s16111_s5 + $0x8] sm:$0xff] (%p72_p5) }
 0x3fc   : > { %v11182_v28 = vpop.f32.mrf.mxu1 }
 0x3fd   : > { %12344 = vtanh.f32 %v262_v27  ;;  %v10440_v30 = vmul.f32 -1.442695, %v262_v27 }
 0x3ff   : > { %12346 = vpow2.f32 %v10440_v30 }
 0x40a   : > { %v12345_v29 = vpop.eup %12344 }
 0x40b   : > { %272 = vrot.lane.b32.xlu1 %v12345_v29, %s13449_s22 }
 0x40c   : > { %v12347_v31 = vpop.eup %12346 }
 0x40d   : > { %v266_v32 = vadd.f32 1.0, %v12347_v31 }
 0x40f   : > { %12348 = vrcp.f32 %v266_v32 }
 0x41c   : > { %v12349_v33 = vpop.eup %12348 }
 0x41d   : > { %v270_v36 = vmul.f32 %v12349_v33, %v176_v20 }
 0x47d   : > { %v273_v34 = vpop.permute.xlu1 %272 }
 0x47e   : > { %v275_v35 = vmul.f32 %v12349_v33, %v273_v34 }
 0x480   : > { %277 = vrot.lane.b32.xlu0 %v275_v35, %s13450_s23 }
 0x4f2   : > { %v278_v37 = vpop.permute.xlu0 %277 }
 0x4f3   : > { %v280_v38 = vadd.f32 %v278_v37, %v270_v36 }
 0x4f5   : > { %12350 = vtanh.f32 %v280_v38 }
 0x502   : > { %v12351_v39 = vpop.eup %12350 }
 0x503   : > { %283 = vrot.lane.b32.xlu1 %v12351_v39, %s13450_s23 }
 0x575   : > { %v284_v40 = vpop.permute.xlu1 %283 }
 0x576   : > { %v286_v41 = vmul.f32 %v12349_v33, %v284_v40 }
 0x578   : > { %292 = vrot.lane.b32.xlu0 %v286_v41, %s13448_s1  ;;  %v496_v58 = vrot.slane %v286_v41, 6 }
 0x57a   : > { %v504_v62 = vsel %vm503_vm2, %v13614_v23, %v496_v58  ;;  %v738_v23 = vld [vmem:[%s16112_s6 + $0x8] sm:$0xff] (%p72_p5)  ;;  %v751_v58 = vld [vmem:[%s16117_s11 + $0x40] sm:$0xff] (%p72_p5) }
 0x5ea   : > { %v293_v42 = vpop.permute.xlu0 %292 }
 0x5eb   : > { %11188 = vmatmul.mubr.msk.f32.vlgmr.msra.gmra.mxu0 %vm85_vm1, %v293_v42 }
 0x5ec   :  { %11198 = vmatpush3.msra.mxu0 (%p72_p5), %v531_v26  ;;  %11201 = vmatprep.mubr.msk.f32.mxu0 (%p72_p5), %vm13453_vm5, %v13452_v24 }
 0x5ed   :  { %11199 = vmatprep.subr.mxu0 (%p72_p5), %v13452_v24 }
 0x5ee   :  { %11200 = vmatpush3.msra.mxu0 (%p72_p5), %v530_v1 }
 0x5ef   :  { %11300 = vmatprep.subr.mxu0 (%p72_p5), %v13452_v24 }
 0x6ab   : > { %v362_v44 = vpop.f32.mrf.mxu0 }
 0x6ac   : > { %v366_v45 = vadd.f32 %v10443_v43, %v362_v44 }
 0x6ad   : > { %v11189_v46 = vpop.f32.mrf.mxu0 }
 0x6ae   : > { %12352 = vtanh.f32 %v366_v45  ;;  %v10445_v48 = vmul.f32 -1.442695, %v366_v45 }
 0x6b0   : > { %12354 = vpow2.f32 %v10445_v48  ;;  %v743_v48 = vld [vmem:[%s16117_s11] sm:$0xff] (%p72_p5) }
 0x6bb   : > { %v12353_v47 = vpop.eup %12352 }
 0x6bc   : > { %376 = vrot.lane.b32.xlu1 %v12353_v47, %s13449_s22 }
 0x6bd   : > { %v12355_v49 = vpop.eup %12354 }
 0x6be   : > { %v370_v50 = vadd.f32 1.0, %v12355_v49 }
 0x6c0   : > { %12356 = vrcp.f32 %v370_v50 }
 0x6cd   : > { %v12357_v51 = vpop.eup %12356 }
 0x6ce   : > { %v374_v54 = vmul.f32 %v12357_v51, %v280_v38 }
 0x72e   : > { %v377_v52 = vpop.permute.xlu1 %376 }
 0x72f   : > { %v379_v53 = vmul.f32 %v12357_v51, %v377_v52  ;;  %v745_v52 = vld [vmem:[%s16117_s11 + $0x10] sm:$0xff] (%p72_p5) }
 0x731   : > { %381 = vrot.lane.b32.xlu0 %v379_v53, %s13450_s23  ;;  %v746_v53 = vld [vmem:[%s16117_s11 + $0x18] sm:$0xff] (%p72_p5) }
 0x7a3   : > { %v382_v55 = vpop.permute.xlu0 %381 }
 0x7a4   : > { %v384_v56 = vadd.f32 %v382_v55, %v374_v54  ;;  %v747_v54 = vld [vmem:[%s16117_s11 + $0x20] sm:$0xff] (%p72_p5)  ;;  %v748_v55 = vld [vmem:[%s16117_s11 + $0x28] sm:$0xff] (%p72_p5) }
 0x7a6   : > { %12358 = vtanh.f32 %v384_v56 }
 0x7b3   : > { %v12359_v57 = vpop.eup %12358 }
 0x7b4   : > { %387 = vrot.lane.b32.xlu1 %v12359_v57, %s13450_s23  ;;  %v750_v57 = vld [vmem:[%s16117_s11 + $0x38] sm:$0xff] (%p72_p5) }
 0x826   : > { %v388_v59 = vpop.permute.xlu1 %387 }
 0x827   : > { %v390_v60 = vmul.f32 %v12357_v51, %v388_v59  ;;  %v744_v51 = vld [vmem:[%s16117_s11 + $0x8] sm:$0xff] (%p72_p5) }
 0x828   :  { %v752_v59 = vld [vmem:[%s16117_s11 + $0x48] sm:$0xff] (%p72_p5) }
 0x829   : > { %v498_v61 = vrot.slane %v390_v60, 4  ;;  %396 = vrot.lane.b32.xlu0 %v390_v60, %s13448_s1  ;;  %v753_v60 = vld [vmem:[%s16117_s11 + $0x50] sm:$0xff] (%p72_p5) }
 0x82b   : > { %v506_v63 = vsel %vm505_vm3, %v504_v62, %v498_v61  ;;  %v754_v61 = vld [vmem:[%s16117_s11 + $0x58] sm:$0xff] (%p72_p5)  ;;  %v755_v62 = vld [vmem:[%s16117_s11 + $0x60] sm:$0xff] (%p72_p5) }
 0x89b   : > { %v397_v0 = vpop.permute.xlu0 %396 }
 0x89c   : > { %11195 = vmatmul.mubr.msk.f32.vlgmr.msra.gmra.mxu1 %vm85_vm1, %v397_v0  ;;  %v757_v0 = vld [vmem:[%s16117_s11 + $0x70] sm:$0xff] (%p72_p5) }
 0x89d   :  { %11247 = vmatpush3.msra.mxu1 (%p72_p5), %v738_v23  ;;  %11250 = vmatprep.mubr.msk.f32.mxu1 (%p72_p5), %vm13453_vm5, %v13452_v24 }
 0x89e   :  { %11248 = vmatprep.subr.mxu1 (%p72_p5), %v13452_v24 }
 0x89f   :  { %11249 = vmatpush3.msra.mxu1 (%p72_p5), %v737_v25 }
 0x8a0   :  { %11253 = vmatprep.subr.mxu1 (%p72_p5), %v13452_v24 }
 0x95c   : > { %v466_v4 = vpop.f32.mrf.mxu1 }
 0x95d   : > { %v470_v5 = vadd.f32 %v10448_v3, %v466_v4 }
 0x95e   : > { %v11196_v6 = vpop.f32.mrf.mxu1 }
 0x95f   : > { %12360 = vtanh.f32 %v470_v5  ;;  %v10450_v8 = vmul.f32 -1.442695, %v470_v5 }
 0x961   : > { %12362 = vpow2.f32 %v10450_v8 }
 0x96c   : > { %v12361_v7 = vpop.eup %12360 }
 0x96d   : > { %480 = vrot.lane.b32.xlu1 %v12361_v7, %s13449_s22 }
 0x96e   : > { %v12363_v9 = vpop.eup %12362 }
 0x96f   : > { %v474_v10 = vadd.f32 1.0, %v12363_v9 }
 0x971   : > { %12364 = vrcp.f32 %v474_v10 }
 0x97e   : > { %v12365_v11 = vpop.eup %12364 }
 0x97f   : > { %v478_v14 = vmul.f32 %v12365_v11, %v384_v56  ;;  %v749_v56 = vld [vmem:[%s16117_s11 + $0x30] sm:$0xff] (%p72_p5) }
 0x9df   : > { %v481_v12 = vpop.permute.xlu1 %480 }
 0x9e0   : > { %v483_v13 = vmul.f32 %v12365_v11, %v481_v12 }
 0x9e2   : > { %485 = vrot.lane.b32.xlu0 %v483_v13, %s13450_s23 }
 0xa54   : > { %v486_v15 = vpop.permute.xlu0 %485 }
 0xa55   : > { %v13640_v3 = vadd.f32 %v486_v15, %v478_v14  }
 0xa57   : > { %v16125_v16 = vmov %v13640_v3 }
 0xa58   : > { %12366 = vtanh.f32 %v16125_v16  ;;  %v16126_v3 = vmov %v16125_v16 }
 0xa65   : > { %v12367_v17 = vpop.eup %12366 }
 0xa66   : > { %491 = vrot.lane.b32.xlu1 %v12367_v17, %s13450_s23 }
 0xad8   : > { %v492_v18 = vpop.permute.xlu1 %491 }
 0xad9   : > { %v494_v19 = vmul.f32 %v12365_v11, %v492_v18  }
 0xadb   : > { %v501_v20 = vrot.slane %v494_v19, 2  ;;  %v16127_v4 = vmov %v494_v19 }
 0xadd   : > { %v508_v21 = vsel %vm507_vm4, %v506_v63, %v501_v20  ;;  %v756_v63 = vld [vmem:[%s16117_s11 + $0x68] sm:$0xff] (%p72_p5) }
 0xade   : > { %510 = vrot.lane.b32.xlu0 %v508_v21, %s13448_s1 }
 0xae2   :  { %813 = vrot.lane.b32.xlu0 (%p72_p5), %v494_v19, %s13451_s27 }
 0xb4d   :  { %74 = sbr.rel (!%p72_p5) target bundleno = 20 (0x14), region = 104 }
 0xb50   : > { %v511_v22 = vpop.permute.xlu0 %510 }
 0xb51   : > { %514 = vst.msk [vmem:[%s513_s24] sm:$0xff] %vm85_vm1, %v511_v22 }
 0xb54   :  { %v13697_v29 = vpop.permute.xlu0 %813 }
 0xb55   :  { %11251 = vmatmul.mubr.msk.f32.vlgmr.msra.gmra.mxu1 %vm85_vm1, %v13697_v29 }
 0xb56   :  { %11255 = vmatprep.mubr.msk.f32.mxu1 %vm13453_vm5, %v13452_v24 }
 0xb58   :  { %v13674_v2 = vld [vmem:[#allocation2] sm:$0xff]  ;;  %v13685_v27 = vld [vmem:[#allocation2 + $0x8] sm:$0xff]  ;;  %v13691_v28 = vld [vmem:[#allocation2 + $0x10] sm:$0xff] }
 0xb59   :  { %11202 = vmatmul.mubr.msk.f32.vlgmr.msra.gmra.mxu0 %vm85_vm1, %v13674_v2  ;;  %v13703_v30 = vld [vmem:[#allocation2 + $0x18] sm:$0xff]  ;;  %v13709_v31 = vld [vmem:[#allocation2 + $0x20] sm:$0xff]  ;;  %v13715_v32 = vld [vmem:[#allocation2 + $0x28] sm:$0xff] }
 0xb5a   :  { %11204 = vmatprep.mubr.msk.f32.mxu0 %vm13453_vm5, %v13452_v24  ;;  %v13721_v33 = vld [vmem:[#allocation2 + $0x30] sm:$0xff]  ;;  %v13727_v34 = vld [vmem:[#allocation2 + $0x38] sm:$0xff]  ;;  %v13733_v35 = vld [vmem:[#allocation2 + $0x40] sm:$0xff] }
 0xb5b   :  { %v13739_v36 = vld [vmem:[#allocation2 + $0x48] sm:$0xff]  ;;  %v13745_v37 = vld [vmem:[#allocation2 + $0x50] sm:$0xff]  ;;  %v13751_v38 = vld [vmem:[#allocation2 + $0x58] sm:$0xff] }
 0xb5c   :  { %v13757_v39 = vld [vmem:[#allocation2 + $0x60] sm:$0xff]  ;;  %v13763_v40 = vld [vmem:[#allocation2 + $0x68] sm:$0xff]  ;;  %v13769_v41 = vld [vmem:[#allocation2 + $0x70] sm:$0xff] }
 0xb5d   :  { %11205 = vmatmul.mubr.msk.f32.gmra.mxu0 %vm85_vm1, %v13685_v27 }
 0xb5e   :  { %11207 = vmatprep.mubr.msk.f32.mxu0 %vm13453_vm5, %v13452_v24 }
 0xb61   :  { %11208 = vmatmul.mubr.msk.f32.gmra.mxu0 %vm85_vm1, %v13691_v28 }
 0xb62   :  { %11210 = vmatprep.mubr.msk.f32.mxu0 %vm13453_vm5, %v13452_v24 }
 0xb65   :  { %11211 = vmatmul.mubr.msk.f32.gmra.mxu0 %vm85_vm1, %v13703_v30 }
 0xb66   :  { %11213 = vmatprep.mubr.msk.f32.mxu0 %vm13453_vm5, %v13452_v24 }
 0xb69   :  { %11214 = vmatmul.mubr.msk.f32.gmra.mxu0 %vm85_vm1, %v13709_v31 }
 0xb6a   :  { %11216 = vmatprep.mubr.msk.f32.mxu0 %vm13453_vm5, %v13452_v24 }
 0xb6d   :  { %11217 = vmatmul.mubr.msk.f32.gmra.mxu0 %vm85_vm1, %v13715_v32 }
 0xb6e   :  { %11219 = vmatprep.mubr.msk.f32.mxu0 %vm13453_vm5, %v13452_v24 }
 0xb71   :  { %11220 = vmatmul.mubr.msk.f32.gmra.mxu0 %vm85_vm1, %v13721_v33 }
 0xb72   :  { %11222 = vmatprep.mubr.msk.f32.mxu0 %vm13453_vm5, %v13452_v24 }
 0xb75   :  { %11223 = vmatmul.mubr.msk.f32.gmra.mxu0 %vm85_vm1, %v13727_v34 }
 0xb76   :  { %11225 = vmatprep.mubr.msk.f32.mxu0 %vm13453_vm5, %v13452_v24 }
 0xb79   :  { %11226 = vmatmul.mubr.msk.f32.gmra.mxu0 %vm85_vm1, %v13733_v35 }
 0xb7a   :  { %11228 = vmatprep.mubr.msk.f32.mxu0 %vm13453_vm5, %v13452_v24 }
 0xb7d   :  { %11229 = vmatmul.mubr.msk.f32.gmra.mxu0 %vm85_vm1, %v13739_v36 }
 0xb7e   :  { %11231 = vmatprep.mubr.msk.f32.mxu0 %vm13453_vm5, %v13452_v24 }
 0xb81   :  { %11232 = vmatmul.mubr.msk.f32.gmra.mxu0 %vm85_vm1, %v13745_v37 }
 0xb82   :  { %11234 = vmatprep.mubr.msk.f32.mxu0 %vm13453_vm5, %v13452_v24 }
 0xb85   :  { %11235 = vmatmul.mubr.msk.f32.gmra.mxu0 %vm85_vm1, %v13751_v38 }
 0xb86   :  { %11237 = vmatprep.mubr.msk.f32.mxu0 %vm13453_vm5, %v13452_v24 }
 0xb89   :  { %11238 = vmatmul.mubr.msk.f32.gmra.mxu0 %vm85_vm1, %v13757_v39 }
 0xb8a   :  { %11240 = vmatprep.mubr.msk.f32.mxu0 %vm13453_vm5, %v13452_v24 }
 0xb8d   :  { %11241 = vmatmul.mubr.msk.f32.gmra.mxu0 %vm85_vm1, %v13763_v40 }
 0xb8e   :  { %11243 = vmatprep.mubr.msk.f32.mxu0 %vm13453_vm5, %v13452_v24 }
 0xb91   :  { %11244 = vmatmul.mubr.msk.f32.gmra.mxu0 %vm85_vm1, %v13769_v41 }
 0xb92   :  { %11330 = vmatprep.mubr.msk.f32.mxu0 %vm13453_vm5, %v13452_v24 }
 0xc15   :  { %v883_v49 = vpop.f32.mrf.mxu1 }
 0xc16   :  { %11254 = vmatpush3.msk.msra.mxu1 %vm503_vm2, %v883_v49 }
 0xc17   :  { %v11252_v50 = vpop.f32.mrf.mxu1  ;;  %11256 = vmatmul.mubr.msk.f32.vlgmr.msra.gmra.mxu1 %vm887_vm6, %v743_v48  ;;  %11333 = vmatprep.subr.mxu1 %v13452_v24 }
 0xc18   :  { %11258 = vmatprep.mubr.msk.f32.mxu1 %vm13453_vm5, %v13452_v24 }
 0xc19   :  { %v644_v42 = vpop.f32.mrf.mxu0 }
 0xc1a   :  { %718 = vst.msk [vmem:[#allocation3] sm:$0xff] %vm85_vm1, %v644_v42 }
 0xc1b   :  { %v11203_v43 = vpop.f32.mrf.mxu0  ;;  %11259 = vmatmul.mubr.msk.f32.gmra.mxu1 %vm887_vm6, %v744_v51 }
 0xc1c   :  { %11261 = vmatprep.mubr.msk.f32.mxu1 %vm13453_vm5, %v13452_v24 }
 0xc1d   :  { %v649_v44 = vpop.f32.mrf.mxu0 }
 0xc1e   :  { %719 = vst.msk [vmem:[#allocation3 + $0x8] sm:$0xff] %vm85_vm1, %v649_v44 }
 0xc1f   :  { %v11206_v45 = vpop.f32.mrf.mxu0  ;;  %11262 = vmatmul.mubr.msk.f32.gmra.mxu1 %vm887_vm6, %v745_v52 }
 0xc20   :  { %11264 = vmatprep.mubr.msk.f32.mxu1 %vm13453_vm5, %v13452_v24 }
 0xc21   :  { %v654_v46 = vpop.f32.mrf.mxu0 }
 0xc22   :  { %720 = vst.msk [vmem:[#allocation3 + $0x10] sm:$0xff] %vm85_vm1, %v654_v46 }
 0xc23   :  { %v11209_v47 = vpop.f32.mrf.mxu0  ;;  %11265 = vmatmul.mubr.msk.f32.gmra.mxu1 %vm887_vm6, %v746_v53 }
 0xc24   :  { %11267 = vmatprep.mubr.msk.f32.mxu1 %vm13453_vm5, %v13452_v24 }
 0xc25   :  { %v659_v3 = vpop.f32.mrf.mxu0 }
 0xc26   :  { %721 = vst.msk [vmem:[#allocation3 + $0x18] sm:$0xff] %vm85_vm1, %v659_v3 }
 0xc27   :  { %11268 = vmatmul.mubr.msk.f32.gmra.mxu1 %vm887_vm6, %v747_v54  ;;  %v11212_v4 = vpop.f32.mrf.mxu0 }
 0xc28   :  { %11270 = vmatprep.mubr.msk.f32.mxu1 %vm13453_vm5, %v13452_v24 }
 0xc29   :  { %v664_v5 = vpop.f32.mrf.mxu0 }
 0xc2a   :  { %722 = vst.msk [vmem:[#allocation3 + $0x20] sm:$0xff] %vm85_vm1, %v664_v5 }
 0xc2b   :  { %11271 = vmatmul.mubr.msk.f32.gmra.mxu1 %vm887_vm6, %v748_v55  ;;  %v11215_v6 = vpop.f32.mrf.mxu0 }
 0xc2c   :  { %11273 = vmatprep.mubr.msk.f32.mxu1 %vm13453_vm5, %v13452_v24 }
 0xc2d   :  { %v669_v7 = vpop.f32.mrf.mxu0 }
 0xc2e   :  { %723 = vst.msk [vmem:[#allocation3 + $0x28] sm:$0xff] %vm85_vm1, %v669_v7 }
 0xc2f   :  { %11274 = vmatmul.mubr.msk.f32.gmra.mxu1 %vm887_vm6, %v749_v56  ;;  %v11218_v8 = vpop.f32.mrf.mxu0 }
 0xc30   :  { %11276 = vmatprep.mubr.msk.f32.mxu1 %vm13453_vm5, %v13452_v24 }
 0xc31   :  { %v674_v9 = vpop.f32.mrf.mxu0  ;;  %v801_v7 = vld [vmem:[#allocation3 + $0x20] sm:$0xff] }
 0xc32   :  { %724 = vst.msk [vmem:[#allocation3 + $0x30] sm:$0xff] %vm85_vm1, %v674_v9 }
 0xc33   :  { %11277 = vmatmul.mubr.msk.f32.gmra.mxu1 %vm887_vm6, %v750_v57  ;;  %v11221_v10 = vpop.f32.mrf.mxu0 }
 0xc34   :  { %11279 = vmatprep.mubr.msk.f32.mxu1 %vm13453_vm5, %v13452_v24 }
 0xc35   :  { %v679_v11 = vpop.f32.mrf.mxu0 }
 0xc36   :  { %725 = vst.msk [vmem:[#allocation3 + $0x38] sm:$0xff] %vm85_vm1, %v679_v11 }
 0xc37   :  { %11280 = vmatmul.mubr.msk.f32.gmra.mxu1 %vm887_vm6, %v751_v58  ;;  %v11224_v12 = vpop.f32.mrf.mxu0 }
 0xc38   :  { %11282 = vmatprep.mubr.msk.f32.mxu1 %vm13453_vm5, %v13452_v24 }
 0xc39   :  { %v684_v13 = vpop.f32.mrf.mxu0 }
 0xc3a   :  { %726 = vst.msk [vmem:[#allocation3 + $0x40] sm:$0xff] %vm85_vm1, %v684_v13 }
 0xc3b   :  { %11283 = vmatmul.mubr.msk.f32.gmra.mxu1 %vm887_vm6, %v752_v59  ;;  %v11227_v14 = vpop.f32.mrf.mxu0 }
 0xc3c   :  { %11285 = vmatprep.mubr.msk.f32.mxu1 %vm13453_vm5, %v13452_v24 }
 0xc3d   :  { %v689_v15 = vpop.f32.mrf.mxu0 }
 0xc3e   :  { %727 = vst.msk [vmem:[#allocation3 + $0x48] sm:$0xff] %vm85_vm1, %v689_v15 }
 0xc3f   :  { %11286 = vmatmul.mubr.msk.f32.gmra.mxu1 %vm887_vm6, %v753_v60  ;;  %v11230_v17 = vpop.f32.mrf.mxu0 }
 0xc40   :  { %11288 = vmatprep.mubr.msk.f32.mxu1 %vm13453_vm5, %v13452_v24 }
 0xc41   :  { %v694_v18 = vpop.f32.mrf.mxu0 }
 0xc42   :  { %728 = vst.msk [vmem:[#allocation3 + $0x50] sm:$0xff] %vm85_vm1, %v694_v18 }
 0xc43   :  { %11289 = vmatmul.mubr.msk.f32.gmra.mxu1 %vm887_vm6, %v754_v61  ;;  %v11233_v19 = vpop.f32.mrf.mxu0 }
 0xc44   :  { %11291 = vmatprep.mubr.msk.f32.mxu1 %vm13453_vm5, %v13452_v24  ;;  %v799_v19 = vld [vmem:[#allocation3 + $0x10] sm:$0xff] }
 0xc45   :  { %v699_v20 = vpop.f32.mrf.mxu0 }
 0xc46   :  { %729 = vst.msk [vmem:[#allocation3 + $0x58] sm:$0xff] %vm85_vm1, %v699_v20 }
 0xc47   :  { %11292 = vmatmul.mubr.msk.f32.gmra.mxu1 %vm887_vm6, %v755_v62  ;;  %v11236_v21 = vpop.f32.mrf.mxu0 }
 0xc48   :  { %11294 = vmatprep.mubr.msk.f32.mxu1 %vm13453_vm5, %v13452_v24 }
 0xc49   :  { %v704_v22 = vpop.f32.mrf.mxu0  ;;  %v807_v20 = vld [vmem:[#allocation3 + $0x50] sm:$0xff] }
 0xc4a   :  { %730 = vst.msk [vmem:[#allocation3 + $0x60] sm:$0xff] %vm85_vm1, %v704_v22 }
 0xc4b   :  { %11295 = vmatmul.mubr.msk.f32.gmra.mxu1 %vm887_vm6, %v756_v63  ;;  %v11239_v23 = vpop.f32.mrf.mxu0 }
 0xc4c   :  { %11297 = vmatprep.mubr.msk.f32.mxu1 %vm13453_vm5, %v13452_v24 }
 0xc4d   :  { %v709_v25 = vpop.f32.mrf.mxu0  ;;  %v808_v11 = vld [vmem:[#allocation3 + $0x58] sm:$0xff] }
 0xc4e   :  { %731 = vst.msk [vmem:[#allocation3 + $0x68] sm:$0xff] %vm85_vm1, %v709_v25 }
 0xc4f   :  { %11298 = vmatmul.mubr.msk.f32.gmra.mxu1 %vm887_vm6, %v757_v0  ;;  %v11242_v26 = vpop.f32.mrf.mxu0 }
 0xc50   :  { %11349 = vmatprep.mubr.msk.f32.mxu1 %vm13453_vm5, %v13452_v24  ;;  %v797_v26 = vld [vmem:[#allocation3] sm:$0xff] }
 0xc51   :  { %v714_v1 = vpop.f32.mrf.mxu0  ;;  %v809_v5 = vld [vmem:[#allocation3 + $0x60] sm:$0xff] }
 0xc52   :  { %732 = vst.msk [vmem:[#allocation3 + $0x70] sm:$0xff] %vm85_vm1, %v714_v1 }
 0xc53   :  { %v11245_v42 = vpop.f32.mrf.mxu0 }
 0xc54   :  { %v806_v42 = vld [vmem:[#allocation3 + $0x48] sm:$0xff] }
 0xc55   :  { %v810_v10 = vld [vmem:[#allocation3 + $0x68] sm:$0xff] }
 0xc59   :  { %v811_v18 = vld [vmem:[#allocation3 + $0x70] sm:$0xff] }
 0xcd7   :  { %v1003_v43 = vpop.f32.mrf.mxu1 }
 0xcd9   :  { %v11257_v44 = vpop.f32.mrf.mxu1 }
 0xcda   :  { %v1077_v44 = vadd.f32 %v1003_v43, %v797_v26 }
 0xcdb   :  { %v13882_v45 = vpop.f32.mrf.mxu1 }
 0xcdd   :  { %v11260_v46 = vpop.f32.mrf.mxu1 }
 0xcdf   :  { %v1013_v47 = vpop.f32.mrf.mxu1 }
 0xce0   :  { %v1079_v23 = vadd.f32 %v1013_v47, %v799_v19  ;;  %v13891_v47 = vld [vmem:[%s16113_s7] ss:$0 sm:$0xff] }
 0xce1   :  { %v11263_v48 = vpop.f32.mrf.mxu1 }
 0xce2   :  { %v805_v48 = vld [vmem:[#allocation3 + $0x40] sm:$0xff] }
 0xce3   :  { %v13884_v49 = vpop.f32.mrf.mxu1 }
 0xce5   :  { %v11266_v50 = vpop.f32.mrf.mxu1 }
 0xce7   :  { %v1023_v51 = vpop.f32.mrf.mxu1 }
 0xce8   :  { %v1081_v13 = vadd.f32 %v1023_v51, %v801_v7  ;;  %v804_v51 = vld [vmem:[#allocation3 + $0x38] sm:$0xff] }
 0xce9   :  { %v11269_v52 = vpop.f32.mrf.mxu1 }
 0xceb   :  { %v13886_v53 = vpop.f32.mrf.mxu1 }
 0xced   :  { %v11272_v54 = vpop.f32.mrf.mxu1 }
 0xcef   :  { %v1033_v55 = vpop.f32.mrf.mxu1 }
 0xcf1   :  { %v11275_v56 = vpop.f32.mrf.mxu1 }
 0xcf3   :  { %v1038_v57 = vpop.f32.mrf.mxu1 }
 0xcf5   :  { %v11278_v58 = vpop.f32.mrf.mxu1 }
 0xcf7   :  { %v1043_v59 = vpop.f32.mrf.mxu1 }
 0xcf8   :  { %v1085_v52 = vadd.f32 %v1043_v59, %v805_v48 }
 0xcf9   :  { %v11281_v60 = vpop.f32.mrf.mxu1 }
 0xcfa   :  { %v1084_v60 = vadd.f32 %v1038_v57, %v804_v51 }
 0xcfb   :  { %v1048_v61 = vpop.f32.mrf.mxu1 }
 0xcfc   :  { %v1086_v46 = vadd.f32 %v1048_v61, %v806_v42 }
 0xcfd   :  { %v11284_v62 = vpop.f32.mrf.mxu1 }
 0xcfe   :  { %v803_v62 = vld [vmem:[#allocation3 + $0x30] sm:$0xff] }
 0xcff   :  { %v1053_v63 = vpop.f32.mrf.mxu1 }
 0xd00   :  { %v1087_v1 = vadd.f32 %v1053_v63, %v807_v20  ;;  %v798_v20 = vld [vmem:[#allocation3 + $0x8] sm:$0xff] }
 0xd01   :  { %v11287_v0 = vpop.f32.mrf.mxu1 }
 0xd03   :  { %v1058_v3 = vpop.f32.mrf.mxu1 }
 0xd04   :  { %v1088_v15 = vadd.f32 %v1058_v3, %v808_v11  ;;  %v1083_v3 = vadd.f32 %v1033_v55, %v803_v62  ;;  %v800_v55 = vld [vmem:[#allocation3 + $0x18] sm:$0xff] }
 0xd05   :  { %v11290_v4 = vpop.f32.mrf.mxu1 }
 0xd07   :  { %v1063_v6 = vpop.f32.mrf.mxu1 }
 0xd08   :  { %v1089_v8 = vadd.f32 %v1063_v6, %v809_v5  ;;  %v802_v5 = vld [vmem:[#allocation3 + $0x28] sm:$0xff] }
 0xd09   :  { %v11293_v9 = vpop.f32.mrf.mxu1 }
 0xd0a   :  { %12436 = vtanh.f32 %v1089_v8 }
 0xd0b   :  { %v1068_v12 = vpop.f32.mrf.mxu1 }
 0xd0c   :  { %v1090_v14 = vadd.f32 %v1068_v12, %v810_v10  ;;  %v1082_v10 = vadd.f32 %v13886_v53, %v802_v5 }
 0xd0d   :  { %v11296_v17 = vpop.f32.mrf.mxu1 }
 0xd0e   :  { %12438 = vtanh.f32 %v1090_v14 }
 0xd0f   :  { %v1073_v21 = vpop.f32.mrf.mxu1  ;;  %12440 = vtanh.f32 %v1081_v13 }
 0xd10   :  { %v1091_v22 = vadd.f32 %v1073_v21, %v811_v18  ;;  %12442 = vtanh.f32 %v1088_v15  ;;  %v1080_v18 = vadd.f32 %v13884_v49, %v800_v55 }
 0xd11   :  { %v11299_v25 = vpop.f32.mrf.mxu1 }
 0xd12   :  { %12444 = vtanh.f32 %v1091_v22  ;;  %v1078_v25 = vadd.f32 %v13882_v45, %v798_v20  ;;  %v766_v20 = vld [vmem:[%s16119_s13 + $0x38] sm:$0xff] }
 0xd13   :  { %12446 = vtanh.f32 %v1079_v23 }
 0xd14   :  { %12448 = vtanh.f32 %v1087_v1 }
 0xd15   :  { %12450 = vtanh.f32 %v1077_v44 }
 0xd16   :  { %12452 = vtanh.f32 %v1086_v46 }
 0xd17   :  { %v12437_v50 = vpop.eup %12436  ;;  %12454 = vtanh.f32 %v1085_v52 }
 0xd18   :  { %v1125_v63 = vmul.f32 %v12437_v50, %v13891_v47  ;;  %12456 = vtanh.f32 %v1084_v60 }
 0xd19   :  { %12458 = vtanh.f32 %v1083_v3  ;;  %v772_v3 = vld [vmem:[%s16119_s13 + $0x68] sm:$0xff] }
 0xd1a   :  { %v1164_v6 = vsel %vm85_vm1, %v1125_v63, 0.0  ;;  %12460 = vtanh.f32 %v1082_v10  ;;  %v769_v10 = vld [vmem:[%s16119_s13 + $0x50] sm:$0xff] }
 0xd1b   :  { %v12439_v54 = vpop.eup %12438  ;;  %12462 = vtanh.f32 %v1080_v18 }
 0xd1c   :  { %v1126_v56 = vmul.f32 %v12439_v54, %v13891_v47  ;;  %v12441_v58 = vpop.eup %12440  ;;  %12464 = vtanh.f32 %v1078_v25 }
 0xd1d   :  { %v12443_v43 = vpop.eup %12442  ;;  %v1117_v8 = vmul.f32 %v12441_v58, %v13891_v47 }
 0xd1e   :  { %v1167_v61 = vsel %vm85_vm1, %v1126_v56, 0.0  ;;  %v1124_v57 = vmul.f32 %v12443_v43, %v13891_v47 }
 0xd1f   :  { %v12445_v0 = vpop.eup %12444  ;;  %1168 = vadd.xlane.f32.xlu1 %v1167_v61  ;;  %v1140_v14 = vsel %vm85_vm1, %v1117_v8, 0.0 }
 0xd20   :  { %v1127_v59 = vmul.f32 %v12445_v0, %v13891_v47  ;;  %v12447_v4 = vpop.eup %12446  ;;  %v1161_v13 = vsel %vm85_vm1, %v1124_v57, 0.0  ;;  %v770_v57 = vld [vmem:[%s16119_s13 + $0x58] sm:$0xff] }
 0xd21   :  { %v12449_v9 = vpop.eup %12448  ;;  %v1115_v11 = vmul.f32 %v12447_v4, %v13891_v47 }
 0xd22   :  { %v1170_v7 = vsel %vm85_vm1, %v1127_v59, 0.0  ;;  %v12451_v12 = vpop.eup %12450  ;;  %v1123_v15 = vmul.f32 %v12449_v9, %v13891_v47  ;;  %v773_v59 = vld [vmem:[%s16119_s13 + $0x70] sm:$0xff] }
 0xd23   :  { %1165 = vadd.xlane.f32.xlu1 %v1164_v6  ;;  %1171 = vadd.xlane.f32.xlu0 %v1170_v7  ;;  %v12453_v17 = vpop.eup %12452  ;;  %v1113_v19 = vmul.f32 %v12451_v12, %v13891_v47  ;;  %v1134_v21 = vsel %vm85_vm1, %v1115_v11, 0.0 }
 0xd24   :  { %v1158_v53 = vsel %vm85_vm1, %v1123_v15, 0.0  ;;  %v1122_v22 = vmul.f32 %v12453_v17, %v13891_v47  ;;  %v12455_v23 = vpop.eup %12454  ;;  %v767_v17 = vld [vmem:[%s16119_s13 + $0x40] sm:$0xff] }
 0xd25   :  { %v12457_v26 = vpop.eup %12456  ;;  %v1128_v49 = vsel %vm85_vm1, %v1113_v19, 0.0  ;;  %v1121_v42 = vmul.f32 %v12455_v23, %v13891_v47 }
 0xd26   :  { %v1155_v1 = vsel %vm85_vm1, %v1122_v22, 0.0  ;;  %v1120_v46 = vmul.f32 %v12457_v26, %v13891_v47  ;;  %v12459_v48 = vpop.eup %12458  ;;  %v765_v22 = vld [vmem:[%s16119_s13 + $0x30] sm:$0xff] }
 0xd27   :  { %1162 = vadd.xlane.f32.xlu1 %v1161_v13  ;;  %1141 = vadd.xlane.f32.xlu0 %v1140_v14  ;;  %v1152_v44 = vsel %vm85_vm1, %v1121_v42, 0.0  ;;  %v1119_v45 = vmul.f32 %v12459_v48, %v13891_v47  ;;  %v12461_v51 = vpop.eup %12460  ;;  %v768_v13 = vld [vmem:[%s16119_s13 + $0x48] sm:$0xff]  ;;  %v762_v48 = vld [vmem:[%s16119_s13 + $0x18] sm:$0xff] }
 0xd28   :  { %v1149_v50 = vsel %vm85_vm1, %v1120_v46, 0.0  ;;  %v1118_v54 = vmul.f32 %v12461_v51, %v13891_v47  ;;  %v12463_v56 = vpop.eup %12462 }
 0xd29   :  { %v1146_v52 = vsel %vm85_vm1, %v1119_v45, 0.0  ;;  %v1116_v60 = vmul.f32 %v12463_v56, %v13891_v47  ;;  %v12465_v43 = vpop.eup %12464  ;;  %v761_v45 = vld [vmem:[%s16119_s13 + $0x10] sm:$0xff] }
 0xd2a   :  { %v1143_v58 = vsel %vm85_vm1, %v1118_v54, 0.0  ;;  %v1114_v61 = vmul.f32 %v12465_v43, %v13891_v47  ;;  %v771_v47 = vld [vmem:[%s16119_s13 + $0x60] sm:$0xff]  ;;  %v760_v54 = vld [vmem:[%s16119_s13 + $0x8] sm:$0xff] }
 0xd2b   :  { %1159 = vadd.xlane.f32.xlu1 %v1158_v53  ;;  %1135 = vadd.xlane.f32.xlu0 %v1134_v21  ;;  %v1137_v62 = vsel %vm85_vm1, %v1116_v60, 0.0 }
 0xd2c   :  { %v1131_v63 = vsel %vm85_vm1, %v1114_v61, 0.0 }
 0xd2f   :  { %1156 = vadd.xlane.f32.xlu1 %v1155_v1  ;;  %1129 = vadd.xlane.f32.xlu0 %v1128_v49  ;;  %v764_v1 = vld [vmem:[%s16119_s13 + $0x28] sm:$0xff]  ;;  %v763_v49 = vld [vmem:[%s16119_s13 + $0x20] sm:$0xff] }
 0xd33   :  { %1153 = vadd.xlane.f32.xlu1 %v1152_v44 }
 0xd37   :  { %1150 = vadd.xlane.f32.xlu1 %v1149_v50 }
 0xd3b   :  { %1147 = vadd.xlane.f32.xlu1 %v1146_v52 }
 0xd3f   :  { %1144 = vadd.xlane.f32.xlu1 %v1143_v58  ;;  %v759_v58 = vld [vmem:[%s16119_s13] sm:$0xff] }
 0xd43   :  { %1138 = vadd.xlane.f32.xlu1 %v1137_v62 }
 0xd47   :  { %1132 = vadd.xlane.f32.xlu1 %v1131_v63  ;;  %v13987_v63 = vld [vmem:[%s16118_s12] sm:$0x3] }
 0xda8   :  { %v1169_v0 = vpop.xlane.xlu1 %1168 }
 0xda9   :  { %v1186_v7 = vmul.f32 %v1169_v0, %v772_v3  ;;  %v774_v0 = vld [vmem:[%s16120_s14] sm:$0xff] }
 0xdac   :  { %v1166_v4 = vpop.xlane.xlu1 %1165  ;;  %v1172_v5 = vpop.xlane.xlu0 %1171 }
 0xdad   :  { %v1187_v6 = vmul.f32 %v1172_v5, %v773_v59  ;;  %v1185_v9 = vmul.f32 %v1166_v4, %v771_v47  ;;  %v14065_v5 = vld [vmem:[%s16109_s3 + $0x8] sm:$0xff]  ;;  %v742_v47 = vld [vmem:[%s16116_s10] sm:$0x3] }
 0xdaf   :  { %11301 = vmatpush3.msra.mxu0 %v1187_v6  ;;  %v14072_v6 = vld [vmem:[%s16109_s3] sm:$0xff] }
 0xdb0   :  { %v1163_v8 = vpop.xlane.xlu1 %1162  ;;  %11302 = vmatprep.subr.mxu0 %v13452_v24  ;;  %v1142_v23 = vpop.xlane.xlu0 %1141 }
 0xdb1   :  { %11303 = vmatpush3.msra.mxu0 %v1186_v7  ;;  %v1184_v11 = vmul.f32 %v1163_v8, %v770_v57  ;;  %v1177_v50 = vmul.f32 %v1142_v23, %v763_v49 }
 0xdb2   :  { %11304 = vmatprep.subr.mxu0 %v13452_v24 }
 0xdb3   :  { %11305 = vmatpush3.msra.mxu0 %v1185_v9 }
 0xdb4   :  { %v1160_v12 = vpop.xlane.xlu1 %1159  ;;  %11306 = vmatprep.subr.mxu0 %v13452_v24  ;;  %v1136_v46 = vpop.xlane.xlu0 %1135 }
 0xdb5   :  { %v1183_v55 = vmul.f32 %v1160_v12, %v769_v10  ;;  %11307 = vmatpush3.msra.mxu0 %v1184_v11  ;;  %v1175_v56 = vmul.f32 %v1136_v46, %v761_v45  ;;  %v13455_v10 = vmov 0   ;;  %v13457_v46 = vmov 1  }
 0xdb6   :  { %11308 = vmatprep.subr.mxu0 %v13452_v24  ;;  %12368 = vset.pattern.permute.xlu0 %v13455_v10 }
 0xdb7   :  { %11309 = vmatpush3.msra.mxu0 %v1183_v55  ;;  %12369 = vset.pattern.permute.xlu1 %v13457_v46 }
 0xdb8   :  { %v1157_v14 = vpop.xlane.xlu1 %1156  ;;  %11310 = vmatprep.subr.mxu0 %v13452_v24  ;;  %v1130_v60 = vpop.xlane.xlu0 %1129 }
 0xdb9   :  { %v1182_v15 = vmul.f32 %v1157_v14, %v768_v13  ;;  %v1173_v61 = vmul.f32 %v1130_v60, %v759_v58  ;;  %v14105_v14 = vld [vmem:[#allocation5] ss:$0 sm:$0xff] }
 0xdbb   :  { %11311 = vmatpush3.msra.mxu0 %v1182_v15  ;;  %v14110_v15 = vld [vmem:[%s16110_s4] ss:$0 sm:$0xff] }
 0xdbc   :  { %v1154_v18 = vpop.xlane.xlu1 %1153  ;;  %11312 = vmatprep.subr.mxu0 %v13452_v24 }
 0xdbd   :  { %v1181_v19 = vmul.f32 %v1154_v18, %v767_v17 }
 0xdbf   :  { %11313 = vmatpush3.msra.mxu0 %v1181_v19 }
 0xdc0   :  { %v1151_v53 = vpop.xlane.xlu1 %1150  ;;  %11314 = vmatprep.subr.mxu0 %v13452_v24 }
 0xdc1   :  { %v1180_v21 = vmul.f32 %v1151_v53, %v766_v20 }
 0xdc3   :  { %11315 = vmatpush3.msra.mxu0 %v1180_v21 }
 0xdc4   :  { %v1148_v25 = vpop.xlane.xlu1 %1147  ;;  %11316 = vmatprep.subr.mxu0 %v13452_v24 }
 0xdc5   :  { %v1179_v26 = vmul.f32 %v1148_v25, %v765_v22 }
 0xdc7   :  { %11317 = vmatpush3.msra.mxu0 %v1179_v26 }
 0xdc8   :  { %v1145_v42 = vpop.xlane.xlu1 %1144  ;;  %11318 = vmatprep.subr.mxu0 %v13452_v24 }
 0xdc9   :  { %v1178_v44 = vmul.f32 %v1145_v42, %v764_v1 }
 0xdcb   :  { %11319 = vmatpush3.msra.mxu0 %v1178_v44 }
 0xdcc   :  { %v1139_v51 = vpop.xlane.xlu1 %1138  ;;  %11320 = vmatprep.subr.mxu0 %v13452_v24 }
 0xdcd   :  { %v1176_v52 = vmul.f32 %v1139_v51, %v762_v48  ;;  %11321 = vmatpush3.msra.mxu0 %v1177_v50 }
 0xdce   :  { %11322 = vmatprep.subr.mxu0 %v13452_v24 }
 0xdcf   :  { %11323 = vmatpush3.msra.mxu0 %v1176_v52 }
 0xdd0   :  { %v1133_v43 = vpop.xlane.xlu1 %1132  ;;  %11324 = vmatprep.subr.mxu0 %v13452_v24 }
 0xdd1   :  { %v1174_v62 = vmul.f32 %v1133_v43, %v760_v54  ;;  %11325 = vmatpush3.msra.mxu0 %v1175_v56 }
 0xdd2   :  { %11326 = vmatprep.subr.mxu0 %v13452_v24 }
 0xdd3   :  { %11327 = vmatpush3.msra.mxu0 %v1174_v62 }
 0xdd4   :  { %11328 = vmatprep.subr.mxu0 %v13452_v24 }
 0xdd5   :  { %11329 = vmatpush3.msra.mxu0 %v1173_v61 }
 0xdd6   :  { %11331 = vmatmul.mubr.msk.f32.vlgmr.msra.gmra.mxu0 %vm1188_vm7, %v13987_v63  ;;  %11352 = vmatprep.subr.mxu0 %v13452_v24 }
 0xdd7   :  { %11353 = vmatpush3.msra.mxu0 %v13769_v41  ;;  %11382 = vmatprep.mubr.msk.f32.mxu0 %vm13453_vm5, %v13452_v24  ;;  %v775_v41 = vld [vmem:[%s16120_s14 + $0x8] sm:$0xff] }
 0xdd8   :  { %11354 = vmatprep.subr.mxu0 %v13452_v24 }
 0xdd9   :  { %11355 = vmatpush3.msra.mxu0 %v13763_v40  ;;  %v776_v40 = vld [vmem:[%s16120_s14 + $0x10] sm:$0xff] }
 0xdda   :  { %11356 = vmatprep.subr.mxu0 %v13452_v24 }
 0xddb   :  { %11357 = vmatpush3.msra.mxu0 %v13757_v39  ;;  %v777_v39 = vld [vmem:[%s16120_s14 + $0x18] sm:$0xff] }
 0xddc   :  { %11358 = vmatprep.subr.mxu0 %v13452_v24 }
 0xddd   :  { %11359 = vmatpush3.msra.mxu0 %v13751_v38  ;;  %v778_v38 = vld [vmem:[%s16120_s14 + $0x20] sm:$0xff] }
 0xdde   :  { %11360 = vmatprep.subr.mxu0 %v13452_v24 }
 0xddf   :  { %11361 = vmatpush3.msra.mxu0 %v13745_v37 }
 0xde0   :  { %11362 = vmatprep.subr.mxu0 %v13452_v24 }
 0xde1   :  { %11363 = vmatpush3.msra.mxu0 %v13739_v36 }
 0xde2   :  { %11364 = vmatprep.subr.mxu0 %v13452_v24 }
 0xde3   :  { %11365 = vmatpush3.msra.mxu0 %v13733_v35 }
 0xde4   :  { %11366 = vmatprep.subr.mxu0 %v13452_v24 }
 0xde5   :  { %11367 = vmatpush3.msra.mxu0 %v13727_v34 }
 0xde6   :  { %11368 = vmatprep.subr.mxu0 %v13452_v24 }
 0xde7   :  { %11369 = vmatpush3.msra.mxu0 %v13721_v33 }
 0xde8   :  { %11370 = vmatprep.subr.mxu0 %v13452_v24 }
 0xde9   :  { %11371 = vmatpush3.msra.mxu0 %v13715_v32 }
 0xdea   :  { %11372 = vmatprep.subr.mxu0 %v13452_v24 }
 0xdeb   :  { %11373 = vmatpush3.msra.mxu0 %v13709_v31 }
 0xdec   :  { %11374 = vmatprep.subr.mxu0 %v13452_v24 }
 0xded   :  { %11375 = vmatpush3.msra.mxu0 %v13703_v30 }
 0xdee   :  { %11376 = vmatprep.subr.mxu0 %v13452_v24 }
 0xdef   :  { %11377 = vmatpush3.msra.mxu0 %v13691_v28  ;;  %v781_v28 = vld [vmem:[%s16120_s14 + $0x38] sm:$0xf] }
 0xdf0   :  { %11378 = vmatprep.subr.mxu0 %v13452_v24  ;;  %11334 = vmatpush3.msk.msra.mxu1 %vm505_vm3, %v781_v28  ;;  %v13458_v28 = vmov 2  }
 0xdf1   :  { %11379 = vmatpush3.msra.mxu0 %v13685_v27  ;;  %v780_v27 = vld [vmem:[%s16120_s14 + $0x30] sm:$0xff]  ;;  %11335 = vmatprep.subr.mxu1 %v13452_v24 }
 0xdf2   :  { %11380 = vmatprep.subr.mxu0 %v13452_v24  ;;  %11336 = vmatpush3.msra.mxu1 %v780_v27 }
 0xdf3   :  { %11381 = vmatpush3.msra.mxu0 %v13674_v2  ;;  %v779_v2 = vld [vmem:[%s16120_s14 + $0x28] sm:$0xff]  ;;  %11337 = vmatprep.subr.mxu1 %v13452_v24 }
 0xdf4   :  { %11434 = vmatprep.subr.mxu0 %v13452_v24  ;;  %11338 = vmatpush3.msra.mxu1 %v779_v2 }
 0xdf5   :  { %11339 = vmatprep.subr.mxu1 %v13452_v24 }
 0xdf6   :  { %11340 = vmatpush3.msra.mxu1 %v778_v38 }
 0xdf7   :  { %11341 = vmatprep.subr.mxu1 %v13452_v24 }
 0xdf8   :  { %11342 = vmatpush3.msra.mxu1 %v777_v39 }
 0xdf9   :  { %11343 = vmatprep.subr.mxu1 %v13452_v24 }
 0xdfa   :  { %11344 = vmatpush3.msra.mxu1 %v776_v40 }
 0xdfb   :  { %11345 = vmatprep.subr.mxu1 %v13452_v24 }
 0xdfc   :  { %11346 = vmatpush3.msra.mxu1 %v775_v41 }
 0xdfd   :  { %11347 = vmatprep.subr.mxu1 %v13452_v24 }
 0xdfe   :  { %11348 = vmatpush3.msra.mxu1 %v774_v0 }
 0xdff   :  { %11385 = vmatprep.subr.mxu1 %v13452_v24 }
 0xe96   :  { %v1258_v31 = vpop.f32.mrf.mxu0 }
 0xe97   :  { %v1263_v32 = vsel %vm1262_vm8, %v1258_v31, -inf }
 0xe98   :  { %1264 = vmax.xlane.f32.xlu1 %v1263_v32  ;;  %v11332_v30 = vpop.f32.mrf.mxu0 }
 0xea9   :  { %1428 = vrot.lane.b32.xlu1 %v742_v47, %s13454_s29 }
 0xf21   :  { %v1265_v33 = vpop.xlane.xlu1 %1264 }
 0xf22   :  { %v1266_v34 = vsub.f32 %v1258_v31, %v1265_v33 }
 0xf24   :  { %v1267_v35 = vmul.f32 1.442695, %v1266_v34 }
 0xf25   :  { %v1429_v11 = vpop.permute.xlu1 %1428 }
 0xf26   :  { %12466 = vpow2.f32 %v1267_v35 }
 0xf33   :  { %v12467_v36 = vpop.eup %12466 }
 0xf34   :  { %v1269_v37 = vsel %vm1262_vm8, %v12467_v36, 0.0 }
 0xf35   :  { %1270 = vadd.xlane.f32.xlu0 %v1269_v37 }
 0xfbe   :  { %v1271_v59 = vpop.xlane.xlu0 %1270 }
 0xfbf   :  { %12468 = vrcp.f32 %v1271_v59 }
 0xfcc   :  { %v12469_v3 = vpop.eup %12468 }
 0xfcd   :  { %v14060_v4 = vmul.f32 %v12469_v3, %v12467_v36 }
 0xfcf   :  { %11350 = vmatmul.mubr.msk.f32.vlgmr.msra.gmra.mxu1 %vm1275_vm9, %v14060_v4 }
 0xfd0   :  { %11386 = vmatpush3.msra.mxu1 %v14065_v5  ;;  %11389 = vmatprep.mubr.msk.f32.mxu1 %vm13453_vm5, %v13452_v24 }
 0xfd1   :  { %11387 = vmatprep.subr.mxu1 %v13452_v24 }
 0xfd2   :  { %11388 = vmatpush3.msra.mxu1 %v14072_v6 }
 0xfd3   :  { %11390 = vmatmul.mubr.msk.f32.vlgmr.msra.gmra.mxu1 %vm85_vm1, %v13697_v29  ;;  %11392 = vmatprep.subr.mxu1 %v13452_v24 }
 0xfd4   :  { %11393 = vmatpush3.msra.mxu1 %v14065_v5  ;;  %11396 = vmatprep.mubr.msk.f32.mxu1 %vm13453_vm5, %v13452_v24 }
 0xfd5   :  { %11394 = vmatprep.subr.mxu1 %v13452_v24 }
 0xfd6   :  { %11395 = vmatpush3.msra.mxu1 %v14072_v6 }
 0xfd7   :  { %11399 = vmatprep.subr.mxu1 %v13452_v24 }
0x108f   :  { %v1349_v29 = vpop.f32.mrf.mxu1 }
0x1090   :  { %v1353_v7 = vmul.f32 %v1349_v29, %v13987_v63 }
0x1091   :  { %v11351_v57 = vpop.f32.mrf.mxu1 }
0x1092   :  { %11383 = vmatmul.mubr.msk.f32.vlgmr.msra.gmra.mxu0 %vm1188_vm7, %v1353_v7 }
0x1093   :  { %v1517_v8 = vpop.f32.mrf.mxu1  ;;  %11435 = vmatpush3.msra.mxu0 %v14065_v5  ;;  %11438 = vmatprep.mubr.msk.f32.mxu0 %vm13453_vm5, %v13452_v24 }
0x1094   :  { %11436 = vmatprep.subr.mxu0 %v13452_v24 }
0x1095   :  { %v11391_v9 = vpop.f32.mrf.mxu1  ;;  %11437 = vmatpush3.msra.mxu0 %v14072_v6 }
0x1096   :  { %11448 = vmatprep.subr.mxu0 %v13452_v24 }
0x1152   :  { %v1423_v12 = vpop.f32.mrf.mxu0 }
0x1153   :  { %v14102_v55 = vsel %vm85_vm1, %v1423_v12, %v1429_v11  ;;  %v13459_v11 = vmov 3  }
0x1154   :  { %1434 = vperm.xlu0 %12368, %v14102_v55   ;;  %v11384_v13 = vpop.f32.mrf.mxu0 }
0x1158   :  { %12371 = vset.pattern.permute.xlu0 %v13459_v11 }
0x11cf   :  { %v1435_v17 = vpop.permute.xlu0 %1434 }
0x11d0   :  { %v1443_v18 = vmul.f32 %v14105_v14, %v1435_v17 }
0x11d2   :  { %v1450_v19 = vadd.f32 %v14110_v15, %v1443_v18 }
0x11d4   :  { %v1521_v20 = vadd.f32 %v1517_v8, %v1450_v19 }
0x11d6   :  { %12470 = vtanh.f32 %v1521_v20  ;;  %v10492_v21 = vmul.f32 -1.442695, %v1521_v20 }
0x11d8   :  { %12472 = vpow2.f32 %v10492_v21 }
0x11e3   :  { %v12471_v53 = vpop.eup %12470 }
0x11e4   :  { %1531 = vrot.lane.b32.xlu1 %v12471_v53, %s13456_s0 }
0x11e5   :  { %v12473_v22 = vpop.eup %12472 }
0x11e6   :  { %v1525_v23 = vadd.f32 1.0, %v12473_v22 }
0x11e8   :  { %12474 = vrcp.f32 %v1525_v23 }
0x11f5   :  { %v12475_v25 = vpop.eup %12474 }
0x11f6   :  { %v1529_v49 = vmul.f32 %v12475_v25, %v16125_v16 }
0x1256   :  { %v1532_v26 = vpop.permute.xlu1 %1531 }
0x1257   :  { %v1534_v1 = vmul.f32 %v12475_v25, %v1532_v26 }
0x1259   :  { %1536 = vrot.lane.b32.xlu1 %v1534_v1, %s13454_s29 }
0x12cb   :  { %v1537_v42 = vpop.permute.xlu1 %1536 }
0x12cc   :  { %v1539_v44 = vadd.f32 %v1537_v42, %v1529_v49 }
0x12ce   :  { %12476 = vtanh.f32 %v1539_v44 }
0x12db   :  { %v12477_v48 = vpop.eup %12476 }
0x12dc   :  { %1542 = vrot.lane.b32.xlu1 %v12477_v48, %s13454_s29 }
0x134e   :  { %v1543_v50 = vpop.permute.xlu1 %1542 }
0x134f   :  { %v1545_v45 = vmul.f32 %v12475_v25, %v1543_v50 }
0x1351   :  { %1553 = vrot.lane.b32.xlu1 %v1545_v45, %s13451_s27 }
0x1355   :  { %1547 = vperm.xlu1 %12369, %v14102_v55  }
0x1359   :  { %12370 = vset.pattern.permute.xlu1 %v13458_v28 }
0x13c3   :  { %v1554_v51 = vpop.permute.xlu1 %1553 }
0x13c4   :  { %11397 = vmatmul.mubr.msk.f32.vlgmr.msra.gmra.mxu1 %vm85_vm1, %v1554_v51 }
0x13c5   :  { %11400 = vmatpush3.msra.mxu1 %v14065_v5  ;;  %11403 = vmatprep.mubr.msk.f32.mxu1 %vm13453_vm5, %v13452_v24 }
0x13c6   :  { %11401 = vmatprep.subr.mxu1 %v13452_v24 }
0x13c7   :  { %11402 = vmatpush3.msra.mxu1 %v14072_v6 }
0x13c8   :  { %11406 = vmatprep.subr.mxu1 %v13452_v24 }
0x13d0   :  { %v1548_v16 = vpop.permute.xlu1 %1547 }
0x13d1   :  { %v1550_v52 = vmul.f32 %v14105_v14, %v1548_v16  ;;  %v13460_v16 = vmov 4  }
0x13d3   :  { %v1551_v54 = vadd.f32 %v14110_v15, %v1550_v52 }
0x1484   :  { %v1623_v56 = vpop.f32.mrf.mxu1 }
0x1485   :  { %v1627_v58 = vadd.f32 %v1623_v56, %v1551_v54 }
0x1486   :  { %v11398_v60 = vpop.f32.mrf.mxu1 }
0x1487   :  { %12478 = vtanh.f32 %v1627_v58  ;;  %v10494_v62 = vmul.f32 -1.442695, %v1627_v58 }
0x1489   :  { %12480 = vpow2.f32 %v10494_v62 }
0x1494   :  { %v12479_v43 = vpop.eup %12478 }
0x1495   :  { %1637 = vrot.lane.b32.xlu1 %v12479_v43, %s13456_s0 }
0x1496   :  { %v12481_v61 = vpop.eup %12480 }
0x1497   :  { %v1631_v63 = vadd.f32 1.0, %v12481_v61 }
0x1499   :  { %12482 = vrcp.f32 %v1631_v63 }
0x14a6   :  { %v12483_v31 = vpop.eup %12482 }
0x14a7   :  { %v1635_v27 = vmul.f32 %v12483_v31, %v1539_v44 }
0x1507   :  { %v1638_v32 = vpop.permute.xlu1 %1637 }
0x1508   :  { %v1640_v30 = vmul.f32 %v12483_v31, %v1638_v32 }
0x150a   :  { %1642 = vrot.lane.b32.xlu1 %v1640_v30, %s13454_s29 }
0x157c   :  { %v1643_v2 = vpop.permute.xlu1 %1642 }
0x157d   :  { %v1645_v33 = vadd.f32 %v1643_v2, %v1635_v27 }
0x157f   :  { %12484 = vtanh.f32 %v1645_v33 }
0x158c   :  { %v12485_v34 = vpop.eup %12484 }
0x158d   :  { %1648 = vrot.lane.b32.xlu1 %v12485_v34, %s13454_s29 }
0x1591   :  { %1653 = vperm.xlu1 %12370, %v14102_v55  }
0x1595   :  { %12402 = vset.pattern.permute.xlu1 %v13455_v10 }
0x15ff   :  { %v1649_v35 = vpop.permute.xlu1 %1648 }
0x1600   :  { %v1651_v36 = vmul.f32 %v12483_v31, %v1649_v35 }
0x1602   :  { %1659 = vrot.lane.b32.xlu0 %v1651_v36, %s13451_s27 }
0x160c   :  { %v1654_v38 = vpop.permute.xlu1 %1653 }
0x160d   :  { %v1656_v39 = vmul.f32 %v14105_v14, %v1654_v38 }
0x160f   :  { %v1657_v40 = vadd.f32 %v14110_v15, %v1656_v39  ;;  %v13461_v39 = vmov 5  }
0x1674   :  { %v1660_v37 = vpop.permute.xlu0 %1659 }
0x1675   :  { %11404 = vmatmul.mubr.msk.f32.vlgmr.msra.gmra.mxu1 %vm85_vm1, %v1660_v37 }
0x1676   :  { %11407 = vmatpush3.msra.mxu1 %v14065_v5  ;;  %11410 = vmatprep.mubr.msk.f32.mxu1 %vm13453_vm5, %v13452_v24 }
0x1677   :  { %11408 = vmatprep.subr.mxu1 %v13452_v24 }
0x1678   :  { %11409 = vmatpush3.msra.mxu1 %v14072_v6 }
0x1679   :  { %11413 = vmatprep.subr.mxu1 %v13452_v24 }
0x1735   :  { %v1729_v41 = vpop.f32.mrf.mxu1 }
0x1736   :  { %v1733_v0 = vadd.f32 %v1729_v41, %v1657_v40 }
0x1737   :  { %v11405_v59 = vpop.f32.mrf.mxu1 }
0x1738   :  { %12486 = vtanh.f32 %v1733_v0  ;;  %v10496_v47 = vmul.f32 -1.442695, %v1733_v0 }
0x173a   :  { %12488 = vpow2.f32 %v10496_v47 }
0x1745   :  { %v12487_v3 = vpop.eup %12486 }
0x1746   :  { %1743 = vrot.lane.b32.xlu0 %v12487_v3, %s13456_s0 }
0x1747   :  { %v12489_v29 = vpop.eup %12488 }
0x1748   :  { %v1737_v7 = vadd.f32 1.0, %v12489_v29 }
0x174a   :  { %12490 = vrcp.f32 %v1737_v7 }
0x1757   :  { %v12491_v57 = vpop.eup %12490 }
0x1758   :  { %v1741_v12 = vmul.f32 %v12491_v57, %v1645_v33 }
0x17b8   :  { %v1744_v8 = vpop.permute.xlu0 %1743 }
0x17b9   :  { %v1746_v9 = vmul.f32 %v12491_v57, %v1744_v8 }
0x17bb   :  { %1748 = vrot.lane.b32.xlu1 %v1746_v9, %s13454_s29 }
0x182d   :  { %v1749_v13 = vpop.permute.xlu1 %1748 }
0x182e   :  { %v1751_v17 = vadd.f32 %v1749_v13, %v1741_v12 }
0x1830   :  { %12492 = vtanh.f32 %v1751_v17 }
0x183d   :  { %v12493_v18 = vpop.eup %12492 }
0x183e   :  { %1754 = vrot.lane.b32.xlu0 %v12493_v18, %s13454_s29 }
0x1842   :  { %1759 = vperm.xlu0 %12371, %v14102_v55  }
0x1846   :  { %12372 = vset.pattern.permute.xlu0 %v13460_v16 }
0x18b0   :  { %v1755_v19 = vpop.permute.xlu0 %1754 }
0x18b1   :  { %v1757_v20 = vmul.f32 %v12491_v57, %v1755_v19 }
0x18b3   :  { %1765 = vrot.lane.b32.xlu1 %v1757_v20, %s13451_s27 }
0x18bd   :  { %v1760_v21 = vpop.permute.xlu0 %1759 }
0x18be   :  { %v1762_v22 = vmul.f32 %v14105_v14, %v1760_v21 }
0x18c0   :  { %v1763_v23 = vadd.f32 %v14110_v15, %v1762_v22 }
0x1925   :  { %v1766_v53 = vpop.permute.xlu1 %1765 }
0x1926   :  { %11411 = vmatmul.mubr.msk.f32.vlgmr.msra.gmra.mxu1 %vm85_vm1, %v1766_v53 }
0x1927   :  { %11414 = vmatpush3.msra.mxu1 %v14065_v5  ;;  %11417 = vmatprep.mubr.msk.f32.mxu1 %vm13453_vm5, %v13452_v24 }
0x1928   :  { %11415 = vmatprep.subr.mxu1 %v13452_v24 }
0x1929   :  { %11416 = vmatpush3.msra.mxu1 %v14072_v6 }
0x192a   :  { %11420 = vmatprep.subr.mxu1 %v13452_v24 }
0x19e6   :  { %v1835_v25 = vpop.f32.mrf.mxu1 }
0x19e7   :  { %v1839_v26 = vadd.f32 %v1835_v25, %v1763_v23  ;;  %v13462_v23 = vmov 6  }
0x19e8   :  { %v11412_v1 = vpop.f32.mrf.mxu1 }
0x19e9   :  { %12494 = vtanh.f32 %v1839_v26  ;;  %v10498_v42 = vmul.f32 -1.442695, %v1839_v26 }
0x19eb   :  { %12496 = vpow2.f32 %v10498_v42 }
0x19f6   :  { %v12495_v49 = vpop.eup %12494 }
0x19f7   :  { %1849 = vrot.lane.b32.xlu1 %v12495_v49, %s13456_s0 }
0x19f8   :  { %v12497_v44 = vpop.eup %12496 }
0x19f9   :  { %v1843_v48 = vadd.f32 1.0, %v12497_v44 }
0x19fb   :  { %12498 = vrcp.f32 %v1843_v48 }
0x1a08   :  { %v12499_v50 = vpop.eup %12498 }
0x1a09   :  { %v1847_v52 = vmul.f32 %v12499_v50, %v1751_v17 }
0x1a69   :  { %v1850_v45 = vpop.permute.xlu1 %1849 }
0x1a6a   :  { %v1852_v51 = vmul.f32 %v12499_v50, %v1850_v45 }
0x1a6c   :  { %1854 = vrot.lane.b32.xlu1 %v1852_v51, %s13454_s29 }
0x1ade   :  { %v1855_v54 = vpop.permute.xlu1 %1854 }
0x1adf   :  { %v1857_v56 = vadd.f32 %v1855_v54, %v1847_v52 }
0x1ae1   :  { %12500 = vtanh.f32 %v1857_v56 }
0x1aee   :  { %v12501_v58 = vpop.eup %12500 }
0x1aef   :  { %1860 = vrot.lane.b32.xlu0 %v12501_v58, %s13454_s29 }
0x1af3   :  { %1865 = vperm.xlu0 %12372, %v14102_v55  }
0x1af7   :  { %12373 = vset.pattern.permute.xlu0 %v13461_v39 }
0x1b61   :  { %v1861_v60 = vpop.permute.xlu0 %1860 }
0x1b62   :  { %v1863_v43 = vmul.f32 %v12499_v50, %v1861_v60 }
0x1b64   :  { %1871 = vrot.lane.b32.xlu1 %v1863_v43, %s13451_s27 }
0x1b6e   :  { %v1866_v61 = vpop.permute.xlu0 %1865 }
0x1b6f   :  { %v1868_v63 = vmul.f32 %v14105_v14, %v1866_v61 }
0x1b71   :  { %v1869_v31 = vadd.f32 %v14110_v15, %v1868_v63 }
0x1bd6   :  { %v1872_v62 = vpop.permute.xlu1 %1871 }
0x1bd7   :  { %11418 = vmatmul.mubr.msk.f32.vlgmr.msra.gmra.mxu1 %vm85_vm1, %v1872_v62 }
0x1bd8   :  { %11421 = vmatpush3.msra.mxu1 %v14065_v5  ;;  %11424 = vmatprep.mubr.msk.f32.mxu1 %vm13453_vm5, %v13452_v24 }
0x1bd9   :  { %11422 = vmatprep.subr.mxu1 %v13452_v24 }
0x1bda   :  { %11423 = vmatpush3.msra.mxu1 %v14072_v6 }
0x1bdb   :  { %11427 = vmatprep.subr.mxu1 %v13452_v24 }
0x1c97   :  { %v1941_v32 = vpop.f32.mrf.mxu1 }
0x1c98   :  { %v1945_v30 = vadd.f32 %v1941_v32, %v1869_v31  ;;  %v13463_v32 = vmov 7  }
0x1c99   :  { %v11419_v27 = vpop.f32.mrf.mxu1 }
0x1c9a   :  { %12502 = vtanh.f32 %v1945_v30  ;;  %v10500_v33 = vmul.f32 -1.442695, %v1945_v30 }
0x1c9c   :  { %12504 = vpow2.f32 %v10500_v33 }
0x1ca7   :  { %v12503_v2 = vpop.eup %12502 }
0x1ca8   :  { %1955 = vrot.lane.b32.xlu1 %v12503_v2, %s13456_s0 }
0x1ca9   :  { %v12505_v34 = vpop.eup %12504 }
0x1caa   :  { %v1949_v35 = vadd.f32 1.0, %v12505_v34 }
0x1cac   :  { %12506 = vrcp.f32 %v1949_v35 }
0x1cb9   :  { %v12507_v36 = vpop.eup %12506 }
0x1cba   :  { %v1953_v40 = vmul.f32 %v12507_v36, %v1857_v56 }
0x1d1a   :  { %v1956_v37 = vpop.permute.xlu1 %1955 }
0x1d1b   :  { %v1958_v38 = vmul.f32 %v12507_v36, %v1956_v37 }
0x1d1d   :  { %1960 = vrot.lane.b32.xlu1 %v1958_v38, %s13454_s29 }
0x1d8f   :  { %v1961_v41 = vpop.permute.xlu1 %1960 }
0x1d90   :  { %v1963_v0 = vadd.f32 %v1961_v41, %v1953_v40 }
0x1d92   :  { %12508 = vtanh.f32 %v1963_v0 }
0x1d9f   :  { %v12509_v59 = vpop.eup %12508 }
0x1da0   :  { %1966 = vrot.lane.b32.xlu0 %v12509_v59, %s13454_s29 }
0x1da4   :  { %1971 = vperm.xlu0 %12373, %v14102_v55  }
0x1da8   :  { %12374 = vset.pattern.permute.xlu0 %v13462_v23 }
0x1e12   :  { %v1967_v3 = vpop.permute.xlu0 %1966 }
0x1e13   :  { %v1969_v47 = vmul.f32 %v12507_v36, %v1967_v3 }
0x1e15   :  { %1977 = vrot.lane.b32.xlu1 %v1969_v47, %s13451_s27 }
0x1e1f   :  { %v1972_v7 = vpop.permute.xlu0 %1971 }
0x1e20   :  { %v1974_v57 = vmul.f32 %v14105_v14, %v1972_v7 }
0x1e22   :  { %v1975_v8 = vadd.f32 %v14110_v15, %v1974_v57 }
0x1e87   :  { %v1978_v29 = vpop.permute.xlu1 %1977 }
0x1e88   :  { %11425 = vmatmul.mubr.msk.f32.vlgmr.msra.gmra.mxu1 %vm85_vm1, %v1978_v29 }
0x1e89   :  { %11428 = vmatpush3.msra.mxu1 %v14065_v5  ;;  %11431 = vmatprep.mubr.msk.f32.mxu1 %vm13453_vm5, %v13452_v24 }
0x1e8a   :  { %11429 = vmatprep.subr.mxu1 %v13452_v24 }
0x1e8b   :  { %11430 = vmatpush3.msra.mxu1 %v14072_v6 }
0x1e8c   :  { %11441 = vmatprep.subr.mxu1 %v13452_v24 }
0x1f48   :  { %v2047_v9 = vpop.f32.mrf.mxu1 }
0x1f49   :  { %v2051_v12 = vadd.f32 %v2047_v9, %v1975_v8 }
0x1f4a   :  { %v11426_v13 = vpop.f32.mrf.mxu1 }
0x1f4b   :  { %12510 = vtanh.f32 %v2051_v12  ;;  %v10502_v18 = vmul.f32 -1.442695, %v2051_v12  ;;  %v13464_v12 = vmov 8  }
0x1f4d   :  { %12512 = vpow2.f32 %v10502_v18 }
0x1f58   :  { %v12511_v17 = vpop.eup %12510 }
0x1f59   :  { %2061 = vrot.lane.b32.xlu1 %v12511_v17, %s13456_s0 }
0x1f5a   :  { %v12513_v19 = vpop.eup %12512 }
0x1f5b   :  { %v2055_v20 = vadd.f32 1.0, %v12513_v19 }
0x1f5d   :  { %12514 = vrcp.f32 %v2055_v20 }
0x1f6a   :  { %v12515_v53 = vpop.eup %12514 }
0x1f6b   :  { %v2059_v25 = vmul.f32 %v12515_v53, %v1963_v0 }
0x1fcb   :  { %v2062_v21 = vpop.permute.xlu1 %2061 }
0x1fcc   :  { %v2064_v22 = vmul.f32 %v12515_v53, %v2062_v21 }
0x1fce   :  { %2066 = vrot.lane.b32.xlu1 %v2064_v22, %s13454_s29 }
0x2040   :  { %v2067_v26 = vpop.permute.xlu1 %2066 }
0x2041   :  { %v2069_v1 = vadd.f32 %v2067_v26, %v2059_v25 }
0x2043   :  { %12516 = vtanh.f32 %v2069_v1 }
0x2050   :  { %v12517_v49 = vpop.eup %12516 }
0x2051   :  { %2072 = vrot.lane.b32.xlu0 %v12517_v49, %s13454_s29 }
0x2055   :  { %2077 = vperm.xlu0 %12374, %v14102_v55  }
0x2059   :  { %12375 = vset.pattern.permute.xlu0 %v13463_v32 }
0x20c3   :  { %v2073_v42 = vpop.permute.xlu0 %2072 }
0x20c4   :  { %v2075_v44 = vmul.f32 %v12515_v53, %v2073_v42 }
0x20c6   :  { %2083 = vrot.lane.b32.xlu1 %v2075_v44, %s13451_s27 }
0x20d0   :  { %v2078_v50 = vpop.permute.xlu0 %2077 }
0x20d1   :  { %v2080_v45 = vmul.f32 %v14105_v14, %v2078_v50 }
0x20d3   :  { %v2081_v51 = vadd.f32 %v14110_v15, %v2080_v45 }
0x2138   :  { %v2084_v48 = vpop.permute.xlu1 %2083 }
0x2139   :  { %11432 = vmatmul.mubr.msk.f32.vlgmr.msra.gmra.mxu1 %vm85_vm1, %v2084_v48 }
0x213a   :  { %11442 = vmatpush3.msra.mxu1 %v14065_v5  ;;  %11445 = vmatprep.mubr.msk.f32.mxu1 %vm13453_vm5, %v13452_v24 }
0x213b   :  { %11443 = vmatprep.subr.mxu1 %v13452_v24 }
0x213c   :  { %11444 = vmatpush3.msra.mxu1 %v14072_v6 }
0x213d   :  { %11455 = vmatprep.subr.mxu1 %v13452_v24 }
0x21f9   :  { %v2153_v52 = vpop.f32.mrf.mxu1 }
0x21fa   :  { %v2157_v54 = vadd.f32 %v2153_v52, %v2081_v51 }
0x21fb   :  { %v11433_v56 = vpop.f32.mrf.mxu1 }
0x21fc   :  { %12518 = vtanh.f32 %v2157_v54  ;;  %v10504_v60 = vmul.f32 -1.442695, %v2157_v54  ;;  %v13465_v56 = vmov 9  }
0x21fe   :  { %12520 = vpow2.f32 %v10504_v60 }
0x2209   :  { %v12519_v58 = vpop.eup %12518 }
0x220a   :  { %2167 = vrot.lane.b32.xlu1 %v12519_v58, %s13456_s0 }
0x220b   :  { %v12521_v43 = vpop.eup %12520 }
0x220c   :  { %v2161_v62 = vadd.f32 1.0, %v12521_v43 }
0x220e   :  { %12522 = vrcp.f32 %v2161_v62 }
0x221b   :  { %v12523_v61 = vpop.eup %12522 }
0x221c   :  { %v2165_v30 = vmul.f32 %v12523_v61, %v2069_v1 }
0x227c   :  { %v2168_v63 = vpop.permute.xlu1 %2167 }
0x227d   :  { %v2170_v31 = vmul.f32 %v12523_v61, %v2168_v63 }
0x227f   :  { %2172 = vrot.lane.b32.xlu1 %v2170_v31, %s13454_s29 }
0x22f1   :  { %v2173_v27 = vpop.permute.xlu1 %2172 }
0x22f2   :  { %v2175_v2 = vadd.f32 %v2173_v27, %v2165_v30 }
0x22f4   :  { %12524 = vtanh.f32 %v2175_v2 }
0x2301   :  { %v12525_v33 = vpop.eup %12524 }
0x2302   :  { %2178 = vrot.lane.b32.xlu0 %v12525_v33, %s13454_s29 }
0x2306   :  { %2183 = vperm.xlu0 %12375, %v14102_v55  }
0x230a   :  { %12376 = vset.pattern.permute.xlu0 %v13464_v12 }
0x2374   :  { %v2179_v34 = vpop.permute.xlu0 %2178 }
0x2375   :  { %v2181_v35 = vmul.f32 %v12523_v61, %v2179_v34 }
0x2377   :  { %2189 = vrot.lane.b32.xlu1 %v2181_v35, %s13451_s27 }
0x2381   :  { %v2184_v37 = vpop.permute.xlu0 %2183 }
0x2382   :  { %v2186_v38 = vmul.f32 %v14105_v14, %v2184_v37 }
0x2384   :  { %v2187_v40 = vadd.f32 %v14110_v15, %v2186_v38 }
0x23e9   :  { %v2190_v36 = vpop.permute.xlu1 %2189 }
0x23ea   :  { %11439 = vmatmul.mubr.msk.f32.vlgmr.msra.gmra.mxu0 %vm85_vm1, %v2190_v36 }
0x23eb   :  { %11449 = vmatpush3.msra.mxu0 %v14065_v5  ;;  %11452 = vmatprep.mubr.msk.f32.mxu0 %vm13453_vm5, %v13452_v24 }
0x23ec   :  { %11450 = vmatprep.subr.mxu0 %v13452_v24 }
0x23ed   :  { %11451 = vmatpush3.msra.mxu0 %v14072_v6 }
0x23ee   :  { %11462 = vmatprep.subr.mxu0 %v13452_v24 }
0x24aa   :  { %v2259_v41 = vpop.f32.mrf.mxu0 }
0x24ab   :  { %v2263_v0 = vadd.f32 %v2259_v41, %v2187_v40 }
0x24ac   :  { %v11440_v59 = vpop.f32.mrf.mxu0 }
0x24ad   :  { %12526 = vtanh.f32 %v2263_v0  ;;  %v10506_v47 = vmul.f32 -1.442695, %v2263_v0 }
0x24af   :  { %12528 = vpow2.f32 %v10506_v47 }
0x24ba   :  { %v12527_v3 = vpop.eup %12526 }
0x24bb   :  { %2273 = vrot.lane.b32.xlu1 %v12527_v3, %s13456_s0  ;;  %v13466_v3 = vmov 10  }
0x24bc   :  { %v12529_v29 = vpop.eup %12528 }
0x24bd   :  { %v2267_v7 = vadd.f32 1.0, %v12529_v29 }
0x24bf   :  { %12530 = vrcp.f32 %v2267_v7 }
0x24cc   :  { %v12531_v57 = vpop.eup %12530 }
0x24cd   :  { %v2271_v13 = vmul.f32 %v12531_v57, %v2175_v2 }
0x252d   :  { %v2274_v8 = vpop.permute.xlu1 %2273 }
0x252e   :  { %v2276_v9 = vmul.f32 %v12531_v57, %v2274_v8 }
0x2530   :  { %2278 = vrot.lane.b32.xlu1 %v2276_v9, %s13454_s29 }
0x25a2   :  { %v2279_v17 = vpop.permute.xlu1 %2278 }
0x25a3   :  { %v2281_v18 = vadd.f32 %v2279_v17, %v2271_v13 }
0x25a5   :  { %12532 = vtanh.f32 %v2281_v18 }
0x25b2   :  { %v12533_v19 = vpop.eup %12532 }
0x25b3   :  { %2284 = vrot.lane.b32.xlu0 %v12533_v19, %s13454_s29 }
0x25b7   :  { %2289 = vperm.xlu0 %12376, %v14102_v55  }
0x25bb   :  { %12377 = vset.pattern.permute.xlu0 %v13465_v56 }
0x2625   :  { %v2285_v20 = vpop.permute.xlu0 %2284 }
0x2626   :  { %v2287_v53 = vmul.f32 %v12531_v57, %v2285_v20 }
0x2628   :  { %2295 = vrot.lane.b32.xlu1 %v2287_v53, %s13451_s27 }
0x2632   :  { %v2290_v22 = vpop.permute.xlu0 %2289 }
0x2633   :  { %v2292_v25 = vmul.f32 %v14105_v14, %v2290_v22 }
0x2635   :  { %v2293_v26 = vadd.f32 %v14110_v15, %v2292_v25 }
0x269a   :  { %v2296_v21 = vpop.permute.xlu1 %2295 }
0x269b   :  { %11446 = vmatmul.mubr.msk.f32.vlgmr.msra.gmra.mxu1 %vm85_vm1, %v2296_v21 }
0x269c   :  { %11456 = vmatpush3.msra.mxu1 %v14065_v5  ;;  %11459 = vmatprep.mubr.msk.f32.mxu1 %vm13453_vm5, %v13452_v24 }
0x269d   :  { %11457 = vmatprep.subr.mxu1 %v13452_v24 }
0x269e   :  { %11458 = vmatpush3.msra.mxu1 %v14072_v6 }
0x269f   :  { %11469 = vmatprep.subr.mxu1 %v13452_v24 }
0x275b   :  { %v2365_v1 = vpop.f32.mrf.mxu1 }
0x275c   :  { %v2369_v49 = vadd.f32 %v2365_v1, %v2293_v26 }
0x275d   :  { %v11447_v42 = vpop.f32.mrf.mxu1 }
0x275e   :  { %12534 = vtanh.f32 %v2369_v49  ;;  %v10508_v48 = vmul.f32 -1.442695, %v2369_v49 }
0x2760   :  { %12536 = vpow2.f32 %v10508_v48  ;;  %v13467_v48 = vmov 11  }
0x276b   :  { %v12535_v44 = vpop.eup %12534 }
0x276c   :  { %2379 = vrot.lane.b32.xlu1 %v12535_v44, %s13456_s0 }
0x276d   :  { %v12537_v50 = vpop.eup %12536 }
0x276e   :  { %v2373_v45 = vadd.f32 1.0, %v12537_v50 }
0x2770   :  { %12538 = vrcp.f32 %v2373_v45 }
0x277d   :  { %v12539_v51 = vpop.eup %12538 }
0x277e   :  { %v2377_v58 = vmul.f32 %v12539_v51, %v2281_v18 }
0x27de   :  { %v2380_v52 = vpop.permute.xlu1 %2379 }
0x27df   :  { %v2382_v54 = vmul.f32 %v12539_v51, %v2380_v52 }
0x27e1   :  { %2384 = vrot.lane.b32.xlu1 %v2382_v54, %s13454_s29 }
0x2853   :  { %v2385_v60 = vpop.permute.xlu1 %2384 }
0x2854   :  { %v2387_v43 = vadd.f32 %v2385_v60, %v2377_v58 }
0x2856   :  { %12540 = vtanh.f32 %v2387_v43 }
0x2863   :  { %v12541_v62 = vpop.eup %12540 }
0x2864   :  { %2390 = vrot.lane.b32.xlu0 %v12541_v62, %s13454_s29 }
0x2868   :  { %2395 = vperm.xlu0 %12377, %v14102_v55  }
0x286c   :  { %12378 = vset.pattern.permute.xlu0 %v13466_v3 }
0x28d6   :  { %v2391_v61 = vpop.permute.xlu0 %2390 }
0x28d7   :  { %v2393_v63 = vmul.f32 %v12539_v51, %v2391_v61 }
0x28d9   :  { %2401 = vrot.lane.b32.xlu1 %v2393_v63, %s13451_s27 }
0x28e3   :  { %v2396_v30 = vpop.permute.xlu0 %2395 }
0x28e4   :  { %v2398_v27 = vmul.f32 %v14105_v14, %v2396_v30 }
0x28e6   :  { %v2399_v2 = vadd.f32 %v14110_v15, %v2398_v27 }
0x294b   :  { %v2402_v31 = vpop.permute.xlu1 %2401 }
0x294c   :  { %11453 = vmatmul.mubr.msk.f32.vlgmr.msra.gmra.mxu0 %vm85_vm1, %v2402_v31 }
0x294d   :  { %11463 = vmatpush3.msra.mxu0 %v14065_v5  ;;  %11466 = vmatprep.mubr.msk.f32.mxu0 %vm13453_vm5, %v13452_v24 }
0x294e   :  { %11464 = vmatprep.subr.mxu0 %v13452_v24 }
0x294f   :  { %11465 = vmatpush3.msra.mxu0 %v14072_v6 }
0x2950   :  { %11476 = vmatprep.subr.mxu0 %v13452_v24 }
0x2a0c   :  { %v2471_v33 = vpop.f32.mrf.mxu0 }
0x2a0d   :  { %v2475_v34 = vadd.f32 %v2471_v33, %v2399_v2 }
0x2a0e   :  { %v11454_v35 = vpop.f32.mrf.mxu0 }
0x2a0f   :  { %12542 = vtanh.f32 %v2475_v34  ;;  %v10510_v37 = vmul.f32 -1.442695, %v2475_v34 }
0x2a11   :  { %12544 = vpow2.f32 %v10510_v37 }
0x2a1c   :  { %v12543_v36 = vpop.eup %12542 }
0x2a1d   :  { %2485 = vrot.lane.b32.xlu1 %v12543_v36, %s13456_s0 }
0x2a1e   :  { %v12545_v38 = vpop.eup %12544 }
0x2a1f   :  { %v2479_v40 = vadd.f32 1.0, %v12545_v38  ;;  %v13468_v38 = vmov 12  }
0x2a21   :  { %12546 = vrcp.f32 %v2479_v40 }
0x2a2e   :  { %v12547_v41 = vpop.eup %12546 }
0x2a2f   :  { %v2483_v47 = vmul.f32 %v12547_v41, %v2387_v43 }
0x2a8f   :  { %v2486_v0 = vpop.permute.xlu1 %2485 }
0x2a90   :  { %v2488_v59 = vmul.f32 %v12547_v41, %v2486_v0 }
0x2a92   :  { %2490 = vrot.lane.b32.xlu1 %v2488_v59, %s13454_s29 }
0x2b04   :  { %v2491_v29 = vpop.permute.xlu1 %2490 }
0x2b05   :  { %v2493_v7 = vadd.f32 %v2491_v29, %v2483_v47 }
0x2b07   :  { %12548 = vtanh.f32 %v2493_v7 }
0x2b14   :  { %v12549_v57 = vpop.eup %12548 }
0x2b15   :  { %2496 = vrot.lane.b32.xlu0 %v12549_v57, %s13454_s29 }
0x2b19   :  { %2501 = vperm.xlu0 %12378, %v14102_v55  }
0x2b1d   :  { %12379 = vset.pattern.permute.xlu0 %v13467_v48 }
0x2b87   :  { %v2497_v8 = vpop.permute.xlu0 %2496 }
0x2b88   :  { %v2499_v9 = vmul.f32 %v12547_v41, %v2497_v8 }
0x2b8a   :  { %2507 = vrot.lane.b32.xlu1 %v2499_v9, %s13451_s27 }
0x2b94   :  { %v2502_v17 = vpop.permute.xlu0 %2501 }
0x2b95   :  { %v2504_v18 = vmul.f32 %v14105_v14, %v2502_v17 }
0x2b97   :  { %v2505_v19 = vadd.f32 %v14110_v15, %v2504_v18 }
0x2bfc   :  { %v2508_v13 = vpop.permute.xlu1 %2507 }
0x2bfd   :  { %11460 = vmatmul.mubr.msk.f32.vlgmr.msra.gmra.mxu1 %vm85_vm1, %v2508_v13 }
0x2bfe   :  { %11470 = vmatpush3.msra.mxu1 %v14065_v5  ;;  %11473 = vmatprep.mubr.msk.f32.mxu1 %vm13453_vm5, %v13452_v24 }
0x2bff   :  { %11471 = vmatprep.subr.mxu1 %v13452_v24 }
0x2c00   :  { %11472 = vmatpush3.msra.mxu1 %v14072_v6 }
0x2c01   :  { %11483 = vmatprep.subr.mxu1 %v13452_v24 }
0x2cbd   :  { %v2577_v20 = vpop.f32.mrf.mxu1 }
0x2cbe   :  { %v2581_v53 = vadd.f32 %v2577_v20, %v2505_v19 }
0x2cbf   :  { %v11461_v21 = vpop.f32.mrf.mxu1 }
0x2cc0   :  { %12550 = vtanh.f32 %v2581_v53  ;;  %v10512_v25 = vmul.f32 -1.442695, %v2581_v53 }
0x2cc2   :  { %12552 = vpow2.f32 %v10512_v25  ;;  %v13469_v25 = vmov 13  }
0x2ccd   :  { %v12551_v22 = vpop.eup %12550 }
0x2cce   :  { %2591 = vrot.lane.b32.xlu1 %v12551_v22, %s13456_s0 }
0x2ccf   :  { %v12553_v26 = vpop.eup %12552 }
0x2cd0   :  { %v2585_v1 = vadd.f32 1.0, %v12553_v26 }
0x2cd2   :  { %12554 = vrcp.f32 %v2585_v1 }
0x2cdf   :  { %v12555_v49 = vpop.eup %12554 }
0x2ce0   :  { %v2589_v50 = vmul.f32 %v12555_v49, %v2493_v7 }
0x2d40   :  { %v2592_v42 = vpop.permute.xlu1 %2591 }
0x2d41   :  { %v2594_v44 = vmul.f32 %v12555_v49, %v2592_v42 }
0x2d43   :  { %2596 = vrot.lane.b32.xlu1 %v2594_v44, %s13454_s29 }
0x2db5   :  { %v2597_v45 = vpop.permute.xlu1 %2596 }
0x2db6   :  { %v2599_v51 = vadd.f32 %v2597_v45, %v2589_v50 }
0x2db8   :  { %12556 = vtanh.f32 %v2599_v51 }
0x2dc5   :  { %v12557_v52 = vpop.eup %12556 }
0x2dc6   :  { %2602 = vrot.lane.b32.xlu0 %v12557_v52, %s13454_s29  ;;  %v14315_v52 = vld [vmem:[%s16109_s3] sm:$0xff] }
0x2dca   :  { %2607 = vperm.xlu0 %12379, %v14102_v55  }
0x2dce   :  { %12380 = vset.pattern.permute.xlu0 %v13468_v38 }
0x2e38   :  { %v2603_v54 = vpop.permute.xlu0 %2602 }
0x2e39   :  { %v2605_v58 = vmul.f32 %v12555_v49, %v2603_v54 }
0x2e3b   :  { %2613 = vrot.lane.b32.xlu1 %v2605_v58, %s13451_s27 }
0x2e45   :  { %v2608_v43 = vpop.permute.xlu0 %2607 }
0x2e46   :  { %v2610_v62 = vmul.f32 %v14105_v14, %v2608_v43 }
0x2e48   :  { %v2611_v61 = vadd.f32 %v14110_v15, %v2610_v62 }
0x2ead   :  { %v2614_v60 = vpop.permute.xlu1 %2613 }
0x2eae   :  { %11467 = vmatmul.mubr.msk.f32.vlgmr.msra.gmra.mxu0 %vm85_vm1, %v2614_v60 }
0x2eaf   :  { %11477 = vmatpush3.msra.mxu0 %v14065_v5  ;;  %11480 = vmatprep.mubr.msk.f32.mxu0 %vm13453_vm5, %v13452_v24 }
0x2eb0   :  { %11478 = vmatprep.subr.mxu0 %v13452_v24 }
0x2eb1   :  { %11479 = vmatpush3.msra.mxu0 %v14072_v6 }
0x2eb2   :  { %11490 = vmatprep.subr.mxu0 %v13452_v24 }
0x2f6e   :  { %v2683_v63 = vpop.f32.mrf.mxu0 }
0x2f6f   :  { %v2687_v31 = vadd.f32 %v2683_v63, %v2611_v61 }
0x2f70   :  { %v11468_v30 = vpop.f32.mrf.mxu0 }
0x2f71   :  { %12558 = vtanh.f32 %v2687_v31  ;;  %v10514_v2 = vmul.f32 -1.442695, %v2687_v31 }
0x2f73   :  { %12560 = vpow2.f32 %v10514_v2 }
0x2f7e   :  { %v12559_v27 = vpop.eup %12558 }
0x2f7f   :  { %2697 = vrot.lane.b32.xlu1 %v12559_v27, %s13456_s0 }
0x2f80   :  { %v12561_v33 = vpop.eup %12560 }
0x2f81   :  { %v2691_v34 = vadd.f32 1.0, %v12561_v33 }
0x2f83   :  { %12562 = vrcp.f32 %v2691_v34 }
0x2f90   :  { %v12563_v35 = vpop.eup %12562 }
0x2f91   :  { %v2695_v40 = vmul.f32 %v12563_v35, %v2599_v51  ;;  %v14306_v51 = vld [vmem:[%s16109_s3 + $0x8] sm:$0xff] }
0x2ff1   :  { %v2698_v36 = vpop.permute.xlu1 %2697 }
0x2ff2   :  { %v2700_v37 = vmul.f32 %v12563_v35, %v2698_v36 }
0x2ff4   :  { %2702 = vrot.lane.b32.xlu1 %v2700_v37, %s13454_s29 }
0x3066   :  { %v2703_v41 = vpop.permute.xlu1 %2702 }
0x3067   :  { %v2705_v0 = vadd.f32 %v2703_v41, %v2695_v40 }
0x3069   :  { %12564 = vtanh.f32 %v2705_v0 }
0x3076   :  { %v12565_v59 = vpop.eup %12564 }
0x3077   :  { %2708 = vrot.lane.b32.xlu0 %v12565_v59, %s13454_s29 }
0x307b   :  { %2713 = vperm.xlu0 %12380, %v14102_v55  }
0x307f   :  { %12381 = vset.pattern.permute.xlu0 %v13469_v25 }
0x30e9   :  { %v2709_v47 = vpop.permute.xlu0 %2708 }
0x30ea   :  { %v2711_v29 = vmul.f32 %v12563_v35, %v2709_v47  ;;  %v14334_v47 = vld [vmem:[#allocation5] ss:$0 sm:$0xff] }
0x30ec   :  { %2719 = vrot.lane.b32.xlu1 %v2711_v29, %s13451_s27 }
0x30f6   :  { %v2714_v57 = vpop.permute.xlu0 %2713 }
0x30f7   :  { %v2716_v8 = vmul.f32 %v14105_v14, %v2714_v57 }
0x30f9   :  { %v2717_v9 = vadd.f32 %v14110_v15, %v2716_v8 }
0x315e   :  { %v2720_v7 = vpop.permute.xlu1 %2719 }
0x315f   :  { %11474 = vmatmul.mubr.msk.f32.vlgmr.msra.gmra.mxu1 %vm85_vm1, %v2720_v7  ;;  %v14340_v7 = vld [vmem:[%s16110_s4] ss:$0 sm:$0xff] }
0x3160   :  { %11484 = vmatpush3.msra.mxu1 %v14065_v5  ;;  %11487 = vmatprep.mubr.msk.f32.mxu1 %vm13453_vm5, %v13452_v24 }
0x3161   :  { %11485 = vmatprep.subr.mxu1 %v13452_v24 }
0x3162   :  { %11486 = vmatpush3.msra.mxu1 %v14072_v6 }
0x3163   :  { %11497 = vmatprep.subr.mxu1 %v13452_v24 }
0x321f   :  { %v2789_v13 = vpop.f32.mrf.mxu1 }
0x3220   :  { %v2793_v17 = vadd.f32 %v2789_v13, %v2717_v9 }
0x3221   :  { %v11475_v18 = vpop.f32.mrf.mxu1 }
0x3222   :  { %12566 = vtanh.f32 %v2793_v17  ;;  %v10516_v5 = vmul.f32 -1.442695, %v2793_v17 }
0x3224   :  { %12568 = vpow2.f32 %v10516_v5 }
0x322f   :  { %v12567_v19 = vpop.eup %12566 }
0x3230   :  { %2803 = vrot.lane.b32.xlu1 %v12567_v19, %s13456_s0 }
0x3231   :  { %v12569_v20 = vpop.eup %12568 }
0x3232   :  { %v2797_v53 = vadd.f32 1.0, %v12569_v20 }
0x3234   :  { %12570 = vrcp.f32 %v2797_v53 }
0x3241   :  { %v12571_v6 = vpop.eup %12570 }
0x3242   :  { %v2801_v26 = vmul.f32 %v12571_v6, %v2705_v0 }
0x32a2   :  { %v2804_v21 = vpop.permute.xlu1 %2803 }
0x32a3   :  { %v2806_v22 = vmul.f32 %v12571_v6, %v2804_v21  ;;  %v13471_v21 = vmov 15  }
0x32a5   :  { %2808 = vrot.lane.b32.xlu1 %v2806_v22, %s13454_s29 }
0x3317   :  { %v2809_v1 = vpop.permute.xlu1 %2808 }
0x3318   :  { %v2811_v49 = vadd.f32 %v2809_v1, %v2801_v26 }
0x331a   :  { %12572 = vtanh.f32 %v2811_v49 }
0x3327   :  { %v12573_v42 = vpop.eup %12572 }
0x3328   :  { %2814 = vrot.lane.b32.xlu0 %v12573_v42, %s13454_s29 }
0x332c   :  { %2819 = vperm.xlu0 %12381, %v14102_v55  }
0x339a   :  { %v2815_v44 = vpop.permute.xlu0 %2814 }
0x339b   :  { %v2817_v50 = vmul.f32 %v12571_v6, %v2815_v44 }
0x339d   :  { %2825 = vrot.lane.b32.xlu1 %v2817_v50, %s13451_s27 }
0x33a7   :  { %v2820_v54 = vpop.permute.xlu0 %2819 }
0x33a8   :  { %v2822_v58 = vmul.f32 %v14105_v14, %v2820_v54  ;;  %v13470_v14 = vmov 14   ;;  %v13121_v54 = vld [vmem:[%s16112_s6] sm:$0xff] }
0x33a9   :  { %12382 = vset.pattern.permute.xlu0 %v13470_v14 }
0x33aa   :  { %v2823_v60 = vadd.f32 %v14110_v15, %v2822_v58 }
0x340f   :  { %v2826_v45 = vpop.permute.xlu1 %2825 }
0x3410   :  { %11481 = vmatmul.mubr.msk.f32.vlgmr.msra.gmra.mxu0 %vm85_vm1, %v2826_v45  ;;  %v13120_v45 = vld [vmem:[%s16112_s6 + $0x8] sm:$0xff] }
0x3411   :  { %11491 = vmatpush3.msra.mxu0 %v14306_v51  ;;  %11494 = vmatprep.mubr.msk.f32.mxu0 %vm13453_vm5, %v13452_v24 }
0x3412   :  { %11492 = vmatprep.subr.mxu0 %v13452_v24 }
0x3413   :  { %11493 = vmatpush3.msra.mxu0 %v14315_v52 }
0x3414   :  { %11504 = vmatprep.subr.mxu0 %v13452_v24 }
0x34d0   :  { %v2895_v43 = vpop.f32.mrf.mxu0 }
0x34d1   :  { %v2899_v62 = vadd.f32 %v2895_v43, %v2823_v60 }
0x34d2   :  { %v11482_v61 = vpop.f32.mrf.mxu0 }
0x34d3   :  { %12574 = vtanh.f32 %v2899_v62  ;;  %v10518_v31 = vmul.f32 -1.442695, %v2899_v62 }
0x34d5   :  { %12576 = vpow2.f32 %v10518_v31 }
0x34e0   :  { %v12575_v63 = vpop.eup %12574 }
0x34e1   :  { %2909 = vrot.lane.b32.xlu1 %v12575_v63, %s13456_s0 }
0x34e2   :  { %v12577_v30 = vpop.eup %12576 }
0x34e3   :  { %v2903_v27 = vadd.f32 1.0, %v12577_v30 }
0x34e5   :  { %12578 = vrcp.f32 %v2903_v27 }
0x34f2   :  { %v12579_v2 = vpop.eup %12578 }
0x34f3   :  { %v2907_v15 = vmul.f32 %v12579_v2, %v2811_v49 }
0x3553   :  { %v2910_v33 = vpop.permute.xlu1 %2909 }
0x3554   :  { %v2912_v34 = vmul.f32 %v12579_v2, %v2910_v33 }
0x3556   :  { %2914 = vrot.lane.b32.xlu1 %v2912_v34, %s13454_s29 }
0x35c8   :  { %v2915_v35 = vpop.permute.xlu1 %2914 }
0x35c9   :  { %v2917_v36 = vadd.f32 %v2915_v35, %v2907_v15  ;;  %v13472_v35 = vmov 16  }
0x35cb   :  { %12580 = vtanh.f32 %v2917_v36 }
0x35d8   :  { %v12581_v37 = vpop.eup %12580 }
0x35d9   :  { %2920 = vrot.lane.b32.xlu0 %v12581_v37, %s13454_s29 }
0x35dd   :  { %2925 = vperm.xlu0 %12382, %v14102_v55  }
0x35e1   :  { %12383 = vset.pattern.permute.xlu0 %v13471_v21 }
0x364b   :  { %v2921_v40 = vpop.permute.xlu0 %2920 }
0x364c   :  { %v2923_v41 = vmul.f32 %v12579_v2, %v2921_v40 }
0x364e   :  { %2931 = vrot.lane.b32.xlu1 %v2923_v41, %s13451_s27 }
0x3658   :  { %v2926_v59 = vpop.permute.xlu0 %2925 }
0x3659   :  { %v2928_v29 = vmul.f32 %v14334_v47, %v2926_v59 }
0x365b   :  { %v2929_v57 = vadd.f32 %v14340_v7, %v2928_v29 }
0x36c0   :  { %v2932_v0 = vpop.permute.xlu1 %2931 }
0x36c1   :  { %11488 = vmatmul.mubr.msk.f32.vlgmr.msra.gmra.mxu1 %vm85_vm1, %v2932_v0 }
0x36c2   :  { %11498 = vmatpush3.msra.mxu1 %v14306_v51  ;;  %11501 = vmatprep.mubr.msk.f32.mxu1 %vm13453_vm5, %v13452_v24 }
0x36c3   :  { %11499 = vmatprep.subr.mxu1 %v13452_v24 }
0x36c4   :  { %11500 = vmatpush3.msra.mxu1 %v14315_v52 }
0x36c5   :  { %11511 = vmatprep.subr.mxu1 %v13452_v24 }
0x3781   :  { %v3001_v8 = vpop.f32.mrf.mxu1 }
0x3782   :  { %v3005_v9 = vadd.f32 %v3001_v8, %v2929_v57 }
0x3783   :  { %v11489_v13 = vpop.f32.mrf.mxu1 }
0x3784   :  { %12582 = vtanh.f32 %v3005_v9  ;;  %v10520_v18 = vmul.f32 -1.442695, %v3005_v9 }
0x3786   :  { %12584 = vpow2.f32 %v10520_v18 }
0x3791   :  { %v12583_v17 = vpop.eup %12582 }
0x3792   :  { %3015 = vrot.lane.b32.xlu1 %v12583_v17, %s13456_s0 }
0x3793   :  { %v12585_v19 = vpop.eup %12584 }
0x3794   :  { %v3009_v5 = vadd.f32 1.0, %v12585_v19 }
0x3796   :  { %12586 = vrcp.f32 %v3009_v5 }
0x37a3   :  { %v12587_v20 = vpop.eup %12586 }
0x37a4   :  { %v3013_v22 = vmul.f32 %v12587_v20, %v2917_v36 }
0x3804   :  { %v3016_v53 = vpop.permute.xlu1 %3015 }
0x3805   :  { %v3018_v6 = vmul.f32 %v12587_v20, %v3016_v53 }
0x3807   :  { %3020 = vrot.lane.b32.xlu1 %v3018_v6, %s13454_s29 }
0x3879   :  { %v3021_v26 = vpop.permute.xlu1 %3020 }
0x387a   :  { %v3023_v1 = vadd.f32 %v3021_v26, %v3013_v22 }
0x387c   :  { %12588 = vtanh.f32 %v3023_v1 }
0x3889   :  { %v12589_v49 = vpop.eup %12588 }
0x388a   :  { %3026 = vrot.lane.b32.xlu0 %v12589_v49, %s13454_s29 }
0x388e   :  { %3031 = vperm.xlu0 %12383, %v14102_v55  }
0x3892   :  { %12384 = vset.pattern.permute.xlu0 %v13472_v35 }
0x38fc   :  { %v3027_v42 = vpop.permute.xlu0 %3026 }
0x38fd   :  { %v3029_v44 = vmul.f32 %v12587_v20, %v3027_v42 }
0x38ff   :  { %3037 = vrot.lane.b32.xlu1 %v3029_v44, %s13451_s27 }
0x3909   :  { %v3032_v58 = vpop.permute.xlu0 %3031 }
0x390a   :  { %v3034_v60 = vmul.f32 %v14334_v47, %v3032_v58 }
0x390c   :  { %v3035_v43 = vadd.f32 %v14340_v7, %v3034_v60  ;;  %v13122_v60 = vld [vmem:[%s16117_s11] sm:$0xff] }
0x3971   :  { %v3038_v50 = vpop.permute.xlu1 %3037 }
0x3972   :  { %11495 = vmatmul.mubr.msk.f32.vlgmr.msra.gmra.mxu0 %vm85_vm1, %v3038_v50 }
0x3973   :  { %11505 = vmatpush3.msra.mxu0 %v13120_v45  ;;  %11508 = vmatprep.mubr.msk.f32.mxu0 %vm13453_vm5, %v13452_v24 }
0x3974   :  { %11506 = vmatprep.subr.mxu0 %v13452_v24 }
0x3975   :  { %11507 = vmatpush3.msra.mxu0 %v13121_v54 }
0x3976   :  { %11558 = vmatprep.subr.mxu0 %v13452_v24 }
0x3a32   :  { %v3107_v62 = vpop.f32.mrf.mxu0 }
0x3a33   :  { %v3111_v61 = vadd.f32 %v3107_v62, %v3035_v43  ;;  %v13123_v43 = vld [vmem:[#allocation2 + $0x70] sm:$0xff]  ;;  %v13124_v62 = vld [vmem:[#allocation2 + $0x68] sm:$0xff] }
0x3a34   :  { %v11496_v63 = vpop.f32.mrf.mxu0 }
0x3a35   :  { %12590 = vtanh.f32 %v3111_v61  ;;  %v10522_v30 = vmul.f32 -1.442695, %v3111_v61  ;;  %v13125_v61 = vld [vmem:[%s16117_s11 + $0x8] sm:$0xff]  ;;  %v13126_v63 = vld [vmem:[#allocation2 + $0x60] sm:$0xff] }
0x3a37   :  { %12592 = vpow2.f32 %v10522_v30  ;;  %v13128_v30 = vld [vmem:[%s16117_s11 + $0x10] sm:$0xff] }
0x3a42   :  { %v12591_v31 = vpop.eup %12590 }
0x3a43   :  { %3121 = vrot.lane.b32.xlu1 %v12591_v31, %s13456_s0  ;;  %v13127_v31 = vld [vmem:[#allocation2 + $0x58] sm:$0xff] }
0x3a44   :  { %v12593_v27 = vpop.eup %12592 }
0x3a45   :  { %v3115_v2 = vadd.f32 1.0, %v12593_v27  ;;  %v13129_v27 = vld [vmem:[#allocation2 + $0x50] sm:$0xff] }
0x3a47   :  { %12594 = vrcp.f32 %v3115_v2  ;;  %v13130_v2 = vld [vmem:[#allocation2 + $0x48] sm:$0xff] }
0x3a54   :  { %v12595_v33 = vpop.eup %12594 }
0x3a55   :  { %v3119_v36 = vmul.f32 %v12595_v33, %v3023_v1 }
0x3ab5   :  { %v3122_v34 = vpop.permute.xlu1 %3121 }
0x3ab6   :  { %v3124_v15 = vmul.f32 %v12595_v33, %v3122_v34  ;;  %v13132_v34 = vld [vmem:[#allocation2 + $0x40] sm:$0xff] }
0x3ab8   :  { %3126 = vrot.lane.b32.xlu1 %v3124_v15, %s13454_s29  ;;  %v13133_v15 = vld [vmem:[#allocation2 + $0x38] sm:$0xff] }
0x3b2a   :  { %v3127_v37 = vpop.permute.xlu1 %3126 }
0x3b2b   :  { %v3129_v40 = vadd.f32 %v3127_v37, %v3119_v36  ;;  %v13134_v36 = vld [vmem:[%s16117_s11 + $0x20] sm:$0xff]  ;;  %v13135_v37 = vld [vmem:[#allocation2 + $0x30] sm:$0xff] }
0x3b2d   :  { %12596 = vtanh.f32 %v3129_v40 }
0x3b3a   :  { %v12597_v41 = vpop.eup %12596 }
0x3b3b   :  { %3132 = vrot.lane.b32.xlu0 %v12597_v41, %s13454_s29  ;;  %v13137_v41 = vld [vmem:[%s16117_s11 + $0x28] sm:$0xff] }
0x3b3f   :  { %3137 = vperm.xlu0 %12384, %v14102_v55  }
0x3b43   :  { %12385 = vset.pattern.permute.xlu0 %v13455_v10 }
0x3bad   :  { %v3133_v0 = vpop.permute.xlu0 %3132 }
0x3bae   :  { %v3135_v59 = vmul.f32 %v12595_v33, %v3133_v0  ;;  %v13131_v33 = vld [vmem:[%s16117_s11 + $0x18] sm:$0xff]  ;;  %v13138_v0 = vld [vmem:[#allocation2 + $0x20] sm:$0xff] }
0x3bb0   :  { %3143 = vrot.lane.b32.xlu1 %v3135_v59, %s13451_s27  ;;  %v13139_v59 = vld [vmem:[#allocation2 + $0x18] sm:$0xff] }
0x3bba   :  { %v3138_v57 = vpop.permute.xlu0 %3137 }
0x3bbb   :  { %v3140_v8 = vmul.f32 %v14334_v47, %v3138_v57  ;;  %v13141_v57 = vld [vmem:[#allocation2 + $0x10] sm:$0xff] }
0x3bbd   :  { %v3141_v9 = vadd.f32 %v14340_v7, %v3140_v8  ;;  %v13142_v8 = vld [vmem:[#allocation2 + $0x8] sm:$0xff] }
0x3c22   :  { %v3144_v29 = vpop.permute.xlu1 %3143 }
0x3c23   :  { %11502 = vmatmul.mubr.msk.f32.vlgmr.msra.gmra.mxu1 %vm85_vm1, %v3144_v29  ;;  %v13140_v29 = vld [vmem:[%s16117_s11 + $0x30] sm:$0xff] }
0x3c24   :  { %11513 = vmatprep.mubr.msk.f32.mxu1 %vm13453_vm5, %v13452_v24 }
0x3ce3   :  { %v3213_v13 = vpop.f32.mrf.mxu1 }
0x3ce4   :  { %v3217_v17 = vadd.f32 %v3213_v13, %v3141_v9  ;;  %v13143_v9 = vld [vmem:[%s16117_s11 + $0x38] sm:$0xff]  ;;  %v13144_v13 = vld [vmem:[#allocation2] sm:$0xff] }
0x3ce5   :  { %v11503_v55 = vpop.f32.mrf.mxu1 }
0x3ce6   :  { %12598 = vtanh.f32 %v3217_v17  ;;  %v10524_v19 = vmul.f32 -1.442695, %v3217_v17  ;;  %v13145_v17 = vld [vmem:[%s16117_s11 + $0x40] sm:$0xff]  ;;  %v13146_v55 = vld [vmem:[%s16117_s11 + $0x48] sm:$0xff] }
0x3ce8   :  { %12600 = vpow2.f32 %v10524_v19  ;;  %v13148_v19 = vld [vmem:[%s16117_s11 + $0x58] sm:$0xff] }
0x3cf3   :  { %v12599_v18 = vpop.eup %12598 }
0x3cf4   :  { %3227 = vrot.lane.b32.xlu1 %v12599_v18, %s13456_s0  ;;  %v13147_v18 = vld [vmem:[%s16117_s11 + $0x50] sm:$0xff] }
0x3cf5   :  { %v12601_v5 = vpop.eup %12600 }
0x3cf6   :  { %v3221_v20 = vadd.f32 1.0, %v12601_v5  ;;  %v13149_v5 = vld [vmem:[%s16117_s11 + $0x60] sm:$0xff] }
0x3cf8   :  { %12602 = vrcp.f32 %v3221_v20  ;;  %v13150_v20 = vld [vmem:[%s16117_s11 + $0x68] sm:$0xff] }
0x3d05   :  { %v12603_v53 = vpop.eup %12602 }
0x3d06   :  { %v3225_v26 = vmul.f32 %v12603_v53, %v3129_v40  ;;  %v13136_v40 = vld [vmem:[#allocation2 + $0x28] sm:$0xff] }
0x3d66   :  { %v3228_v6 = vpop.permute.xlu1 %3227 }
0x3d67   :  { %v3230_v22 = vmul.f32 %v12603_v53, %v3228_v6 }
0x3d69   :  { %3232 = vrot.lane.b32.xlu1 %v3230_v22, %s13454_s29 }
0x3ddb   :  { %v3233_v1 = vpop.permute.xlu1 %3232 }
0x3ddc   :  { %v14376_v49 = vadd.f32 %v3233_v1, %v3225_v26 }
0x3dde   :  { %12604 = vtanh.f32 %v14376_v49 }
0x3deb   :  { %v12605_v42 = vpop.eup %12604 }
0x3dec   :  { %3238 = vrot.lane.b32.xlu0 %v12605_v42, %s13454_s29 }
0x3e5e   :  { %v3239_v44 = vpop.permute.xlu0 %3238 }
0x3e5f   :  { %v14380_v50 = vmul.f32 %v12603_v53, %v3239_v44  ;;  %v13151_v53 = vld [vmem:[%s16117_s11 + $0x70] sm:$0xff] }
0x3e61   :  { %3267 = vrot.lane.b32.xlu1 %v14380_v50, %s13451_s27 }
0x3ed3   :  { %v14384_v45 = vpop.permute.xlu1 %3267 }
0x3ed4   :  { %11509 = vmatmul.mubr.msk.f32.vlgmr.msra.gmra.mxu0 %vm85_vm1, %v14384_v45 }
0x3ed5   :  { %11588 = vmatprep.mubr.msk.f32.mxu0 %vm13453_vm5, %v13452_v24 }
0x3f94   :  { %v3337_v54 = vpop.f32.mrf.mxu0 }
0x3f95   :  { %11512 = vmatpush3.msk.msra.mxu1 %vm503_vm2, %v3337_v54 }
0x3f96   :  { %v11510_v58 = vpop.f32.mrf.mxu0  ;;  %11514 = vmatmul.mubr.msk.f32.vlgmr.msra.gmra.mxu1 %vm887_vm6, %v13122_v60  ;;  %11610 = vmatprep.subr.mxu1 %v13452_v24 }
0x3f97   :  { %11516 = vmatprep.mubr.msk.f32.mxu1 %vm13453_vm5, %v13452_v24  ;;  %11611 = vmatpush3.msra.mxu1 %v13123_v43 }
0x3f98   :  { %11612 = vmatprep.subr.mxu1 %v13452_v24 }
0x3f99   :  { %11613 = vmatpush3.msra.mxu1 %v13124_v62 }
0x3f9a   :  { %11517 = vmatmul.mubr.msk.f32.gmra.mxu1 %vm887_vm6, %v13125_v61  ;;  %11614 = vmatprep.subr.mxu1 %v13452_v24 }
0x3f9b   :  { %11519 = vmatprep.mubr.msk.f32.mxu1 %vm13453_vm5, %v13452_v24  ;;  %11615 = vmatpush3.msra.mxu1 %v13126_v63 }
0x3f9c   :  { %11616 = vmatprep.subr.mxu1 %v13452_v24 }
0x3f9d   :  { %11617 = vmatpush3.msra.mxu1 %v13127_v31 }
0x3f9e   :  { %11520 = vmatmul.mubr.msk.f32.gmra.mxu1 %vm887_vm6, %v13128_v30  ;;  %11618 = vmatprep.subr.mxu1 %v13452_v24 }
0x3f9f   :  { %11522 = vmatprep.mubr.msk.f32.mxu1 %vm13453_vm5, %v13452_v24  ;;  %11619 = vmatpush3.msra.mxu1 %v13129_v27 }
0x3fa0   :  { %11620 = vmatprep.subr.mxu1 %v13452_v24 }
0x3fa1   :  { %11621 = vmatpush3.msra.mxu1 %v13130_v2 }
0x3fa2   :  { %11523 = vmatmul.mubr.msk.f32.gmra.mxu1 %vm887_vm6, %v13131_v33  ;;  %11622 = vmatprep.subr.mxu1 %v13452_v24 }
0x3fa3   :  { %11525 = vmatprep.mubr.msk.f32.mxu1 %vm13453_vm5, %v13452_v24  ;;  %11623 = vmatpush3.msra.mxu1 %v13132_v34 }
0x3fa4   :  { %11624 = vmatprep.subr.mxu1 %v13452_v24 }
0x3fa5   :  { %11625 = vmatpush3.msra.mxu1 %v13133_v15 }
0x3fa6   :  { %11526 = vmatmul.mubr.msk.f32.gmra.mxu1 %vm887_vm6, %v13134_v36  ;;  %11626 = vmatprep.subr.mxu1 %v13452_v24 }
0x3fa7   :  { %11528 = vmatprep.mubr.msk.f32.mxu1 %vm13453_vm5, %v13452_v24  ;;  %11627 = vmatpush3.msra.mxu1 %v13135_v37 }
0x3fa8   :  { %11628 = vmatprep.subr.mxu1 %v13452_v24 }
0x3fa9   :  { %11629 = vmatpush3.msra.mxu1 %v13136_v40 }
0x3faa   :  { %11529 = vmatmul.mubr.msk.f32.gmra.mxu1 %vm887_vm6, %v13137_v41  ;;  %11630 = vmatprep.subr.mxu1 %v13452_v24 }
0x3fab   :  { %11531 = vmatprep.mubr.msk.f32.mxu1 %vm13453_vm5, %v13452_v24  ;;  %11631 = vmatpush3.msra.mxu1 %v13138_v0 }
0x3fac   :  { %11632 = vmatprep.subr.mxu1 %v13452_v24 }
0x3fad   :  { %11633 = vmatpush3.msra.mxu1 %v13139_v59  ;;  %v13152_v59 = vld [vmem:[#allocation3 + $0x50] sm:$0xff] }
0x3fae   :  { %11532 = vmatmul.mubr.msk.f32.gmra.mxu1 %vm887_vm6, %v13140_v29  ;;  %11634 = vmatprep.subr.mxu1 %v13452_v24 }
0x3faf   :  { %11534 = vmatprep.mubr.msk.f32.mxu1 %vm13453_vm5, %v13452_v24  ;;  %11635 = vmatpush3.msra.mxu1 %v13141_v57 }
0x3fb0   :  { %11636 = vmatprep.subr.mxu1 %v13452_v24 }
0x3fb1   :  { %11637 = vmatpush3.msra.mxu1 %v13142_v8 }
0x3fb2   :  { %11535 = vmatmul.mubr.msk.f32.gmra.mxu1 %vm887_vm6, %v13143_v9  ;;  %11638 = vmatprep.subr.mxu1 %v13452_v24  ;;  %v13153_v9 = vld [vmem:[#allocation3 + $0x40] sm:$0xff] }
0x3fb3   :  { %11537 = vmatprep.mubr.msk.f32.mxu1 %vm13453_vm5, %v13452_v24  ;;  %11639 = vmatpush3.msra.mxu1 %v13144_v13 }
0x3fb4   :  { %11678 = vmatprep.subr.mxu1 %v13452_v24 }
0x3fb6   :  { %11538 = vmatmul.mubr.msk.f32.gmra.mxu1 %vm887_vm6, %v13145_v17  ;;  %v13154_v17 = vld [vmem:[#allocation3 + $0x68] sm:$0xff] }
0x3fb7   :  { %11540 = vmatprep.mubr.msk.f32.mxu1 %vm13453_vm5, %v13452_v24 }
0x3fba   :  { %11541 = vmatmul.mubr.msk.f32.gmra.mxu1 %vm887_vm6, %v13146_v55 }
0x3fbb   :  { %11543 = vmatprep.mubr.msk.f32.mxu1 %vm13453_vm5, %v13452_v24 }
0x3fbe   :  { %11544 = vmatmul.mubr.msk.f32.gmra.mxu1 %vm887_vm6, %v13147_v18  ;;  %v13155_v18 = vld [vmem:[#allocation3 + $0x60] sm:$0xff] }
0x3fbf   :  { %11546 = vmatprep.mubr.msk.f32.mxu1 %vm13453_vm5, %v13452_v24 }
0x3fc2   :  { %11547 = vmatmul.mubr.msk.f32.gmra.mxu1 %vm887_vm6, %v13148_v19 }
0x3fc3   :  { %11549 = vmatprep.mubr.msk.f32.mxu1 %vm13453_vm5, %v13452_v24 }
0x3fc6   :  { %11550 = vmatmul.mubr.msk.f32.gmra.mxu1 %vm887_vm6, %v13149_v5 }
0x3fc7   :  { %11552 = vmatprep.mubr.msk.f32.mxu1 %vm13453_vm5, %v13452_v24 }
0x3fca   :  { %11553 = vmatmul.mubr.msk.f32.gmra.mxu1 %vm887_vm6, %v13150_v20 }
0x3fcb   :  { %11555 = vmatprep.mubr.msk.f32.mxu1 %vm13453_vm5, %v13452_v24 }
0x3fce   :  { %11556 = vmatmul.mubr.msk.f32.gmra.mxu1 %vm887_vm6, %v13151_v53  ;;  %v13156_v53 = vld [vmem:[#allocation3 + $0x70] sm:$0xff] }
0x3fcf   :  { %11640 = vmatprep.mubr.msk.f32.mxu1 %vm13453_vm5, %v13452_v24 }
0x4056   :  { %v14497_v6 = vpop.f32.mrf.mxu1 }
0x4058   :  { %v11515_v22 = vpop.f32.mrf.mxu1 }
0x405a   :  { %v14499_v26 = vpop.f32.mrf.mxu1 }
0x405c   :  { %v11518_v1 = vpop.f32.mrf.mxu1 }
0x405d   :  { %v13157_v1 = vld [vmem:[#allocation3 + $0x30] sm:$0xff] }
0x405e   :  { %v3420_v42 = vpop.f32.mrf.mxu1 }
0x4060   :  { %v11521_v44 = vpop.f32.mrf.mxu1 }
0x4062   :  { %v14501_v54 = vpop.f32.mrf.mxu1 }
0x4064   :  { %v11524_v58 = vpop.f32.mrf.mxu1 }
0x4066   :  { %v3430_v60 = vpop.f32.mrf.mxu1 }
0x4068   :  { %v11527_v43 = vpop.f32.mrf.mxu1 }
0x4069   :  { %v13158_v43 = vld [vmem:[#allocation3 + $0x58] sm:$0xff] }
0x406a   :  { %v3435_v62 = vpop.f32.mrf.mxu1 }
0x406c   :  { %v11530_v61 = vpop.f32.mrf.mxu1 }
0x406e   :  { %v3440_v63 = vpop.f32.mrf.mxu1 }
0x406f   :  { %v3490_v44 = vadd.f32 %v13157_v1, %v3440_v63  ;;  %v13163_v63 = vld [vmem:[#allocation3] sm:$0xff] }
0x4070   :  { %v11533_v31 = vpop.f32.mrf.mxu1 }
0x4071   :  { %v13159_v31 = vld [vmem:[#allocation3 + $0x20] sm:$0xff] }
0x4072   :  { %v3445_v30 = vpop.f32.mrf.mxu1 }
0x4074   :  { %v11536_v27 = vpop.f32.mrf.mxu1 }
0x4075   :  { %v3488_v27 = vadd.f32 %v13159_v31, %v3430_v60 }
0x4076   :  { %v3450_v2 = vpop.f32.mrf.mxu1 }
0x4077   :  { %v3492_v13 = vadd.f32 %v13153_v9, %v3450_v2  ;;  %v13160_v2 = vld [vmem:[#allocation3 + $0x48] sm:$0xff] }
0x4078   :  { %v11539_v33 = vpop.f32.mrf.mxu1 }
0x407a   :  { %v3455_v34 = vpop.f32.mrf.mxu1 }
0x407b   :  { %v3493_v33 = vadd.f32 %v13160_v2, %v3455_v34 }
0x407c   :  { %v11542_v15 = vpop.f32.mrf.mxu1 }
0x407d   :  { %v13161_v15 = vld [vmem:[#allocation3 + $0x10] sm:$0xff] }
0x407e   :  { %v3460_v36 = vpop.f32.mrf.mxu1 }
0x407f   :  { %v3494_v29 = vadd.f32 %v13152_v59, %v3460_v36  ;;  %v3486_v36 = vadd.f32 %v13161_v15, %v3420_v42 }
0x4080   :  { %v11545_v37 = vpop.f32.mrf.mxu1 }
0x4081   :  { %12606 = vtanh.f32 %v3494_v29  ;;  %v3484_v29 = vadd.f32 %v13163_v63, %v14497_v6 }
0x4082   :  { %v3465_v40 = vpop.f32.mrf.mxu1 }
0x4083   :  { %v3495_v61 = vadd.f32 %v13158_v43, %v3465_v40  ;;  %v14507_v40 = vld [vmem:[%s16113_s7] ss:$0 sm:$0xff] }
0x4084   :  { %v11548_v41 = vpop.f32.mrf.mxu1 }
0x4085   :  { %v13162_v41 = vld [vmem:[#allocation3 + $0x38] sm:$0xff] }
0x4086   :  { %v3470_v0 = vpop.f32.mrf.mxu1 }
0x4087   :  { %v3496_v19 = vadd.f32 %v13155_v18, %v3470_v0  ;;  %v3491_v0 = vadd.f32 %v13162_v41, %v3445_v30 }
0x4088   :  { %v11551_v57 = vpop.f32.mrf.mxu1 }
0x4089   :  { %v13165_v57 = vld [vmem:[#allocation3 + $0x28] sm:$0xff] }
0x408a   :  { %v3475_v8 = vpop.f32.mrf.mxu1  ;;  %v3489_v42 = vadd.f32 %v13165_v57, %v3435_v62 }
0x408b   :  { %v3497_v55 = vadd.f32 %v13154_v17, %v3475_v8  ;;  %v13166_v17 = vld [vmem:[#allocation3 + $0x18] sm:$0xff] }
0x408c   :  { %v11554_v5 = vpop.f32.mrf.mxu1 }
0x408d   :  { %12608 = vtanh.f32 %v3497_v55  ;;  %v3487_v55 = vadd.f32 %v13166_v17, %v14501_v54 }
0x408e   :  { %v3480_v20 = vpop.f32.mrf.mxu1  ;;  %12610 = vtanh.f32 %v3492_v13  ;;  %v12607_v37 = vpop.eup %12606 }
0x408f   :  { %v3498_v22 = vadd.f32 %v13156_v53, %v3480_v20  ;;  %12612 = vtanh.f32 %v3496_v19  ;;  %v3524_v9 = vmul.f32 %v14507_v40, %v12607_v37 }
0x4090   :  { %v11557_v58 = vpop.f32.mrf.mxu1 }
0x4091   :  { %12614 = vtanh.f32 %v3498_v22  ;;  %v3559_v19 = vsel %vm85_vm1, %v3524_v9, 0.0  ;;  %v13167_v22 = vld [vmem:[#allocation3 + $0x8] sm:$0xff] }
0x4092   :  { %12616 = vtanh.f32 %v3490_v44  ;;  %v3485_v1 = vadd.f32 %v13167_v22, %v14499_v26  ;;  %v13169_v22 = vld [vmem:[%s16119_s13 + $0x68] sm:$0xff] }
0x4093   :  { %12618 = vtanh.f32 %v3495_v61 }
0x4094   :  { %12620 = vtanh.f32 %v3488_v27 }
0x4095   :  { %12622 = vtanh.f32 %v3493_v33 }
0x4096   :  { %12624 = vtanh.f32 %v3486_v36 }
0x4097   :  { %12626 = vtanh.f32 %v3491_v0 }
0x4098   :  { %12628 = vtanh.f32 %v3484_v29 }
0x4099   :  { %12630 = vtanh.f32 %v3489_v42 }
0x409a   :  { %v12609_v59 = vpop.eup %12608  ;;  %12632 = vtanh.f32 %v3487_v55 }
0x409b   :  { %v3527_v60 = vmul.f32 %v14507_v40, %v12609_v59  ;;  %v12611_v34 = vpop.eup %12610  ;;  %12634 = vtanh.f32 %v3485_v1 }
0x409c   :  { %v12613_v8 = vpop.eup %12612  ;;  %v3522_v5 = vmul.f32 %v14507_v40, %v12611_v34 }
0x409d   :  { %v3568_v30 = vsel %vm85_vm1, %v3527_v60, 0.0  ;;  %v3526_v20 = vmul.f32 %v14507_v40, %v12613_v8 }
0x409e   :  { %v12615_v13 = vpop.eup %12614  ;;  %3569 = vadd.xlane.f32.xlu1 %v3568_v30  ;;  %v3553_v54 = vsel %vm85_vm1, %v3522_v5, 0.0 }
0x409f   :  { %v3528_v6 = vmul.f32 %v14507_v40, %v12615_v13  ;;  %v12617_v18 = vpop.eup %12616  ;;  %v3565_v58 = vsel %vm85_vm1, %v3526_v20, 0.0  ;;  %v13168_v20 = vld [vmem:[%s16119_s13 + $0x70] sm:$0xff] }
0x40a0   :  { %v12619_v53 = vpop.eup %12618  ;;  %v3520_v43 = vmul.f32 %v14507_v40, %v12617_v18 }
0x40a1   :  { %v3571_v62 = vsel %vm85_vm1, %v3528_v6, 0.0  ;;  %v12621_v44 = vpop.eup %12620  ;;  %v3525_v61 = vmul.f32 %v14507_v40, %v12619_v53 }
0x40a2   :  { %3560 = vadd.xlane.f32.xlu1 %v3559_v19  ;;  %3572 = vadd.xlane.f32.xlu0 %v3571_v62  ;;  %v12623_v31 = vpop.eup %12622  ;;  %v3547_v2 = vsel %vm85_vm1, %v3520_v43, 0.0  ;;  %v3518_v26 = vmul.f32 %v14507_v40, %v12621_v44 }
0x40a3   :  { %v12625_v27 = vpop.eup %12624  ;;  %v3562_v33 = vsel %vm85_vm1, %v3525_v61, 0.0  ;;  %v3523_v15 = vmul.f32 %v14507_v40, %v12623_v31  ;;  %v13171_v61 = vld [vmem:[%s16119_s13 + $0x58] sm:$0xff] }
0x40a4   :  { %v12627_v36 = vpop.eup %12626  ;;  %v3541_v0 = vsel %vm85_vm1, %v3518_v26, 0.0  ;;  %v3516_v63 = vmul.f32 %v14507_v40, %v12625_v27 }
0x40a5   :  { %v12629_v37 = vpop.eup %12628  ;;  %v3556_v59 = vsel %vm85_vm1, %v3523_v15, 0.0  ;;  %v3521_v29 = vmul.f32 %v14507_v40, %v12627_v36  ;;  %v13173_v15 = vld [vmem:[%s16119_s13 + $0x48] sm:$0xff] }
0x40a6   :  { %3554 = vadd.xlane.f32.xlu1 %v3553_v54  ;;  %3566 = vadd.xlane.f32.xlu0 %v3565_v58  ;;  %v12631_v41 = vpop.eup %12630  ;;  %v3535_v34 = vsel %vm85_vm1, %v3516_v63, 0.0  ;;  %v3514_v42 = vmul.f32 %v14507_v40, %v12629_v37  ;;  %v13170_v54 = vld [vmem:[%s16119_s13 + $0x60] sm:$0xff]  ;;  %v13175_v63 = vld [vmem:[%s16119_s13 + $0x38] sm:$0xff] }
0x40a7   :  { %v12633_v60 = vpop.eup %12632  ;;  %v3550_v57 = vsel %vm85_vm1, %v3521_v29, 0.0  ;;  %v3519_v8 = vmul.f32 %v14507_v40, %v12631_v41  ;;  %v13174_v37 = vld [vmem:[%s16119_s13 + $0x40] sm:$0xff] }
0x40a8   :  { %v12635_v30 = vpop.eup %12634  ;;  %v3529_v9 = vsel %vm85_vm1, %v3514_v42, 0.0  ;;  %v3517_v6 = vmul.f32 %v14507_v40, %v12633_v60  ;;  %v13176_v60 = vld [vmem:[%s16119_s13 + $0x30] sm:$0xff]  ;;  %v13177_v42 = vld [vmem:[%s16119_s13 + $0x28] sm:$0xff] }
0x40a9   :  { %v3544_v13 = vsel %vm85_vm1, %v3519_v8, 0.0  ;;  %v3515_v55 = vmul.f32 %v14507_v40, %v12635_v30 }
0x40aa   :  { %3548 = vadd.xlane.f32.xlu1 %v3547_v2  ;;  %3563 = vadd.xlane.f32.xlu0 %v3562_v33  ;;  %v3538_v17 = vsel %vm85_vm1, %v3517_v6, 0.0  ;;  %v13172_v2 = vld [vmem:[%s16119_s13 + $0x50] sm:$0xff] }
0x40ab   :  { %v3532_v18 = vsel %vm85_vm1, %v3515_v55, 0.0 }
0x40ae   :  { %3542 = vadd.xlane.f32.xlu1 %v3541_v0  ;;  %3557 = vadd.xlane.f32.xlu0 %v3556_v59 }
0x40b2   :  { %3536 = vadd.xlane.f32.xlu1 %v3535_v34  ;;  %3551 = vadd.xlane.f32.xlu0 %v3550_v57 }
0x40b6   :  { %3530 = vadd.xlane.f32.xlu1 %v3529_v9  ;;  %3545 = vadd.xlane.f32.xlu0 %v3544_v13  ;;  %v13178_v9 = vld [vmem:[%s16119_s13 + $0x20] sm:$0xff] }
0x40ba   :  { %3539 = vadd.xlane.f32.xlu0 %v3538_v17  ;;  %v13179_v17 = vld [vmem:[%s16119_s13 + $0x18] sm:$0xff] }
0x40be   :  { %3533 = vadd.xlane.f32.xlu0 %v3532_v18  ;;  %v13180_v18 = vld [vmem:[%s16119_s13 + $0x10] sm:$0xff] }
0x4127   :  { %v3570_v19 = vpop.xlane.xlu1 %3569 }
0x4128   :  { %v3587_v1 = vmul.f32 %v13169_v22, %v3570_v19  ;;  %v13182_v22 = vld [vmem:[%s16119_s13] sm:$0xff] }
0x412b   :  { %v3561_v62 = vpop.xlane.xlu1 %3560  ;;  %v3573_v5 = vpop.xlane.xlu0 %3572 }
0x412c   :  { %v3588_v53 = vmul.f32 %v13168_v20, %v3573_v5  ;;  %v3584_v33 = vmul.f32 %v13172_v2, %v3561_v62  ;;  %v13181_v20 = vld [vmem:[%s16119_s13 + $0x8] sm:$0xff]  ;;  %v13191_v2 = vld [vmem:[%s16120_s14] sm:$0xff] }
0x412e   :  { %11559 = vmatpush3.msra.mxu0 %v3588_v53 }
0x412f   :  { %v3555_v44 = vpop.xlane.xlu1 %3554  ;;  %11560 = vmatprep.subr.mxu0 %v13452_v24  ;;  %v3567_v40 = vpop.xlane.xlu0 %3566 }
0x4130   :  { %v3586_v58 = vmul.f32 %v13170_v54, %v3567_v40  ;;  %11561 = vmatpush3.msra.mxu0 %v3587_v1  ;;  %v3582_v41 = vmul.f32 %v13174_v37, %v3555_v44  ;;  %v14603_v44 = vld [vmem:[%s16118_s12] sm:$0x3]  ;;  %v13184_v40 = vld [vmem:[%s16120_s14 + $0x38] sm:$0xf]  ;;  %v13185_v54 = vld [vmem:[%s16120_s14 + $0x30] sm:$0xff] }
0x4131   :  { %11562 = vmatprep.subr.mxu0 %v13452_v24 }
0x4132   :  { %11563 = vmatpush3.msra.mxu0 %v3586_v58  ;;  %v13186_v58 = vld [vmem:[%s16120_s14 + $0x28] sm:$0xff] }
0x4133   :  { %v3564_v43 = vpop.xlane.xlu0 %3563  ;;  %11564 = vmatprep.subr.mxu0 %v13452_v24  ;;  %v3549_v27 = vpop.xlane.xlu1 %3548 }
0x4134   :  { %v3585_v31 = vmul.f32 %v13171_v61, %v3564_v43  ;;  %v3580_v34 = vmul.f32 %v13176_v60, %v3549_v27  ;;  %v13187_v43 = vld [vmem:[%s16120_s14 + $0x20] sm:$0xff]  ;;  %v13188_v61 = vld [vmem:[%s16120_s14 + $0x18] sm:$0xff]  ;;  %v13190_v27 = vld [vmem:[%s16120_s14 + $0x8] sm:$0xff] }
0x4136   :  { %11565 = vmatpush3.msra.mxu0 %v3585_v31  ;;  %v13189_v31 = vld [vmem:[%s16120_s14 + $0x10] sm:$0xff] }
0x4137   :  { %11566 = vmatprep.subr.mxu0 %v13452_v24  ;;  %v3558_v26 = vpop.xlane.xlu0 %3557  ;;  %v3543_v0 = vpop.xlane.xlu1 %3542 }
0x4138   :  { %v3583_v36 = vmul.f32 %v13173_v15, %v3558_v26  ;;  %11567 = vmatpush3.msra.mxu0 %v3584_v33  ;;  %v3578_v13 = vmul.f32 %v13178_v9, %v3543_v0 }
0x4139   :  { %11568 = vmatprep.subr.mxu0 %v13452_v24 }
0x413a   :  { %11569 = vmatpush3.msra.mxu0 %v3583_v36  ;;  %v10525_v36 = vld [vmem:[%s16114_s8] ss:$0 sm:$0xff] }
0x413b   :  { %11570 = vmatprep.subr.mxu0 %v13452_v24  ;;  %v3552_v59 = vpop.xlane.xlu0 %3551  ;;  %v3537_v30 = vpop.xlane.xlu1 %3536 }
0x413c   :  { %v3581_v29 = vmul.f32 %v13175_v63, %v3552_v59  ;;  %11571 = vmatpush3.msra.mxu0 %v3582_v41  ;;  %v3576_v19 = vmul.f32 %v13180_v18, %v3537_v30 }
0x413d   :  { %11572 = vmatprep.subr.mxu0 %v13452_v24 }
0x413e   :  { %11573 = vmatpush3.msra.mxu0 %v3581_v29 }
0x413f   :  { %11574 = vmatprep.subr.mxu0 %v13452_v24  ;;  %v3546_v57 = vpop.xlane.xlu0 %3545  ;;  %v3531_v62 = vpop.xlane.xlu1 %3530 }
0x4140   :  { %v3579_v8 = vmul.f32 %v13177_v42, %v3546_v57  ;;  %11575 = vmatpush3.msra.mxu0 %v3580_v34  ;;  %v3574_v1 = vmul.f32 %v13182_v22, %v3531_v62 }
0x4141   :  { %11576 = vmatprep.subr.mxu0 %v13452_v24 }
0x4142   :  { %11577 = vmatpush3.msra.mxu0 %v3579_v8 }
0x4143   :  { %11578 = vmatprep.subr.mxu0 %v13452_v24  ;;  %v3540_v6 = vpop.xlane.xlu0 %3539 }
0x4144   :  { %v3577_v55 = vmul.f32 %v13179_v17, %v3540_v6  ;;  %11579 = vmatpush3.msra.mxu0 %v3578_v13 }
0x4145   :  { %11580 = vmatprep.subr.mxu0 %v13452_v24 }
0x4146   :  { %11581 = vmatpush3.msra.mxu0 %v3577_v55 }
0x4147   :  { %11582 = vmatprep.subr.mxu0 %v13452_v24  ;;  %v3534_v5 = vpop.xlane.xlu0 %3533 }
0x4148   :  { %v3575_v53 = vmul.f32 %v13181_v20, %v3534_v5  ;;  %11583 = vmatpush3.msra.mxu0 %v3576_v19 }
0x4149   :  { %11584 = vmatprep.subr.mxu0 %v13452_v24 }
0x414a   :  { %11585 = vmatpush3.msra.mxu0 %v3575_v53 }
0x414b   :  { %11586 = vmatprep.subr.mxu0 %v13452_v24 }
0x414c   :  { %11587 = vmatpush3.msra.mxu0 %v3574_v1 }
0x414d   :  { %11589 = vmatmul.mubr.msk.f32.vlgmr.msra.gmra.mxu0 %vm1188_vm7, %v14603_v44  ;;  %11591 = vmatprep.subr.mxu0 %v13452_v24 }
0x414e   :  { %11592 = vmatpush3.msk.msra.mxu0 %vm505_vm3, %v13184_v40  ;;  %11607 = vmatprep.mubr.msk.f32.mxu0 %vm13453_vm5, %v13452_v24 }
0x414f   :  { %11593 = vmatprep.subr.mxu0 %v13452_v24 }
0x4150   :  { %11594 = vmatpush3.msra.mxu0 %v13185_v54 }
0x4151   :  { %11595 = vmatprep.subr.mxu0 %v13452_v24 }
0x4152   :  { %11596 = vmatpush3.msra.mxu0 %v13186_v58 }
0x4153   :  { %11597 = vmatprep.subr.mxu0 %v13452_v24 }
0x4154   :  { %11598 = vmatpush3.msra.mxu0 %v13187_v43 }
0x4155   :  { %11599 = vmatprep.subr.mxu0 %v13452_v24 }
0x4156   :  { %11600 = vmatpush3.msra.mxu0 %v13188_v61 }
0x4157   :  { %11601 = vmatprep.subr.mxu0 %v13452_v24 }
0x4158   :  { %11602 = vmatpush3.msra.mxu0 %v13189_v31 }
0x4159   :  { %11603 = vmatprep.subr.mxu0 %v13452_v24 }
0x415a   :  { %11604 = vmatpush3.msra.mxu0 %v13190_v27 }
0x415b   :  { %11605 = vmatprep.subr.mxu0 %v13452_v24 }
0x415c   :  { %11606 = vmatpush3.msra.mxu0 %v13191_v2 }
0x415d   :  { %11643 = vmatprep.subr.mxu0 %v13452_v24 }
0x420d   :  { %v3655_v33 = vpop.f32.mrf.mxu0 }
0x420e   :  { %v3659_v26 = vsel %vm1262_vm8, %v3655_v33, -inf }
0x420f   :  { %3660 = vmax.xlane.f32.xlu0 %v3659_v26  ;;  %v11590_v15 = vpop.f32.mrf.mxu0 }
0x4225   :  { %3247 = vrot.lane.b32.xlu0 %v10525_v36, %s13473_s21 }
0x4298   :  { %v3661_v37 = vpop.xlane.xlu0 %3660 }
0x4299   :  { %v3662_v41 = vsub.f32 %v3655_v33, %v3661_v37 }
0x429b   :  { %v3663_v0 = vmul.f32 1.442695, %v3662_v41 }
0x429c   :  { %v14648_v29 = vpop.permute.xlu0 %3247 }
0x429d   :  { %12636 = vpow2.f32 %v3663_v0  ;;  %v3250_v60 = vmul.f32 %v14648_v29, %v14380_v50  ;;  %v10526_v50 = vld [vmem:[#allocation4] ss:$0 sm:$0xff] }
0x42aa   :  { %v12637_v59 = vpop.eup %12636 }
0x42ab   :  { %v3665_v63 = vsel %vm1262_vm8, %v12637_v59, 0.0 }
0x42ac   :  { %3666 = vadd.xlane.f32.xlu1 %v3665_v63 }
0x42bd   :  { %3252 = vrot.lane.b32.xlu1 %v3250_v60, %s13451_s27 }
0x4335   :  { %v3667_v34 = vpop.xlane.xlu1 %3666 }
0x4336   :  { %12638 = vrcp.f32 %v3667_v34 }
0x4339   :  { %v3253_v57 = vpop.permute.xlu1 %3252 }
0x433a   :  { %v3256_v42 = vsel %vm3255_vm10, %v3253_v57, 0.0 }
0x433b   :  { %3257 = vadd.xlane.f32.xlu1 %v3256_v42 }
0x4343   :  { %v12639_v8 = vpop.eup %12638 }
0x4344   :  { %v14654_v30 = vmul.f32 %v12639_v8, %v12637_v59 }
0x4346   :  { %11608 = vmatmul.mubr.msk.f32.vlgmr.msra.gmra.mxu0 %vm1275_vm9, %v14654_v30 }
0x4347   :  { %11644 = vmatpush3.msra.mxu0 %v14306_v51  ;;  %11647 = vmatprep.mubr.msk.f32.mxu0 %vm13453_vm5, %v13452_v24 }
0x4348   :  { %11645 = vmatprep.subr.mxu0 %v13452_v24 }
0x4349   :  { %11646 = vmatpush3.msra.mxu0 %v14315_v52 }
0x434a   :  { %11648 = vmatmul.mubr.msk.f32.vlgmr.msra.gmra.mxu0 %vm85_vm1, %v14384_v45  ;;  %11650 = vmatprep.subr.mxu0 %v13452_v24 }
0x434b   :  { %11651 = vmatpush3.msra.mxu0 %v14306_v51  ;;  %11654 = vmatprep.mubr.msk.f32.mxu0 %vm13453_vm5, %v13452_v24 }
0x434c   :  { %11652 = vmatprep.subr.mxu0 %v13452_v24 }
0x434d   :  { %11653 = vmatpush3.msra.mxu0 %v14315_v52 }
0x434e   :  { %11657 = vmatprep.subr.mxu0 %v13452_v24 }
0x43c4   :  { %v3258_v9 = vpop.xlane.xlu1 %3257 }
0x43c5   :  { %v14672_v13 = vadd.f32 %v10526_v50, %v3258_v9 }
0x43c7   :  { %3819 = vrot.lane.b32.xlu0 %v14672_v13, %s13454_s29 }
0x4406   :  { %v3740_v45 = vpop.f32.mrf.mxu0 }
0x4407   :  { %v3744_v6 = vmul.f32 %v14603_v44, %v3740_v45 }
0x4408   :  { %v11609_v17 = vpop.f32.mrf.mxu0 }
0x4409   :  { %11641 = vmatmul.mubr.msk.f32.vlgmr.msra.gmra.mxu1 %vm1188_vm7, %v3744_v6 }
0x440a   :  { %v3896_v55 = vpop.f32.mrf.mxu0  ;;  %11679 = vmatpush3.msra.mxu1 %v14306_v51  ;;  %11682 = vmatprep.mubr.msk.f32.mxu1 %vm13453_vm5, %v13452_v24 }
0x440b   :  { %11680 = vmatprep.subr.mxu1 %v13452_v24 }
0x440c   :  { %v11649_v18 = vpop.f32.mrf.mxu0  ;;  %11681 = vmatpush3.msra.mxu1 %v14315_v52 }
0x440d   :  { %11692 = vmatprep.subr.mxu1 %v13452_v24 }
0x4439   :  { %v3820_v19 = vpop.permute.xlu0 %3819 }
0x44c9   :  { %v3814_v62 = vpop.f32.mrf.mxu1 }
0x44ca   :  { %v14685_v5 = vsel %vm85_vm1, %v3814_v62, %v3820_v19 }
0x44cb   :  { %3825 = vperm.xlu0 %12385, %v14685_v5   ;;  %v11642_v20 = vpop.f32.mrf.mxu1 }
0x44cc   :  { %v14717_v20 = vld [vmem:[%s16109_s3 + $0x8] sm:$0xff] }
0x44cf   :  { %12386 = vset.pattern.permute.xlu0 %v13457_v46 }
0x4546   :  { %v3826_v53 = vpop.permute.xlu0 %3825 }
0x4547   :  { %v3828_v22 = vmul.f32 %v14334_v47, %v3826_v53  ;;  %v14726_v53 = vld [vmem:[%s16109_s3] sm:$0xff] }
0x4549   :  { %v3829_v1 = vadd.f32 %v14340_v7, %v3828_v22 }
0x454b   :  { %v3900_v44 = vadd.f32 %v3896_v55, %v3829_v1 }
0x454d   :  { %12640 = vtanh.f32 %v3900_v44  ;;  %v10549_v54 = vmul.f32 -1.442695, %v3900_v44 }
0x454f   :  { %12642 = vpow2.f32 %v10549_v54 }
0x455a   :  { %v12641_v40 = vpop.eup %12640 }
0x455b   :  { %3910 = vrot.lane.b32.xlu0 %v12641_v40, %s13456_s0 }
0x455c   :  { %v12643_v58 = vpop.eup %12642 }
0x455d   :  { %v3904_v43 = vadd.f32 1.0, %v12643_v58 }
0x455f   :  { %12644 = vrcp.f32 %v3904_v43 }
0x456c   :  { %v12645_v61 = vpop.eup %12644 }
0x456d   :  { %v3908_v2 = vmul.f32 %v12645_v61, %v14376_v49 }
0x45cd   :  { %v3911_v31 = vpop.permute.xlu0 %3910 }
0x45ce   :  { %v3913_v27 = vmul.f32 %v12645_v61, %v3911_v31 }
0x45d0   :  { %3915 = vrot.lane.b32.xlu0 %v3913_v27, %s13454_s29 }
0x4642   :  { %v3916_v33 = vpop.permute.xlu0 %3915 }
0x4643   :  { %v3918_v26 = vadd.f32 %v3916_v33, %v3908_v2 }
0x4645   :  { %12646 = vtanh.f32 %v3918_v26 }
0x4652   :  { %v12647_v15 = vpop.eup %12646 }
0x4653   :  { %3921 = vrot.lane.b32.xlu0 %v12647_v15, %s13454_s29 }
0x46c5   :  { %v3922_v36 = vpop.permute.xlu0 %3921 }
0x46c6   :  { %v3924_v37 = vmul.f32 %v12645_v61, %v3922_v36 }
0x46c8   :  { %3932 = vrot.lane.b32.xlu0 %v3924_v37, %s13451_s27 }
0x46cc   :  { %3926 = vperm.xlu0 %12386, %v14685_v5  }
0x46d0   :  { %12387 = vset.pattern.permute.xlu0 %v13458_v28 }
0x473a   :  { %v3933_v41 = vpop.permute.xlu0 %3932 }
0x473b   :  { %11655 = vmatmul.mubr.msk.f32.vlgmr.msra.gmra.mxu0 %vm85_vm1, %v3933_v41 }
0x473c   :  { %11658 = vmatpush3.msra.mxu0 %v14306_v51  ;;  %11661 = vmatprep.mubr.msk.f32.mxu0 %vm13453_vm5, %v13452_v24 }
0x473d   :  { %11659 = vmatprep.subr.mxu0 %v13452_v24 }
0x473e   :  { %11660 = vmatpush3.msra.mxu0 %v14315_v52 }
0x473f   :  { %11664 = vmatprep.subr.mxu0 %v13452_v24 }
0x4747   :  { %v3927_v49 = vpop.permute.xlu0 %3926 }
0x4748   :  { %v3929_v0 = vmul.f32 %v14334_v47, %v3927_v49 }
0x474a   :  { %v3930_v59 = vadd.f32 %v14340_v7, %v3929_v0 }
0x47fb   :  { %v4002_v63 = vpop.f32.mrf.mxu0 }
0x47fc   :  { %v4006_v60 = vadd.f32 %v4002_v63, %v3930_v59  ;;  %v14745_v59 = vld [vmem:[#allocation5] ss:$0 sm:$0xff] }
0x47fd   :  { %v11656_v34 = vpop.f32.mrf.mxu0 }
0x47fe   :  { %12648 = vtanh.f32 %v4006_v60  ;;  %v10551_v51 = vmul.f32 -1.442695, %v4006_v60  ;;  %v14751_v60 = vld [vmem:[%s16110_s4] ss:$0 sm:$0xff] }
0x4800   :  { %12650 = vpow2.f32 %v10551_v51 }
0x480b   :  { %v12649_v57 = vpop.eup %12648 }
0x480c   :  { %4016 = vrot.lane.b32.xlu1 %v12649_v57, %s13456_s0 }
0x480d   :  { %v12651_v42 = vpop.eup %12650 }
0x480e   :  { %v4010_v8 = vadd.f32 1.0, %v12651_v42 }
0x4810   :  { %12652 = vrcp.f32 %v4010_v8 }
0x481d   :  { %v12653_v52 = vpop.eup %12652 }
0x481e   :  { %v4014_v45 = vmul.f32 %v12653_v52, %v3918_v26 }
0x487e   :  { %v4017_v50 = vpop.permute.xlu1 %4016 }
0x487f   :  { %v4019_v9 = vmul.f32 %v12653_v52, %v4017_v50 }
0x4881   :  { %4021 = vrot.lane.b32.xlu0 %v4019_v9, %s13454_s29 }
0x48f3   :  { %v4022_v6 = vpop.permute.xlu0 %4021 }
0x48f4   :  { %v4024_v17 = vadd.f32 %v4022_v6, %v4014_v45 }
0x48f6   :  { %12654 = vtanh.f32 %v4024_v17 }
0x4903   :  { %v12655_v55 = vpop.eup %12654 }
0x4904   :  { %4027 = vrot.lane.b32.xlu0 %v12655_v55, %s13454_s29 }
0x4976   :  { %v4028_v18 = vpop.permute.xlu0 %4027 }
0x4977   :  { %v4030_v19 = vmul.f32 %v12653_v52, %v4028_v18 }
0x4979   :  { %4038 = vrot.lane.b32.xlu0 %v4030_v19, %s13451_s27 }
0x497d   :  { %4032 = vperm.xlu0 %12387, %v14685_v5  }
0x4981   :  { %12388 = vset.pattern.permute.xlu0 %v13459_v11 }
0x49eb   :  { %v4039_v62 = vpop.permute.xlu0 %4038 }
0x49ec   :  { %11662 = vmatmul.mubr.msk.f32.vlgmr.msra.gmra.mxu0 %vm85_vm1, %v4039_v62 }
0x49ed   :  { %11665 = vmatpush3.msra.mxu0 %v14717_v20  ;;  %11668 = vmatprep.mubr.msk.f32.mxu0 %vm13453_vm5, %v13452_v24 }
0x49ee   :  { %11666 = vmatprep.subr.mxu0 %v13452_v24 }
0x49ef   :  { %11667 = vmatpush3.msra.mxu0 %v14726_v53 }
0x49f0   :  { %11671 = vmatprep.subr.mxu0 %v13452_v24 }
0x49f8   :  { %v4033_v22 = vpop.permute.xlu0 %4032 }
0x49f9   :  { %v4035_v1 = vmul.f32 %v14334_v47, %v4033_v22 }
0x49fb   :  { %v4036_v44 = vadd.f32 %v14340_v7, %v4035_v1 }
0x4aac   :  { %v4108_v40 = vpop.f32.mrf.mxu0 }
0x4aad   :  { %v4112_v54 = vadd.f32 %v4108_v40, %v4036_v44 }
0x4aae   :  { %v11663_v58 = vpop.f32.mrf.mxu0 }
0x4aaf   :  { %12656 = vtanh.f32 %v4112_v54  ;;  %v10553_v61 = vmul.f32 -1.442695, %v4112_v54 }
0x4ab1   :  { %12658 = vpow2.f32 %v10553_v61 }
0x4abc   :  { %v12657_v43 = vpop.eup %12656 }
0x4abd   :  { %4122 = vrot.lane.b32.xlu1 %v12657_v43, %s13456_s0 }
0x4abe   :  { %v12659_v31 = vpop.eup %12658 }
0x4abf   :  { %v4116_v27 = vadd.f32 1.0, %v12659_v31 }
0x4ac1   :  { %12660 = vrcp.f32 %v4116_v27 }
0x4ace   :  { %v12661_v2 = vpop.eup %12660 }
0x4acf   :  { %v4120_v47 = vmul.f32 %v12661_v2, %v4024_v17 }
0x4b2f   :  { %v4123_v33 = vpop.permute.xlu1 %4122 }
0x4b30   :  { %v4125_v26 = vmul.f32 %v12661_v2, %v4123_v33 }
0x4b32   :  { %4127 = vrot.lane.b32.xlu1 %v4125_v26, %s13454_s29 }
0x4ba4   :  { %v4128_v15 = vpop.permute.xlu1 %4127 }
0x4ba5   :  { %v4130_v7 = vadd.f32 %v4128_v15, %v4120_v47 }
0x4ba7   :  { %12662 = vtanh.f32 %v4130_v7 }
0x4bb4   :  { %v12663_v36 = vpop.eup %12662 }
0x4bb5   :  { %4133 = vrot.lane.b32.xlu0 %v12663_v36, %s13454_s29 }
0x4bb9   :  { %4138 = vperm.xlu0 %12388, %v14685_v5  }
0x4bbd   :  { %12389 = vset.pattern.permute.xlu0 %v13460_v16 }
0x4c27   :  { %v4134_v37 = vpop.permute.xlu0 %4133 }
0x4c28   :  { %v4136_v41 = vmul.f32 %v12661_v2, %v4134_v37 }
0x4c2a   :  { %4144 = vrot.lane.b32.xlu1 %v4136_v41, %s13451_s27 }
0x4c34   :  { %v4139_v0 = vpop.permute.xlu0 %4138 }
0x4c35   :  { %v4141_v63 = vmul.f32 %v14745_v59, %v4139_v0 }
0x4c37   :  { %v4142_v34 = vadd.f32 %v14751_v60, %v4141_v63 }
0x4c9c   :  { %v4145_v49 = vpop.permute.xlu1 %4144 }
0x4c9d   :  { %11669 = vmatmul.mubr.msk.f32.vlgmr.msra.gmra.mxu0 %vm85_vm1, %v4145_v49 }
0x4c9e   :  { %11672 = vmatpush3.msra.mxu0 %v14717_v20  ;;  %11675 = vmatprep.mubr.msk.f32.mxu0 %vm13453_vm5, %v13452_v24 }
0x4c9f   :  { %11673 = vmatprep.subr.mxu0 %v13452_v24 }
0x4ca0   :  { %11674 = vmatpush3.msra.mxu0 %v14726_v53 }
0x4ca1   :  { %11685 = vmatprep.subr.mxu0 %v13452_v24 }
0x4d5d   :  { %v4214_v57 = vpop.f32.mrf.mxu0 }
0x4d5e   :  { %v4218_v51 = vadd.f32 %v4214_v57, %v4142_v34 }
0x4d5f   :  { %v11670_v42 = vpop.f32.mrf.mxu0 }
0x4d60   :  { %12664 = vtanh.f32 %v4218_v51  ;;  %v10555_v52 = vmul.f32 -1.442695, %v4218_v51 }
0x4d62   :  { %12666 = vpow2.f32 %v10555_v52 }
0x4d6d   :  { %v12665_v8 = vpop.eup %12664 }
0x4d6e   :  { %4228 = vrot.lane.b32.xlu1 %v12665_v8, %s13456_s0 }
0x4d6f   :  { %v12667_v50 = vpop.eup %12666 }
0x4d70   :  { %v4222_v9 = vadd.f32 1.0, %v12667_v50 }
0x4d72   :  { %12668 = vrcp.f32 %v4222_v9 }
0x4d7f   :  { %v12669_v45 = vpop.eup %12668 }
0x4d80   :  { %v4226_v55 = vmul.f32 %v12669_v45, %v4130_v7 }
0x4de0   :  { %v4229_v6 = vpop.permute.xlu1 %4228 }
0x4de1   :  { %v4231_v17 = vmul.f32 %v12669_v45, %v4229_v6 }
0x4de3   :  { %4233 = vrot.lane.b32.xlu1 %v4231_v17, %s13454_s29 }
0x4e55   :  { %v4234_v18 = vpop.permute.xlu1 %4233 }
0x4e56   :  { %v4236_v19 = vadd.f32 %v4234_v18, %v4226_v55 }
0x4e58   :  { %12670 = vtanh.f32 %v4236_v19 }
0x4e65   :  { %v12671_v62 = vpop.eup %12670 }
0x4e66   :  { %4239 = vrot.lane.b32.xlu0 %v12671_v62, %s13454_s29 }
0x4e6a   :  { %4244 = vperm.xlu0 %12389, %v14685_v5  }
0x4e6e   :  { %12390 = vset.pattern.permute.xlu0 %v13461_v39 }
0x4ed8   :  { %v4240_v22 = vpop.permute.xlu0 %4239 }
0x4ed9   :  { %v4242_v1 = vmul.f32 %v12669_v45, %v4240_v22 }
0x4edb   :  { %4250 = vrot.lane.b32.xlu1 %v4242_v1, %s13451_s27 }
0x4ee5   :  { %v4245_v40 = vpop.permute.xlu0 %4244 }
0x4ee6   :  { %v4247_v54 = vmul.f32 %v14745_v59, %v4245_v40 }
0x4ee8   :  { %v4248_v58 = vadd.f32 %v14751_v60, %v4247_v54 }
0x4f4d   :  { %v4251_v44 = vpop.permute.xlu1 %4250 }
0x4f4e   :  { %11676 = vmatmul.mubr.msk.f32.vlgmr.msra.gmra.mxu0 %vm85_vm1, %v4251_v44 }
0x4f4f   :  { %11686 = vmatpush3.msra.mxu0 %v14717_v20  ;;  %11689 = vmatprep.mubr.msk.f32.mxu0 %vm13453_vm5, %v13452_v24 }
0x4f50   :  { %11687 = vmatprep.subr.mxu0 %v13452_v24 }
0x4f51   :  { %11688 = vmatpush3.msra.mxu0 %v14726_v53 }
0x4f52   :  { %11699 = vmatprep.subr.mxu0 %v13452_v24 }
0x500e   :  { %v4320_v43 = vpop.f32.mrf.mxu0 }
0x500f   :  { %v4324_v61 = vadd.f32 %v4320_v43, %v4248_v58 }
0x5010   :  { %v11677_v31 = vpop.f32.mrf.mxu0 }
0x5011   :  { %12672 = vtanh.f32 %v4324_v61  ;;  %v10557_v2 = vmul.f32 -1.442695, %v4324_v61 }
0x5013   :  { %12674 = vpow2.f32 %v10557_v2 }
0x501e   :  { %v12673_v27 = vpop.eup %12672 }
0x501f   :  { %4334 = vrot.lane.b32.xlu1 %v12673_v27, %s13456_s0 }
0x5020   :  { %v12675_v33 = vpop.eup %12674 }
0x5021   :  { %v4328_v26 = vadd.f32 1.0, %v12675_v33 }
0x5023   :  { %12676 = vrcp.f32 %v4328_v26 }
0x5030   :  { %v12677_v47 = vpop.eup %12676 }
0x5031   :  { %v4332_v36 = vmul.f32 %v12677_v47, %v4236_v19 }
0x5091   :  { %v4335_v15 = vpop.permute.xlu1 %4334 }
0x5092   :  { %v4337_v7 = vmul.f32 %v12677_v47, %v4335_v15 }
0x5094   :  { %4339 = vrot.lane.b32.xlu1 %v4337_v7, %s13454_s29 }
0x5106   :  { %v4340_v37 = vpop.permute.xlu1 %4339 }
0x5107   :  { %v4342_v41 = vadd.f32 %v4340_v37, %v4332_v36 }
0x5109   :  { %12678 = vtanh.f32 %v4342_v41 }
0x5116   :  { %v12679_v49 = vpop.eup %12678 }
0x5117   :  { %4345 = vrot.lane.b32.xlu0 %v12679_v49, %s13454_s29 }
0x511b   :  { %4350 = vperm.xlu0 %12390, %v14685_v5  }
0x511f   :  { %12391 = vset.pattern.permute.xlu0 %v13462_v23 }
0x5189   :  { %v4346_v0 = vpop.permute.xlu0 %4345 }
0x518a   :  { %v4348_v63 = vmul.f32 %v12677_v47, %v4346_v0 }
0x518c   :  { %4356 = vrot.lane.b32.xlu1 %v4348_v63, %s13451_s27 }
0x5196   :  { %v4351_v57 = vpop.permute.xlu0 %4350 }
0x5197   :  { %v4353_v51 = vmul.f32 %v14745_v59, %v4351_v57 }
0x5199   :  { %v4354_v42 = vadd.f32 %v14751_v60, %v4353_v51 }
0x51fe   :  { %v4357_v34 = vpop.permute.xlu1 %4356 }
0x51ff   :  { %11683 = vmatmul.mubr.msk.f32.vlgmr.msra.gmra.mxu1 %vm85_vm1, %v4357_v34 }
0x5200   :  { %11693 = vmatpush3.msra.mxu1 %v14717_v20  ;;  %11696 = vmatprep.mubr.msk.f32.mxu1 %vm13453_vm5, %v13452_v24 }
0x5201   :  { %11694 = vmatprep.subr.mxu1 %v13452_v24 }
0x5202   :  { %11695 = vmatpush3.msra.mxu1 %v14726_v53 }
0x5203   :  { %11706 = vmatprep.subr.mxu1 %v13452_v24 }
0x52bf   :  { %v4426_v8 = vpop.f32.mrf.mxu1 }
0x52c0   :  { %v4430_v52 = vadd.f32 %v4426_v8, %v4354_v42 }
0x52c1   :  { %v11684_v50 = vpop.f32.mrf.mxu1 }
0x52c2   :  { %12680 = vtanh.f32 %v4430_v52  ;;  %v10559_v45 = vmul.f32 -1.442695, %v4430_v52 }
0x52c4   :  { %12682 = vpow2.f32 %v10559_v45 }
0x52cf   :  { %v12681_v9 = vpop.eup %12680 }
0x52d0   :  { %4440 = vrot.lane.b32.xlu1 %v12681_v9, %s13456_s0 }
0x52d1   :  { %v12683_v6 = vpop.eup %12682 }
0x52d2   :  { %v4434_v17 = vadd.f32 1.0, %v12683_v6 }
0x52d4   :  { %12684 = vrcp.f32 %v4434_v17 }
0x52e1   :  { %v12685_v55 = vpop.eup %12684 }
0x52e2   :  { %v4438_v62 = vmul.f32 %v12685_v55, %v4342_v41 }
0x5342   :  { %v4441_v18 = vpop.permute.xlu1 %4440 }
0x5343   :  { %v4443_v19 = vmul.f32 %v12685_v55, %v4441_v18 }
0x5345   :  { %4445 = vrot.lane.b32.xlu1 %v4443_v19, %s13454_s29 }
0x53b7   :  { %v4446_v22 = vpop.permute.xlu1 %4445 }
0x53b8   :  { %v4448_v1 = vadd.f32 %v4446_v22, %v4438_v62 }
0x53ba   :  { %12686 = vtanh.f32 %v4448_v1 }
0x53c7   :  { %v12687_v44 = vpop.eup %12686 }
0x53c8   :  { %4451 = vrot.lane.b32.xlu0 %v12687_v44, %s13454_s29 }
0x53cc   :  { %4456 = vperm.xlu0 %12391, %v14685_v5  }
0x53d0   :  { %12392 = vset.pattern.permute.xlu0 %v13463_v32 }
0x543a   :  { %v4452_v40 = vpop.permute.xlu0 %4451 }
0x543b   :  { %v4454_v54 = vmul.f32 %v12685_v55, %v4452_v40 }
0x543d   :  { %4462 = vrot.lane.b32.xlu1 %v4454_v54, %s13451_s27 }
0x5447   :  { %v4457_v43 = vpop.permute.xlu0 %4456 }
0x5448   :  { %v4459_v61 = vmul.f32 %v14745_v59, %v4457_v43 }
0x544a   :  { %v4460_v31 = vadd.f32 %v14751_v60, %v4459_v61 }
0x54af   :  { %v4463_v58 = vpop.permute.xlu1 %4462 }
0x54b0   :  { %11690 = vmatmul.mubr.msk.f32.vlgmr.msra.gmra.mxu0 %vm85_vm1, %v4463_v58 }
0x54b1   :  { %11700 = vmatpush3.msra.mxu0 %v14717_v20  ;;  %11703 = vmatprep.mubr.msk.f32.mxu0 %vm13453_vm5, %v13452_v24 }
0x54b2   :  { %11701 = vmatprep.subr.mxu0 %v13452_v24 }
0x54b3   :  { %11702 = vmatpush3.msra.mxu0 %v14726_v53 }
0x54b4   :  { %11713 = vmatprep.subr.mxu0 %v13452_v24 }
0x5570   :  { %v4532_v27 = vpop.f32.mrf.mxu0 }
0x5571   :  { %v4536_v2 = vadd.f32 %v4532_v27, %v4460_v31 }
0x5572   :  { %v11691_v33 = vpop.f32.mrf.mxu0 }
0x5573   :  { %12688 = vtanh.f32 %v4536_v2  ;;  %v10561_v47 = vmul.f32 -1.442695, %v4536_v2 }
0x5575   :  { %12690 = vpow2.f32 %v10561_v47 }
0x5580   :  { %v12689_v26 = vpop.eup %12688 }
0x5581   :  { %4546 = vrot.lane.b32.xlu1 %v12689_v26, %s13456_s0 }
0x5582   :  { %v12691_v15 = vpop.eup %12690 }
0x5583   :  { %v4540_v7 = vadd.f32 1.0, %v12691_v15 }
0x5585   :  { %12692 = vrcp.f32 %v4540_v7 }
0x5592   :  { %v12693_v36 = vpop.eup %12692 }
0x5593   :  { %v4544_v49 = vmul.f32 %v12693_v36, %v4448_v1 }
0x55f3   :  { %v4547_v37 = vpop.permute.xlu1 %4546 }
0x55f4   :  { %v4549_v41 = vmul.f32 %v12693_v36, %v4547_v37 }
0x55f6   :  { %4551 = vrot.lane.b32.xlu1 %v4549_v41, %s13454_s29 }
0x5668   :  { %v4552_v0 = vpop.permute.xlu1 %4551 }
0x5669   :  { %v4554_v63 = vadd.f32 %v4552_v0, %v4544_v49 }
0x566b   :  { %12694 = vtanh.f32 %v4554_v63 }
0x5678   :  { %v12695_v34 = vpop.eup %12694 }
0x5679   :  { %4557 = vrot.lane.b32.xlu0 %v12695_v34, %s13454_s29 }
0x567d   :  { %4562 = vperm.xlu0 %12392, %v14685_v5  }
0x5681   :  { %12393 = vset.pattern.permute.xlu0 %v13464_v12 }
0x56eb   :  { %v4558_v57 = vpop.permute.xlu0 %4557 }
0x56ec   :  { %v4560_v51 = vmul.f32 %v12693_v36, %v4558_v57 }
0x56ee   :  { %4568 = vrot.lane.b32.xlu1 %v4560_v51, %s13451_s27 }
0x56f8   :  { %v4563_v8 = vpop.permute.xlu0 %4562 }
0x56f9   :  { %v4565_v52 = vmul.f32 %v14745_v59, %v4563_v8 }
0x56fb   :  { %v4566_v50 = vadd.f32 %v14751_v60, %v4565_v52 }
0x5760   :  { %v4569_v42 = vpop.permute.xlu1 %4568 }
0x5761   :  { %11697 = vmatmul.mubr.msk.f32.vlgmr.msra.gmra.mxu1 %vm85_vm1, %v4569_v42 }
0x5762   :  { %11707 = vmatpush3.msra.mxu1 %v14717_v20  ;;  %11710 = vmatprep.mubr.msk.f32.mxu1 %vm13453_vm5, %v13452_v24 }
0x5763   :  { %11708 = vmatprep.subr.mxu1 %v13452_v24 }
0x5764   :  { %11709 = vmatpush3.msra.mxu1 %v14726_v53 }
0x5765   :  { %11720 = vmatprep.subr.mxu1 %v13452_v24 }
0x5821   :  { %v4638_v9 = vpop.f32.mrf.mxu1 }
0x5822   :  { %v4642_v45 = vadd.f32 %v4638_v9, %v4566_v50 }
0x5823   :  { %v11698_v6 = vpop.f32.mrf.mxu1 }
0x5824   :  { %12696 = vtanh.f32 %v4642_v45  ;;  %v10563_v55 = vmul.f32 -1.442695, %v4642_v45 }
0x5826   :  { %12698 = vpow2.f32 %v10563_v55 }
0x5831   :  { %v12697_v17 = vpop.eup %12696 }
0x5832   :  { %4652 = vrot.lane.b32.xlu1 %v12697_v17, %s13456_s0 }
0x5833   :  { %v12699_v18 = vpop.eup %12698 }
0x5834   :  { %v4646_v19 = vadd.f32 1.0, %v12699_v18 }
0x5836   :  { %12700 = vrcp.f32 %v4646_v19 }
0x5843   :  { %v12701_v62 = vpop.eup %12700 }
0x5844   :  { %v4650_v44 = vmul.f32 %v12701_v62, %v4554_v63 }
0x58a4   :  { %v4653_v22 = vpop.permute.xlu1 %4652 }
0x58a5   :  { %v4655_v1 = vmul.f32 %v12701_v62, %v4653_v22 }
0x58a7   :  { %4657 = vrot.lane.b32.xlu1 %v4655_v1, %s13454_s29 }
0x5919   :  { %v4658_v40 = vpop.permute.xlu1 %4657 }
0x591a   :  { %v4660_v54 = vadd.f32 %v4658_v40, %v4650_v44 }
0x591c   :  { %12702 = vtanh.f32 %v4660_v54 }
0x5929   :  { %v12703_v58 = vpop.eup %12702 }
0x592a   :  { %4663 = vrot.lane.b32.xlu0 %v12703_v58, %s13454_s29 }
0x592e   :  { %4668 = vperm.xlu0 %12393, %v14685_v5  }
0x5932   :  { %12394 = vset.pattern.permute.xlu0 %v13465_v56 }
0x599c   :  { %v4664_v43 = vpop.permute.xlu0 %4663 }
0x599d   :  { %v4666_v61 = vmul.f32 %v12701_v62, %v4664_v43 }
0x599f   :  { %4674 = vrot.lane.b32.xlu1 %v4666_v61, %s13451_s27 }
0x59a9   :  { %v4669_v27 = vpop.permute.xlu0 %4668 }
0x59aa   :  { %v4671_v2 = vmul.f32 %v14745_v59, %v4669_v27 }
0x59ac   :  { %v4672_v33 = vadd.f32 %v14751_v60, %v4671_v2 }
0x5a11   :  { %v4675_v31 = vpop.permute.xlu1 %4674 }
0x5a12   :  { %11704 = vmatmul.mubr.msk.f32.vlgmr.msra.gmra.mxu0 %vm85_vm1, %v4675_v31 }
0x5a13   :  { %11714 = vmatpush3.msra.mxu0 %v14717_v20  ;;  %11717 = vmatprep.mubr.msk.f32.mxu0 %vm13453_vm5, %v13452_v24 }
0x5a14   :  { %11715 = vmatprep.subr.mxu0 %v13452_v24 }
0x5a15   :  { %11716 = vmatpush3.msra.mxu0 %v14726_v53 }
0x5a16   :  { %11727 = vmatprep.subr.mxu0 %v13452_v24 }
0x5ad2   :  { %v4744_v26 = vpop.f32.mrf.mxu0 }
0x5ad3   :  { %v4748_v47 = vadd.f32 %v4744_v26, %v4672_v33 }
0x5ad4   :  { %v11705_v15 = vpop.f32.mrf.mxu0 }
0x5ad5   :  { %12704 = vtanh.f32 %v4748_v47  ;;  %v10565_v36 = vmul.f32 -1.442695, %v4748_v47 }
0x5ad7   :  { %12706 = vpow2.f32 %v10565_v36 }
0x5ae2   :  { %v12705_v7 = vpop.eup %12704 }
0x5ae3   :  { %4758 = vrot.lane.b32.xlu1 %v12705_v7, %s13456_s0 }
0x5ae4   :  { %v12707_v37 = vpop.eup %12706 }
0x5ae5   :  { %v4752_v41 = vadd.f32 1.0, %v12707_v37 }
0x5ae7   :  { %12708 = vrcp.f32 %v4752_v41 }
0x5af4   :  { %v12709_v49 = vpop.eup %12708 }
0x5af5   :  { %v4756_v34 = vmul.f32 %v12709_v49, %v4660_v54 }
0x5b55   :  { %v4759_v0 = vpop.permute.xlu1 %4758 }
0x5b56   :  { %v4761_v63 = vmul.f32 %v12709_v49, %v4759_v0 }
0x5b58   :  { %4763 = vrot.lane.b32.xlu1 %v4761_v63, %s13454_s29 }
0x5bca   :  { %v4764_v57 = vpop.permute.xlu1 %4763 }
0x5bcb   :  { %v4766_v51 = vadd.f32 %v4764_v57, %v4756_v34 }
0x5bcd   :  { %12710 = vtanh.f32 %v4766_v51 }
0x5bda   :  { %v12711_v42 = vpop.eup %12710 }
0x5bdb   :  { %4769 = vrot.lane.b32.xlu0 %v12711_v42, %s13454_s29 }
0x5bdf   :  { %4774 = vperm.xlu0 %12394, %v14685_v5  }
0x5be3   :  { %12395 = vset.pattern.permute.xlu0 %v13466_v3 }
0x5c4d   :  { %v4770_v8 = vpop.permute.xlu0 %4769 }
0x5c4e   :  { %v4772_v52 = vmul.f32 %v12709_v49, %v4770_v8 }
0x5c50   :  { %4780 = vrot.lane.b32.xlu1 %v4772_v52, %s13451_s27 }
0x5c5a   :  { %v4775_v9 = vpop.permute.xlu0 %4774 }
0x5c5b   :  { %v4777_v45 = vmul.f32 %v14745_v59, %v4775_v9 }
0x5c5d   :  { %v4778_v6 = vadd.f32 %v14751_v60, %v4777_v45 }
0x5cc2   :  { %v4781_v50 = vpop.permute.xlu1 %4780 }
0x5cc3   :  { %11711 = vmatmul.mubr.msk.f32.vlgmr.msra.gmra.mxu1 %vm85_vm1, %v4781_v50 }
0x5cc4   :  { %11721 = vmatpush3.msra.mxu1 %v14717_v20  ;;  %11724 = vmatprep.mubr.msk.f32.mxu1 %vm13453_vm5, %v13452_v24 }
0x5cc5   :  { %11722 = vmatprep.subr.mxu1 %v13452_v24 }
0x5cc6   :  { %11723 = vmatpush3.msra.mxu1 %v14726_v53 }
0x5cc7   :  { %11734 = vmatprep.subr.mxu1 %v13452_v24 }
0x5d83   :  { %v4850_v17 = vpop.f32.mrf.mxu1 }
0x5d84   :  { %v4854_v55 = vadd.f32 %v4850_v17, %v4778_v6 }
0x5d85   :  { %v11712_v18 = vpop.f32.mrf.mxu1 }
0x5d86   :  { %12712 = vtanh.f32 %v4854_v55  ;;  %v10567_v62 = vmul.f32 -1.442695, %v4854_v55 }
0x5d88   :  { %12714 = vpow2.f32 %v10567_v62 }
0x5d93   :  { %v12713_v19 = vpop.eup %12712 }
0x5d94   :  { %4864 = vrot.lane.b32.xlu1 %v12713_v19, %s13456_s0 }
0x5d95   :  { %v12715_v22 = vpop.eup %12714 }
0x5d96   :  { %v4858_v1 = vadd.f32 1.0, %v12715_v22 }
0x5d98   :  { %12716 = vrcp.f32 %v4858_v1 }
0x5da5   :  { %v12717_v44 = vpop.eup %12716 }
0x5da6   :  { %v4862_v58 = vmul.f32 %v12717_v44, %v4766_v51 }
0x5e06   :  { %v4865_v40 = vpop.permute.xlu1 %4864 }
0x5e07   :  { %v4867_v54 = vmul.f32 %v12717_v44, %v4865_v40 }
0x5e09   :  { %4869 = vrot.lane.b32.xlu1 %v4867_v54, %s13454_s29 }
0x5e7b   :  { %v4870_v43 = vpop.permute.xlu1 %4869 }
0x5e7c   :  { %v4872_v61 = vadd.f32 %v4870_v43, %v4862_v58 }
0x5e7e   :  { %12718 = vtanh.f32 %v4872_v61 }
0x5e8b   :  { %v12719_v31 = vpop.eup %12718 }
0x5e8c   :  { %4875 = vrot.lane.b32.xlu0 %v12719_v31, %s13454_s29 }
0x5e90   :  { %4880 = vperm.xlu0 %12395, %v14685_v5  }
0x5e94   :  { %12396 = vset.pattern.permute.xlu0 %v13467_v48 }
0x5efe   :  { %v4876_v27 = vpop.permute.xlu0 %4875 }
0x5eff   :  { %v4878_v2 = vmul.f32 %v12717_v44, %v4876_v27 }
0x5f01   :  { %4886 = vrot.lane.b32.xlu1 %v4878_v2, %s13451_s27 }
0x5f0b   :  { %v4881_v26 = vpop.permute.xlu0 %4880 }
0x5f0c   :  { %v4883_v47 = vmul.f32 %v14745_v59, %v4881_v26 }
0x5f0e   :  { %v4884_v15 = vadd.f32 %v14751_v60, %v4883_v47 }
0x5f73   :  { %v4887_v33 = vpop.permute.xlu1 %4886 }
0x5f74   :  { %11718 = vmatmul.mubr.msk.f32.vlgmr.msra.gmra.mxu0 %vm85_vm1, %v4887_v33 }
0x5f75   :  { %11728 = vmatpush3.msra.mxu0 %v14717_v20  ;;  %11731 = vmatprep.mubr.msk.f32.mxu0 %vm13453_vm5, %v13452_v24 }
0x5f76   :  { %11729 = vmatprep.subr.mxu0 %v13452_v24 }
0x5f77   :  { %11730 = vmatpush3.msra.mxu0 %v14726_v53 }
0x5f78   :  { %11741 = vmatprep.subr.mxu0 %v13452_v24 }
0x6034   :  { %v4956_v7 = vpop.f32.mrf.mxu0 }
0x6035   :  { %v4960_v36 = vadd.f32 %v4956_v7, %v4884_v15 }
0x6036   :  { %v11719_v37 = vpop.f32.mrf.mxu0 }
0x6037   :  { %12720 = vtanh.f32 %v4960_v36  ;;  %v10569_v49 = vmul.f32 -1.442695, %v4960_v36 }
0x6039   :  { %12722 = vpow2.f32 %v10569_v49 }
0x6044   :  { %v12721_v41 = vpop.eup %12720 }
0x6045   :  { %4970 = vrot.lane.b32.xlu1 %v12721_v41, %s13456_s0 }
0x6046   :  { %v12723_v0 = vpop.eup %12722 }
0x6047   :  { %v4964_v63 = vadd.f32 1.0, %v12723_v0 }
0x6049   :  { %12724 = vrcp.f32 %v4964_v63 }
0x6056   :  { %v12725_v34 = vpop.eup %12724 }
0x6057   :  { %v4968_v42 = vmul.f32 %v12725_v34, %v4872_v61 }
0x60b7   :  { %v4971_v57 = vpop.permute.xlu1 %4970 }
0x60b8   :  { %v4973_v51 = vmul.f32 %v12725_v34, %v4971_v57 }
0x60ba   :  { %4975 = vrot.lane.b32.xlu1 %v4973_v51, %s13454_s29 }
0x612c   :  { %v4976_v8 = vpop.permute.xlu1 %4975 }
0x612d   :  { %v4978_v52 = vadd.f32 %v4976_v8, %v4968_v42 }
0x612f   :  { %12726 = vtanh.f32 %v4978_v52 }
0x613c   :  { %v12727_v50 = vpop.eup %12726 }
0x613d   :  { %4981 = vrot.lane.b32.xlu0 %v12727_v50, %s13454_s29 }
0x6141   :  { %4986 = vperm.xlu0 %12396, %v14685_v5  }
0x6145   :  { %12397 = vset.pattern.permute.xlu0 %v13468_v38 }
0x61af   :  { %v4982_v9 = vpop.permute.xlu0 %4981 }
0x61b0   :  { %v4984_v45 = vmul.f32 %v12725_v34, %v4982_v9 }
0x61b2   :  { %4992 = vrot.lane.b32.xlu1 %v4984_v45, %s13451_s27 }
0x61bc   :  { %v4987_v17 = vpop.permute.xlu0 %4986 }
0x61bd   :  { %v4989_v55 = vmul.f32 %v14745_v59, %v4987_v17 }
0x61bf   :  { %v4990_v18 = vadd.f32 %v14751_v60, %v4989_v55 }
0x6224   :  { %v4993_v6 = vpop.permute.xlu1 %4992 }
0x6225   :  { %11725 = vmatmul.mubr.msk.f32.vlgmr.msra.gmra.mxu1 %vm85_vm1, %v4993_v6 }
0x6226   :  { %11735 = vmatpush3.msra.mxu1 %v14717_v20  ;;  %11738 = vmatprep.mubr.msk.f32.mxu1 %vm13453_vm5, %v13452_v24 }
0x6227   :  { %11736 = vmatprep.subr.mxu1 %v13452_v24 }
0x6228   :  { %11737 = vmatpush3.msra.mxu1 %v14726_v53 }
0x6229   :  { %11748 = vmatprep.subr.mxu1 %v13452_v24 }
0x62e5   :  { %v5062_v19 = vpop.f32.mrf.mxu1 }
0x62e6   :  { %v5066_v62 = vadd.f32 %v5062_v19, %v4990_v18 }
0x62e7   :  { %v11726_v22 = vpop.f32.mrf.mxu1 }
0x62e8   :  { %12728 = vtanh.f32 %v5066_v62  ;;  %v10571_v44 = vmul.f32 -1.442695, %v5066_v62 }
0x62ea   :  { %12730 = vpow2.f32 %v10571_v44 }
0x62f5   :  { %v12729_v1 = vpop.eup %12728 }
0x62f6   :  { %5076 = vrot.lane.b32.xlu1 %v12729_v1, %s13456_s0 }
0x62f7   :  { %v12731_v40 = vpop.eup %12730 }
0x62f8   :  { %v5070_v54 = vadd.f32 1.0, %v12731_v40 }
0x62fa   :  { %12732 = vrcp.f32 %v5070_v54 }
0x6307   :  { %v12733_v58 = vpop.eup %12732 }
0x6308   :  { %v5074_v31 = vmul.f32 %v12733_v58, %v4978_v52 }
0x6368   :  { %v5077_v43 = vpop.permute.xlu1 %5076 }
0x6369   :  { %v5079_v61 = vmul.f32 %v12733_v58, %v5077_v43 }
0x636b   :  { %5081 = vrot.lane.b32.xlu1 %v5079_v61, %s13454_s29 }
0x63dd   :  { %v5082_v27 = vpop.permute.xlu1 %5081 }
0x63de   :  { %v5084_v2 = vadd.f32 %v5082_v27, %v5074_v31 }
0x63e0   :  { %12734 = vtanh.f32 %v5084_v2 }
0x63ed   :  { %v12735_v33 = vpop.eup %12734 }
0x63ee   :  { %5087 = vrot.lane.b32.xlu0 %v12735_v33, %s13454_s29 }
0x63f2   :  { %5092 = vperm.xlu0 %12397, %v14685_v5  }
0x63f6   :  { %12398 = vset.pattern.permute.xlu0 %v13469_v25 }
0x6460   :  { %v5088_v26 = vpop.permute.xlu0 %5087 }
0x6461   :  { %v5090_v47 = vmul.f32 %v12733_v58, %v5088_v26 }
0x6463   :  { %5098 = vrot.lane.b32.xlu1 %v5090_v47, %s13451_s27 }
0x646d   :  { %v5093_v7 = vpop.permute.xlu0 %5092 }
0x646e   :  { %v5095_v36 = vmul.f32 %v14745_v59, %v5093_v7 }
0x6470   :  { %v5096_v37 = vadd.f32 %v14751_v60, %v5095_v36 }
0x64d5   :  { %v5099_v15 = vpop.permute.xlu1 %5098 }
0x64d6   :  { %11732 = vmatmul.mubr.msk.f32.vlgmr.msra.gmra.mxu0 %vm85_vm1, %v5099_v15 }
0x64d7   :  { %11742 = vmatpush3.msra.mxu0 %v14717_v20  ;;  %11745 = vmatprep.mubr.msk.f32.mxu0 %vm13453_vm5, %v13452_v24 }
0x64d8   :  { %11743 = vmatprep.subr.mxu0 %v13452_v24 }
0x64d9   :  { %11744 = vmatpush3.msra.mxu0 %v14726_v53 }
0x64da   :  { %11755 = vmatprep.subr.mxu0 %v13452_v24 }
0x6596   :  { %v5168_v41 = vpop.f32.mrf.mxu0 }
0x6597   :  { %v5172_v49 = vadd.f32 %v5168_v41, %v5096_v37 }
0x6598   :  { %v11733_v0 = vpop.f32.mrf.mxu0 }
0x6599   :  { %12736 = vtanh.f32 %v5172_v49  ;;  %v10573_v34 = vmul.f32 -1.442695, %v5172_v49 }
0x659b   :  { %12738 = vpow2.f32 %v10573_v34 }
0x65a6   :  { %v12737_v63 = vpop.eup %12736 }
0x65a7   :  { %5182 = vrot.lane.b32.xlu1 %v12737_v63, %s13456_s0 }
0x65a8   :  { %v12739_v57 = vpop.eup %12738 }
0x65a9   :  { %v5176_v51 = vadd.f32 1.0, %v12739_v57 }
0x65ab   :  { %12740 = vrcp.f32 %v5176_v51 }
0x65b8   :  { %v12741_v42 = vpop.eup %12740 }
0x65b9   :  { %v5180_v50 = vmul.f32 %v12741_v42, %v5084_v2 }
0x6619   :  { %v5183_v8 = vpop.permute.xlu1 %5182 }
0x661a   :  { %v5185_v52 = vmul.f32 %v12741_v42, %v5183_v8 }
0x661c   :  { %5187 = vrot.lane.b32.xlu1 %v5185_v52, %s13454_s29 }
0x668e   :  { %v5188_v9 = vpop.permute.xlu1 %5187 }
0x668f   :  { %v5190_v45 = vadd.f32 %v5188_v9, %v5180_v50 }
0x6691   :  { %12742 = vtanh.f32 %v5190_v45 }
0x669e   :  { %v12743_v6 = vpop.eup %12742 }
0x669f   :  { %5193 = vrot.lane.b32.xlu0 %v12743_v6, %s13454_s29 }
0x66a3   :  { %5198 = vperm.xlu0 %12398, %v14685_v5  }
0x66a7   :  { %12399 = vset.pattern.permute.xlu0 %v13470_v14 }
0x6711   :  { %v5194_v17 = vpop.permute.xlu0 %5193 }
0x6712   :  { %v5196_v55 = vmul.f32 %v12741_v42, %v5194_v17 }
0x6714   :  { %5204 = vrot.lane.b32.xlu1 %v5196_v55, %s13451_s27 }
0x671e   :  { %v5199_v19 = vpop.permute.xlu0 %5198 }
0x671f   :  { %v5201_v62 = vmul.f32 %v14745_v59, %v5199_v19 }
0x6721   :  { %v5202_v22 = vadd.f32 %v14751_v60, %v5201_v62  ;;  %v13196_v62 = vld [vmem:[%s16112_s6 + $0x8] sm:$0xff] }
0x6786   :  { %v5205_v18 = vpop.permute.xlu1 %5204 }
0x6787   :  { %11739 = vmatmul.mubr.msk.f32.vlgmr.msra.gmra.mxu1 %vm85_vm1, %v5205_v18 }
0x6788   :  { %11749 = vmatpush3.msra.mxu1 %v14717_v20  ;;  %11752 = vmatprep.mubr.msk.f32.mxu1 %vm13453_vm5, %v13452_v24 }
0x6789   :  { %11750 = vmatprep.subr.mxu1 %v13452_v24 }
0x678a   :  { %11751 = vmatpush3.msra.mxu1 %v14726_v53 }
0x678b   :  { %11762 = vmatprep.subr.mxu1 %v13452_v24 }
0x6847   :  { %v5274_v1 = vpop.f32.mrf.mxu1 }
0x6848   :  { %v5278_v44 = vadd.f32 %v5274_v1, %v5202_v22  ;;  %v13197_v22 = vld [vmem:[%s16112_s6] sm:$0xff] }
0x6849   :  { %v11740_v40 = vpop.f32.mrf.mxu1 }
0x684a   :  { %12744 = vtanh.f32 %v5278_v44  ;;  %v10575_v58 = vmul.f32 -1.442695, %v5278_v44 }
0x684c   :  { %12746 = vpow2.f32 %v10575_v58 }
0x6857   :  { %v12745_v54 = vpop.eup %12744 }
0x6858   :  { %5288 = vrot.lane.b32.xlu1 %v12745_v54, %s13456_s0 }
0x6859   :  { %v12747_v43 = vpop.eup %12746 }
0x685a   :  { %v5282_v61 = vadd.f32 1.0, %v12747_v43 }
0x685c   :  { %12748 = vrcp.f32 %v5282_v61 }
0x6869   :  { %v12749_v31 = vpop.eup %12748 }
0x686a   :  { %v5286_v33 = vmul.f32 %v12749_v31, %v5190_v45 }
0x68ca   :  { %v5289_v27 = vpop.permute.xlu1 %5288 }
0x68cb   :  { %v5291_v2 = vmul.f32 %v12749_v31, %v5289_v27 }
0x68cd   :  { %5293 = vrot.lane.b32.xlu1 %v5291_v2, %s13454_s29 }
0x693f   :  { %v5294_v26 = vpop.permute.xlu1 %5293 }
0x6940   :  { %v5296_v47 = vadd.f32 %v5294_v26, %v5286_v33 }
0x6942   :  { %12750 = vtanh.f32 %v5296_v47 }
0x694f   :  { %v12751_v15 = vpop.eup %12750 }
0x6950   :  { %5299 = vrot.lane.b32.xlu0 %v12751_v15, %s13454_s29 }
0x6954   :  { %5304 = vperm.xlu0 %12399, %v14685_v5  }
0x6958   :  { %12400 = vset.pattern.permute.xlu0 %v13471_v21 }
0x69c2   :  { %v5300_v7 = vpop.permute.xlu0 %5299 }
0x69c3   :  { %v5302_v36 = vmul.f32 %v12749_v31, %v5300_v7 }
0x69c5   :  { %5310 = vrot.lane.b32.xlu1 %v5302_v36, %s13451_s27 }
0x69cf   :  { %v5305_v41 = vpop.permute.xlu0 %5304 }
0x69d0   :  { %v5307_v49 = vmul.f32 %v14745_v59, %v5305_v41 }
0x69d2   :  { %v5308_v0 = vadd.f32 %v14751_v60, %v5307_v49 }
0x6a37   :  { %v5311_v37 = vpop.permute.xlu1 %5310 }
0x6a38   :  { %11746 = vmatmul.mubr.msk.f32.vlgmr.msra.gmra.mxu0 %vm85_vm1, %v5311_v37 }
0x6a39   :  { %11756 = vmatpush3.msra.mxu0 %v14717_v20  ;;  %11759 = vmatprep.mubr.msk.f32.mxu0 %vm13453_vm5, %v13452_v24 }
0x6a3a   :  { %11757 = vmatprep.subr.mxu0 %v13452_v24 }
0x6a3b   :  { %11758 = vmatpush3.msra.mxu0 %v14726_v53 }
0x6a3c   :  { %11769 = vmatprep.subr.mxu0 %v13452_v24 }
0x6af8   :  { %v5380_v63 = vpop.f32.mrf.mxu0 }
0x6af9   :  { %v5384_v34 = vadd.f32 %v5380_v63, %v5308_v0 }
0x6afa   :  { %v11747_v57 = vpop.f32.mrf.mxu0 }
0x6afb   :  { %12752 = vtanh.f32 %v5384_v34  ;;  %v10577_v20 = vmul.f32 -1.442695, %v5384_v34 }
0x6afd   :  { %12754 = vpow2.f32 %v10577_v20 }
0x6b08   :  { %v12753_v51 = vpop.eup %12752 }
0x6b09   :  { %5394 = vrot.lane.b32.xlu1 %v12753_v51, %s13456_s0 }
0x6b0a   :  { %v12755_v42 = vpop.eup %12754 }
0x6b0b   :  { %v5388_v8 = vadd.f32 1.0, %v12755_v42 }
0x6b0d   :  { %12756 = vrcp.f32 %v5388_v8 }
0x6b1a   :  { %v12757_v53 = vpop.eup %12756 }
0x6b1b   :  { %v5392_v9 = vmul.f32 %v12757_v53, %v5296_v47 }
0x6b7b   :  { %v5395_v52 = vpop.permute.xlu1 %5394 }
0x6b7c   :  { %v5397_v50 = vmul.f32 %v12757_v53, %v5395_v52 }
0x6b7e   :  { %5399 = vrot.lane.b32.xlu1 %v5397_v50, %s13454_s29 }
0x6bf0   :  { %v5400_v45 = vpop.permute.xlu1 %5399 }
0x6bf1   :  { %v5402_v6 = vadd.f32 %v5400_v45, %v5392_v9 }
0x6bf3   :  { %12758 = vtanh.f32 %v5402_v6 }
0x6c00   :  { %v12759_v17 = vpop.eup %12758 }
0x6c01   :  { %5405 = vrot.lane.b32.xlu0 %v12759_v17, %s13454_s29 }
0x6c05   :  { %5410 = vperm.xlu0 %12400, %v14685_v5  }
0x6c09   :  { %12401 = vset.pattern.permute.xlu0 %v13472_v35 }
0x6c73   :  { %v5406_v55 = vpop.permute.xlu0 %5405 }
0x6c74   :  { %v5408_v18 = vmul.f32 %v12757_v53, %v5406_v55 }
0x6c76   :  { %5416 = vrot.lane.b32.xlu1 %v5408_v18, %s13451_s27 }
0x6c80   :  { %v5411_v1 = vpop.permute.xlu0 %5410 }
0x6c81   :  { %v5413_v44 = vmul.f32 %v14745_v59, %v5411_v1  ;;  %v13198_v1 = vld [vmem:[%s16117_s11] sm:$0xff] }
0x6c83   :  { %v5414_v40 = vadd.f32 %v14751_v60, %v5413_v44  ;;  %v13199_v44 = vld [vmem:[#allocation2 + $0x70] sm:$0xff] }
0x6ce8   :  { %v5417_v19 = vpop.permute.xlu1 %5416 }
0x6ce9   :  { %11753 = vmatmul.mubr.msk.f32.vlgmr.msra.gmra.mxu1 %vm85_vm1, %v5417_v19 }
0x6cea   :  { %11763 = vmatpush3.msra.mxu1 %v13196_v62  ;;  %11766 = vmatprep.mubr.msk.f32.mxu1 %vm13453_vm5, %v13452_v24 }
0x6ceb   :  { %11764 = vmatprep.subr.mxu1 %v13452_v24 }
0x6cec   :  { %11765 = vmatpush3.msra.mxu1 %v13197_v22 }
0x6ced   :  { %11816 = vmatprep.subr.mxu1 %v13452_v24 }
0x6da9   :  { %v5486_v54 = vpop.f32.mrf.mxu1 }
0x6daa   :  { %v5490_v58 = vadd.f32 %v5486_v54, %v5414_v40  ;;  %v13200_v40 = vld [vmem:[#allocation2 + $0x68] sm:$0xff] }
0x6dab   :  { %v11754_v43 = vpop.f32.mrf.mxu1  ;;  %v13201_v54 = vld [vmem:[%s16117_s11 + $0x8] sm:$0xff] }
0x6dac   :  { %12760 = vtanh.f32 %v5490_v58  ;;  %v10579_v31 = vmul.f32 -1.442695, %v5490_v58  ;;  %v13202_v58 = vld [vmem:[#allocation2 + $0x60] sm:$0xff]  ;;  %v13203_v43 = vld [vmem:[#allocation2 + $0x58] sm:$0xff] }
0x6dae   :  { %12762 = vpow2.f32 %v10579_v31  ;;  %v13205_v31 = vld [vmem:[#allocation2 + $0x50] sm:$0xff] }
0x6db9   :  { %v12761_v61 = vpop.eup %12760 }
0x6dba   :  { %5500 = vrot.lane.b32.xlu1 %v12761_v61, %s13456_s0  ;;  %v13204_v61 = vld [vmem:[%s16117_s11 + $0x10] sm:$0xff] }
0x6dbb   :  { %v12763_v27 = vpop.eup %12762 }
0x6dbc   :  { %v5494_v2 = vadd.f32 1.0, %v12763_v27  ;;  %v13206_v27 = vld [vmem:[#allocation2 + $0x48] sm:$0xff] }
0x6dbe   :  { %12764 = vrcp.f32 %v5494_v2  ;;  %v13207_v2 = vld [vmem:[%s16117_s11 + $0x18] sm:$0xff] }
0x6dcb   :  { %v12765_v33 = vpop.eup %12764 }
0x6dcc   :  { %v5498_v15 = vmul.f32 %v12765_v33, %v5402_v6 }
0x6e2c   :  { %v5501_v26 = vpop.permute.xlu1 %5500 }
0x6e2d   :  { %v5503_v47 = vmul.f32 %v12765_v33, %v5501_v26  ;;  %v13209_v26 = vld [vmem:[#allocation2 + $0x38] sm:$0xff] }
0x6e2f   :  { %5505 = vrot.lane.b32.xlu1 %v5503_v47, %s13454_s29  ;;  %v13210_v47 = vld [vmem:[%s16117_s11 + $0x20] sm:$0xff] }
0x6ea1   :  { %v5506_v7 = vpop.permute.xlu1 %5505 }
0x6ea2   :  { %v5508_v36 = vadd.f32 %v5506_v7, %v5498_v15  ;;  %v13211_v15 = vld [vmem:[#allocation2 + $0x30] sm:$0xff]  ;;  %v13212_v7 = vld [vmem:[#allocation2 + $0x28] sm:$0xff] }
0x6ea4   :  { %12766 = vtanh.f32 %v5508_v36 }
0x6eb1   :  { %v12767_v37 = vpop.eup %12766 }
0x6eb2   :  { %5511 = vrot.lane.b32.xlu0 %v12767_v37, %s13454_s29  ;;  %v13214_v37 = vld [vmem:[#allocation2 + $0x20] sm:$0xff] }
0x6eb6   :  { %5516 = vperm.xlu0 %12401, %v14685_v5  }
0x6eba   :  { %12404 = vset.pattern.permute.xlu0 %v13458_v28 }
0x6f24   :  { %v5512_v41 = vpop.permute.xlu0 %5511 }
0x6f25   :  { %v5514_v49 = vmul.f32 %v12765_v33, %v5512_v41  ;;  %v13208_v33 = vld [vmem:[#allocation2 + $0x40] sm:$0xff]  ;;  %v13215_v41 = vld [vmem:[#allocation2 + $0x18] sm:$0xff] }
0x6f27   :  { %5522 = vrot.lane.b32.xlu1 %v5514_v49, %s13451_s27  ;;  %v13216_v49 = vld [vmem:[%s16117_s11 + $0x30] sm:$0xff] }
0x6f31   :  { %v5517_v63 = vpop.permute.xlu0 %5516 }
0x6f32   :  { %v5519_v34 = vmul.f32 %v14745_v59, %v5517_v63  ;;  %v13218_v63 = vld [vmem:[#allocation2 + $0x8] sm:$0xff] }
0x6f34   :  { %v5520_v57 = vadd.f32 %v14751_v60, %v5519_v34  ;;  %v13219_v34 = vld [vmem:[%s16117_s11 + $0x38] sm:$0xff] }
0x6f99   :  { %v5523_v0 = vpop.permute.xlu1 %5522 }
0x6f9a   :  { %11760 = vmatmul.mubr.msk.f32.vlgmr.msra.gmra.mxu0 %vm85_vm1, %v5523_v0  ;;  %v13217_v0 = vld [vmem:[#allocation2 + $0x10] sm:$0xff] }
0x6f9b   :  { %11771 = vmatprep.mubr.msk.f32.mxu0 %vm13453_vm5, %v13452_v24 }
0x705a   :  { %v5592_v51 = vpop.f32.mrf.mxu0 }
0x705b   :  { %v5596_v20 = vadd.f32 %v5592_v51, %v5520_v57  ;;  %v13220_v57 = vld [vmem:[#allocation2] sm:$0xff] }
0x705c   :  { %v11761_v5 = vpop.f32.mrf.mxu0  ;;  %v13221_v51 = vld [vmem:[%s16117_s11 + $0x40] sm:$0xff] }
0x705d   :  { %12768 = vtanh.f32 %v5596_v20  ;;  %v10581_v8 = vmul.f32 -1.442695, %v5596_v20  ;;  %v13222_v20 = vld [vmem:[%s16117_s11 + $0x48] sm:$0xff]  ;;  %v13223_v5 = vld [vmem:[%s16117_s11 + $0x50] sm:$0xff] }
0x705f   :  { %12770 = vpow2.f32 %v10581_v8  ;;  %v13225_v8 = vld [vmem:[%s16117_s11 + $0x60] sm:$0xff] }
0x706a   :  { %v12769_v42 = vpop.eup %12768 }
0x706b   :  { %5606 = vrot.lane.b32.xlu1 %v12769_v42, %s13456_s0  ;;  %v13224_v42 = vld [vmem:[%s16117_s11 + $0x58] sm:$0xff] }
0x706c   :  { %v12771_v53 = vpop.eup %12770 }
0x706d   :  { %v5600_v52 = vadd.f32 1.0, %v12771_v53  ;;  %v13226_v53 = vld [vmem:[%s16117_s11 + $0x68] sm:$0xff] }
0x706f   :  { %12772 = vrcp.f32 %v5600_v52  ;;  %v13227_v52 = vld [vmem:[%s16117_s11 + $0x70] sm:$0xff] }
0x707c   :  { %v12773_v50 = vpop.eup %12772 }
0x707d   :  { %v5604_v59 = vmul.f32 %v12773_v50, %v5508_v36  ;;  %v13213_v36 = vld [vmem:[%s16117_s11 + $0x28] sm:$0xff] }
0x70dd   :  { %v5607_v9 = vpop.permute.xlu1 %5606 }
0x70de   :  { %v5609_v45 = vmul.f32 %v12773_v50, %v5607_v9 }
0x70e0   :  { %5611 = vrot.lane.b32.xlu1 %v5609_v45, %s13454_s29 }
0x7152   :  { %v5612_v6 = vpop.permute.xlu1 %5611 }
0x7153   :  { %v14951_v60 = vadd.f32 %v5612_v6, %v5604_v59 }
0x7155   :  { %12774 = vtanh.f32 %v14951_v60 }
0x7162   :  { %v12775_v17 = vpop.eup %12774 }
0x7163   :  { %5617 = vrot.lane.b32.xlu0 %v12775_v17, %s13454_s29 }
0x71d5   :  { %v5618_v55 = vpop.permute.xlu0 %5617 }
0x71d6   :  { %v14955_v18 = vmul.f32 %v12773_v50, %v5618_v55 }
0x71d8   :  { %5631 = vrot.lane.b32.xlu1 %v14955_v18, %s13451_s27 }
0x724a   :  { %v14959_v19 = vpop.permute.xlu1 %5631 }
0x724b   :  { %11767 = vmatmul.mubr.msk.f32.vlgmr.msra.gmra.mxu1 %vm85_vm1, %v14959_v19 }
0x724c   :  { %11846 = vmatprep.mubr.msk.f32.mxu1 %vm13453_vm5, %v13452_v24 }
0x730b   :  { %v5701_v62 = vpop.f32.mrf.mxu1 }
0x730c   :  { %11770 = vmatpush3.msk.msra.mxu0 %vm503_vm2, %v5701_v62 }
0x730d   :  { %v11768_v22 = vpop.f32.mrf.mxu1  ;;  %11772 = vmatmul.mubr.msk.f32.vlgmr.msra.gmra.mxu0 %vm887_vm6, %v13198_v1  ;;  %11868 = vmatprep.subr.mxu0 %v13452_v24 }
0x730e   :  { %11774 = vmatprep.mubr.msk.f32.mxu0 %vm13453_vm5, %v13452_v24  ;;  %11869 = vmatpush3.msra.mxu0 %v13199_v44 }
0x730f   :  { %11870 = vmatprep.subr.mxu0 %v13452_v24 }
0x7310   :  { %11871 = vmatpush3.msra.mxu0 %v13200_v40 }
0x7311   :  { %11775 = vmatmul.mubr.msk.f32.gmra.mxu0 %vm887_vm6, %v13201_v54  ;;  %11872 = vmatprep.subr.mxu0 %v13452_v24 }
0x7312   :  { %11777 = vmatprep.mubr.msk.f32.mxu0 %vm13453_vm5, %v13452_v24  ;;  %11873 = vmatpush3.msra.mxu0 %v13202_v58 }
0x7313   :  { %11874 = vmatprep.subr.mxu0 %v13452_v24 }
0x7314   :  { %11875 = vmatpush3.msra.mxu0 %v13203_v43 }
0x7315   :  { %11778 = vmatmul.mubr.msk.f32.gmra.mxu0 %vm887_vm6, %v13204_v61  ;;  %11876 = vmatprep.subr.mxu0 %v13452_v24 }
0x7316   :  { %11780 = vmatprep.mubr.msk.f32.mxu0 %vm13453_vm5, %v13452_v24  ;;  %11877 = vmatpush3.msra.mxu0 %v13205_v31 }
0x7317   :  { %11878 = vmatprep.subr.mxu0 %v13452_v24 }
0x7318   :  { %11879 = vmatpush3.msra.mxu0 %v13206_v27 }
0x7319   :  { %11781 = vmatmul.mubr.msk.f32.gmra.mxu0 %vm887_vm6, %v13207_v2  ;;  %11880 = vmatprep.subr.mxu0 %v13452_v24 }
0x731a   :  { %11783 = vmatprep.mubr.msk.f32.mxu0 %vm13453_vm5, %v13452_v24  ;;  %11881 = vmatpush3.msra.mxu0 %v13208_v33 }
0x731b   :  { %11882 = vmatprep.subr.mxu0 %v13452_v24 }
0x731c   :  { %11883 = vmatpush3.msra.mxu0 %v13209_v26 }
0x731d   :  { %11784 = vmatmul.mubr.msk.f32.gmra.mxu0 %vm887_vm6, %v13210_v47  ;;  %11884 = vmatprep.subr.mxu0 %v13452_v24 }
0x731e   :  { %11786 = vmatprep.mubr.msk.f32.mxu0 %vm13453_vm5, %v13452_v24  ;;  %11885 = vmatpush3.msra.mxu0 %v13211_v15 }
0x731f   :  { %11886 = vmatprep.subr.mxu0 %v13452_v24 }
0x7320   :  { %11887 = vmatpush3.msra.mxu0 %v13212_v7 }
0x7321   :  { %11787 = vmatmul.mubr.msk.f32.gmra.mxu0 %vm887_vm6, %v13213_v36  ;;  %11888 = vmatprep.subr.mxu0 %v13452_v24 }
0x7322   :  { %11789 = vmatprep.mubr.msk.f32.mxu0 %vm13453_vm5, %v13452_v24  ;;  %11889 = vmatpush3.msra.mxu0 %v13214_v37  ;;  %v13228_v37 = vld [vmem:[#allocation3 + $0x60] sm:$0xff] }
0x7323   :  { %11890 = vmatprep.subr.mxu0 %v13452_v24 }
0x7324   :  { %11891 = vmatpush3.msra.mxu0 %v13215_v41 }
0x7325   :  { %11790 = vmatmul.mubr.msk.f32.gmra.mxu0 %vm887_vm6, %v13216_v49  ;;  %11892 = vmatprep.subr.mxu0 %v13452_v24  ;;  %v13229_v49 = vld [vmem:[#allocation3 + $0x48] sm:$0xff] }
0x7326   :  { %11792 = vmatprep.mubr.msk.f32.mxu0 %vm13453_vm5, %v13452_v24  ;;  %11893 = vmatpush3.msra.mxu0 %v13217_v0 }
0x7327   :  { %11894 = vmatprep.subr.mxu0 %v13452_v24 }
0x7328   :  { %11895 = vmatpush3.msra.mxu0 %v13218_v63 }
0x7329   :  { %11793 = vmatmul.mubr.msk.f32.gmra.mxu0 %vm887_vm6, %v13219_v34  ;;  %11896 = vmatprep.subr.mxu0 %v13452_v24 }
0x732a   :  { %11795 = vmatprep.mubr.msk.f32.mxu0 %vm13453_vm5, %v13452_v24  ;;  %11897 = vmatpush3.msra.mxu0 %v13220_v57  ;;  %v13230_v57 = vld [vmem:[#allocation3 + $0x38] sm:$0xff] }
0x732b   :  { %11936 = vmatprep.subr.mxu0 %v13452_v24 }
0x732d   :  { %11796 = vmatmul.mubr.msk.f32.gmra.mxu0 %vm887_vm6, %v13221_v51 }
0x732e   :  { %11798 = vmatprep.mubr.msk.f32.mxu0 %vm13453_vm5, %v13452_v24 }
0x7331   :  { %11799 = vmatmul.mubr.msk.f32.gmra.mxu0 %vm887_vm6, %v13222_v20  ;;  %v13231_v20 = vld [vmem:[#allocation3 + $0x68] sm:$0xff] }
0x7332   :  { %11801 = vmatprep.mubr.msk.f32.mxu0 %vm13453_vm5, %v13452_v24 }
0x7335   :  { %11802 = vmatmul.mubr.msk.f32.gmra.mxu0 %vm887_vm6, %v13223_v5 }
0x7336   :  { %11804 = vmatprep.mubr.msk.f32.mxu0 %vm13453_vm5, %v13452_v24 }
0x7339   :  { %11805 = vmatmul.mubr.msk.f32.gmra.mxu0 %vm887_vm6, %v13224_v42  ;;  %v13232_v42 = vld [vmem:[#allocation3 + $0x58] sm:$0xff] }
0x733a   :  { %11807 = vmatprep.mubr.msk.f32.mxu0 %vm13453_vm5, %v13452_v24 }
0x733d   :  { %11808 = vmatmul.mubr.msk.f32.gmra.mxu0 %vm887_vm6, %v13225_v8 }
0x733e   :  { %11810 = vmatprep.mubr.msk.f32.mxu0 %vm13453_vm5, %v13452_v24 }
0x7341   :  { %11811 = vmatmul.mubr.msk.f32.gmra.mxu0 %vm887_vm6, %v13226_v53 }
0x7342   :  { %11813 = vmatprep.mubr.msk.f32.mxu0 %vm13453_vm5, %v13452_v24 }
0x7345   :  { %11814 = vmatmul.mubr.msk.f32.gmra.mxu0 %vm887_vm6, %v13227_v52 }
0x7346   :  { %11898 = vmatprep.mubr.msk.f32.mxu0 %vm13453_vm5, %v13452_v24 }
0x73cd   :  { %v15072_v50 = vpop.f32.mrf.mxu0 }
0x73cf   :  { %v11773_v9 = vpop.f32.mrf.mxu0 }
0x73d0   :  { %v13233_v9 = vld [vmem:[#allocation3 + $0x70] sm:$0xff] }
0x73d1   :  { %v5779_v45 = vpop.f32.mrf.mxu0 }
0x73d3   :  { %v11776_v59 = vpop.f32.mrf.mxu0 }
0x73d5   :  { %v15074_v6 = vpop.f32.mrf.mxu0 }
0x73d7   :  { %v11779_v17 = vpop.f32.mrf.mxu0 }
0x73d8   :  { %v13234_v17 = vld [vmem:[#allocation3 + $0x28] sm:$0xff] }
0x73d9   :  { %v5789_v55 = vpop.f32.mrf.mxu0 }
0x73db   :  { %v11782_v62 = vpop.f32.mrf.mxu0 }
0x73dd   :  { %v15076_v22 = vpop.f32.mrf.mxu0 }
0x73df   :  { %v11785_v1 = vpop.f32.mrf.mxu0 }
0x73e1   :  { %v5799_v44 = vpop.f32.mrf.mxu0 }
0x73e2   :  { %v5853_v62 = vadd.f32 %v13234_v17, %v5799_v44  ;;  %v13239_v44 = vld [vmem:[#allocation3 + $0x8] sm:$0xff] }
0x73e3   :  { %v11788_v40 = vpop.f32.mrf.mxu0 }
0x73e4   :  { %v13235_v40 = vld [vmem:[#allocation3 + $0x50] sm:$0xff] }
0x73e5   :  { %v5804_v54 = vpop.f32.mrf.mxu0 }
0x73e7   :  { %v11791_v58 = vpop.f32.mrf.mxu0 }
0x73e9   :  { %v5809_v43 = vpop.f32.mrf.mxu0 }
0x73ea   :  { %v5855_v51 = vadd.f32 %v13230_v57, %v5809_v43 }
0x73eb   :  { %v11794_v61 = vpop.f32.mrf.mxu0 }
0x73ec   :  { %v13236_v61 = vld [vmem:[#allocation3 + $0x18] sm:$0xff] }
0x73ed   :  { %v5814_v31 = vpop.f32.mrf.mxu0  ;;  %v5851_v43 = vadd.f32 %v13236_v61, %v5789_v55 }
0x73ef   :  { %v11797_v27 = vpop.f32.mrf.mxu0 }
0x73f0   :  { %v13237_v27 = vld [vmem:[#allocation3 + $0x40] sm:$0xff] }
0x73f1   :  { %v5819_v2 = vpop.f32.mrf.mxu0 }
0x73f2   :  { %v5857_v0 = vadd.f32 %v13229_v49, %v5819_v2  ;;  %v5856_v2 = vadd.f32 %v13237_v27, %v5814_v31 }
0x73f3   :  { %v11800_v33 = vpop.f32.mrf.mxu0 }
0x73f5   :  { %v5824_v26 = vpop.f32.mrf.mxu0 }
0x73f6   :  { %v5858_v58 = vadd.f32 %v13235_v40, %v5824_v26  ;;  %v13240_v26 = vld [vmem:[#allocation3 + $0x30] sm:$0xff] }
0x73f7   :  { %v11803_v47 = vpop.f32.mrf.mxu0 }
0x73f8   :  { %v15081_v47 = vld [vmem:[%s16113_s7] ss:$0 sm:$0xff] }
0x73f9   :  { %v5829_v15 = vpop.f32.mrf.mxu0 }
0x73fa   :  { %v5859_v8 = vadd.f32 %v13232_v42, %v5829_v15 }
0x73fb   :  { %v11806_v7 = vpop.f32.mrf.mxu0 }
0x73fc   :  { %v5849_v7 = vadd.f32 %v13239_v44, %v5779_v45 }
0x73fd   :  { %v5834_v36 = vpop.f32.mrf.mxu0 }
0x73fe   :  { %v5860_v41 = vadd.f32 %v13228_v37, %v5834_v36  ;;  %v5854_v37 = vadd.f32 %v13240_v26, %v5804_v54 }
0x73ff   :  { %v11809_v63 = vpop.f32.mrf.mxu0 }
0x7400   :  { %12776 = vtanh.f32 %v5860_v41 }
0x7401   :  { %v5839_v34 = vpop.f32.mrf.mxu0  ;;  %12778 = vtanh.f32 %v5857_v0  ;;  %v13241_v0 = vld [vmem:[#allocation3 + $0x20] sm:$0xff] }
0x7402   :  { %v5861_v5 = vadd.f32 %v13231_v20, %v5839_v34  ;;  %v5852_v63 = vadd.f32 %v13241_v0, %v15076_v22  ;;  %v13242_v20 = vld [vmem:[#allocation3 + $0x10] sm:$0xff] }
0x7403   :  { %v11812_v53 = vpop.f32.mrf.mxu0 }
0x7404   :  { %12780 = vtanh.f32 %v5861_v5  ;;  %v5850_v5 = vadd.f32 %v13242_v20, %v15074_v6 }
0x7405   :  { %v5844_v52 = vpop.f32.mrf.mxu0  ;;  %12782 = vtanh.f32 %v5855_v51 }
0x7406   :  { %v5862_v59 = vadd.f32 %v13233_v9, %v5844_v52  ;;  %12784 = vtanh.f32 %v5859_v8 }
0x7407   :  { %v11815_v1 = vpop.f32.mrf.mxu0 }
0x7408   :  { %12786 = vtanh.f32 %v5862_v59  ;;  %v13243_v59 = vld [vmem:[#allocation3] sm:$0xff] }
0x7409   :  { %12788 = vtanh.f32 %v5853_v62  ;;  %v5848_v17 = vadd.f32 %v13243_v59, %v15072_v50 }
0x740a   :  { %12790 = vtanh.f32 %v5858_v58 }
0x740b   :  { %12792 = vtanh.f32 %v5851_v43 }
0x740c   :  { %12794 = vtanh.f32 %v5856_v2 }
0x740d   :  { %v12777_v33 = vpop.eup %12776  ;;  %12796 = vtanh.f32 %v5849_v7 }
0x740e   :  { %v5890_v15 = vmul.f32 %v15081_v47, %v12777_v33  ;;  %v12779_v36 = vpop.eup %12778  ;;  %12798 = vtanh.f32 %v5854_v37 }
0x740f   :  { %v5887_v57 = vmul.f32 %v15081_v47, %v12779_v36  ;;  %12800 = vtanh.f32 %v5852_v63 }
0x7410   :  { %v5929_v55 = vsel %vm85_vm1, %v5890_v15, 0.0  ;;  %12802 = vtanh.f32 %v5850_v5 }
0x7411   :  { %v12781_v41 = vpop.eup %12780  ;;  %5930 = vadd.xlane.f32.xlu0 %v5929_v55  ;;  %v5920_v8 = vsel %vm85_vm1, %v5887_v57, 0.0  ;;  %12804 = vtanh.f32 %v5848_v17 }
0x7412   :  { %v5891_v31 = vmul.f32 %v15081_v47, %v12781_v41  ;;  %v12783_v49 = vpop.eup %12782 }
0x7413   :  { %v12785_v34 = vpop.eup %12784  ;;  %v5885_v22 = vmul.f32 %v15081_v47, %v12783_v49 }
0x7414   :  { %v5932_v45 = vsel %vm85_vm1, %v5891_v31, 0.0  ;;  %v5889_v52 = vmul.f32 %v15081_v47, %v12785_v34 }
0x7415   :  { %v12787_v51 = vpop.eup %12786  ;;  %5933 = vadd.xlane.f32.xlu1 %v5932_v45  ;;  %v5914_v6 = vsel %vm85_vm1, %v5885_v22, 0.0  ;;  %v13245_v22 = vld [vmem:[%s16119_s13 + $0x68] sm:$0xff] }
0x7416   :  { %v5892_v54 = vmul.f32 %v15081_v47, %v12787_v51  ;;  %v12789_v42 = vpop.eup %12788  ;;  %v5926_v1 = vsel %vm85_vm1, %v5889_v52, 0.0 }
0x7417   :  { %v12791_v9 = vpop.eup %12790  ;;  %v5883_v40 = vmul.f32 %v15081_v47, %v12789_v42 }
0x7418   :  { %v5935_v53 = vsel %vm85_vm1, %v5892_v54, 0.0  ;;  %v12793_v62 = vpop.eup %12792  ;;  %v5888_v58 = vmul.f32 %v15081_v47, %v12791_v9  ;;  %v13246_v9 = vld [vmem:[%s16119_s13 + $0x60] sm:$0xff] }
0x7419   :  { %5921 = vadd.xlane.f32.xlu1 %v5920_v8  ;;  %5936 = vadd.xlane.f32.xlu0 %v5935_v53  ;;  %v12795_v61 = vpop.eup %12794  ;;  %v5908_v27 = vsel %vm85_vm1, %v5883_v40, 0.0  ;;  %v5881_v50 = vmul.f32 %v15081_v47, %v12793_v62  ;;  %v13244_v8 = vld [vmem:[%s16119_s13 + $0x70] sm:$0xff]  ;;  %v13247_v62 = vld [vmem:[%s16119_s13 + $0x58] sm:$0xff] }
0x741a   :  { %v12797_v43 = vpop.eup %12796  ;;  %v5923_v2 = vsel %vm85_vm1, %v5888_v58, 0.0  ;;  %v5886_v33 = vmul.f32 %v15081_v47, %v12795_v61  ;;  %v13248_v40 = vld [vmem:[%s16119_s13 + $0x50] sm:$0xff]  ;;  %v13249_v61 = vld [vmem:[%s16119_s13 + $0x48] sm:$0xff] }
0x741b   :  { %v12799_v15 = vpop.eup %12798  ;;  %v5902_v7 = vsel %vm85_vm1, %v5881_v50, 0.0  ;;  %v5879_v26 = vmul.f32 %v15081_v47, %v12797_v43  ;;  %v13250_v50 = vld [vmem:[%s16119_s13 + $0x40] sm:$0xff] }
0x741c   :  { %v12801_v44 = vpop.eup %12800  ;;  %v5917_v36 = vsel %vm85_vm1, %v5886_v33, 0.0  ;;  %v5884_v37 = vmul.f32 %v15081_v47, %v12799_v15  ;;  %v13251_v15 = vld [vmem:[%s16119_s13 + $0x38] sm:$0xff] }
0x741d   :  { %5915 = vadd.xlane.f32.xlu1 %v5914_v6  ;;  %5927 = vadd.xlane.f32.xlu0 %v5926_v1  ;;  %v12803_v55 = vpop.eup %12802  ;;  %v5896_v41 = vsel %vm85_vm1, %v5879_v26, 0.0  ;;  %v5882_v49 = vmul.f32 %v15081_v47, %v12801_v44 }
0x741e   :  { %v5911_v31 = vsel %vm85_vm1, %v5884_v37, 0.0  ;;  %v12805_v0 = vpop.eup %12804  ;;  %v5880_v34 = vmul.f32 %v15081_v47, %v12803_v55  ;;  %v13253_v55 = vld [vmem:[%s16119_s13 + $0x28] sm:$0xff] }
0x741f   :  { %v5905_v63 = vsel %vm85_vm1, %v5882_v49, 0.0  ;;  %v5878_v57 = vmul.f32 %v15081_v47, %v12805_v0  ;;  %v13254_v49 = vld [vmem:[%s16119_s13 + $0x20] sm:$0xff] }
0x7420   :  { %v5899_v45 = vsel %vm85_vm1, %v5880_v34, 0.0 }
0x7421   :  { %5909 = vadd.xlane.f32.xlu1 %v5908_v27  ;;  %5924 = vadd.xlane.f32.xlu0 %v5923_v2  ;;  %v5893_v51 = vsel %vm85_vm1, %v5878_v57, 0.0 }
0x7425   :  { %5903 = vadd.xlane.f32.xlu1 %v5902_v7  ;;  %5918 = vadd.xlane.f32.xlu0 %v5917_v36  ;;  %v13252_v36 = vld [vmem:[%s16119_s13 + $0x30] sm:$0xff] }
0x7429   :  { %5897 = vadd.xlane.f32.xlu1 %v5896_v41  ;;  %5912 = vadd.xlane.f32.xlu0 %v5911_v31 }
0x742d   :  { %5906 = vadd.xlane.f32.xlu0 %v5905_v63  ;;  %v13255_v63 = vld [vmem:[%s16119_s13 + $0x18] sm:$0xff] }
0x7431   :  { %5900 = vadd.xlane.f32.xlu0 %v5899_v45 }
0x7435   :  { %5894 = vadd.xlane.f32.xlu0 %v5893_v51  ;;  %v13256_v51 = vld [vmem:[%s16119_s13 + $0x10] sm:$0xff] }
0x749a   :  { %v5931_v54 = vpop.xlane.xlu0 %5930 }
0x749b   :  { %v5950_v59 = vmul.f32 %v13246_v9, %v5931_v54  ;;  %v13262_v9 = vld [vmem:[%s16120_s14 + $0x28] sm:$0xff] }
0x749e   :  { %v5934_v20 = vpop.xlane.xlu1 %5933 }
0x749f   :  { %v5951_v52 = vmul.f32 %v13245_v22, %v5934_v20  ;;  %v13257_v20 = vld [vmem:[%s16119_s13 + $0x8] sm:$0xff]  ;;  %v15178_v22 = vld [vmem:[%s16118_s12] sm:$0x3] }
0x74a2   :  { %v5922_v5 = vpop.xlane.xlu1 %5921  ;;  %v5937_v42 = vpop.xlane.xlu0 %5936 }
0x74a3   :  { %v5952_v53 = vmul.f32 %v13244_v8, %v5937_v42  ;;  %v5947_v43 = vmul.f32 %v13249_v61, %v5922_v5  ;;  %v13258_v8 = vld [vmem:[%s16119_s13] sm:$0xff] }
0x74a5   :  { %11817 = vmatpush3.msra.mxu1 %v5952_v53 }
0x74a6   :  { %11818 = vmatprep.subr.mxu1 %v13452_v24  ;;  %v5928_v47 = vpop.xlane.xlu0 %5927  ;;  %v5916_v17 = vpop.xlane.xlu1 %5915 }
0x74a7   :  { %11819 = vmatpush3.msra.mxu1 %v5951_v52  ;;  %v5949_v6 = vmul.f32 %v13247_v62, %v5928_v47  ;;  %v5945_v44 = vmul.f32 %v13251_v15, %v5916_v17  ;;  %v13260_v52 = vld [vmem:[%s16120_s14 + $0x38] sm:$0xf]  ;;  %v13261_v47 = vld [vmem:[%s16120_s14 + $0x30] sm:$0xff] }
0x74a8   :  { %11820 = vmatprep.subr.mxu1 %v13452_v24  ;;  %v13264_v17 = vld [vmem:[%s16120_s14 + $0x18] sm:$0xff]  ;;  %v13265_v62 = vld [vmem:[%s16120_s14 + $0x10] sm:$0xff] }
0x74a9   :  { %11821 = vmatpush3.msra.mxu1 %v5950_v59  ;;  %v13263_v59 = vld [vmem:[%s16120_s14 + $0x20] sm:$0xff] }
0x74aa   :  { %11822 = vmatprep.subr.mxu1 %v13452_v24  ;;  %v5925_v1 = vpop.xlane.xlu0 %5924  ;;  %v5910_v27 = vpop.xlane.xlu1 %5909 }
0x74ab   :  { %v5948_v58 = vmul.f32 %v13248_v40, %v5925_v1  ;;  %11823 = vmatpush3.msra.mxu1 %v5949_v6  ;;  %v5943_v41 = vmul.f32 %v13253_v55, %v5910_v27  ;;  %v13266_v6 = vld [vmem:[%s16120_s14 + $0x8] sm:$0xff]  ;;  %v13267_v1 = vld [vmem:[%s16120_s14] sm:$0xff] }
0x74ac   :  { %11824 = vmatprep.subr.mxu1 %v13452_v24 }
0x74ad   :  { %11825 = vmatpush3.msra.mxu1 %v5948_v58 }
0x74ae   :  { %11826 = vmatprep.subr.mxu1 %v13452_v24  ;;  %v5919_v2 = vpop.xlane.xlu0 %5918  ;;  %v5904_v37 = vpop.xlane.xlu1 %5903 }
0x74af   :  { %v5946_v33 = vmul.f32 %v13250_v50, %v5919_v2  ;;  %11827 = vmatpush3.msra.mxu1 %v5947_v43  ;;  %v5941_v34 = vmul.f32 %v13255_v63, %v5904_v37  ;;  %v5621_v43 = vmul.f32 %v14955_v18, %v14648_v29  ;;  %v13268_v37 = vld [vmem:[#allocation4] ss:$0 sm:$0xff] }
0x74b0   :  { %11828 = vmatprep.subr.mxu1 %v13452_v24 }
0x74b1   :  { %11829 = vmatpush3.msra.mxu1 %v5946_v33 }
0x74b2   :  { %11830 = vmatprep.subr.mxu1 %v13452_v24  ;;  %v5913_v7 = vpop.xlane.xlu0 %5912  ;;  %v5898_v45 = vpop.xlane.xlu1 %5897 }
0x74b3   :  { %v5944_v26 = vmul.f32 %v13252_v36, %v5913_v7  ;;  %11831 = vmatpush3.msra.mxu1 %v5945_v44  ;;  %v5939_v5 = vmul.f32 %v13257_v20, %v5898_v45 }
0x74b4   :  { %11832 = vmatprep.subr.mxu1 %v13452_v24 }
0x74b5   :  { %11833 = vmatpush3.msra.mxu1 %v5944_v26 }
0x74b6   :  { %11834 = vmatprep.subr.mxu1 %v13452_v24  ;;  %v5907_v31 = vpop.xlane.xlu0 %5906 }
0x74b7   :  { %v5942_v0 = vmul.f32 %v13254_v49, %v5907_v31  ;;  %11835 = vmatpush3.msra.mxu1 %v5943_v41  ;;  %v3670_v31 = vadd.f32 %v14654_v30, %v14060_v4  ;;  %v15245_v4 = vld [vmem:[%s16109_s3] sm:$0xff] }
0x74b8   :  { %11836 = vmatprep.subr.mxu1 %v13452_v24 }
0x74b9   :  { %11837 = vmatpush3.msra.mxu1 %v5942_v0  ;;  %v15236_v0 = vld [vmem:[%s16109_s3 + $0x8] sm:$0xff] }
0x74ba   :  { %11838 = vmatprep.subr.mxu1 %v13452_v24  ;;  %v5901_v57 = vpop.xlane.xlu0 %5900 }
0x74bb   :  { %v5940_v54 = vmul.f32 %v13256_v51, %v5901_v57  ;;  %11839 = vmatpush3.msra.mxu1 %v5941_v34 }
0x74bc   :  { %11840 = vmatprep.subr.mxu1 %v13452_v24 }
0x74bd   :  { %11841 = vmatpush3.msra.mxu1 %v5940_v54 }
0x74be   :  { %11842 = vmatprep.subr.mxu1 %v13452_v24  ;;  %v5895_v42 = vpop.xlane.xlu0 %5894 }
0x74bf   :  { %v5938_v53 = vmul.f32 %v13258_v8, %v5895_v42  ;;  %11843 = vmatpush3.msra.mxu1 %v5939_v5  ;;  %v15270_v42 = vld [vmem:[#allocation5] ss:$0 sm:$0xff] }
0x74c0   :  { %11844 = vmatprep.subr.mxu1 %v13452_v24 }
0x74c1   :  { %11845 = vmatpush3.msra.mxu1 %v5938_v53  ;;  %v15276_v53 = vld [vmem:[%s16110_s4] ss:$0 sm:$0xff] }
0x74c2   :  { %11847 = vmatmul.mubr.msk.f32.vlgmr.msra.gmra.mxu1 %vm1188_vm7, %v15178_v22  ;;  %11849 = vmatprep.subr.mxu1 %v13452_v24 }
0x74c3   :  { %11850 = vmatpush3.msk.msra.mxu1 %vm505_vm3, %v13260_v52  ;;  %11865 = vmatprep.mubr.msk.f32.mxu1 %vm13453_vm5, %v13452_v24 }
0x74c4   :  { %11851 = vmatprep.subr.mxu1 %v13452_v24 }
0x74c5   :  { %11852 = vmatpush3.msra.mxu1 %v13261_v47 }
0x74c6   :  { %11853 = vmatprep.subr.mxu1 %v13452_v24 }
0x74c7   :  { %11854 = vmatpush3.msra.mxu1 %v13262_v9 }
0x74c8   :  { %11855 = vmatprep.subr.mxu1 %v13452_v24 }
0x74c9   :  { %11856 = vmatpush3.msra.mxu1 %v13263_v59 }
0x74ca   :  { %11857 = vmatprep.subr.mxu1 %v13452_v24 }
0x74cb   :  { %11858 = vmatpush3.msra.mxu1 %v13264_v17 }
0x74cc   :  { %11859 = vmatprep.subr.mxu1 %v13452_v24 }
0x74cd   :  { %11860 = vmatpush3.msra.mxu1 %v13265_v62 }
0x74ce   :  { %11861 = vmatprep.subr.mxu1 %v13452_v24 }
0x74cf   :  { %11862 = vmatpush3.msra.mxu1 %v13266_v6 }
0x74d0   :  { %11863 = vmatprep.subr.mxu1 %v13452_v24 }
0x74d1   :  { %11864 = vmatpush3.msra.mxu1 %v13267_v1 }
0x74d2   :  { %11901 = vmatprep.subr.mxu1 %v13452_v24 }
0x7582   :  { %v6019_v40 = vpop.f32.mrf.mxu1 }
0x7583   :  { %v6023_v58 = vsel %vm1262_vm8, %v6019_v40, -inf }
0x7584   :  { %6024 = vmax.xlane.f32.xlu1 %v6023_v58  ;;  %v11848_v61 = vpop.f32.mrf.mxu1 }
0x7595   :  { %5623 = vrot.lane.b32.xlu1 %v5621_v43, %s13451_s27 }
0x760d   :  { %v6025_v27 = vpop.xlane.xlu1 %6024 }
0x760e   :  { %v6026_v2 = vsub.f32 %v6019_v40, %v6025_v27 }
0x7610   :  { %v6027_v50 = vmul.f32 1.442695, %v6026_v2 }
0x7611   :  { %v5624_v44 = vpop.permute.xlu1 %5623 }
0x7612   :  { %12806 = vpow2.f32 %v6027_v50  ;;  %v5626_v7 = vsel %vm3255_vm10, %v5624_v44, 0.0 }
0x761f   :  { %v12807_v33 = vpop.eup %12806 }
0x7620   :  { %v6029_v15 = vsel %vm1262_vm8, %v12807_v33, 0.0 }
0x7621   :  { %6030 = vadd.xlane.f32.xlu0 %v6029_v15 }
0x7625   :  { %5627 = vadd.xlane.f32.xlu0 %v5626_v7 }
0x76aa   :  { %v6031_v36 = vpop.xlane.xlu0 %6030 }
0x76ab   :  { %12808 = vrcp.f32 %v6031_v36 }
0x76ae   :  { %v5628_v26 = vpop.xlane.xlu0 %5627 }
0x76af   :  { %v15224_v55 = vadd.f32 %v13268_v37, %v5628_v26 }
0x76b1   :  { %6183 = vrot.lane.b32.xlu0 %v15224_v55, %s13454_s29 }
0x76b8   :  { %v12809_v18 = vpop.eup %12808 }
0x76b9   :  { %v6033_v41 = vmul.f32 %v12809_v18, %v12807_v33 }
0x76bb   :  { %11866 = vmatmul.mubr.msk.f32.vlgmr.msra.gmra.mxu1 %vm1275_vm9, %v6033_v41  ;;  %v15231_v49 = vadd.f32 %v6033_v41, %v3670_v31 }
0x76bc   :  { %11902 = vmatpush3.msra.mxu1 %v15236_v0  ;;  %11905 = vmatprep.mubr.msk.f32.mxu1 %vm13453_vm5, %v13452_v24 }
0x76bd   :  { %11903 = vmatprep.subr.mxu1 %v13452_v24 }
0x76be   :  { %11904 = vmatpush3.msra.mxu1 %v15245_v4 }
0x76bf   :  { %11906 = vmatmul.mubr.msk.f32.vlgmr.msra.gmra.mxu1 %vm85_vm1, %v14959_v19  ;;  %11908 = vmatprep.subr.mxu1 %v13452_v24 }
0x76c0   :  { %11909 = vmatpush3.msra.mxu1 %v15236_v0  ;;  %11912 = vmatprep.mubr.msk.f32.mxu1 %vm13453_vm5, %v13452_v24 }
0x76c1   :  { %11910 = vmatprep.subr.mxu1 %v13452_v24 }
0x76c2   :  { %11911 = vmatpush3.msra.mxu1 %v15245_v4 }
0x76c3   :  { %11915 = vmatprep.subr.mxu1 %v13452_v24 }
0x7723   :  { %v6184_v57 = vpop.permute.xlu0 %6183 }
0x777b   :  { %v6104_v30 = vpop.f32.mrf.mxu1 }
0x777c   :  { %v6108_v63 = vmul.f32 %v15178_v22, %v6104_v30 }
0x777d   :  { %v11867_v34 = vpop.f32.mrf.mxu1 }
0x777e   :  { %11899 = vmatmul.mubr.msk.f32.vlgmr.msra.gmra.mxu0 %vm1188_vm7, %v6108_v63 }
0x777f   :  { %v6260_v19 = vpop.f32.mrf.mxu1  ;;  %11937 = vmatpush3.msra.mxu0 %v15236_v0  ;;  %11940 = vmatprep.mubr.msk.f32.mxu0 %vm13453_vm5, %v13452_v24 }
0x7780   :  { %11938 = vmatprep.subr.mxu0 %v13452_v24 }
0x7781   :  { %v11907_v45 = vpop.f32.mrf.mxu1  ;;  %11939 = vmatpush3.msra.mxu0 %v15245_v4 }
0x7782   :  { %11950 = vmatprep.subr.mxu0 %v13452_v24 }
0x783e   :  { %v6178_v51 = vpop.f32.mrf.mxu0 }
0x783f   :  { %v15266_v54 = vsel %vm85_vm1, %v6178_v51, %v6184_v57 }
0x7840   :  { %6189 = vperm.xlu1 %12402, %v15266_v54   ;;  %v11900_v20 = vpop.f32.mrf.mxu0 }
0x7844   :  { %12403 = vset.pattern.permute.xlu1 %v13457_v46 }
0x78bb   :  { %v6190_v5 = vpop.permute.xlu1 %6189 }
0x78bc   :  { %v6192_v8 = vmul.f32 %v15270_v42, %v6190_v5 }
0x78be   :  { %v6193_v22 = vadd.f32 %v15276_v53, %v6192_v8 }
0x78c0   :  { %v6264_v52 = vadd.f32 %v6260_v19, %v6193_v22 }
0x78c2   :  { %12810 = vtanh.f32 %v6264_v52  ;;  %v10604_v9 = vmul.f32 -1.442695, %v6264_v52 }
0x78c4   :  { %12812 = vpow2.f32 %v10604_v9 }
0x78cf   :  { %v12811_v47 = vpop.eup %12810 }
0x78d0   :  { %6274 = vrot.lane.b32.xlu1 %v12811_v47, %s13456_s0 }
0x78d1   :  { %v12813_v59 = vpop.eup %12812 }
0x78d2   :  { %v6268_v17 = vadd.f32 1.0, %v12813_v59 }
0x78d4   :  { %12814 = vrcp.f32 %v6268_v17 }
0x78e1   :  { %v12815_v62 = vpop.eup %12814 }
0x78e2   :  { %v6272_v40 = vmul.f32 %v12815_v62, %v14951_v60 }
0x7942   :  { %v6275_v6 = vpop.permute.xlu1 %6274 }
0x7943   :  { %v6277_v1 = vmul.f32 %v12815_v62, %v6275_v6 }
0x7945   :  { %6279 = vrot.lane.b32.xlu1 %v6277_v1, %s13454_s29 }
0x79b7   :  { %v6280_v58 = vpop.permute.xlu1 %6279 }
0x79b8   :  { %v6282_v61 = vadd.f32 %v6280_v58, %v6272_v40 }
0x79ba   :  { %12816 = vtanh.f32 %v6282_v61 }
0x79c7   :  { %v12817_v43 = vpop.eup %12816 }
0x79c8   :  { %6285 = vrot.lane.b32.xlu1 %v12817_v43, %s13454_s29 }
0x79cc   :  { %6290 = vperm.xlu1 %12403, %v15266_v54  }
0x79d0   :  { %12419 = vset.pattern.permute.xlu1 %v13455_v10 }
0x7a3a   :  { %v6286_v27 = vpop.permute.xlu1 %6285 }
0x7a3b   :  { %v6288_v2 = vmul.f32 %v12815_v62, %v6286_v27 }
0x7a3d   :  { %6296 = vrot.lane.b32.xlu0 %v6288_v2, %s13451_s27 }
0x7a47   :  { %v6291_v60 = vpop.permute.xlu1 %6290 }
0x7a48   :  { %v6293_v10 = vmul.f32 %v15270_v42, %v6291_v60 }
0x7a4a   :  { %v6294_v33 = vadd.f32 %v15276_v53, %v6293_v10 }
0x7aaf   :  { %v6297_v50 = vpop.permute.xlu0 %6296 }
0x7ab0   :  { %11913 = vmatmul.mubr.msk.f32.vlgmr.msra.gmra.mxu1 %vm85_vm1, %v6297_v50 }
0x7ab1   :  { %11916 = vmatpush3.msra.mxu1 %v15236_v0  ;;  %11919 = vmatprep.mubr.msk.f32.mxu1 %vm13453_vm5, %v13452_v24 }
0x7ab2   :  { %11917 = vmatprep.subr.mxu1 %v13452_v24 }
0x7ab3   :  { %11918 = vmatpush3.msra.mxu1 %v15245_v4 }
0x7ab4   :  { %11922 = vmatprep.subr.mxu1 %v13452_v24 }
0x7b70   :  { %v6366_v15 = vpop.f32.mrf.mxu1 }
0x7b71   :  { %v6370_v44 = vadd.f32 %v6366_v15, %v6294_v33 }
0x7b72   :  { %v11914_v7 = vpop.f32.mrf.mxu1 }
0x7b73   :  { %12818 = vtanh.f32 %v6370_v44  ;;  %v10606_v26 = vmul.f32 -1.442695, %v6370_v44 }
0x7b75   :  { %12820 = vpow2.f32 %v10606_v26 }
0x7b80   :  { %v12819_v36 = vpop.eup %12818 }
0x7b81   :  { %6380 = vrot.lane.b32.xlu0 %v12819_v36, %s13456_s0 }
0x7b82   :  { %v12821_v37 = vpop.eup %12820 }
0x7b83   :  { %v6374_v18 = vadd.f32 1.0, %v12821_v37 }
0x7b85   :  { %12822 = vrcp.f32 %v6374_v18 }
0x7b92   :  { %v12823_v41 = vpop.eup %12822 }
0x7b93   :  { %v6378_v63 = vmul.f32 %v12823_v41, %v6282_v61 }
0x7bf3   :  { %v6381_v31 = vpop.permute.xlu0 %6380 }
0x7bf4   :  { %v6383_v30 = vmul.f32 %v12823_v41, %v6381_v31 }
0x7bf6   :  { %6385 = vrot.lane.b32.xlu1 %v6383_v30, %s13454_s29 }
0x7c68   :  { %v6386_v34 = vpop.permute.xlu1 %6385 }
0x7c69   :  { %v6388_v19 = vadd.f32 %v6386_v34, %v6378_v63 }
0x7c6b   :  { %12824 = vtanh.f32 %v6388_v19 }
0x7c78   :  { %v12825_v45 = vpop.eup %12824 }
0x7c79   :  { %6391 = vrot.lane.b32.xlu0 %v12825_v45, %s13454_s29 }
0x7c7d   :  { %6396 = vperm.xlu0 %12404, %v15266_v54  }
0x7c81   :  { %12405 = vset.pattern.permute.xlu0 %v13459_v11 }
0x7ceb   :  { %v6392_v57 = vpop.permute.xlu0 %6391 }
0x7cec   :  { %v6394_v51 = vmul.f32 %v12823_v41, %v6392_v57 }
0x7cee   :  { %6402 = vrot.lane.b32.xlu1 %v6394_v51, %s13451_s27 }
0x7cf8   :  { %v6397_v5 = vpop.permute.xlu0 %6396 }
0x7cf9   :  { %v6399_v8 = vmul.f32 %v15270_v42, %v6397_v5 }
0x7cfb   :  { %v6400_v22 = vadd.f32 %v15276_v53, %v6399_v8 }
0x7d60   :  { %v6403_v20 = vpop.permute.xlu1 %6402 }
0x7d61   :  { %11920 = vmatmul.mubr.msk.f32.vlgmr.msra.gmra.mxu1 %vm85_vm1, %v6403_v20 }
0x7d62   :  { %11923 = vmatpush3.msra.mxu1 %v15236_v0  ;;  %11926 = vmatprep.mubr.msk.f32.mxu1 %vm13453_vm5, %v13452_v24 }
0x7d63   :  { %11924 = vmatprep.subr.mxu1 %v13452_v24 }
0x7d64   :  { %11925 = vmatpush3.msra.mxu1 %v15245_v4 }
0x7d65   :  { %11929 = vmatprep.subr.mxu1 %v13452_v24 }
0x7e21   :  { %v6472_v52 = vpop.f32.mrf.mxu1 }
0x7e22   :  { %v6476_v47 = vadd.f32 %v6472_v52, %v6400_v22 }
0x7e23   :  { %v11921_v9 = vpop.f32.mrf.mxu1 }
0x7e24   :  { %12826 = vtanh.f32 %v6476_v47  ;;  %v10608_v17 = vmul.f32 -1.442695, %v6476_v47 }
0x7e26   :  { %12828 = vpow2.f32 %v10608_v17 }
0x7e31   :  { %v12827_v59 = vpop.eup %12826 }
0x7e32   :  { %6486 = vrot.lane.b32.xlu1 %v12827_v59, %s13456_s0 }
0x7e33   :  { %v12829_v62 = vpop.eup %12828 }
0x7e34   :  { %v6480_v6 = vadd.f32 1.0, %v12829_v62 }
0x7e36   :  { %12830 = vrcp.f32 %v6480_v6 }
0x7e43   :  { %v12831_v1 = vpop.eup %12830 }
0x7e44   :  { %v6484_v61 = vmul.f32 %v12831_v1, %v6388_v19 }
0x7ea4   :  { %v6487_v40 = vpop.permute.xlu1 %6486 }
0x7ea5   :  { %v6489_v58 = vmul.f32 %v12831_v1, %v6487_v40 }
0x7ea7   :  { %6491 = vrot.lane.b32.xlu1 %v6489_v58, %s13454_s29 }
0x7f19   :  { %v6492_v43 = vpop.permute.xlu1 %6491 }
0x7f1a   :  { %v6494_v27 = vadd.f32 %v6492_v43, %v6484_v61 }
0x7f1c   :  { %12832 = vtanh.f32 %v6494_v27 }
0x7f29   :  { %v12833_v2 = vpop.eup %12832 }
0x7f2a   :  { %6497 = vrot.lane.b32.xlu0 %v12833_v2, %s13454_s29 }
0x7f2e   :  { %6502 = vperm.xlu0 %12405, %v15266_v54  }
0x7f32   :  { %12406 = vset.pattern.permute.xlu0 %v13460_v16 }
0x7f9c   :  { %v6498_v50 = vpop.permute.xlu0 %6497 }
0x7f9d   :  { %v6500_v60 = vmul.f32 %v12831_v1, %v6498_v50 }
0x7f9f   :  { %6508 = vrot.lane.b32.xlu1 %v6500_v60, %s13451_s27 }
0x7fa9   :  { %v6503_v33 = vpop.permute.xlu0 %6502 }
0x7faa   :  { %v6505_v15 = vmul.f32 %v15270_v42, %v6503_v33 }
0x7fac   :  { %v6506_v44 = vadd.f32 %v15276_v53, %v6505_v15 }
0x8011   :  { %v6509_v10 = vpop.permute.xlu1 %6508 }
0x8012   :  { %11927 = vmatmul.mubr.msk.f32.vlgmr.msra.gmra.mxu1 %vm85_vm1, %v6509_v10 }
0x8013   :  { %11930 = vmatpush3.msra.mxu1 %v15236_v0  ;;  %11933 = vmatprep.mubr.msk.f32.mxu1 %vm13453_vm5, %v13452_v24 }
0x8014   :  { %11931 = vmatprep.subr.mxu1 %v13452_v24 }
0x8015   :  { %11932 = vmatpush3.msra.mxu1 %v15245_v4 }
0x8016   :  { %11943 = vmatprep.subr.mxu1 %v13452_v24 }
0x80d2   :  { %v6578_v7 = vpop.f32.mrf.mxu1 }
0x80d3   :  { %v6582_v36 = vadd.f32 %v6578_v7, %v6506_v44 }
0x80d4   :  { %v11928_v26 = vpop.f32.mrf.mxu1 }
0x80d5   :  { %12834 = vtanh.f32 %v6582_v36  ;;  %v10610_v18 = vmul.f32 -1.442695, %v6582_v36 }
0x80d7   :  { %12836 = vpow2.f32 %v10610_v18 }
0x80e2   :  { %v12835_v37 = vpop.eup %12834 }
0x80e3   :  { %6592 = vrot.lane.b32.xlu1 %v12835_v37, %s13456_s0 }
0x80e4   :  { %v12837_v41 = vpop.eup %12836 }
0x80e5   :  { %v6586_v31 = vadd.f32 1.0, %v12837_v41 }
0x80e7   :  { %12838 = vrcp.f32 %v6586_v31 }
0x80f4   :  { %v12839_v30 = vpop.eup %12838 }
0x80f5   :  { %v6590_v19 = vmul.f32 %v12839_v30, %v6494_v27 }
0x8155   :  { %v6593_v63 = vpop.permute.xlu1 %6592 }
0x8156   :  { %v6595_v34 = vmul.f32 %v12839_v30, %v6593_v63 }
0x8158   :  { %6597 = vrot.lane.b32.xlu1 %v6595_v34, %s13454_s29 }
0x81ca   :  { %v6598_v45 = vpop.permute.xlu1 %6597 }
0x81cb   :  { %v6600_v57 = vadd.f32 %v6598_v45, %v6590_v19 }
0x81cd   :  { %12840 = vtanh.f32 %v6600_v57 }
0x81da   :  { %v12841_v51 = vpop.eup %12840 }
0x81db   :  { %6603 = vrot.lane.b32.xlu0 %v12841_v51, %s13454_s29 }
0x81df   :  { %6608 = vperm.xlu0 %12406, %v15266_v54  }
0x81e3   :  { %12407 = vset.pattern.permute.xlu0 %v13461_v39 }
0x824d   :  { %v6604_v20 = vpop.permute.xlu0 %6603 }
0x824e   :  { %v6606_v5 = vmul.f32 %v12839_v30, %v6604_v20 }
0x8250   :  { %6614 = vrot.lane.b32.xlu1 %v6606_v5, %s13451_s27 }
0x825a   :  { %v6609_v22 = vpop.permute.xlu0 %6608 }
0x825b   :  { %v6611_v52 = vmul.f32 %v15270_v42, %v6609_v22 }
0x825d   :  { %v6612_v47 = vadd.f32 %v15276_v53, %v6611_v52 }
0x82c2   :  { %v6615_v8 = vpop.permute.xlu1 %6614 }
0x82c3   :  { %11934 = vmatmul.mubr.msk.f32.vlgmr.msra.gmra.mxu1 %vm85_vm1, %v6615_v8 }
0x82c4   :  { %11944 = vmatpush3.msra.mxu1 %v15236_v0  ;;  %11947 = vmatprep.mubr.msk.f32.mxu1 %vm13453_vm5, %v13452_v24 }
0x82c5   :  { %11945 = vmatprep.subr.mxu1 %v13452_v24 }
0x82c6   :  { %11946 = vmatpush3.msra.mxu1 %v15245_v4 }
0x82c7   :  { %11957 = vmatprep.subr.mxu1 %v13452_v24 }
0x8383   :  { %v6684_v9 = vpop.f32.mrf.mxu1 }
0x8384   :  { %v6688_v59 = vadd.f32 %v6684_v9, %v6612_v47 }
0x8385   :  { %v11935_v17 = vpop.f32.mrf.mxu1 }
0x8386   :  { %12842 = vtanh.f32 %v6688_v59  ;;  %v10612_v6 = vmul.f32 -1.442695, %v6688_v59 }
0x8388   :  { %12844 = vpow2.f32 %v10612_v6 }
0x8393   :  { %v12843_v62 = vpop.eup %12842 }
0x8394   :  { %6698 = vrot.lane.b32.xlu1 %v12843_v62, %s13456_s0 }
0x8395   :  { %v12845_v1 = vpop.eup %12844 }
0x8396   :  { %v6692_v40 = vadd.f32 1.0, %v12845_v1 }
0x8398   :  { %12846 = vrcp.f32 %v6692_v40 }
0x83a5   :  { %v12847_v58 = vpop.eup %12846 }
0x83a6   :  { %v6696_v27 = vmul.f32 %v12847_v58, %v6600_v57 }
0x8406   :  { %v6699_v61 = vpop.permute.xlu1 %6698 }
0x8407   :  { %v6701_v43 = vmul.f32 %v12847_v58, %v6699_v61 }
0x8409   :  { %6703 = vrot.lane.b32.xlu1 %v6701_v43, %s13454_s29 }
0x847b   :  { %v6704_v2 = vpop.permute.xlu1 %6703 }
0x847c   :  { %v6706_v50 = vadd.f32 %v6704_v2, %v6696_v27 }
0x847e   :  { %12848 = vtanh.f32 %v6706_v50 }
0x848b   :  { %v12849_v60 = vpop.eup %12848 }
0x848c   :  { %6709 = vrot.lane.b32.xlu0 %v12849_v60, %s13454_s29 }
0x8490   :  { %6714 = vperm.xlu0 %12407, %v15266_v54  }
0x8494   :  { %12408 = vset.pattern.permute.xlu0 %v13462_v23 }
0x84fe   :  { %v6710_v10 = vpop.permute.xlu0 %6709 }
0x84ff   :  { %v6712_v33 = vmul.f32 %v12847_v58, %v6710_v10 }
0x8501   :  { %6720 = vrot.lane.b32.xlu1 %v6712_v33, %s13451_s27 }
0x850b   :  { %v6715_v44 = vpop.permute.xlu0 %6714 }
0x850c   :  { %v6717_v7 = vmul.f32 %v15270_v42, %v6715_v44 }
0x850e   :  { %v6718_v36 = vadd.f32 %v15276_v53, %v6717_v7 }
0x8573   :  { %v6721_v15 = vpop.permute.xlu1 %6720 }
0x8574   :  { %11941 = vmatmul.mubr.msk.f32.vlgmr.msra.gmra.mxu0 %vm85_vm1, %v6721_v15 }
0x8575   :  { %11951 = vmatpush3.msra.mxu0 %v15236_v0  ;;  %11954 = vmatprep.mubr.msk.f32.mxu0 %vm13453_vm5, %v13452_v24 }
0x8576   :  { %11952 = vmatprep.subr.mxu0 %v13452_v24 }
0x8577   :  { %11953 = vmatpush3.msra.mxu0 %v15245_v4 }
0x8578   :  { %11964 = vmatprep.subr.mxu0 %v13452_v24 }
0x8634   :  { %v6790_v26 = vpop.f32.mrf.mxu0 }
0x8635   :  { %v6794_v37 = vadd.f32 %v6790_v26, %v6718_v36 }
0x8636   :  { %v11942_v18 = vpop.f32.mrf.mxu0 }
0x8637   :  { %12850 = vtanh.f32 %v6794_v37  ;;  %v10614_v31 = vmul.f32 -1.442695, %v6794_v37 }
0x8639   :  { %12852 = vpow2.f32 %v10614_v31 }
0x8644   :  { %v12851_v41 = vpop.eup %12850 }
0x8645   :  { %6804 = vrot.lane.b32.xlu1 %v12851_v41, %s13456_s0 }
0x8646   :  { %v12853_v30 = vpop.eup %12852 }
0x8647   :  { %v6798_v63 = vadd.f32 1.0, %v12853_v30 }
0x8649   :  { %12854 = vrcp.f32 %v6798_v63 }
0x8656   :  { %v12855_v34 = vpop.eup %12854 }
0x8657   :  { %v6802_v57 = vmul.f32 %v12855_v34, %v6706_v50 }
0x86b7   :  { %v6805_v19 = vpop.permute.xlu1 %6804 }
0x86b8   :  { %v6807_v45 = vmul.f32 %v12855_v34, %v6805_v19 }
0x86ba   :  { %6809 = vrot.lane.b32.xlu1 %v6807_v45, %s13454_s29 }
0x872c   :  { %v6810_v51 = vpop.permute.xlu1 %6809 }
0x872d   :  { %v6812_v20 = vadd.f32 %v6810_v51, %v6802_v57 }
0x872f   :  { %12856 = vtanh.f32 %v6812_v20 }
0x873c   :  { %v12857_v5 = vpop.eup %12856 }
0x873d   :  { %6815 = vrot.lane.b32.xlu0 %v12857_v5, %s13454_s29 }
0x8741   :  { %6820 = vperm.xlu0 %12408, %v15266_v54  }
0x8745   :  { %12409 = vset.pattern.permute.xlu0 %v13463_v32 }
0x87af   :  { %v6816_v8 = vpop.permute.xlu0 %6815 }
0x87b0   :  { %v6818_v22 = vmul.f32 %v12855_v34, %v6816_v8 }
0x87b2   :  { %6826 = vrot.lane.b32.xlu1 %v6818_v22, %s13451_s27 }
0x87bc   :  { %v6821_v47 = vpop.permute.xlu0 %6820 }
0x87bd   :  { %v6823_v9 = vmul.f32 %v15270_v42, %v6821_v47 }
0x87bf   :  { %v6824_v59 = vadd.f32 %v15276_v53, %v6823_v9 }
0x8824   :  { %v6827_v52 = vpop.permute.xlu1 %6826 }
0x8825   :  { %11948 = vmatmul.mubr.msk.f32.vlgmr.msra.gmra.mxu1 %vm85_vm1, %v6827_v52 }
0x8826   :  { %11958 = vmatpush3.msra.mxu1 %v15236_v0  ;;  %11961 = vmatprep.mubr.msk.f32.mxu1 %vm13453_vm5, %v13452_v24 }
0x8827   :  { %11959 = vmatprep.subr.mxu1 %v13452_v24 }
0x8828   :  { %11960 = vmatpush3.msra.mxu1 %v15245_v4 }
0x8829   :  { %11971 = vmatprep.subr.mxu1 %v13452_v24 }
0x88e5   :  { %v6896_v17 = vpop.f32.mrf.mxu1 }
0x88e6   :  { %v6900_v62 = vadd.f32 %v6896_v17, %v6824_v59 }
0x88e7   :  { %v11949_v6 = vpop.f32.mrf.mxu1 }
0x88e8   :  { %12858 = vtanh.f32 %v6900_v62  ;;  %v10616_v40 = vmul.f32 -1.442695, %v6900_v62 }
0x88ea   :  { %12860 = vpow2.f32 %v10616_v40 }
0x88f5   :  { %v12859_v1 = vpop.eup %12858 }
0x88f6   :  { %6910 = vrot.lane.b32.xlu1 %v12859_v1, %s13456_s0 }
0x88f7   :  { %v12861_v58 = vpop.eup %12860 }
0x88f8   :  { %v6904_v61 = vadd.f32 1.0, %v12861_v58 }
0x88fa   :  { %12862 = vrcp.f32 %v6904_v61 }
0x8907   :  { %v12863_v43 = vpop.eup %12862 }
0x8908   :  { %v6908_v50 = vmul.f32 %v12863_v43, %v6812_v20 }
0x8968   :  { %v6911_v27 = vpop.permute.xlu1 %6910 }
0x8969   :  { %v6913_v2 = vmul.f32 %v12863_v43, %v6911_v27 }
0x896b   :  { %6915 = vrot.lane.b32.xlu1 %v6913_v2, %s13454_s29 }
0x89dd   :  { %v6916_v60 = vpop.permute.xlu1 %6915 }
0x89de   :  { %v6918_v10 = vadd.f32 %v6916_v60, %v6908_v50 }
0x89e0   :  { %12864 = vtanh.f32 %v6918_v10 }
0x89ed   :  { %v12865_v33 = vpop.eup %12864 }
0x89ee   :  { %6921 = vrot.lane.b32.xlu0 %v12865_v33, %s13454_s29 }
0x89f2   :  { %6926 = vperm.xlu0 %12409, %v15266_v54  }
0x89f6   :  { %12410 = vset.pattern.permute.xlu0 %v13464_v12 }
0x8a60   :  { %v6922_v15 = vpop.permute.xlu0 %6921 }
0x8a61   :  { %v6924_v44 = vmul.f32 %v12863_v43, %v6922_v15 }
0x8a63   :  { %6932 = vrot.lane.b32.xlu1 %v6924_v44, %s13451_s27 }
0x8a6d   :  { %v6927_v36 = vpop.permute.xlu0 %6926 }
0x8a6e   :  { %v6929_v26 = vmul.f32 %v15270_v42, %v6927_v36 }
0x8a70   :  { %v6930_v37 = vadd.f32 %v15276_v53, %v6929_v26 }
0x8ad5   :  { %v6933_v7 = vpop.permute.xlu1 %6932 }
0x8ad6   :  { %11955 = vmatmul.mubr.msk.f32.vlgmr.msra.gmra.mxu0 %vm85_vm1, %v6933_v7 }
0x8ad7   :  { %11965 = vmatpush3.msra.mxu0 %v15236_v0  ;;  %11968 = vmatprep.mubr.msk.f32.mxu0 %vm13453_vm5, %v13452_v24 }
0x8ad8   :  { %11966 = vmatprep.subr.mxu0 %v13452_v24 }
0x8ad9   :  { %11967 = vmatpush3.msra.mxu0 %v15245_v4 }
0x8ada   :  { %11978 = vmatprep.subr.mxu0 %v13452_v24 }
0x8b96   :  { %v7002_v18 = vpop.f32.mrf.mxu0 }
0x8b97   :  { %v7006_v41 = vadd.f32 %v7002_v18, %v6930_v37 }
0x8b98   :  { %v11956_v31 = vpop.f32.mrf.mxu0 }
0x8b99   :  { %12866 = vtanh.f32 %v7006_v41  ;;  %v10618_v63 = vmul.f32 -1.442695, %v7006_v41 }
0x8b9b   :  { %12868 = vpow2.f32 %v10618_v63 }
0x8ba6   :  { %v12867_v30 = vpop.eup %12866 }
0x8ba7   :  { %7016 = vrot.lane.b32.xlu1 %v12867_v30, %s13456_s0 }
0x8ba8   :  { %v12869_v34 = vpop.eup %12868 }
0x8ba9   :  { %v7010_v19 = vadd.f32 1.0, %v12869_v34 }
0x8bab   :  { %12870 = vrcp.f32 %v7010_v19 }
0x8bb8   :  { %v12871_v45 = vpop.eup %12870 }
0x8bb9   :  { %v7014_v20 = vmul.f32 %v12871_v45, %v6918_v10 }
0x8c19   :  { %v7017_v57 = vpop.permute.xlu1 %7016 }
0x8c1a   :  { %v7019_v51 = vmul.f32 %v12871_v45, %v7017_v57 }
0x8c1c   :  { %7021 = vrot.lane.b32.xlu1 %v7019_v51, %s13454_s29 }
0x8c8e   :  { %v7022_v5 = vpop.permute.xlu1 %7021 }
0x8c8f   :  { %v7024_v8 = vadd.f32 %v7022_v5, %v7014_v20 }
0x8c91   :  { %12872 = vtanh.f32 %v7024_v8 }
0x8c9e   :  { %v12873_v22 = vpop.eup %12872 }
0x8c9f   :  { %7027 = vrot.lane.b32.xlu0 %v12873_v22, %s13454_s29 }
0x8ca3   :  { %7032 = vperm.xlu0 %12410, %v15266_v54  }
0x8ca7   :  { %12411 = vset.pattern.permute.xlu0 %v13465_v56 }
0x8d11   :  { %v7028_v52 = vpop.permute.xlu0 %7027 }
0x8d12   :  { %v7030_v47 = vmul.f32 %v12871_v45, %v7028_v52 }
0x8d14   :  { %7038 = vrot.lane.b32.xlu1 %v7030_v47, %s13451_s27 }
0x8d1e   :  { %v7033_v59 = vpop.permute.xlu0 %7032 }
0x8d1f   :  { %v7035_v17 = vmul.f32 %v15270_v42, %v7033_v59 }
0x8d21   :  { %v7036_v62 = vadd.f32 %v15276_v53, %v7035_v17 }
0x8d86   :  { %v7039_v9 = vpop.permute.xlu1 %7038 }
0x8d87   :  { %11962 = vmatmul.mubr.msk.f32.vlgmr.msra.gmra.mxu1 %vm85_vm1, %v7039_v9 }
0x8d88   :  { %11972 = vmatpush3.msra.mxu1 %v15236_v0  ;;  %11975 = vmatprep.mubr.msk.f32.mxu1 %vm13453_vm5, %v13452_v24 }
0x8d89   :  { %11973 = vmatprep.subr.mxu1 %v13452_v24 }
0x8d8a   :  { %11974 = vmatpush3.msra.mxu1 %v15245_v4 }
0x8d8b   :  { %11985 = vmatprep.subr.mxu1 %v13452_v24 }
0x8e47   :  { %v7108_v6 = vpop.f32.mrf.mxu1 }
0x8e48   :  { %v7112_v1 = vadd.f32 %v7108_v6, %v7036_v62 }
0x8e49   :  { %v11963_v40 = vpop.f32.mrf.mxu1 }
0x8e4a   :  { %12874 = vtanh.f32 %v7112_v1  ;;  %v10620_v61 = vmul.f32 -1.442695, %v7112_v1 }
0x8e4c   :  { %12876 = vpow2.f32 %v10620_v61 }
0x8e57   :  { %v12875_v58 = vpop.eup %12874 }
0x8e58   :  { %7122 = vrot.lane.b32.xlu1 %v12875_v58, %s13456_s0 }
0x8e59   :  { %v12877_v43 = vpop.eup %12876 }
0x8e5a   :  { %v7116_v27 = vadd.f32 1.0, %v12877_v43 }
0x8e5c   :  { %12878 = vrcp.f32 %v7116_v27 }
0x8e69   :  { %v12879_v2 = vpop.eup %12878 }
0x8e6a   :  { %v7120_v10 = vmul.f32 %v12879_v2, %v7024_v8 }
0x8eca   :  { %v7123_v50 = vpop.permute.xlu1 %7122 }
0x8ecb   :  { %v7125_v60 = vmul.f32 %v12879_v2, %v7123_v50 }
0x8ecd   :  { %7127 = vrot.lane.b32.xlu1 %v7125_v60, %s13454_s29 }
0x8f3f   :  { %v7128_v33 = vpop.permute.xlu1 %7127 }
0x8f40   :  { %v7130_v15 = vadd.f32 %v7128_v33, %v7120_v10 }
0x8f42   :  { %12880 = vtanh.f32 %v7130_v15 }
0x8f4f   :  { %v12881_v44 = vpop.eup %12880 }
0x8f50   :  { %7133 = vrot.lane.b32.xlu0 %v12881_v44, %s13454_s29 }
0x8f54   :  { %7138 = vperm.xlu0 %12411, %v15266_v54  }
0x8f58   :  { %12412 = vset.pattern.permute.xlu0 %v13466_v3 }
0x8fc2   :  { %v7134_v7 = vpop.permute.xlu0 %7133 }
0x8fc3   :  { %v7136_v36 = vmul.f32 %v12879_v2, %v7134_v7 }
0x8fc5   :  { %7144 = vrot.lane.b32.xlu1 %v7136_v36, %s13451_s27 }
0x8fcf   :  { %v7139_v37 = vpop.permute.xlu0 %7138 }
0x8fd0   :  { %v7141_v18 = vmul.f32 %v15270_v42, %v7139_v37 }
0x8fd2   :  { %v7142_v41 = vadd.f32 %v15276_v53, %v7141_v18 }
0x9037   :  { %v7145_v26 = vpop.permute.xlu1 %7144 }
0x9038   :  { %11969 = vmatmul.mubr.msk.f32.vlgmr.msra.gmra.mxu0 %vm85_vm1, %v7145_v26 }
0x9039   :  { %11979 = vmatpush3.msra.mxu0 %v15236_v0  ;;  %11982 = vmatprep.mubr.msk.f32.mxu0 %vm13453_vm5, %v13452_v24 }
0x903a   :  { %11980 = vmatprep.subr.mxu0 %v13452_v24 }
0x903b   :  { %11981 = vmatpush3.msra.mxu0 %v15245_v4 }
0x903c   :  { %11992 = vmatprep.subr.mxu0 %v13452_v24 }
0x90f8   :  { %v7214_v31 = vpop.f32.mrf.mxu0 }
0x90f9   :  { %v7218_v30 = vadd.f32 %v7214_v31, %v7142_v41 }
0x90fa   :  { %v11970_v63 = vpop.f32.mrf.mxu0 }
0x90fb   :  { %12882 = vtanh.f32 %v7218_v30  ;;  %v10622_v19 = vmul.f32 -1.442695, %v7218_v30 }
0x90fd   :  { %12884 = vpow2.f32 %v10622_v19 }
0x9108   :  { %v12883_v34 = vpop.eup %12882 }
0x9109   :  { %7228 = vrot.lane.b32.xlu1 %v12883_v34, %s13456_s0 }
0x910a   :  { %v12885_v45 = vpop.eup %12884 }
0x910b   :  { %v7222_v57 = vadd.f32 1.0, %v12885_v45 }
0x910d   :  { %12886 = vrcp.f32 %v7222_v57 }
0x911a   :  { %v12887_v51 = vpop.eup %12886 }
0x911b   :  { %v7226_v8 = vmul.f32 %v12887_v51, %v7130_v15 }
0x917b   :  { %v7229_v20 = vpop.permute.xlu1 %7228 }
0x917c   :  { %v7231_v5 = vmul.f32 %v12887_v51, %v7229_v20 }
0x917e   :  { %7233 = vrot.lane.b32.xlu1 %v7231_v5, %s13454_s29 }
0x91f0   :  { %v7234_v22 = vpop.permute.xlu1 %7233 }
0x91f1   :  { %v7236_v52 = vadd.f32 %v7234_v22, %v7226_v8 }
0x91f3   :  { %12888 = vtanh.f32 %v7236_v52 }
0x9200   :  { %v12889_v47 = vpop.eup %12888 }
0x9201   :  { %7239 = vrot.lane.b32.xlu0 %v12889_v47, %s13454_s29 }
0x9205   :  { %7244 = vperm.xlu0 %12412, %v15266_v54  }
0x9209   :  { %12413 = vset.pattern.permute.xlu0 %v13467_v48 }
0x9273   :  { %v7240_v9 = vpop.permute.xlu0 %7239 }
0x9274   :  { %v7242_v59 = vmul.f32 %v12887_v51, %v7240_v9 }
0x9276   :  { %7250 = vrot.lane.b32.xlu1 %v7242_v59, %s13451_s27 }
0x9280   :  { %v7245_v62 = vpop.permute.xlu0 %7244 }
0x9281   :  { %v7247_v6 = vmul.f32 %v15270_v42, %v7245_v62 }
0x9283   :  { %v7248_v1 = vadd.f32 %v15276_v53, %v7247_v6 }
0x92e8   :  { %v7251_v17 = vpop.permute.xlu1 %7250 }
0x92e9   :  { %11976 = vmatmul.mubr.msk.f32.vlgmr.msra.gmra.mxu1 %vm85_vm1, %v7251_v17 }
0x92ea   :  { %11986 = vmatpush3.msra.mxu1 %v15236_v0  ;;  %11989 = vmatprep.mubr.msk.f32.mxu1 %vm13453_vm5, %v13452_v24 }
0x92eb   :  { %11987 = vmatprep.subr.mxu1 %v13452_v24 }
0x92ec   :  { %11988 = vmatpush3.msra.mxu1 %v15245_v4 }
0x92ed   :  { %11999 = vmatprep.subr.mxu1 %v13452_v24 }
0x93a9   :  { %v7320_v40 = vpop.f32.mrf.mxu1 }
0x93aa   :  { %v7324_v58 = vadd.f32 %v7320_v40, %v7248_v1 }
0x93ab   :  { %v11977_v61 = vpop.f32.mrf.mxu1 }
0x93ac   :  { %12890 = vtanh.f32 %v7324_v58  ;;  %v10624_v27 = vmul.f32 -1.442695, %v7324_v58 }
0x93ae   :  { %12892 = vpow2.f32 %v10624_v27 }
0x93b9   :  { %v12891_v43 = vpop.eup %12890 }
0x93ba   :  { %7334 = vrot.lane.b32.xlu1 %v12891_v43, %s13456_s0 }
0x93bb   :  { %v12893_v2 = vpop.eup %12892 }
0x93bc   :  { %v7328_v50 = vadd.f32 1.0, %v12893_v2 }
0x93be   :  { %12894 = vrcp.f32 %v7328_v50 }
0x93cb   :  { %v12895_v60 = vpop.eup %12894 }
0x93cc   :  { %v7332_v15 = vmul.f32 %v12895_v60, %v7236_v52 }
0x942c   :  { %v7335_v10 = vpop.permute.xlu1 %7334 }
0x942d   :  { %v7337_v33 = vmul.f32 %v12895_v60, %v7335_v10 }
0x942f   :  { %7339 = vrot.lane.b32.xlu1 %v7337_v33, %s13454_s29 }
0x94a1   :  { %v7340_v44 = vpop.permute.xlu1 %7339 }
0x94a2   :  { %v7342_v7 = vadd.f32 %v7340_v44, %v7332_v15 }
0x94a4   :  { %12896 = vtanh.f32 %v7342_v7 }
0x94b1   :  { %v12897_v36 = vpop.eup %12896 }
0x94b2   :  { %7345 = vrot.lane.b32.xlu0 %v12897_v36, %s13454_s29 }
0x94b6   :  { %7350 = vperm.xlu0 %12413, %v15266_v54  }
0x94ba   :  { %12414 = vset.pattern.permute.xlu0 %v13468_v38 }
0x9524   :  { %v7346_v26 = vpop.permute.xlu0 %7345 }
0x9525   :  { %v7348_v37 = vmul.f32 %v12895_v60, %v7346_v26 }
0x9527   :  { %7356 = vrot.lane.b32.xlu1 %v7348_v37, %s13451_s27 }
0x9531   :  { %v7351_v41 = vpop.permute.xlu0 %7350 }
0x9532   :  { %v7353_v31 = vmul.f32 %v15270_v42, %v7351_v41 }
0x9534   :  { %v7354_v30 = vadd.f32 %v15276_v53, %v7353_v31 }
0x9599   :  { %v7357_v18 = vpop.permute.xlu1 %7356 }
0x959a   :  { %11983 = vmatmul.mubr.msk.f32.vlgmr.msra.gmra.mxu0 %vm85_vm1, %v7357_v18 }
0x959b   :  { %11993 = vmatpush3.msra.mxu0 %v15236_v0  ;;  %11996 = vmatprep.mubr.msk.f32.mxu0 %vm13453_vm5, %v13452_v24 }
0x959c   :  { %11994 = vmatprep.subr.mxu0 %v13452_v24 }
0x959d   :  { %11995 = vmatpush3.msra.mxu0 %v15245_v4 }
0x959e   :  { %12006 = vmatprep.subr.mxu0 %v13452_v24 }
0x965a   :  { %v7426_v63 = vpop.f32.mrf.mxu0 }
0x965b   :  { %v7430_v34 = vadd.f32 %v7426_v63, %v7354_v30 }
0x965c   :  { %v11984_v19 = vpop.f32.mrf.mxu0 }
0x965d   :  { %12898 = vtanh.f32 %v7430_v34  ;;  %v10626_v57 = vmul.f32 -1.442695, %v7430_v34 }
0x965f   :  { %12900 = vpow2.f32 %v10626_v57 }
0x966a   :  { %v12899_v45 = vpop.eup %12898 }
0x966b   :  { %7440 = vrot.lane.b32.xlu1 %v12899_v45, %s13456_s0 }
0x966c   :  { %v12901_v51 = vpop.eup %12900 }
0x966d   :  { %v7434_v20 = vadd.f32 1.0, %v12901_v51 }
0x966f   :  { %12902 = vrcp.f32 %v7434_v20 }
0x967c   :  { %v12903_v5 = vpop.eup %12902 }
0x967d   :  { %v7438_v52 = vmul.f32 %v12903_v5, %v7342_v7 }
0x96dd   :  { %v7441_v8 = vpop.permute.xlu1 %7440 }
0x96de   :  { %v7443_v22 = vmul.f32 %v12903_v5, %v7441_v8 }
0x96e0   :  { %7445 = vrot.lane.b32.xlu1 %v7443_v22, %s13454_s29 }
0x9752   :  { %v7446_v47 = vpop.permute.xlu1 %7445 }
0x9753   :  { %v7448_v9 = vadd.f32 %v7446_v47, %v7438_v52 }
0x9755   :  { %12904 = vtanh.f32 %v7448_v9 }
0x9762   :  { %v12905_v59 = vpop.eup %12904 }
0x9763   :  { %7451 = vrot.lane.b32.xlu0 %v12905_v59, %s13454_s29 }
0x9767   :  { %7456 = vperm.xlu0 %12414, %v15266_v54  }
0x976b   :  { %12415 = vset.pattern.permute.xlu0 %v13469_v25 }
0x97d5   :  { %v7452_v17 = vpop.permute.xlu0 %7451 }
0x97d6   :  { %v7454_v62 = vmul.f32 %v12903_v5, %v7452_v17 }
0x97d8   :  { %7462 = vrot.lane.b32.xlu1 %v7454_v62, %s13451_s27 }
0x97e2   :  { %v7457_v1 = vpop.permute.xlu0 %7456 }
0x97e3   :  { %v7459_v40 = vmul.f32 %v15270_v42, %v7457_v1  ;;  %v15485_v1 = vld [vmem:[%s16109_s3 + $0x8] sm:$0xff] }
0x97e5   :  { %v7460_v58 = vadd.f32 %v15276_v53, %v7459_v40  ;;  %v15494_v40 = vld [vmem:[%s16109_s3] sm:$0xff] }
0x984a   :  { %v7463_v6 = vpop.permute.xlu1 %7462 }
0x984b   :  { %11990 = vmatmul.mubr.msk.f32.vlgmr.msra.gmra.mxu1 %vm85_vm1, %v7463_v6 }
0x984c   :  { %12000 = vmatpush3.msra.mxu1 %v15236_v0  ;;  %12003 = vmatprep.mubr.msk.f32.mxu1 %vm13453_vm5, %v13452_v24 }
0x984d   :  { %12001 = vmatprep.subr.mxu1 %v13452_v24 }
0x984e   :  { %12002 = vmatpush3.msra.mxu1 %v15245_v4 }
0x984f   :  { %12013 = vmatprep.subr.mxu1 %v13452_v24 }
0x990b   :  { %v7532_v61 = vpop.f32.mrf.mxu1 }
0x990c   :  { %v7536_v43 = vadd.f32 %v7532_v61, %v7460_v58 }
0x990d   :  { %v11991_v27 = vpop.f32.mrf.mxu1 }
0x990e   :  { %12906 = vtanh.f32 %v7536_v43  ;;  %v10628_v50 = vmul.f32 -1.442695, %v7536_v43 }
0x9910   :  { %12908 = vpow2.f32 %v10628_v50 }
0x991b   :  { %v12907_v2 = vpop.eup %12906 }
0x991c   :  { %7546 = vrot.lane.b32.xlu1 %v12907_v2, %s13456_s0 }
0x991d   :  { %v12909_v60 = vpop.eup %12908 }
0x991e   :  { %v7540_v10 = vadd.f32 1.0, %v12909_v60 }
0x9920   :  { %12910 = vrcp.f32 %v7540_v10 }
0x992d   :  { %v12911_v33 = vpop.eup %12910 }
0x992e   :  { %v7544_v7 = vmul.f32 %v12911_v33, %v7448_v9 }
0x998e   :  { %v7547_v15 = vpop.permute.xlu1 %7546 }
0x998f   :  { %v7549_v44 = vmul.f32 %v12911_v33, %v7547_v15 }
0x9991   :  { %7551 = vrot.lane.b32.xlu1 %v7549_v44, %s13454_s29 }
0x9a03   :  { %v7552_v36 = vpop.permute.xlu1 %7551 }
0x9a04   :  { %v7554_v26 = vadd.f32 %v7552_v36, %v7544_v7 }
0x9a06   :  { %12912 = vtanh.f32 %v7554_v26 }
0x9a13   :  { %v12913_v37 = vpop.eup %12912 }
0x9a14   :  { %7557 = vrot.lane.b32.xlu0 %v12913_v37, %s13454_s29 }
0x9a18   :  { %7562 = vperm.xlu0 %12415, %v15266_v54  }
0x9a1c   :  { %12416 = vset.pattern.permute.xlu0 %v13470_v14 }
0x9a86   :  { %v7558_v18 = vpop.permute.xlu0 %7557 }
0x9a87   :  { %v7560_v41 = vmul.f32 %v12911_v33, %v7558_v18 }
0x9a89   :  { %7568 = vrot.lane.b32.xlu1 %v7560_v41, %s13451_s27 }
0x9a93   :  { %v7563_v30 = vpop.permute.xlu0 %7562 }
0x9a94   :  { %v7565_v63 = vmul.f32 %v15270_v42, %v7563_v30  ;;  %v13275_v30 = vld [vmem:[%s16112_s6 + $0x8] sm:$0xff] }
0x9a96   :  { %v7566_v34 = vadd.f32 %v15276_v53, %v7565_v63  ;;  %v13276_v63 = vld [vmem:[%s16112_s6] sm:$0xff]  ;;  %s13476_s6 = smov [#allocation9]  }
0x9a97   :  { %s10392_s20 = sshll.u32 %s13476_s6, 4  ;;  %s10393_s20 = int_to_ptr.vmem [resolvable:$true] %s10392_s20 }
0x9a98   :  { %p13380_p7 = scmp.lt.s32.totalorder %s10393_s20, %s10393_s20 }
0x9afb   :  { %v7569_v31 = vpop.permute.xlu1 %7568 }
0x9afc   :  { %11997 = vmatmul.mubr.msk.f32.vlgmr.msra.gmra.mxu0 %vm85_vm1, %v7569_v31 }
0x9afd   :  { %12007 = vmatpush3.msra.mxu0 %v15236_v0  ;;  %12010 = vmatprep.mubr.msk.f32.mxu0 %vm13453_vm5, %v13452_v24 }
0x9afe   :  { %12008 = vmatprep.subr.mxu0 %v13452_v24 }
0x9aff   :  { %12009 = vmatpush3.msra.mxu0 %v15245_v4 }
0x9b00   :  { %12020 = vmatprep.subr.mxu0 %v13452_v24 }
0x9bbc   :  { %v7638_v19 = vpop.f32.mrf.mxu0 }
0x9bbd   :  { %v7642_v45 = vadd.f32 %v7638_v19, %v7566_v34  ;;  %v15517_v19 = vld [vmem:[#allocation5] ss:$0 sm:$0xff] }
0x9bbe   :  { %v11998_v57 = vpop.f32.mrf.mxu0 }
0x9bbf   :  { %12914 = vtanh.f32 %v7642_v45  ;;  %v10630_v0 = vmul.f32 -1.442695, %v7642_v45  ;;  %v15523_v57 = vld [vmem:[%s16110_s4] ss:$0 sm:$0xff] }
0x9bc1   :  { %12916 = vpow2.f32 %v10630_v0 }
0x9bcc   :  { %v12915_v51 = vpop.eup %12914 }
0x9bcd   :  { %7652 = vrot.lane.b32.xlu1 %v12915_v51, %s13456_s0 }
0x9bce   :  { %v12917_v20 = vpop.eup %12916 }
0x9bcf   :  { %v7646_v5 = vadd.f32 1.0, %v12917_v20 }
0x9bd1   :  { %12918 = vrcp.f32 %v7646_v5 }
0x9bde   :  { %v12919_v4 = vpop.eup %12918 }
0x9bdf   :  { %v7650_v52 = vmul.f32 %v12919_v4, %v7554_v26 }
0x9c3f   :  { %v7653_v8 = vpop.permute.xlu1 %7652 }
0x9c40   :  { %v7655_v22 = vmul.f32 %v12919_v4, %v7653_v8 }
0x9c42   :  { %7657 = vrot.lane.b32.xlu1 %v7655_v22, %s13454_s29 }
0x9cb4   :  { %v7658_v47 = vpop.permute.xlu1 %7657 }
0x9cb5   :  { %v7660_v9 = vadd.f32 %v7658_v47, %v7650_v52 }
0x9cb7   :  { %12920 = vtanh.f32 %v7660_v9 }
0x9cc4   :  { %v12921_v59 = vpop.eup %12920 }
0x9cc5   :  { %7663 = vrot.lane.b32.xlu0 %v12921_v59, %s13454_s29 }
0x9cc9   :  { %7668 = vperm.xlu0 %12416, %v15266_v54  }
0x9ccd   :  { %12417 = vset.pattern.permute.xlu0 %v13471_v21 }
0x9d37   :  { %v7664_v17 = vpop.permute.xlu0 %7663 }
0x9d38   :  { %v7666_v62 = vmul.f32 %v12919_v4, %v7664_v17 }
0x9d3a   :  { %7674 = vrot.lane.b32.xlu1 %v7666_v62, %s13451_s27 }
0x9d44   :  { %v7669_v58 = vpop.permute.xlu0 %7668 }
0x9d45   :  { %v7671_v61 = vmul.f32 %v15270_v42, %v7669_v58 }
0x9d47   :  { %v7672_v43 = vadd.f32 %v15276_v53, %v7671_v61 }
0x9dac   :  { %v7675_v6 = vpop.permute.xlu1 %7674 }
0x9dad   :  { %12004 = vmatmul.mubr.msk.f32.vlgmr.msra.gmra.mxu1 %vm85_vm1, %v7675_v6 }
0x9dae   :  { %12014 = vmatpush3.msra.mxu1 %v15485_v1  ;;  %12017 = vmatprep.mubr.msk.f32.mxu1 %vm13453_vm5, %v13452_v24 }
0x9daf   :  { %12015 = vmatprep.subr.mxu1 %v13452_v24 }
0x9db0   :  { %12016 = vmatpush3.msra.mxu1 %v15494_v40 }
0x9db1   :  { %12027 = vmatprep.subr.mxu1 %v13452_v24 }
0x9e6d   :  { %v7744_v27 = vpop.f32.mrf.mxu1 }
0x9e6e   :  { %v7748_v2 = vadd.f32 %v7744_v27, %v7672_v43 }
0x9e6f   :  { %v12005_v50 = vpop.f32.mrf.mxu1 }
0x9e70   :  { %12922 = vtanh.f32 %v7748_v2  ;;  %v10632_v10 = vmul.f32 -1.442695, %v7748_v2 }
0x9e72   :  { %12924 = vpow2.f32 %v10632_v10 }
0x9e7d   :  { %v12923_v60 = vpop.eup %12922 }
0x9e7e   :  { %7758 = vrot.lane.b32.xlu1 %v12923_v60, %s13456_s0 }
0x9e7f   :  { %v12925_v33 = vpop.eup %12924 }
0x9e80   :  { %v7752_v15 = vadd.f32 1.0, %v12925_v33 }
0x9e82   :  { %12926 = vrcp.f32 %v7752_v15 }
0x9e8f   :  { %v12927_v44 = vpop.eup %12926 }
0x9e90   :  { %v7756_v42 = vmul.f32 %v12927_v44, %v7660_v9 }
0x9ef0   :  { %v7759_v7 = vpop.permute.xlu1 %7758 }
0x9ef1   :  { %v7761_v36 = vmul.f32 %v12927_v44, %v7759_v7 }
0x9ef3   :  { %7763 = vrot.lane.b32.xlu1 %v7761_v36, %s13454_s29 }
0x9f65   :  { %v7764_v26 = vpop.permute.xlu1 %7763 }
0x9f66   :  { %v7766_v53 = vadd.f32 %v7764_v26, %v7756_v42 }
0x9f68   :  { %12928 = vtanh.f32 %v7766_v53 }
0x9f75   :  { %v12929_v37 = vpop.eup %12928 }
0x9f76   :  { %7769 = vrot.lane.b32.xlu0 %v12929_v37, %s13454_s29 }
0x9f7a   :  { %7774 = vperm.xlu0 %12417, %v15266_v54  }
0x9f7e   :  { %12418 = vset.pattern.permute.xlu0 %v13472_v35 }
0x9fe8   :  { %v7770_v18 = vpop.permute.xlu0 %7769 }
0x9fe9   :  { %v7772_v41 = vmul.f32 %v12927_v44, %v7770_v18 }
0x9feb   :  { %7780 = vrot.lane.b32.xlu1 %v7772_v41, %s13451_s27 }
0x9ff5   :  { %v7775_v34 = vpop.permute.xlu0 %7774 }
0x9ff6   :  { %v7777_v45 = vmul.f32 %v15517_v19, %v7775_v34 }
0x9ff8   :  { %v7778_v51 = vadd.f32 %v15523_v57, %v7777_v45 }
0xa05d   :  { %v7781_v31 = vpop.permute.xlu1 %7780 }
0xa05e   :  { %12011 = vmatmul.mubr.msk.f32.vlgmr.msra.gmra.mxu0 %vm85_vm1, %v7781_v31 }
0xa05f   :  { %12021 = vmatpush3.msra.mxu0 %v13275_v30  ;;  %12024 = vmatprep.mubr.msk.f32.mxu0 %vm13453_vm5, %v13452_v24 }
0xa060   :  { %12022 = vmatprep.subr.mxu0 %v13452_v24 }
0xa061   :  { %12023 = vmatpush3.msra.mxu0 %v13276_v63 }
0xa062   :  { %12074 = vmatprep.subr.mxu0 %v13452_v24 }
0xa11e   :  { %v7850_v0 = vpop.f32.mrf.mxu0 }
0xa11f   :  { %v7854_v20 = vadd.f32 %v7850_v0, %v7778_v51  ;;  %v13279_v51 = vld [vmem:[%s16117_s11] sm:$0xff]  ;;  %v13280_v0 = vld [vmem:[#allocation2 + $0x70] sm:$0xff] }
0xa120   :  { %v12012_v5 = vpop.f32.mrf.mxu0 }
0xa121   :  { %12930 = vtanh.f32 %v7854_v20  ;;  %v10634_v8 = vmul.f32 -1.442695, %v7854_v20  ;;  %v13281_v20 = vld [vmem:[#allocation2 + $0x68] sm:$0xff] }
0xa122   :  { %v13282_v5 = vld [vmem:[%s16117_s11 + $0x8] sm:$0xff] }
0xa123   :  { %12932 = vpow2.f32 %v10634_v8  ;;  %v13284_v8 = vld [vmem:[#allocation2 + $0x58] sm:$0xff] }
0xa12e   :  { %v12931_v4 = vpop.eup %12930 }
0xa12f   :  { %7864 = vrot.lane.b32.xlu1 %v12931_v4, %s13456_s0  ;;  %v13283_v4 = vld [vmem:[#allocation2 + $0x60] sm:$0xff] }
0xa130   :  { %v12933_v22 = vpop.eup %12932 }
0xa131   :  { %v7858_v52 = vadd.f32 1.0, %v12933_v22  ;;  %v13285_v22 = vld [vmem:[%s16117_s11 + $0x10] sm:$0xff] }
0xa133   :  { %12934 = vrcp.f32 %v7858_v52  ;;  %v13286_v52 = vld [vmem:[#allocation2 + $0x50] sm:$0xff] }
0xa140   :  { %v12935_v47 = vpop.eup %12934 }
0xa141   :  { %v7862_v17 = vmul.f32 %v12935_v47, %v7766_v53 }
0xa1a1   :  { %v7865_v9 = vpop.permute.xlu1 %7864 }
0xa1a2   :  { %v7867_v59 = vmul.f32 %v12935_v47, %v7865_v9  ;;  %v13288_v9 = vld [vmem:[%s16117_s11 + $0x18] sm:$0xff] }
0xa1a4   :  { %7869 = vrot.lane.b32.xlu1 %v7867_v59, %s13454_s29  ;;  %v13289_v59 = vld [vmem:[#allocation2 + $0x40] sm:$0xff] }
0xa216   :  { %v7870_v62 = vpop.permute.xlu1 %7869 }
0xa217   :  { %v7872_v6 = vadd.f32 %v7870_v62, %v7862_v17  ;;  %v13290_v17 = vld [vmem:[#allocation2 + $0x38] sm:$0xff]  ;;  %v13291_v62 = vld [vmem:[%s16117_s11 + $0x20] sm:$0xff] }
0xa219   :  { %12936 = vtanh.f32 %v7872_v6 }
0xa226   :  { %v12937_v58 = vpop.eup %12936 }
0xa227   :  { %7875 = vrot.lane.b32.xlu0 %v12937_v58, %s13454_s29  ;;  %v13293_v58 = vld [vmem:[#allocation2 + $0x28] sm:$0xff] }
0xa22b   :  { %7880 = vperm.xlu0 %12418, %v15266_v54  }
0xa22f   :  { %12421 = vset.pattern.permute.xlu0 %v13458_v28 }
0xa299   :  { %v7876_v61 = vpop.permute.xlu0 %7875 }
0xa29a   :  { %v7878_v43 = vmul.f32 %v12935_v47, %v7876_v61  ;;  %v13287_v47 = vld [vmem:[#allocation2 + $0x48] sm:$0xff] }
0xa29b   :  { %v13294_v61 = vld [vmem:[%s16117_s11 + $0x28] sm:$0xff] }
0xa29c   :  { %7886 = vrot.lane.b32.xlu1 %v7878_v43, %s13451_s27  ;;  %v13295_v43 = vld [vmem:[#allocation2 + $0x20] sm:$0xff] }
0xa2a6   :  { %v7881_v2 = vpop.permute.xlu0 %7880 }
0xa2a7   :  { %v7883_v50 = vmul.f32 %v15517_v19, %v7881_v2  ;;  %v13297_v2 = vld [vmem:[%s16117_s11 + $0x30] sm:$0xff] }
0xa2a9   :  { %v7884_v60 = vadd.f32 %v15523_v57, %v7883_v50  ;;  %v13298_v50 = vld [vmem:[#allocation2 + $0x10] sm:$0xff] }
0xa30e   :  { %v7887_v27 = vpop.permute.xlu1 %7886 }
0xa30f   :  { %12018 = vmatmul.mubr.msk.f32.vlgmr.msra.gmra.mxu1 %vm85_vm1, %v7887_v27  ;;  %v13296_v27 = vld [vmem:[#allocation2 + $0x18] sm:$0xff] }
0xa310   :  { %12029 = vmatprep.mubr.msk.f32.mxu1 %vm13453_vm5, %v13452_v24 }
0xa3cf   :  { %v7956_v10 = vpop.f32.mrf.mxu1 }
0xa3d0   :  { %v7960_v33 = vadd.f32 %v7956_v10, %v7884_v60  ;;  %v13299_v60 = vld [vmem:[#allocation2 + $0x8] sm:$0xff]  ;;  %v13300_v10 = vld [vmem:[%s16117_s11 + $0x38] sm:$0xff] }
0xa3d1   :  { %v12019_v54 = vpop.f32.mrf.mxu1 }
0xa3d2   :  { %12938 = vtanh.f32 %v7960_v33  ;;  %v10636_v15 = vmul.f32 -1.442695, %v7960_v33  ;;  %v13301_v33 = vld [vmem:[#allocation2] sm:$0xff] }
0xa3d3   :  { %v13302_v54 = vld [vmem:[%s16117_s11 + $0x40] sm:$0xff] }
0xa3d4   :  { %12940 = vpow2.f32 %v10636_v15  ;;  %v13304_v15 = vld [vmem:[%s16117_s11 + $0x50] sm:$0xff] }
0xa3df   :  { %v12939_v28 = vpop.eup %12938 }
0xa3e0   :  { %7970 = vrot.lane.b32.xlu1 %v12939_v28, %s13456_s0  ;;  %v13303_v28 = vld [vmem:[%s16117_s11 + $0x48] sm:$0xff] }
0xa3e1   :  { %v12941_v44 = vpop.eup %12940 }
0xa3e2   :  { %v7964_v7 = vadd.f32 1.0, %v12941_v44  ;;  %v13305_v44 = vld [vmem:[%s16117_s11 + $0x58] sm:$0xff] }
0xa3e4   :  { %12942 = vrcp.f32 %v7964_v7  ;;  %v13306_v7 = vld [vmem:[%s16117_s11 + $0x60] sm:$0xff] }
0xa3f1   :  { %v12943_v36 = vpop.eup %12942 }
0xa3f2   :  { %v7968_v53 = vmul.f32 %v12943_v36, %v7872_v6  ;;  %v13292_v6 = vld [vmem:[#allocation2 + $0x30] sm:$0xff] }
0xa452   :  { %v7971_v42 = vpop.permute.xlu1 %7970 }
0xa453   :  { %v7973_v26 = vmul.f32 %v12943_v36, %v7971_v42  ;;  %v13308_v42 = vld [vmem:[%s16117_s11 + $0x70] sm:$0xff] }
0xa455   :  { %7975 = vrot.lane.b32.xlu1 %v7973_v26, %s13454_s29 }
0xa4c7   :  { %v7976_v37 = vpop.permute.xlu1 %7975 }
0xa4c8   :  { %v15539_v18 = vadd.f32 %v7976_v37, %v7968_v53 }
0xa4ca   :  { %12944 = vtanh.f32 %v15539_v18 }
0xa4d7   :  { %v12945_v41 = vpop.eup %12944 }
0xa4d8   :  { %7981 = vrot.lane.b32.xlu0 %v12945_v41, %s13454_s29 }
0xa54a   :  { %v7982_v31 = vpop.permute.xlu0 %7981 }
0xa54b   :  { %v15543_v30 = vmul.f32 %v12943_v36, %v7982_v31  ;;  %v13307_v36 = vld [vmem:[%s16117_s11 + $0x68] sm:$0xff] }
0xa54d   :  { %7995 = vrot.lane.b32.xlu1 %v15543_v30, %s13451_s27 }
0xa5bf   :  { %v15547_v63 = vpop.permute.xlu1 %7995 }
0xa5c0   :  { %12025 = vmatmul.mubr.msk.f32.vlgmr.msra.gmra.mxu0 %vm85_vm1, %v15547_v63 }
0xa5c1   :  { %12104 = vmatprep.mubr.msk.f32.mxu0 %vm13453_vm5, %v13452_v24 }
0xa680   :  { %v8065_v34 = vpop.f32.mrf.mxu0 }
0xa681   :  { %12028 = vmatpush3.msk.msra.mxu1 %vm503_vm2, %v8065_v34 }
0xa682   :  { %v12026_v45 = vpop.f32.mrf.mxu0  ;;  %12030 = vmatmul.mubr.msk.f32.vlgmr.msra.gmra.mxu1 %vm887_vm6, %v13279_v51  ;;  %12126 = vmatprep.subr.mxu1 %v13452_v24 }
0xa683   :  { %12032 = vmatprep.mubr.msk.f32.mxu1 %vm13453_vm5, %v13452_v24  ;;  %12127 = vmatpush3.msra.mxu1 %v13280_v0 }
0xa684   :  { %12128 = vmatprep.subr.mxu1 %v13452_v24 }
0xa685   :  { %12129 = vmatpush3.msra.mxu1 %v13281_v20 }
0xa686   :  { %12033 = vmatmul.mubr.msk.f32.gmra.mxu1 %vm887_vm6, %v13282_v5  ;;  %12130 = vmatprep.subr.mxu1 %v13452_v24 }
0xa687   :  { %12035 = vmatprep.mubr.msk.f32.mxu1 %vm13453_vm5, %v13452_v24  ;;  %12131 = vmatpush3.msra.mxu1 %v13283_v4 }
0xa688   :  { %12132 = vmatprep.subr.mxu1 %v13452_v24 }
0xa689   :  { %12133 = vmatpush3.msra.mxu1 %v13284_v8 }
0xa68a   :  { %12036 = vmatmul.mubr.msk.f32.gmra.mxu1 %vm887_vm6, %v13285_v22  ;;  %12134 = vmatprep.subr.mxu1 %v13452_v24 }
0xa68b   :  { %12038 = vmatprep.mubr.msk.f32.mxu1 %vm13453_vm5, %v13452_v24  ;;  %12135 = vmatpush3.msra.mxu1 %v13286_v52 }
0xa68c   :  { %12136 = vmatprep.subr.mxu1 %v13452_v24 }
0xa68d   :  { %12137 = vmatpush3.msra.mxu1 %v13287_v47 }
0xa68e   :  { %12039 = vmatmul.mubr.msk.f32.gmra.mxu1 %vm887_vm6, %v13288_v9  ;;  %12138 = vmatprep.subr.mxu1 %v13452_v24 }
0xa68f   :  { %12041 = vmatprep.mubr.msk.f32.mxu1 %vm13453_vm5, %v13452_v24  ;;  %12139 = vmatpush3.msra.mxu1 %v13289_v59 }
0xa690   :  { %12140 = vmatprep.subr.mxu1 %v13452_v24 }
0xa691   :  { %12141 = vmatpush3.msra.mxu1 %v13290_v17 }
0xa692   :  { %12042 = vmatmul.mubr.msk.f32.gmra.mxu1 %vm887_vm6, %v13291_v62  ;;  %12142 = vmatprep.subr.mxu1 %v13452_v24 }
0xa693   :  { %12044 = vmatprep.mubr.msk.f32.mxu1 %vm13453_vm5, %v13452_v24  ;;  %12143 = vmatpush3.msra.mxu1 %v13292_v6 }
0xa694   :  { %12144 = vmatprep.subr.mxu1 %v13452_v24 }
0xa695   :  { %12145 = vmatpush3.msra.mxu1 %v13293_v58 }
0xa696   :  { %12045 = vmatmul.mubr.msk.f32.gmra.mxu1 %vm887_vm6, %v13294_v61  ;;  %12146 = vmatprep.subr.mxu1 %v13452_v24 }
0xa697   :  { %12047 = vmatprep.mubr.msk.f32.mxu1 %vm13453_vm5, %v13452_v24  ;;  %12147 = vmatpush3.msra.mxu1 %v13295_v43 }
0xa698   :  { %12148 = vmatprep.subr.mxu1 %v13452_v24 }
0xa699   :  { %12149 = vmatpush3.msra.mxu1 %v13296_v27 }
0xa69a   :  { %12048 = vmatmul.mubr.msk.f32.gmra.mxu1 %vm887_vm6, %v13297_v2  ;;  %12150 = vmatprep.subr.mxu1 %v13452_v24  ;;  %v13309_v2 = vld [vmem:[#allocation3 + $0x60] sm:$0xff] }
0xa69b   :  { %12050 = vmatprep.mubr.msk.f32.mxu1 %vm13453_vm5, %v13452_v24  ;;  %12151 = vmatpush3.msra.mxu1 %v13298_v50 }
0xa69c   :  { %12152 = vmatprep.subr.mxu1 %v13452_v24 }
0xa69d   :  { %12153 = vmatpush3.msra.mxu1 %v13299_v60  ;;  %v13310_v60 = vld [vmem:[#allocation3 + $0x48] sm:$0xff] }
0xa69e   :  { %12051 = vmatmul.mubr.msk.f32.gmra.mxu1 %vm887_vm6, %v13300_v10  ;;  %12154 = vmatprep.subr.mxu1 %v13452_v24 }
0xa69f   :  { %12053 = vmatprep.mubr.msk.f32.mxu1 %vm13453_vm5, %v13452_v24  ;;  %12155 = vmatpush3.msra.mxu1 %v13301_v33 }
0xa6a0   :  { %12194 = vmatprep.subr.mxu1 %v13452_v24 }
0xa6a2   :  { %12054 = vmatmul.mubr.msk.f32.gmra.mxu1 %vm887_vm6, %v13302_v54 }
0xa6a3   :  { %12056 = vmatprep.mubr.msk.f32.mxu1 %vm13453_vm5, %v13452_v24 }
0xa6a6   :  { %12057 = vmatmul.mubr.msk.f32.gmra.mxu1 %vm887_vm6, %v13303_v28  ;;  %v13311_v28 = vld [vmem:[#allocation3 + $0x38] sm:$0xff] }
0xa6a7   :  { %12059 = vmatprep.mubr.msk.f32.mxu1 %vm13453_vm5, %v13452_v24 }
0xa6aa   :  { %12060 = vmatmul.mubr.msk.f32.gmra.mxu1 %vm887_vm6, %v13304_v15 }
0xa6ab   :  { %12062 = vmatprep.mubr.msk.f32.mxu1 %vm13453_vm5, %v13452_v24 }
0xa6ae   :  { %12063 = vmatmul.mubr.msk.f32.gmra.mxu1 %vm887_vm6, %v13305_v44  ;;  %v13312_v44 = vld [vmem:[#allocation3 + $0x68] sm:$0xff] }
0xa6af   :  { %12065 = vmatprep.mubr.msk.f32.mxu1 %vm13453_vm5, %v13452_v24 }
0xa6b2   :  { %12066 = vmatmul.mubr.msk.f32.gmra.mxu1 %vm887_vm6, %v13306_v7 }
0xa6b3   :  { %12068 = vmatprep.mubr.msk.f32.mxu1 %vm13453_vm5, %v13452_v24 }
0xa6b6   :  { %12069 = vmatmul.mubr.msk.f32.gmra.mxu1 %vm887_vm6, %v13307_v36  ;;  %v13313_v36 = vld [vmem:[#allocation3 + $0x58] sm:$0xff] }
0xa6b7   :  { %12071 = vmatprep.mubr.msk.f32.mxu1 %vm13453_vm5, %v13452_v24 }
0xa6ba   :  { %12072 = vmatmul.mubr.msk.f32.gmra.mxu1 %vm887_vm6, %v13308_v42 }
0xa6bb   :  { %12156 = vmatprep.mubr.msk.f32.mxu1 %vm13453_vm5, %v13452_v24 }
0xa742   :  { %v15660_v26 = vpop.f32.mrf.mxu1 }
0xa744   :  { %v12031_v53 = vpop.f32.mrf.mxu1 }
0xa746   :  { %v8143_v37 = vpop.f32.mrf.mxu1 }
0xa748   :  { %v12034_v41 = vpop.f32.mrf.mxu1 }
0xa74a   :  { %v15662_v31 = vpop.f32.mrf.mxu1 }
0xa74c   :  { %v12037_v34 = vpop.f32.mrf.mxu1 }
0xa74d   :  { %v13314_v34 = vld [vmem:[#allocation3 + $0x70] sm:$0xff] }
0xa74e   :  { %v8153_v45 = vpop.f32.mrf.mxu1 }
0xa750   :  { %v12040_v51 = vpop.f32.mrf.mxu1 }
0xa752   :  { %v15664_v0 = vpop.f32.mrf.mxu1 }
0xa754   :  { %v12043_v20 = vpop.f32.mrf.mxu1 }
0xa755   :  { %v13315_v20 = vld [vmem:[#allocation3 + $0x28] sm:$0xff] }
0xa756   :  { %v8163_v5 = vpop.f32.mrf.mxu1 }
0xa758   :  { %v12046_v4 = vpop.f32.mrf.mxu1 }
0xa759   :  { %v8217_v4 = vadd.f32 %v13315_v20, %v8163_v5  ;;  %v13320_v5 = vld [vmem:[#allocation3 + $0x8] sm:$0xff] }
0xa75a   :  { %v8168_v8 = vpop.f32.mrf.mxu1 }
0xa75c   :  { %v12049_v22 = vpop.f32.mrf.mxu1 }
0xa75e   :  { %v8173_v52 = vpop.f32.mrf.mxu1 }
0xa75f   :  { %v8219_v15 = vadd.f32 %v13311_v28, %v8173_v52 }
0xa760   :  { %v12052_v47 = vpop.f32.mrf.mxu1 }
0xa761   :  { %v13316_v47 = vld [vmem:[#allocation3 + $0x50] sm:$0xff] }
0xa762   :  { %v8178_v9 = vpop.f32.mrf.mxu1 }
0xa764   :  { %v12055_v59 = vpop.f32.mrf.mxu1 }
0xa766   :  { %v8183_v17 = vpop.f32.mrf.mxu1 }
0xa767   :  { %v8221_v10 = vadd.f32 %v13310_v60, %v8183_v17  ;;  %v13317_v17 = vld [vmem:[#allocation3 + $0x18] sm:$0xff] }
0xa768   :  { %v12058_v62 = vpop.f32.mrf.mxu1  ;;  %v8215_v52 = vadd.f32 %v13317_v17, %v8153_v45 }
0xa769   :  { %v13318_v62 = vld [vmem:[#allocation3 + $0x40] sm:$0xff] }
0xa76a   :  { %v8188_v6 = vpop.f32.mrf.mxu1 }
0xa76b   :  { %v8222_v59 = vadd.f32 %v13316_v47, %v8188_v6  ;;  %v13321_v6 = vld [vmem:[#allocation3 + $0x30] sm:$0xff] }
0xa76c   :  { %v12061_v58 = vpop.f32.mrf.mxu1  ;;  %v8218_v60 = vadd.f32 %v13321_v6, %v8168_v8 }
0xa76d   :  { %v8220_v58 = vadd.f32 %v13318_v62, %v8178_v9 }
0xa76e   :  { %v8193_v61 = vpop.f32.mrf.mxu1 }
0xa76f   :  { %v8223_v42 = vadd.f32 %v13313_v36, %v8193_v61  ;;  %v13323_v36 = vld [vmem:[#allocation3 + $0x10] sm:$0xff] }
0xa770   :  { %v12064_v43 = vpop.f32.mrf.mxu1 }
0xa771   :  { %v15669_v43 = vld [vmem:[%s16113_s7] ss:$0 sm:$0xff] }
0xa772   :  { %v8198_v27 = vpop.f32.mrf.mxu1 }
0xa773   :  { %v8224_v50 = vadd.f32 %v13309_v2, %v8198_v27  ;;  %v8213_v2 = vadd.f32 %v13320_v5, %v8143_v37 }
0xa774   :  { %v12067_v33 = vpop.f32.mrf.mxu1 }
0xa775   :  { %12946 = vtanh.f32 %v8224_v50 }
0xa776   :  { %v8203_v54 = vpop.f32.mrf.mxu1  ;;  %12948 = vtanh.f32 %v8221_v10 }
0xa777   :  { %v8225_v7 = vadd.f32 %v13312_v44, %v8203_v54  ;;  %v13322_v54 = vld [vmem:[#allocation3 + $0x20] sm:$0xff] }
0xa778   :  { %v12070_v53 = vpop.f32.mrf.mxu1  ;;  %v8216_v28 = vadd.f32 %v13322_v54, %v15664_v0 }
0xa779   :  { %12950 = vtanh.f32 %v8225_v7 }
0xa77a   :  { %v8208_v41 = vpop.f32.mrf.mxu1  ;;  %12952 = vtanh.f32 %v8219_v15 }
0xa77b   :  { %v8226_v51 = vadd.f32 %v13314_v34, %v8208_v41  ;;  %12954 = vtanh.f32 %v8223_v42  ;;  %v8214_v42 = vadd.f32 %v13323_v36, %v15662_v31 }
0xa77c   :  { %v12073_v22 = vpop.f32.mrf.mxu1 }
0xa77d   :  { %12956 = vtanh.f32 %v8226_v51 }
0xa77e   :  { %12958 = vtanh.f32 %v8217_v4  ;;  %v13324_v4 = vld [vmem:[#allocation3] sm:$0xff] }
0xa77f   :  { %12960 = vtanh.f32 %v8222_v59  ;;  %v8212_v22 = vadd.f32 %v13324_v4, %v15660_v26 }
0xa780   :  { %12962 = vtanh.f32 %v8215_v52 }
0xa781   :  { %12964 = vtanh.f32 %v8220_v58 }
0xa782   :  { %v12947_v61 = vpop.eup %12946  ;;  %12966 = vtanh.f32 %v8213_v2 }
0xa783   :  { %v8254_v27 = vmul.f32 %v15669_v43, %v12947_v61  ;;  %v12949_v50 = vpop.eup %12948  ;;  %12968 = vtanh.f32 %v8218_v60 }
0xa784   :  { %v8251_v44 = vmul.f32 %v15669_v43, %v12949_v50  ;;  %12970 = vtanh.f32 %v8216_v28 }
0xa785   :  { %v8293_v45 = vsel %vm85_vm1, %v8254_v27, 0.0  ;;  %12972 = vtanh.f32 %v8214_v42 }
0xa786   :  { %v12951_v10 = vpop.eup %12950  ;;  %8294 = vadd.xlane.f32.xlu0 %v8293_v45  ;;  %v8284_v41 = vsel %vm85_vm1, %v8251_v44, 0.0  ;;  %12974 = vtanh.f32 %v8212_v22  ;;  %v13327_v22 = vld [vmem:[%s16119_s13 + $0x60] sm:$0xff] }
0xa787   :  { %v8255_v9 = vmul.f32 %v15669_v43, %v12951_v10  ;;  %v12953_v33 = vpop.eup %12952 }
0xa788   :  { %v12955_v15 = vpop.eup %12954  ;;  %v8249_v0 = vmul.f32 %v15669_v43, %v12953_v33 }
0xa789   :  { %v8296_v37 = vsel %vm85_vm1, %v8255_v9, 0.0  ;;  %v8253_v51 = vmul.f32 %v15669_v43, %v12955_v15 }
0xa78a   :  { %v12957_v7 = vpop.eup %12956  ;;  %8297 = vadd.xlane.f32.xlu1 %v8296_v37  ;;  %v8278_v31 = vsel %vm85_vm1, %v8249_v0, 0.0  ;;  %v13325_v0 = vld [vmem:[%s16119_s13 + $0x70] sm:$0xff] }
0xa78b   :  { %v8256_v8 = vmul.f32 %v15669_v43, %v12957_v7  ;;  %v12959_v53 = vpop.eup %12958  ;;  %v8290_v59 = vsel %vm85_vm1, %v8253_v51, 0.0 }
0xa78c   :  { %v12961_v20 = vpop.eup %12960  ;;  %v8247_v17 = vmul.f32 %v15669_v43, %v12959_v53 }
0xa78d   :  { %v8299_v34 = vsel %vm85_vm1, %v8256_v8, 0.0  ;;  %v12963_v47 = vpop.eup %12962  ;;  %v8252_v52 = vmul.f32 %v15669_v43, %v12961_v20  ;;  %v13326_v20 = vld [vmem:[%s16119_s13 + $0x68] sm:$0xff] }
0xa78e   :  { %8285 = vadd.xlane.f32.xlu1 %v8284_v41  ;;  %8300 = vadd.xlane.f32.xlu0 %v8299_v34  ;;  %v12965_v62 = vpop.eup %12964  ;;  %v8272_v61 = vsel %vm85_vm1, %v8247_v17, 0.0  ;;  %v8245_v26 = vmul.f32 %v15669_v43, %v12963_v47 }
0xa78f   :  { %v12967_v58 = vpop.eup %12966  ;;  %v8287_v27 = vsel %vm85_vm1, %v8252_v52, 0.0  ;;  %v8250_v5 = vmul.f32 %v15669_v43, %v12965_v62  ;;  %v13329_v62 = vld [vmem:[%s16119_s13 + $0x50] sm:$0xff] }
0xa790   :  { %v12969_v2 = vpop.eup %12968  ;;  %v8266_v6 = vsel %vm85_vm1, %v8245_v26, 0.0  ;;  %v8243_v45 = vmul.f32 %v15669_v43, %v12967_v58 }
0xa791   :  { %v12971_v50 = vpop.eup %12970  ;;  %v8281_v60 = vsel %vm85_vm1, %v8250_v5, 0.0  ;;  %v8248_v10 = vmul.f32 %v15669_v43, %v12969_v2  ;;  %v13331_v2 = vld [vmem:[%s16119_s13 + $0x40] sm:$0xff] }
0xa792   :  { %8279 = vadd.xlane.f32.xlu1 %v8278_v31  ;;  %8291 = vadd.xlane.f32.xlu0 %v8290_v59  ;;  %v12973_v9 = vpop.eup %12972  ;;  %v8260_v33 = vsel %vm85_vm1, %v8243_v45, 0.0  ;;  %v8246_v28 = vmul.f32 %v15669_v43, %v12971_v50  ;;  %v13328_v59 = vld [vmem:[%s16119_s13 + $0x58] sm:$0xff] }
0xa793   :  { %v8275_v54 = vsel %vm85_vm1, %v8248_v10, 0.0  ;;  %v12975_v15 = vpop.eup %12974  ;;  %v8244_v44 = vmul.f32 %v15669_v43, %v12973_v9  ;;  %v13333_v10 = vld [vmem:[%s16119_s13 + $0x30] sm:$0xff] }
0xa794   :  { %v8269_v37 = vsel %vm85_vm1, %v8246_v28, 0.0  ;;  %v8242_v8 = vmul.f32 %v15669_v43, %v12975_v15 }
0xa795   :  { %v8263_v7 = vsel %vm85_vm1, %v8244_v44, 0.0 }
0xa796   :  { %8273 = vadd.xlane.f32.xlu1 %v8272_v61  ;;  %8288 = vadd.xlane.f32.xlu0 %v8287_v27  ;;  %v8257_v36 = vsel %vm85_vm1, %v8242_v8, 0.0  ;;  %v13330_v61 = vld [vmem:[%s16119_s13 + $0x48] sm:$0xff] }
0xa79a   :  { %8267 = vadd.xlane.f32.xlu1 %v8266_v6  ;;  %8282 = vadd.xlane.f32.xlu0 %v8281_v60  ;;  %v13332_v6 = vld [vmem:[%s16119_s13 + $0x38] sm:$0xff] }
0xa79e   :  { %8261 = vadd.xlane.f32.xlu1 %v8260_v33  ;;  %8276 = vadd.xlane.f32.xlu0 %v8275_v54  ;;  %v13334_v54 = vld [vmem:[%s16119_s13 + $0x28] sm:$0xff] }
0xa7a2   :  { %8270 = vadd.xlane.f32.xlu0 %v8269_v37  ;;  %v13335_v37 = vld [vmem:[%s16119_s13 + $0x20] sm:$0xff] }
0xa7a6   :  { %8264 = vadd.xlane.f32.xlu0 %v8263_v7  ;;  %v13336_v7 = vld [vmem:[%s16119_s13 + $0x18] sm:$0xff] }
0xa7aa   :  { %8258 = vadd.xlane.f32.xlu0 %v8257_v36 }
0xa80f   :  { %v8295_v42 = vpop.xlane.xlu0 %8294 }
0xa810   :  { %v8314_v47 = vmul.f32 %v13327_v22, %v8295_v42  ;;  %v13341_v22 = vld [vmem:[%s16120_s14 + $0x38] sm:$0xf] }
0xa813   :  { %v8298_v53 = vpop.xlane.xlu1 %8297 }
0xa814   :  { %v8315_v4 = vmul.f32 %v13326_v20, %v8298_v53  ;;  %v13337_v53 = vld [vmem:[%s16119_s13 + $0x10] sm:$0xff]  ;;  %v13339_v20 = vld [vmem:[%s16119_s13] sm:$0xff] }
0xa817   :  { %v8286_v41 = vpop.xlane.xlu1 %8285  ;;  %v8301_v34 = vpop.xlane.xlu0 %8300 }
0xa818   :  { %v8316_v51 = vmul.f32 %v13325_v0, %v8301_v34  ;;  %v8311_v27 = vmul.f32 %v13330_v61, %v8286_v41  ;;  %v13338_v34 = vld [vmem:[%s16119_s13 + $0x8] sm:$0xff] }
0xa81a   :  { %12075 = vmatpush3.msra.mxu0 %v8316_v51 }
0xa81b   :  { %12076 = vmatprep.subr.mxu0 %v13452_v24  ;;  %v8292_v43 = vpop.xlane.xlu0 %8291  ;;  %v8280_v31 = vpop.xlane.xlu1 %8279 }
0xa81c   :  { %12077 = vmatpush3.msra.mxu0 %v8315_v4  ;;  %v8313_v17 = vmul.f32 %v13328_v59, %v8292_v43  ;;  %v8309_v60 = vmul.f32 %v13332_v6, %v8280_v31  ;;  %v15766_v43 = vld [vmem:[%s16118_s12] sm:$0x3]  ;;  %v13343_v31 = vld [vmem:[%s16120_s14 + $0x28] sm:$0xff] }
0xa81d   :  { %12078 = vmatprep.subr.mxu0 %v13452_v24  ;;  %v13344_v59 = vld [vmem:[%s16120_s14 + $0x20] sm:$0xff] }
0xa81e   :  { %12079 = vmatpush3.msra.mxu0 %v8314_v47  ;;  %v13342_v47 = vld [vmem:[%s16120_s14 + $0x30] sm:$0xff] }
0xa81f   :  { %12080 = vmatprep.subr.mxu0 %v13452_v24  ;;  %v8289_v52 = vpop.xlane.xlu0 %8288  ;;  %v8274_v26 = vpop.xlane.xlu1 %8273 }
0xa820   :  { %v8312_v58 = vmul.f32 %v13329_v62, %v8289_v52  ;;  %12081 = vmatpush3.msra.mxu0 %v8313_v17  ;;  %v8307_v28 = vmul.f32 %v13334_v54, %v8274_v26  ;;  %v13345_v17 = vld [vmem:[%s16120_s14 + $0x18] sm:$0xff]  ;;  %v13346_v52 = vld [vmem:[%s16120_s14 + $0x10] sm:$0xff]  ;;  %v13347_v62 = vld [vmem:[%s16120_s14 + $0x8] sm:$0xff] }
0xa821   :  { %12082 = vmatprep.subr.mxu0 %v13452_v24 }
0xa822   :  { %12083 = vmatpush3.msra.mxu0 %v8312_v58  ;;  %v13348_v58 = vld [vmem:[%s16120_s14] sm:$0xff] }
0xa823   :  { %12084 = vmatprep.subr.mxu0 %v13452_v24  ;;  %v8283_v5 = vpop.xlane.xlu0 %8282  ;;  %v8268_v33 = vpop.xlane.xlu1 %8267 }
0xa824   :  { %v8310_v50 = vmul.f32 %v13331_v2, %v8283_v5  ;;  %12085 = vmatpush3.msra.mxu0 %v8311_v27  ;;  %v8305_v8 = vmul.f32 %v13336_v7, %v8268_v33  ;;  %v7985_v5 = vmul.f32 %v15543_v30, %v14648_v29 }
0xa825   :  { %12086 = vmatprep.subr.mxu0 %v13452_v24 }
0xa826   :  { %12087 = vmatpush3.msra.mxu0 %v8310_v50 }
0xa827   :  { %12088 = vmatprep.subr.mxu0 %v13452_v24  ;;  %v8277_v45 = vpop.xlane.xlu0 %8276  ;;  %v8262_v36 = vpop.xlane.xlu1 %8261 }
0xa828   :  { %v8308_v9 = vmul.f32 %v13333_v10, %v8277_v45  ;;  %12089 = vmatpush3.msra.mxu0 %v8309_v60  ;;  %v8303_v0 = vmul.f32 %v13338_v34, %v8262_v36 }
0xa829   :  { %12090 = vmatprep.subr.mxu0 %v13452_v24 }
0xa82a   :  { %12091 = vmatpush3.msra.mxu0 %v8308_v9 }
0xa82b   :  { %12092 = vmatprep.subr.mxu0 %v13452_v24  ;;  %v8271_v15 = vpop.xlane.xlu0 %8270 }
0xa82c   :  { %v8306_v44 = vmul.f32 %v13335_v37, %v8271_v15  ;;  %12093 = vmatpush3.msra.mxu0 %v8307_v28  ;;  %v13349_v28 = vld [vmem:[#allocation4] ss:$0 sm:$0xff] }
0xa82d   :  { %12094 = vmatprep.subr.mxu0 %v13452_v24 }
0xa82e   :  { %12095 = vmatpush3.msra.mxu0 %v8306_v44 }
0xa82f   :  { %12096 = vmatprep.subr.mxu0 %v13452_v24  ;;  %v8265_v42 = vpop.xlane.xlu0 %8264 }
0xa830   :  { %v8304_v41 = vmul.f32 %v13337_v53, %v8265_v42  ;;  %12097 = vmatpush3.msra.mxu0 %v8305_v8 }
0xa831   :  { %12098 = vmatprep.subr.mxu0 %v13452_v24 }
0xa832   :  { %12099 = vmatpush3.msra.mxu0 %v8304_v41 }
0xa833   :  { %12100 = vmatprep.subr.mxu0 %v13452_v24  ;;  %v8259_v51 = vpop.xlane.xlu0 %8258 }
0xa834   :  { %v8302_v4 = vmul.f32 %v13339_v20, %v8259_v51  ;;  %12101 = vmatpush3.msra.mxu0 %v8303_v0 }
0xa835   :  { %12102 = vmatprep.subr.mxu0 %v13452_v24 }
0xa836   :  { %12103 = vmatpush3.msra.mxu0 %v8302_v4 }
0xa837   :  { %12105 = vmatmul.mubr.msk.f32.vlgmr.msra.gmra.mxu0 %vm1188_vm7, %v15766_v43  ;;  %12107 = vmatprep.subr.mxu0 %v13452_v24 }
0xa838   :  { %12108 = vmatpush3.msk.msra.mxu0 %vm505_vm3, %v13341_v22  ;;  %12123 = vmatprep.mubr.msk.f32.mxu0 %vm13453_vm5, %v13452_v24 }
0xa839   :  { %12109 = vmatprep.subr.mxu0 %v13452_v24 }
0xa83a   :  { %12110 = vmatpush3.msra.mxu0 %v13342_v47 }
0xa83b   :  { %12111 = vmatprep.subr.mxu0 %v13452_v24 }
0xa83c   :  { %12112 = vmatpush3.msra.mxu0 %v13343_v31 }
0xa83d   :  { %12113 = vmatprep.subr.mxu0 %v13452_v24 }
0xa83e   :  { %12114 = vmatpush3.msra.mxu0 %v13344_v59 }
0xa83f   :  { %12115 = vmatprep.subr.mxu0 %v13452_v24 }
0xa840   :  { %12116 = vmatpush3.msra.mxu0 %v13345_v17 }
0xa841   :  { %12117 = vmatprep.subr.mxu0 %v13452_v24 }
0xa842   :  { %12118 = vmatpush3.msra.mxu0 %v13346_v52 }
0xa843   :  { %12119 = vmatprep.subr.mxu0 %v13452_v24 }
0xa844   :  { %12120 = vmatpush3.msra.mxu0 %v13347_v62 }
0xa845   :  { %12121 = vmatprep.subr.mxu0 %v13452_v24 }
0xa846   :  { %12122 = vmatpush3.msra.mxu0 %v13348_v58 }
0xa847   :  { %12159 = vmatprep.subr.mxu0 %v13452_v24 }
0xa8f7   :  { %v8383_v61 = vpop.f32.mrf.mxu0 }
0xa8f8   :  { %v8387_v27 = vsel %vm1262_vm8, %v8383_v61, -inf }
0xa8f9   :  { %8388 = vmax.xlane.f32.xlu1 %v8387_v27  ;;  %v12106_v26 = vpop.f32.mrf.mxu0 }
0xa90a   :  { %7987 = vrot.lane.b32.xlu1 %v7985_v5, %s13451_s27 }
0xa982   :  { %v8389_v2 = vpop.xlane.xlu1 %8388 }
0xa983   :  { %v8390_v50 = vsub.f32 %v8383_v61, %v8389_v2 }
0xa985   :  { %v8391_v6 = vmul.f32 1.442695, %v8390_v50 }
0xa986   :  { %v7988_v10 = vpop.permute.xlu1 %7987 }
0xa987   :  { %12976 = vpow2.f32 %v8391_v6  ;;  %v7990_v9 = vsel %vm3255_vm10, %v7988_v10, 0.0 }
0xa994   :  { %v12977_v60 = vpop.eup %12976 }
0xa995   :  { %v8393_v45 = vsel %vm1262_vm8, %v12977_v60, 0.0 }
0xa996   :  { %8394 = vadd.xlane.f32.xlu0 %v8393_v45 }
0xa99a   :  { %7991 = vadd.xlane.f32.xlu0 %v7990_v9 }
0xaa1f   :  { %v8395_v33 = vpop.xlane.xlu0 %8394 }
0xaa20   :  { %12978 = vrcp.f32 %v8395_v33 }
0xaa23   :  { %v7992_v54 = vpop.xlane.xlu0 %7991 }
0xaa24   :  { %v15812_v15 = vadd.f32 %v13349_v28, %v7992_v54 }
0xaa26   :  { %8547 = vrot.lane.b32.xlu0 %v15812_v15, %s13454_s29 }
0xaa2d   :  { %v12979_v30 = vpop.eup %12978 }
0xaa2e   :  { %v8397_v37 = vmul.f32 %v12979_v30, %v12977_v60 }
0xaa30   :  { %12124 = vmatmul.mubr.msk.f32.vlgmr.msra.gmra.mxu0 %vm1275_vm9, %v8397_v37  ;;  %v8398_v44 = vadd.f32 %v8397_v37, %v15231_v49 }
0xaa31   :  { %12160 = vmatpush3.msra.mxu0 %v15485_v1  ;;  %12163 = vmatprep.mubr.msk.f32.mxu0 %vm13453_vm5, %v13452_v24 }
0xaa32   :  { %12161 = vmatprep.subr.mxu0 %v13452_v24  ;;  %10375 = vst.msk [vmem:[#allocation9] sm:$0x3] %vm1262_vm8, %v8398_v44 }
0xaa33   :  { %12162 = vmatpush3.msra.mxu0 %v15494_v40 }
0xaa34   :  { %12164 = vmatmul.mubr.msk.f32.vlgmr.msra.gmra.mxu0 %vm85_vm1, %v15547_v63  ;;  %12166 = vmatprep.subr.mxu0 %v13452_v24 }
0xaa35   :  { %12167 = vmatpush3.msra.mxu0 %v15485_v1  ;;  %12170 = vmatprep.mubr.msk.f32.mxu0 %vm13453_vm5, %v13452_v24 }
0xaa36   :  { %12168 = vmatprep.subr.mxu0 %v13452_v24 }
0xaa37   :  { %12169 = vmatpush3.msra.mxu0 %v15494_v40 }
0xaa38   :  { %12173 = vmatprep.subr.mxu0 %v13452_v24 }
0xaa98   :  { %v8548_v42 = vpop.permute.xlu0 %8547 }
0xaaf0   :  { %v8468_v49 = vpop.f32.mrf.mxu0 }
0xaaf1   :  { %v8472_v7 = vmul.f32 %v15766_v43, %v8468_v49 }
0xaaf2   :  { %v12125_v8 = vpop.f32.mrf.mxu0 }
0xaaf3   :  { %12157 = vmatmul.mubr.msk.f32.vlgmr.msra.gmra.mxu1 %vm1188_vm7, %v8472_v7 }
0xaaf4   :  { %v8624_v63 = vpop.f32.mrf.mxu0  ;;  %12195 = vmatpush3.msra.mxu1 %v15485_v1  ;;  %12198 = vmatprep.mubr.msk.f32.mxu1 %vm13453_vm5, %v13452_v24 }
0xaaf5   :  { %12196 = vmatprep.subr.mxu1 %v13452_v24 }
0xaaf6   :  { %v12165_v36 = vpop.f32.mrf.mxu0  ;;  %12197 = vmatpush3.msra.mxu1 %v15494_v40 }
0xaaf7   :  { %12208 = vmatprep.subr.mxu1 %v13452_v24 }
0xabb3   :  { %v8542_v53 = vpop.f32.mrf.mxu1 }
0xabb4   :  { %v15842_v41 = vsel %vm85_vm1, %v8542_v53, %v8548_v42 }
0xabb5   :  { %8553 = vperm.xlu1 %12419, %v15842_v41   ;;  %v12158_v34 = vpop.f32.mrf.mxu1 }
0xabb9   :  { %12420 = vset.pattern.permute.xlu1 %v13457_v46 }
0xac30   :  { %v8554_v0 = vpop.permute.xlu1 %8553 }
0xac31   :  { %v8556_v51 = vmul.f32 %v15517_v19, %v8554_v0 }
0xac33   :  { %v8557_v20 = vadd.f32 %v15523_v57, %v8556_v51 }
0xac35   :  { %v8628_v4 = vadd.f32 %v8624_v63, %v8557_v20 }
0xac37   :  { %12980 = vtanh.f32 %v8628_v4  ;;  %v10659_v22 = vmul.f32 -1.442695, %v8628_v4 }
0xac39   :  { %12982 = vpow2.f32 %v10659_v22 }
0xac44   :  { %v12981_v43 = vpop.eup %12980 }
0xac45   :  { %8638 = vrot.lane.b32.xlu1 %v12981_v43, %s13456_s0 }
0xac46   :  { %v12983_v47 = vpop.eup %12982 }
0xac47   :  { %v8632_v31 = vadd.f32 1.0, %v12983_v47 }
0xac49   :  { %12984 = vrcp.f32 %v8632_v31 }
0xac56   :  { %v12985_v59 = vpop.eup %12984 }
0xac57   :  { %v8636_v46 = vmul.f32 %v12985_v59, %v15539_v18 }
0xacb7   :  { %v8639_v17 = vpop.permute.xlu1 %8638 }
0xacb8   :  { %v8641_v52 = vmul.f32 %v12985_v59, %v8639_v17 }
0xacba   :  { %8643 = vrot.lane.b32.xlu1 %v8641_v52, %s13454_s29 }
0xad2c   :  { %v8644_v62 = vpop.permute.xlu1 %8643 }
0xad2d   :  { %v8646_v58 = vadd.f32 %v8644_v62, %v8636_v46 }
0xad2f   :  { %12986 = vtanh.f32 %v8646_v58 }
0xad3c   :  { %v12987_v61 = vpop.eup %12986 }
0xad3d   :  { %8649 = vrot.lane.b32.xlu1 %v12987_v61, %s13454_s29 }
0xad41   :  { %8654 = vperm.xlu1 %12420, %v15842_v41  }
0xadaf   :  { %v8650_v27 = vpop.permute.xlu1 %8649 }
0xadb0   :  { %v8652_v26 = vmul.f32 %v12985_v59, %v8650_v27  ;;  %v15888_v27 = vld [vmem:[%s16109_s3 + $0x8] sm:$0xff] }
0xadb2   :  { %8660 = vrot.lane.b32.xlu0 %v8652_v26, %s13451_s27 }
0xadbc   :  { %v8655_v18 = vpop.permute.xlu1 %8654 }
0xadbd   :  { %v8657_v2 = vmul.f32 %v15517_v19, %v8655_v18 }
0xadbf   :  { %v8658_v50 = vadd.f32 %v15523_v57, %v8657_v2 }
0xae24   :  { %v8661_v5 = vpop.permute.xlu0 %8660 }
0xae25   :  { %12171 = vmatmul.mubr.msk.f32.vlgmr.msra.gmra.mxu0 %vm85_vm1, %v8661_v5 }
0xae26   :  { %12174 = vmatpush3.msra.mxu0 %v15485_v1  ;;  %12177 = vmatprep.mubr.msk.f32.mxu0 %vm13453_vm5, %v13452_v24 }
0xae27   :  { %12175 = vmatprep.subr.mxu0 %v13452_v24 }
0xae28   :  { %12176 = vmatpush3.msra.mxu0 %v15494_v40 }
0xae29   :  { %12180 = vmatprep.subr.mxu0 %v13452_v24 }
0xaee5   :  { %v8730_v6 = vpop.f32.mrf.mxu0 }
0xaee6   :  { %v8734_v60 = vadd.f32 %v8730_v6, %v8658_v50 }
0xaee7   :  { %v12172_v45 = vpop.f32.mrf.mxu0 }
0xaee8   :  { %12988 = vtanh.f32 %v8734_v60  ;;  %v10661_v9 = vmul.f32 -1.442695, %v8734_v60 }
0xaeea   :  { %12990 = vpow2.f32 %v10661_v9 }
0xaef5   :  { %v12989_v10 = vpop.eup %12988 }
0xaef6   :  { %8744 = vrot.lane.b32.xlu0 %v12989_v10, %s13456_s0 }
0xaef7   :  { %v12991_v33 = vpop.eup %12990 }
0xaef8   :  { %v8738_v54 = vadd.f32 1.0, %v12991_v33 }
0xaefa   :  { %12992 = vrcp.f32 %v8738_v54 }
0xaf07   :  { %v12993_v28 = vpop.eup %12992 }
0xaf08   :  { %v8742_v44 = vmul.f32 %v12993_v28, %v8646_v58 }
0xaf68   :  { %v8745_v30 = vpop.permute.xlu0 %8744 }
0xaf69   :  { %v8747_v37 = vmul.f32 %v12993_v28, %v8745_v30 }
0xaf6b   :  { %8749 = vrot.lane.b32.xlu1 %v8747_v37, %s13454_s29 }
0xafdd   :  { %v8750_v49 = vpop.permute.xlu1 %8749 }
0xafde   :  { %v8752_v7 = vadd.f32 %v8750_v49, %v8742_v44 }
0xafe0   :  { %12994 = vtanh.f32 %v8752_v7 }
0xafed   :  { %v12995_v8 = vpop.eup %12994 }
0xafee   :  { %8755 = vrot.lane.b32.xlu0 %v12995_v8, %s13454_s29 }
0xaff2   :  { %8760 = vperm.xlu0 %12421, %v15842_v41  }
0xaff6   :  { %12422 = vset.pattern.permute.xlu0 %v13459_v11 }
0xb060   :  { %v8756_v63 = vpop.permute.xlu0 %8755 }
0xb061   :  { %v8758_v36 = vmul.f32 %v12993_v28, %v8756_v63 }
0xb063   :  { %8766 = vrot.lane.b32.xlu1 %v8758_v36, %s13451_s27  ;;  %v15922_v36 = vld [vmem:[%s16110_s4] ss:$0 sm:$0xff]  ;;  %s13474_s4 = smov 1  }
0xb06d   :  { %v8761_v53 = vpop.permute.xlu0 %8760 }
0xb06e   :  { %v8763_v11 = vmul.f32 %v15517_v19, %v8761_v53 }
0xb070   :  { %v8764_v34 = vadd.f32 %v15523_v57, %v8763_v11 }
0xb0d5   :  { %v8767_v42 = vpop.permute.xlu1 %8766 }
0xb0d6   :  { %12178 = vmatmul.mubr.msk.f32.vlgmr.msra.gmra.mxu0 %vm85_vm1, %v8767_v42 }
0xb0d7   :  { %12181 = vmatpush3.msra.mxu0 %v15485_v1  ;;  %12184 = vmatprep.mubr.msk.f32.mxu0 %vm13453_vm5, %v13452_v24 }
0xb0d8   :  { %12182 = vmatprep.subr.mxu0 %v13452_v24 }
0xb0d9   :  { %12183 = vmatpush3.msra.mxu0 %v15494_v40 }
0xb0da   :  { %12187 = vmatprep.subr.mxu0 %v13452_v24 }
0xb196   :  { %v8836_v0 = vpop.f32.mrf.mxu0 }
0xb197   :  { %v8840_v51 = vadd.f32 %v8836_v0, %v8764_v34 }
0xb198   :  { %v12179_v20 = vpop.f32.mrf.mxu0 }
0xb199   :  { %12996 = vtanh.f32 %v8840_v51  ;;  %v10663_v1 = vmul.f32 -1.442695, %v8840_v51 }
0xb19b   :  { %12998 = vpow2.f32 %v10663_v1 }
0xb1a6   :  { %v12997_v4 = vpop.eup %12996 }
0xb1a7   :  { %8850 = vrot.lane.b32.xlu1 %v12997_v4, %s13456_s0 }
0xb1a8   :  { %v12999_v43 = vpop.eup %12998 }
0xb1a9   :  { %v8844_v22 = vadd.f32 1.0, %v12999_v43 }
0xb1ab   :  { %13000 = vrcp.f32 %v8844_v22 }
0xb1b8   :  { %v13001_v40 = vpop.eup %13000 }
0xb1b9   :  { %v8848_v59 = vmul.f32 %v13001_v40, %v8752_v7 }
0xb219   :  { %v8851_v47 = vpop.permute.xlu1 %8850 }
0xb21a   :  { %v8853_v31 = vmul.f32 %v13001_v40, %v8851_v47 }
0xb21c   :  { %8855 = vrot.lane.b32.xlu1 %v8853_v31, %s13454_s29 }
0xb28e   :  { %v8856_v17 = vpop.permute.xlu1 %8855 }
0xb28f   :  { %v8858_v52 = vadd.f32 %v8856_v17, %v8848_v59 }
0xb291   :  { %13002 = vtanh.f32 %v8858_v52 }
0xb29e   :  { %v13003_v46 = vpop.eup %13002 }
0xb29f   :  { %8861 = vrot.lane.b32.xlu0 %v13003_v46, %s13454_s29 }
0xb2a3   :  { %8866 = vperm.xlu0 %12422, %v15842_v41  }
0xb2a7   :  { %12423 = vset.pattern.permute.xlu0 %v13460_v16  ;;  %v15897_v16 = vld [vmem:[%s16109_s3] sm:$0xff] }
0xb311   :  { %v8862_v62 = vpop.permute.xlu0 %8861 }
0xb312   :  { %v8864_v58 = vmul.f32 %v13001_v40, %v8862_v62 }
0xb314   :  { %8872 = vrot.lane.b32.xlu1 %v8864_v58, %s13451_s27 }
0xb31e   :  { %v8867_v26 = vpop.permute.xlu0 %8866 }
0xb31f   :  { %v8869_v5 = vmul.f32 %v15517_v19, %v8867_v26 }
0xb321   :  { %v8870_v18 = vadd.f32 %v15523_v57, %v8869_v5 }
0xb386   :  { %v8873_v61 = vpop.permute.xlu1 %8872 }
0xb387   :  { %12185 = vmatmul.mubr.msk.f32.vlgmr.msra.gmra.mxu0 %vm85_vm1, %v8873_v61 }
0xb388   :  { %12188 = vmatpush3.msra.mxu0 %v15888_v27  ;;  %12191 = vmatprep.mubr.msk.f32.mxu0 %vm13453_vm5, %v13452_v24 }
0xb389   :  { %12189 = vmatprep.subr.mxu0 %v13452_v24 }
0xb38a   :  { %12190 = vmatpush3.msra.mxu0 %v15897_v16 }
0xb38b   :  { %12201 = vmatprep.subr.mxu0 %v13452_v24 }
0xb447   :  { %v8942_v2 = vpop.f32.mrf.mxu0 }
0xb448   :  { %v8946_v50 = vadd.f32 %v8942_v2, %v8870_v18 }
0xb449   :  { %v12186_v6 = vpop.f32.mrf.mxu0 }
0xb44a   :  { %13004 = vtanh.f32 %v8946_v50  ;;  %v10665_v45 = vmul.f32 -1.442695, %v8946_v50 }
0xb44c   :  { %13006 = vpow2.f32 %v10665_v45 }
0xb457   :  { %v13005_v60 = vpop.eup %13004 }
0xb458   :  { %8956 = vrot.lane.b32.xlu1 %v13005_v60, %s13456_s0 }
0xb459   :  { %v13007_v10 = vpop.eup %13006 }
0xb45a   :  { %v8950_v9 = vadd.f32 1.0, %v13007_v10 }
0xb45c   :  { %13008 = vrcp.f32 %v8950_v9 }
0xb469   :  { %v13009_v33 = vpop.eup %13008 }
0xb46a   :  { %v8954_v19 = vmul.f32 %v13009_v33, %v8858_v52 }
0xb4ca   :  { %v8957_v54 = vpop.permute.xlu1 %8956 }
0xb4cb   :  { %v8959_v28 = vmul.f32 %v13009_v33, %v8957_v54 }
0xb4cd   :  { %8961 = vrot.lane.b32.xlu1 %v8959_v28, %s13454_s29 }
0xb53f   :  { %v8962_v30 = vpop.permute.xlu1 %8961 }
0xb540   :  { %v8964_v57 = vadd.f32 %v8962_v30, %v8954_v19 }
0xb542   :  { %13010 = vtanh.f32 %v8964_v57 }
0xb54f   :  { %v13011_v37 = vpop.eup %13010 }
0xb550   :  { %8967 = vrot.lane.b32.xlu0 %v13011_v37, %s13454_s29 }
0xb554   :  { %8972 = vperm.xlu0 %12423, %v15842_v41  }
0xb558   :  { %12424 = vset.pattern.permute.xlu0 %v13461_v39  ;;  %v15916_v39 = vld [vmem:[#allocation5] ss:$0 sm:$0xff] }
0xb5c2   :  { %v8968_v44 = vpop.permute.xlu0 %8967 }
0xb5c3   :  { %v8970_v49 = vmul.f32 %v13009_v33, %v8968_v44 }
0xb5c5   :  { %8978 = vrot.lane.b32.xlu1 %v8970_v49, %s13451_s27 }
0xb5cf   :  { %v8973_v8 = vpop.permute.xlu0 %8972 }
0xb5d0   :  { %v8975_v63 = vmul.f32 %v15916_v39, %v8973_v8 }
0xb5d2   :  { %v8976_v42 = vadd.f32 %v15922_v36, %v8975_v63 }
0xb637   :  { %v8979_v7 = vpop.permute.xlu1 %8978 }
0xb638   :  { %12192 = vmatmul.mubr.msk.f32.vlgmr.msra.gmra.mxu0 %vm85_vm1, %v8979_v7 }
0xb639   :  { %12202 = vmatpush3.msra.mxu0 %v15888_v27  ;;  %12205 = vmatprep.mubr.msk.f32.mxu0 %vm13453_vm5, %v13452_v24 }
0xb63a   :  { %12203 = vmatprep.subr.mxu0 %v13452_v24 }
0xb63b   :  { %12204 = vmatpush3.msra.mxu0 %v15897_v16 }
0xb63c   :  { %12215 = vmatprep.subr.mxu0 %v13452_v24 }
0xb6f8   :  { %v9048_v53 = vpop.f32.mrf.mxu0 }
0xb6f9   :  { %v9052_v11 = vadd.f32 %v9048_v53, %v8976_v42 }
0xb6fa   :  { %v12193_v34 = vpop.f32.mrf.mxu0 }
0xb6fb   :  { %13012 = vtanh.f32 %v9052_v11  ;;  %v10667_v51 = vmul.f32 -1.442695, %v9052_v11 }
0xb6fd   :  { %13014 = vpow2.f32 %v10667_v51 }
0xb708   :  { %v13013_v0 = vpop.eup %13012 }
0xb709   :  { %9062 = vrot.lane.b32.xlu1 %v13013_v0, %s13456_s0 }
0xb70a   :  { %v13015_v20 = vpop.eup %13014 }
0xb70b   :  { %v9056_v4 = vadd.f32 1.0, %v13015_v20 }
0xb70d   :  { %13016 = vrcp.f32 %v9056_v4 }
0xb71a   :  { %v13017_v1 = vpop.eup %13016 }
0xb71b   :  { %v9060_v40 = vmul.f32 %v13017_v1, %v8964_v57 }
0xb77b   :  { %v9063_v43 = vpop.permute.xlu1 %9062 }
0xb77c   :  { %v9065_v22 = vmul.f32 %v13017_v1, %v9063_v43 }
0xb77e   :  { %9067 = vrot.lane.b32.xlu1 %v9065_v22, %s13454_s29 }
0xb7f0   :  { %v9068_v47 = vpop.permute.xlu1 %9067 }
0xb7f1   :  { %v9070_v31 = vadd.f32 %v9068_v47, %v9060_v40 }
0xb7f3   :  { %13018 = vtanh.f32 %v9070_v31 }
0xb800   :  { %v13019_v59 = vpop.eup %13018 }
0xb801   :  { %9073 = vrot.lane.b32.xlu0 %v13019_v59, %s13454_s29 }
0xb805   :  { %9078 = vperm.xlu0 %12424, %v15842_v41  }
0xb809   :  { %12425 = vset.pattern.permute.xlu0 %v13462_v23 }
0xb873   :  { %v9074_v17 = vpop.permute.xlu0 %9073 }
0xb874   :  { %v9076_v52 = vmul.f32 %v13017_v1, %v9074_v17 }
0xb876   :  { %9084 = vrot.lane.b32.xlu1 %v9076_v52, %s13451_s27 }
0xb880   :  { %v9079_v62 = vpop.permute.xlu0 %9078 }
0xb881   :  { %v9081_v23 = vmul.f32 %v15916_v39, %v9079_v62 }
0xb883   :  { %v9082_v58 = vadd.f32 %v15922_v36, %v9081_v23 }
0xb8e8   :  { %v9085_v46 = vpop.permute.xlu1 %9084 }
0xb8e9   :  { %12199 = vmatmul.mubr.msk.f32.vlgmr.msra.gmra.mxu1 %vm85_vm1, %v9085_v46 }
0xb8ea   :  { %12209 = vmatpush3.msra.mxu1 %v15888_v27  ;;  %12212 = vmatprep.mubr.msk.f32.mxu1 %vm13453_vm5, %v13452_v24 }
0xb8eb   :  { %12210 = vmatprep.subr.mxu1 %v13452_v24 }
0xb8ec   :  { %12211 = vmatpush3.msra.mxu1 %v15897_v16 }
0xb8ed   :  { %12222 = vmatprep.subr.mxu1 %v13452_v24 }
0xb9a9   :  { %v9154_v61 = vpop.f32.mrf.mxu1 }
0xb9aa   :  { %v9158_v26 = vadd.f32 %v9154_v61, %v9082_v58 }
0xb9ab   :  { %v12200_v5 = vpop.f32.mrf.mxu1 }
0xb9ac   :  { %13020 = vtanh.f32 %v9158_v26  ;;  %v10669_v2 = vmul.f32 -1.442695, %v9158_v26 }
0xb9ae   :  { %13022 = vpow2.f32 %v10669_v2 }
0xb9b9   :  { %v13021_v18 = vpop.eup %13020 }
0xb9ba   :  { %9168 = vrot.lane.b32.xlu1 %v13021_v18, %s13456_s0 }
0xb9bb   :  { %v13023_v50 = vpop.eup %13022 }
0xb9bc   :  { %v9162_v6 = vadd.f32 1.0, %v13023_v50 }
0xb9be   :  { %13024 = vrcp.f32 %v9162_v6 }
0xb9cb   :  { %v13025_v60 = vpop.eup %13024 }
0xb9cc   :  { %v9166_v9 = vmul.f32 %v13025_v60, %v9070_v31 }
0xba2c   :  { %v9169_v45 = vpop.permute.xlu1 %9168 }
0xba2d   :  { %v9171_v10 = vmul.f32 %v13025_v60, %v9169_v45 }
0xba2f   :  { %9173 = vrot.lane.b32.xlu1 %v9171_v10, %s13454_s29 }
0xbaa1   :  { %v9174_v33 = vpop.permute.xlu1 %9173 }
0xbaa2   :  { %v9176_v54 = vadd.f32 %v9174_v33, %v9166_v9 }
0xbaa4   :  { %13026 = vtanh.f32 %v9176_v54 }
0xbab1   :  { %v13027_v28 = vpop.eup %13026 }
0xbab2   :  { %9179 = vrot.lane.b32.xlu0 %v13027_v28, %s13454_s29 }
0xbab6   :  { %9184 = vperm.xlu0 %12425, %v15842_v41  }
0xbaba   :  { %12426 = vset.pattern.permute.xlu0 %v13463_v32 }
0xbb24   :  { %v9180_v19 = vpop.permute.xlu0 %9179 }
0xbb25   :  { %v9182_v30 = vmul.f32 %v13025_v60, %v9180_v19 }
0xbb27   :  { %9190 = vrot.lane.b32.xlu1 %v9182_v30, %s13451_s27 }
0xbb31   :  { %v9185_v37 = vpop.permute.xlu0 %9184 }
0xbb32   :  { %v9187_v32 = vmul.f32 %v15916_v39, %v9185_v37 }
0xbb34   :  { %v9188_v44 = vadd.f32 %v15922_v36, %v9187_v32 }
0xbb99   :  { %v9191_v57 = vpop.permute.xlu1 %9190 }
0xbb9a   :  { %12206 = vmatmul.mubr.msk.f32.vlgmr.msra.gmra.mxu0 %vm85_vm1, %v9191_v57 }
0xbb9b   :  { %12216 = vmatpush3.msra.mxu0 %v15888_v27  ;;  %12219 = vmatprep.mubr.msk.f32.mxu0 %vm13453_vm5, %v13452_v24 }
0xbb9c   :  { %12217 = vmatprep.subr.mxu0 %v13452_v24 }
0xbb9d   :  { %12218 = vmatpush3.msra.mxu0 %v15897_v16 }
0xbb9e   :  { %12229 = vmatprep.subr.mxu0 %v13452_v24 }
0xbc5a   :  { %v9260_v49 = vpop.f32.mrf.mxu0 }
0xbc5b   :  { %v9264_v7 = vadd.f32 %v9260_v49, %v9188_v44 }
0xbc5c   :  { %v12207_v8 = vpop.f32.mrf.mxu0 }
0xbc5d   :  { %13028 = vtanh.f32 %v9264_v7  ;;  %v10671_v42 = vmul.f32 -1.442695, %v9264_v7 }
0xbc5f   :  { %13030 = vpow2.f32 %v10671_v42 }
0xbc6a   :  { %v13029_v63 = vpop.eup %13028 }
0xbc6b   :  { %9274 = vrot.lane.b32.xlu1 %v13029_v63, %s13456_s0 }
0xbc6c   :  { %v13031_v53 = vpop.eup %13030 }
0xbc6d   :  { %v9268_v11 = vadd.f32 1.0, %v13031_v53 }
0xbc6f   :  { %13032 = vrcp.f32 %v9268_v11 }
0xbc7c   :  { %v13033_v34 = vpop.eup %13032 }
0xbc7d   :  { %v9272_v20 = vmul.f32 %v13033_v34, %v9176_v54 }
0xbcdd   :  { %v9275_v0 = vpop.permute.xlu1 %9274 }
0xbcde   :  { %v9277_v51 = vmul.f32 %v13033_v34, %v9275_v0 }
0xbce0   :  { %9279 = vrot.lane.b32.xlu1 %v9277_v51, %s13454_s29 }
0xbd52   :  { %v9280_v4 = vpop.permute.xlu1 %9279 }
0xbd53   :  { %v9282_v1 = vadd.f32 %v9280_v4, %v9272_v20 }
0xbd55   :  { %13034 = vtanh.f32 %v9282_v1 }
0xbd62   :  { %v13035_v43 = vpop.eup %13034 }
0xbd63   :  { %9285 = vrot.lane.b32.xlu0 %v13035_v43, %s13454_s29 }
0xbd67   :  { %9290 = vperm.xlu0 %12426, %v15842_v41  }
0xbd6b   :  { %12427 = vset.pattern.permute.xlu0 %v13464_v12 }
0xbdd5   :  { %v9286_v22 = vpop.permute.xlu0 %9285 }
0xbdd6   :  { %v9288_v40 = vmul.f32 %v13033_v34, %v9286_v22 }
0xbdd8   :  { %9296 = vrot.lane.b32.xlu1 %v9288_v40, %s13451_s27 }
0xbde2   :  { %v9291_v31 = vpop.permute.xlu0 %9290 }
0xbde3   :  { %v9293_v12 = vmul.f32 %v15916_v39, %v9291_v31 }
0xbde5   :  { %v9294_v59 = vadd.f32 %v15922_v36, %v9293_v12 }
0xbe4a   :  { %v9297_v47 = vpop.permute.xlu1 %9296 }
0xbe4b   :  { %12213 = vmatmul.mubr.msk.f32.vlgmr.msra.gmra.mxu1 %vm85_vm1, %v9297_v47 }
0xbe4c   :  { %12223 = vmatpush3.msra.mxu1 %v15888_v27  ;;  %12226 = vmatprep.mubr.msk.f32.mxu1 %vm13453_vm5, %v13452_v24 }
0xbe4d   :  { %12224 = vmatprep.subr.mxu1 %v13452_v24 }
0xbe4e   :  { %12225 = vmatpush3.msra.mxu1 %v15897_v16 }
0xbe4f   :  { %12236 = vmatprep.subr.mxu1 %v13452_v24 }
0xbf0b   :  { %v9366_v17 = vpop.f32.mrf.mxu1 }
0xbf0c   :  { %v9370_v52 = vadd.f32 %v9366_v17, %v9294_v59 }
0xbf0d   :  { %v12214_v46 = vpop.f32.mrf.mxu1 }
0xbf0e   :  { %13036 = vtanh.f32 %v9370_v52  ;;  %v10673_v23 = vmul.f32 -1.442695, %v9370_v52 }
0xbf10   :  { %13038 = vpow2.f32 %v10673_v23 }
0xbf1b   :  { %v13037_v62 = vpop.eup %13036 }
0xbf1c   :  { %9380 = vrot.lane.b32.xlu1 %v13037_v62, %s13456_s0 }
0xbf1d   :  { %v13039_v58 = vpop.eup %13038 }
0xbf1e   :  { %v9374_v61 = vadd.f32 1.0, %v13039_v58 }
0xbf20   :  { %13040 = vrcp.f32 %v9374_v61 }
0xbf2d   :  { %v13041_v26 = vpop.eup %13040 }
0xbf2e   :  { %v9378_v2 = vmul.f32 %v13041_v26, %v9282_v1 }
0xbf8e   :  { %v9381_v5 = vpop.permute.xlu1 %9380 }
0xbf8f   :  { %v9383_v18 = vmul.f32 %v13041_v26, %v9381_v5 }
0xbf91   :  { %9385 = vrot.lane.b32.xlu1 %v9383_v18, %s13454_s29 }
0xc003   :  { %v9386_v50 = vpop.permute.xlu1 %9385 }
0xc004   :  { %v9388_v6 = vadd.f32 %v9386_v50, %v9378_v2 }
0xc006   :  { %13042 = vtanh.f32 %v9388_v6 }
0xc013   :  { %v13043_v60 = vpop.eup %13042 }
0xc014   :  { %9391 = vrot.lane.b32.xlu0 %v13043_v60, %s13454_s29 }
0xc018   :  { %9396 = vperm.xlu0 %12427, %v15842_v41  }
0xc01c   :  { %12428 = vset.pattern.permute.xlu0 %v13465_v56 }
0xc086   :  { %v9392_v45 = vpop.permute.xlu0 %9391 }
0xc087   :  { %v9394_v10 = vmul.f32 %v13041_v26, %v9392_v45 }
0xc089   :  { %9402 = vrot.lane.b32.xlu1 %v9394_v10, %s13451_s27 }
0xc093   :  { %v9397_v33 = vpop.permute.xlu0 %9396 }
0xc094   :  { %v9399_v56 = vmul.f32 %v15916_v39, %v9397_v33 }
0xc096   :  { %v9400_v54 = vadd.f32 %v15922_v36, %v9399_v56 }
0xc0fb   :  { %v9403_v9 = vpop.permute.xlu1 %9402 }
0xc0fc   :  { %12220 = vmatmul.mubr.msk.f32.vlgmr.msra.gmra.mxu0 %vm85_vm1, %v9403_v9 }
0xc0fd   :  { %12230 = vmatpush3.msra.mxu0 %v15888_v27  ;;  %12233 = vmatprep.mubr.msk.f32.mxu0 %vm13453_vm5, %v13452_v24 }
0xc0fe   :  { %12231 = vmatprep.subr.mxu0 %v13452_v24 }
0xc0ff   :  { %12232 = vmatpush3.msra.mxu0 %v15897_v16 }
0xc100   :  { %12243 = vmatprep.subr.mxu0 %v13452_v24 }
0xc1bc   :  { %v9472_v28 = vpop.f32.mrf.mxu0 }
0xc1bd   :  { %v9476_v19 = vadd.f32 %v9472_v28, %v9400_v54 }
0xc1be   :  { %v12221_v30 = vpop.f32.mrf.mxu0 }
0xc1bf   :  { %13044 = vtanh.f32 %v9476_v19  ;;  %v10675_v37 = vmul.f32 -1.442695, %v9476_v19 }
0xc1c1   :  { %13046 = vpow2.f32 %v10675_v37 }
0xc1cc   :  { %v13045_v57 = vpop.eup %13044 }
0xc1cd   :  { %9486 = vrot.lane.b32.xlu1 %v13045_v57, %s13456_s0 }
0xc1ce   :  { %v13047_v32 = vpop.eup %13046 }
0xc1cf   :  { %v9480_v44 = vadd.f32 1.0, %v13047_v32 }
0xc1d1   :  { %13048 = vrcp.f32 %v9480_v44 }
0xc1de   :  { %v13049_v49 = vpop.eup %13048 }
0xc1df   :  { %v9484_v63 = vmul.f32 %v13049_v49, %v9388_v6 }
0xc23f   :  { %v9487_v7 = vpop.permute.xlu1 %9486 }
0xc240   :  { %v9489_v8 = vmul.f32 %v13049_v49, %v9487_v7 }
0xc242   :  { %9491 = vrot.lane.b32.xlu1 %v9489_v8, %s13454_s29 }
0xc2b4   :  { %v9492_v42 = vpop.permute.xlu1 %9491 }
0xc2b5   :  { %v9494_v53 = vadd.f32 %v9492_v42, %v9484_v63 }
0xc2b7   :  { %13050 = vtanh.f32 %v9494_v53 }
0xc2c4   :  { %v13051_v11 = vpop.eup %13050 }
0xc2c5   :  { %9497 = vrot.lane.b32.xlu0 %v13051_v11, %s13454_s29 }
0xc2c9   :  { %9502 = vperm.xlu0 %12428, %v15842_v41  }
0xc2cd   :  { %12429 = vset.pattern.permute.xlu0 %v13466_v3 }
0xc337   :  { %v9498_v34 = vpop.permute.xlu0 %9497 }
0xc338   :  { %v9500_v0 = vmul.f32 %v13049_v49, %v9498_v34 }
0xc33a   :  { %9508 = vrot.lane.b32.xlu1 %v9500_v0, %s13451_s27 }
0xc344   :  { %v9503_v20 = vpop.permute.xlu0 %9502 }
0xc345   :  { %v9505_v3 = vmul.f32 %v15916_v39, %v9503_v20 }
0xc347   :  { %v9506_v4 = vadd.f32 %v15922_v36, %v9505_v3 }
0xc3ac   :  { %v9509_v51 = vpop.permute.xlu1 %9508 }
0xc3ad   :  { %12227 = vmatmul.mubr.msk.f32.vlgmr.msra.gmra.mxu1 %vm85_vm1, %v9509_v51 }
0xc3ae   :  { %12237 = vmatpush3.msra.mxu1 %v15888_v27  ;;  %12240 = vmatprep.mubr.msk.f32.mxu1 %vm13453_vm5, %v13452_v24 }
0xc3af   :  { %12238 = vmatprep.subr.mxu1 %v13452_v24 }
0xc3b0   :  { %12239 = vmatpush3.msra.mxu1 %v15897_v16 }
0xc3b1   :  { %12250 = vmatprep.subr.mxu1 %v13452_v24 }
0xc46d   :  { %v9578_v1 = vpop.f32.mrf.mxu1 }
0xc46e   :  { %v9582_v43 = vadd.f32 %v9578_v1, %v9506_v4 }
0xc46f   :  { %v12228_v22 = vpop.f32.mrf.mxu1 }
0xc470   :  { %13052 = vtanh.f32 %v9582_v43  ;;  %v10677_v47 = vmul.f32 -1.442695, %v9582_v43 }
0xc472   :  { %13054 = vpow2.f32 %v10677_v47 }
0xc47d   :  { %v13053_v40 = vpop.eup %13052 }
0xc47e   :  { %9592 = vrot.lane.b32.xlu1 %v13053_v40, %s13456_s0 }
0xc47f   :  { %v13055_v31 = vpop.eup %13054 }
0xc480   :  { %v9586_v12 = vadd.f32 1.0, %v13055_v31 }
0xc482   :  { %13056 = vrcp.f32 %v9586_v12 }
0xc48f   :  { %v13057_v59 = vpop.eup %13056 }
0xc490   :  { %v9590_v46 = vmul.f32 %v13057_v59, %v9494_v53 }
0xc4f0   :  { %v9593_v17 = vpop.permute.xlu1 %9592 }
0xc4f1   :  { %v9595_v52 = vmul.f32 %v13057_v59, %v9593_v17 }
0xc4f3   :  { %9597 = vrot.lane.b32.xlu1 %v9595_v52, %s13454_s29 }
0xc565   :  { %v9598_v62 = vpop.permute.xlu1 %9597 }
0xc566   :  { %v9600_v23 = vadd.f32 %v9598_v62, %v9590_v46 }
0xc568   :  { %13058 = vtanh.f32 %v9600_v23 }
0xc575   :  { %v13059_v58 = vpop.eup %13058 }
0xc576   :  { %9603 = vrot.lane.b32.xlu0 %v13059_v58, %s13454_s29 }
0xc57a   :  { %9608 = vperm.xlu0 %12429, %v15842_v41  }
0xc57e   :  { %12430 = vset.pattern.permute.xlu0 %v13467_v48 }
0xc5e8   :  { %v9604_v61 = vpop.permute.xlu0 %9603 }
0xc5e9   :  { %v9606_v26 = vmul.f32 %v13057_v59, %v9604_v61 }
0xc5eb   :  { %9614 = vrot.lane.b32.xlu1 %v9606_v26, %s13451_s27 }
0xc5f5   :  { %v9609_v18 = vpop.permute.xlu0 %9608 }
0xc5f6   :  { %v9611_v48 = vmul.f32 %v15916_v39, %v9609_v18 }
0xc5f8   :  { %v9612_v2 = vadd.f32 %v15922_v36, %v9611_v48 }
0xc65d   :  { %v9615_v5 = vpop.permute.xlu1 %9614 }
0xc65e   :  { %12234 = vmatmul.mubr.msk.f32.vlgmr.msra.gmra.mxu0 %vm85_vm1, %v9615_v5 }
0xc65f   :  { %12244 = vmatpush3.msra.mxu0 %v15888_v27  ;;  %12247 = vmatprep.mubr.msk.f32.mxu0 %vm13453_vm5, %v13452_v24 }
0xc660   :  { %12245 = vmatprep.subr.mxu0 %v13452_v24 }
0xc661   :  { %12246 = vmatpush3.msra.mxu0 %v15897_v16 }
0xc662   :  { %12257 = vmatprep.subr.mxu0 %v13452_v24 }
0xc71e   :  { %v9684_v50 = vpop.f32.mrf.mxu0 }
0xc71f   :  { %v9688_v6 = vadd.f32 %v9684_v50, %v9612_v2 }
0xc720   :  { %v12235_v60 = vpop.f32.mrf.mxu0 }
0xc721   :  { %13060 = vtanh.f32 %v9688_v6  ;;  %v10679_v10 = vmul.f32 -1.442695, %v9688_v6 }
0xc723   :  { %13062 = vpow2.f32 %v10679_v10 }
0xc72e   :  { %v13061_v45 = vpop.eup %13060 }
0xc72f   :  { %9698 = vrot.lane.b32.xlu1 %v13061_v45, %s13456_s0 }
0xc730   :  { %v13063_v9 = vpop.eup %13062 }
0xc731   :  { %v9692_v33 = vadd.f32 1.0, %v13063_v9 }
0xc733   :  { %13064 = vrcp.f32 %v9692_v33 }
0xc740   :  { %v13065_v56 = vpop.eup %13064 }
0xc741   :  { %v9696_v19 = vmul.f32 %v13065_v56, %v9600_v23 }
0xc7a1   :  { %v9699_v54 = vpop.permute.xlu1 %9698 }
0xc7a2   :  { %v9701_v28 = vmul.f32 %v13065_v56, %v9699_v54 }
0xc7a4   :  { %9703 = vrot.lane.b32.xlu1 %v9701_v28, %s13454_s29 }
0xc816   :  { %v9704_v30 = vpop.permute.xlu1 %9703 }
0xc817   :  { %v9706_v57 = vadd.f32 %v9704_v30, %v9696_v19 }
0xc819   :  { %13066 = vtanh.f32 %v9706_v57 }
0xc826   :  { %v13067_v37 = vpop.eup %13066 }
0xc827   :  { %9709 = vrot.lane.b32.xlu0 %v13067_v37, %s13454_s29 }
0xc82b   :  { %9714 = vperm.xlu0 %12430, %v15842_v41  }
0xc82f   :  { %12431 = vset.pattern.permute.xlu0 %v13468_v38 }
0xc899   :  { %v9710_v32 = vpop.permute.xlu0 %9709 }
0xc89a   :  { %v9712_v44 = vmul.f32 %v13065_v56, %v9710_v32 }
0xc89c   :  { %9720 = vrot.lane.b32.xlu1 %v9712_v44, %s13451_s27 }
0xc8a6   :  { %v9715_v7 = vpop.permute.xlu0 %9714 }
0xc8a7   :  { %v9717_v38 = vmul.f32 %v15916_v39, %v9715_v7 }
0xc8a9   :  { %v9718_v8 = vadd.f32 %v15922_v36, %v9717_v38 }
0xc90e   :  { %v9721_v49 = vpop.permute.xlu1 %9720 }
0xc90f   :  { %12241 = vmatmul.mubr.msk.f32.vlgmr.msra.gmra.mxu1 %vm85_vm1, %v9721_v49 }
0xc910   :  { %12251 = vmatpush3.msra.mxu1 %v15888_v27  ;;  %12254 = vmatprep.mubr.msk.f32.mxu1 %vm13453_vm5, %v13452_v24 }
0xc911   :  { %12252 = vmatprep.subr.mxu1 %v13452_v24 }
0xc912   :  { %12253 = vmatpush3.msra.mxu1 %v15897_v16 }
0xc913   :  { %12264 = vmatprep.subr.mxu1 %v13452_v24 }
0xc9cf   :  { %v9790_v63 = vpop.f32.mrf.mxu1 }
0xc9d0   :  { %v9794_v42 = vadd.f32 %v9790_v63, %v9718_v8 }
0xc9d1   :  { %v12242_v53 = vpop.f32.mrf.mxu1 }
0xc9d2   :  { %13068 = vtanh.f32 %v9794_v42  ;;  %v10681_v34 = vmul.f32 -1.442695, %v9794_v42 }
0xc9d4   :  { %13070 = vpow2.f32 %v10681_v34 }
0xc9df   :  { %v13069_v11 = vpop.eup %13068 }
0xc9e0   :  { %9804 = vrot.lane.b32.xlu1 %v13069_v11, %s13456_s0 }
0xc9e1   :  { %v13071_v0 = vpop.eup %13070 }
0xc9e2   :  { %v9798_v51 = vadd.f32 1.0, %v13071_v0 }
0xc9e4   :  { %13072 = vrcp.f32 %v9798_v51 }
0xc9f1   :  { %v13073_v20 = vpop.eup %13072 }
0xc9f2   :  { %v9802_v1 = vmul.f32 %v13073_v20, %v9706_v57 }
0xca52   :  { %v9805_v3 = vpop.permute.xlu1 %9804 }
0xca53   :  { %v9807_v4 = vmul.f32 %v13073_v20, %v9805_v3 }
0xca55   :  { %9809 = vrot.lane.b32.xlu1 %v9807_v4, %s13454_s29 }
0xcac7   :  { %v9810_v43 = vpop.permute.xlu1 %9809 }
0xcac8   :  { %v9812_v22 = vadd.f32 %v9810_v43, %v9802_v1 }
0xcaca   :  { %13074 = vtanh.f32 %v9812_v22 }
0xcad7   :  { %v13075_v40 = vpop.eup %13074 }
0xcad8   :  { %9815 = vrot.lane.b32.xlu0 %v13075_v40, %s13454_s29 }
0xcadc   :  { %9820 = vperm.xlu0 %12431, %v15842_v41  }
0xcae0   :  { %12432 = vset.pattern.permute.xlu0 %v13469_v25 }
0xcb4a   :  { %v9816_v47 = vpop.permute.xlu0 %9815 }
0xcb4b   :  { %v9818_v31 = vmul.f32 %v13073_v20, %v9816_v47 }
0xcb4d   :  { %9826 = vrot.lane.b32.xlu1 %v9818_v31, %s13451_s27 }
0xcb57   :  { %v9821_v59 = vpop.permute.xlu0 %9820 }
0xcb58   :  { %v9823_v25 = vmul.f32 %v15916_v39, %v9821_v59 }
0xcb5a   :  { %v9824_v17 = vadd.f32 %v15922_v36, %v9823_v25 }
0xcbbf   :  { %v9827_v12 = vpop.permute.xlu1 %9826 }
0xcbc0   :  { %12248 = vmatmul.mubr.msk.f32.vlgmr.msra.gmra.mxu0 %vm85_vm1, %v9827_v12 }
0xcbc1   :  { %12258 = vmatpush3.msra.mxu0 %v15888_v27  ;;  %12261 = vmatprep.mubr.msk.f32.mxu0 %vm13453_vm5, %v13452_v24 }
0xcbc2   :  { %12259 = vmatprep.subr.mxu0 %v13452_v24 }
0xcbc3   :  { %12260 = vmatpush3.msra.mxu0 %v15897_v16 }
0xcbc4   :  { %12271 = vmatprep.subr.mxu0 %v13452_v24 }
0xcc80   :  { %v9896_v52 = vpop.f32.mrf.mxu0 }
0xcc81   :  { %v9900_v46 = vadd.f32 %v9896_v52, %v9824_v17 }
0xcc82   :  { %v12249_v62 = vpop.f32.mrf.mxu0 }
0xcc83   :  { %13076 = vtanh.f32 %v9900_v46  ;;  %v10683_v58 = vmul.f32 -1.442695, %v9900_v46 }
0xcc85   :  { %13078 = vpow2.f32 %v10683_v58 }
0xcc90   :  { %v13077_v23 = vpop.eup %13076 }
0xcc91   :  { %9910 = vrot.lane.b32.xlu1 %v13077_v23, %s13456_s0 }
0xcc92   :  { %v13079_v61 = vpop.eup %13078 }
0xcc93   :  { %v9904_v26 = vadd.f32 1.0, %v13079_v61 }
0xcc95   :  { %13080 = vrcp.f32 %v9904_v26 }
0xcca2   :  { %v13081_v5 = vpop.eup %13080 }
0xcca3   :  { %v9908_v2 = vmul.f32 %v13081_v5, %v9812_v22 }
0xcd03   :  { %v9911_v18 = vpop.permute.xlu1 %9910 }
0xcd04   :  { %v9913_v48 = vmul.f32 %v13081_v5, %v9911_v18 }
0xcd06   :  { %9915 = vrot.lane.b32.xlu1 %v9913_v48, %s13454_s29 }
0xcd78   :  { %v9916_v50 = vpop.permute.xlu1 %9915 }
0xcd79   :  { %v9918_v6 = vadd.f32 %v9916_v50, %v9908_v2 }
0xcd7b   :  { %13082 = vtanh.f32 %v9918_v6 }
0xcd88   :  { %v13083_v60 = vpop.eup %13082 }
0xcd89   :  { %9921 = vrot.lane.b32.xlu0 %v13083_v60, %s13454_s29 }
0xcd8d   :  { %9926 = vperm.xlu0 %12432, %v15842_v41  }
0xcd91   :  { %12433 = vset.pattern.permute.xlu0 %v13470_v14 }
0xcdfb   :  { %v9922_v45 = vpop.permute.xlu0 %9921 }
0xcdfc   :  { %v9924_v10 = vmul.f32 %v13081_v5, %v9922_v45 }
0xcdfe   :  { %9932 = vrot.lane.b32.xlu1 %v9924_v10, %s13451_s27 }
0xce08   :  { %v9927_v33 = vpop.permute.xlu0 %9926 }
0xce09   :  { %v9929_v56 = vmul.f32 %v15916_v39, %v9927_v33 }
0xce0b   :  { %v9930_v14 = vadd.f32 %v15922_v36, %v9929_v56 }
0xce70   :  { %v9933_v9 = vpop.permute.xlu1 %9932 }
0xce71   :  { %12255 = vmatmul.mubr.msk.f32.vlgmr.msra.gmra.mxu1 %vm85_vm1, %v9933_v9 }
0xce72   :  { %12265 = vmatpush3.msra.mxu1 %v15888_v27  ;;  %12268 = vmatprep.mubr.msk.f32.mxu1 %vm13453_vm5, %v13452_v24 }
0xce73   :  { %12266 = vmatprep.subr.mxu1 %v13452_v24 }
0xce74   :  { %12267 = vmatpush3.msra.mxu1 %v15897_v16 }
0xcf31   :  { %v10002_v54 = vpop.f32.mrf.mxu1 }
0xcf32   :  { %v10006_v28 = vadd.f32 %v10002_v54, %v9930_v14 }
0xcf33   :  { %v12256_v19 = vpop.f32.mrf.mxu1 }
0xcf34   :  { %13084 = vtanh.f32 %v10006_v28  ;;  %v10685_v57 = vmul.f32 -1.442695, %v10006_v28 }
0xcf36   :  { %13086 = vpow2.f32 %v10685_v57 }
0xcf41   :  { %v13085_v30 = vpop.eup %13084 }
0xcf42   :  { %10016 = vrot.lane.b32.xlu1 %v13085_v30, %s13456_s0 }
0xcf43   :  { %v13087_v37 = vpop.eup %13086 }
0xcf44   :  { %v10010_v32 = vadd.f32 1.0, %v13087_v37 }
0xcf46   :  { %13088 = vrcp.f32 %v10010_v32 }
0xcf53   :  { %v13089_v44 = vpop.eup %13088 }
0xcf54   :  { %v10014_v38 = vmul.f32 %v13089_v44, %v9918_v6 }
0xcfb4   :  { %v10017_v49 = vpop.permute.xlu1 %10016 }
0xcfb5   :  { %v10019_v7 = vmul.f32 %v13089_v44, %v10017_v49 }
0xcfb7   :  { %10021 = vrot.lane.b32.xlu1 %v10019_v7, %s13454_s29 }
0xd029   :  { %v10022_v8 = vpop.permute.xlu1 %10021 }
0xd02a   :  { %v10024_v63 = vadd.f32 %v10022_v8, %v10014_v38 }
0xd02c   :  { %13090 = vtanh.f32 %v10024_v63 }
0xd039   :  { %v13091_v42 = vpop.eup %13090 }
0xd03a   :  { %10027 = vrot.lane.b32.xlu0 %v13091_v42, %s13454_s29 }
0xd03e   :  { %10032 = vperm.xlu0 %12433, %v15842_v41  }
0xd042   :  { %12434 = vset.pattern.permute.xlu0 %v13471_v21 }
0xd0ac   :  { %v10028_v53 = vpop.permute.xlu0 %10027 }
0xd0ad   :  { %v10030_v11 = vmul.f32 %v13089_v44, %v10028_v53 }
0xd0af   :  { %10038 = vrot.lane.b32.xlu1 %v10030_v11, %s13451_s27 }
0xd0b9   :  { %v10033_v0 = vpop.permute.xlu0 %10032 }
0xd0ba   :  { %v10035_v51 = vmul.f32 %v15916_v39, %v10033_v0 }
0xd0bc   :  { %v10036_v21 = vadd.f32 %v15922_v36, %v10035_v51 }
0xd121   :  { %v10039_v34 = vpop.permute.xlu1 %10038 }
0xd122   :  { %12262 = vmatmul.mubr.msk.f32.vlgmr.msra.gmra.mxu0 %vm85_vm1, %v10039_v34 }
0xd123   :  { %12272 = vmatpush3.msra.mxu0 %v15888_v27  ;;  %12275 = vmatprep.mubr.msk.f32.mxu0 %vm13453_vm5, %v13452_v24 }
0xd124   :  { %12273 = vmatprep.subr.mxu0 %v13452_v24 }
0xd125   :  { %12274 = vmatpush3.msra.mxu0 %v15897_v16 }
0xd1e2   :  { %v10108_v20 = vpop.f32.mrf.mxu0 }
0xd1e3   :  { %v10112_v3 = vadd.f32 %v10108_v20, %v10036_v21 }
0xd1e4   :  { %v12263_v4 = vpop.f32.mrf.mxu0 }
0xd1e5   :  { %13092 = vtanh.f32 %v10112_v3  ;;  %v10687_v27 = vmul.f32 -1.442695, %v10112_v3 }
0xd1e7   :  { %13094 = vpow2.f32 %v10687_v27 }
0xd1f2   :  { %v13093_v1 = vpop.eup %13092 }
0xd1f3   :  { %10122 = vrot.lane.b32.xlu1 %v13093_v1, %s13456_s0 }
0xd1f4   :  { %v13095_v43 = vpop.eup %13094 }
0xd1f5   :  { %v10116_v22 = vadd.f32 1.0, %v13095_v43 }
0xd1f7   :  { %13096 = vrcp.f32 %v10116_v22 }
0xd204   :  { %v13097_v24 = vpop.eup %13096 }
0xd205   :  { %v10120_v47 = vmul.f32 %v13097_v24, %v10024_v63 }
0xd265   :  { %v10123_v40 = vpop.permute.xlu1 %10122 }
0xd266   :  { %v10125_v16 = vmul.f32 %v13097_v24, %v10123_v40 }
0xd268   :  { %10127 = vrot.lane.b32.xlu1 %v10125_v16, %s13454_s29 }
0xd2da   :  { %v10128_v31 = vpop.permute.xlu1 %10127 }
0xd2db   :  { %v10130_v12 = vadd.f32 %v10128_v31, %v10120_v47 }
0xd2dd   :  { %13098 = vtanh.f32 %v10130_v12 }
0xd2ea   :  { %v13099_v59 = vpop.eup %13098 }
0xd2eb   :  { %10133 = vrot.lane.b32.xlu0 %v13099_v59, %s13454_s29 }
0xd2ef   :  { %10138 = vperm.xlu0 %12434, %v15842_v41  }
0xd2f3   :  { %12435 = vset.pattern.permute.xlu0 %v13472_v35 }
0xd35d   :  { %v10134_v25 = vpop.permute.xlu0 %10133 }
0xd35e   :  { %v10136_v17 = vmul.f32 %v13097_v24, %v10134_v25 }
0xd360   :  { %10144 = vrot.lane.b32.xlu1 %v10136_v17, %s13451_s27 }
0xd36a   :  { %v10139_v46 = vpop.permute.xlu0 %10138 }
0xd36b   :  { %v10141_v62 = vmul.f32 %v15916_v39, %v10139_v46 }
0xd36d   :  { %v10142_v23 = vadd.f32 %v15922_v36, %v10141_v62 }
0xd3d2   :  { %v10145_v52 = vpop.permute.xlu1 %10144 }
0xd3d3   :  { %12269 = vmatmul.mubr.msk.f32.vlgmr.msra.gmra.mxu1 %vm85_vm1, %v10145_v52 }
0xd493   :  { %v10214_v58 = vpop.f32.mrf.mxu1 }
0xd494   :  { %v10218_v61 = vadd.f32 %v10214_v58, %v10142_v23 }
0xd495   :  { %v12270_v26 = vpop.f32.mrf.mxu1 }
0xd496   :  { %13100 = vtanh.f32 %v10218_v61  ;;  %v10689_v35 = vmul.f32 -1.442695, %v10218_v61 }
0xd498   :  { %13102 = vpow2.f32 %v10689_v35 }
0xd4a3   :  { %v13101_v5 = vpop.eup %13100 }
0xd4a4   :  { %10228 = vrot.lane.b32.xlu1 %v13101_v5, %s13456_s0 }
0xd4a5   :  { %v13103_v18 = vpop.eup %13102 }
0xd4a6   :  { %v10222_v48 = vadd.f32 1.0, %v13103_v18 }
0xd4a8   :  { %13104 = vrcp.f32 %v10222_v48 }
0xd4b5   :  { %v13105_v2 = vpop.eup %13104 }
0xd4b6   :  { %v10226_v60 = vmul.f32 %v13105_v2, %v10130_v12 }
0xd516   :  { %v10229_v50 = vpop.permute.xlu1 %10228 }
0xd517   :  { %v10231_v6 = vmul.f32 %v13105_v2, %v10229_v50 }
0xd519   :  { %10233 = vrot.lane.b32.xlu1 %v10231_v6, %s13454_s29 }
0xd58b   :  { %v10234_v45 = vpop.permute.xlu1 %10233 }
0xd58c   :  { %v10236_v10 = vadd.f32 %v10234_v45, %v10226_v60 }
0xd58e   :  { %13106 = vtanh.f32 %v10236_v10 }
0xd59b   :  { %v13107_v9 = vpop.eup %13106 }
0xd59c   :  { %10239 = vrot.lane.b32.xlu0 %v13107_v9, %s13454_s29 }
0xd5a0   :  { %10244 = vperm.xlu0 %12435, %v15842_v41  }
0xd60e   :  { %v10240_v33 = vpop.permute.xlu0 %10239 }
0xd60f   :  { %v10242_v56 = vmul.f32 %v13105_v2, %v10240_v33 }
0xd611   :  { %10250 = vrot.lane.b32.xlu1 %v10242_v56, %s13451_s27 }
0xd61b   :  { %v10245_v54 = vpop.permute.xlu0 %10244 }
0xd61c   :  { %v10247_v28 = vmul.f32 %v15916_v39, %v10245_v54 }
0xd61e   :  { %v10248_v19 = vadd.f32 %v15922_v36, %v10247_v28 }
0xd683   :  { %v10251_v14 = vpop.permute.xlu1 %10250 }
0xd684   :  { %12276 = vmatmul.mubr.msk.f32.vlgmr.msra.gmra.mxu0 %vm85_vm1, %v10251_v14 }
0xd744   :  { %v10320_v30 = vpop.f32.mrf.mxu0 }
0xd745   :  { %v10324_v57 = vadd.f32 %v10320_v30, %v10248_v19 }
0xd746   :  { %v12277_v37 = vpop.f32.mrf.mxu0 }
0xd747   :  { %13108 = vtanh.f32 %v10324_v57  ;;  %v10691_v41 = vmul.f32 -1.442695, %v10324_v57 }
0xd749   :  { %13110 = vpow2.f32 %v10691_v41 }
0xd754   :  { %v13109_v32 = vpop.eup %13108 }
0xd755   :  { %10334 = vrot.lane.b32.xlu1 %v13109_v32, %s13456_s0  ;;  %s13475_s0 = smov 2  }
0xd756   :  { %v13111_v44 = vpop.eup %13110 }
0xd757   :  { %v10328_v49 = vadd.f32 1.0, %v13111_v44 }
0xd759   :  { %13112 = vrcp.f32 %v10328_v49 }
0xd766   :  { %v13113_v7 = vpop.eup %13112 }
0xd767   :  { %v10332_v39 = vmul.f32 %v13113_v7, %v10236_v10 }
0xd7c7   :  { %v10335_v38 = vpop.permute.xlu1 %10334 }
0xd7c8   :  { %v10337_v8 = vmul.f32 %v13113_v7, %v10335_v38 }
0xd7ca   :  { %10339 = vrot.lane.b32.xlu1 %v10337_v8, %s13454_s29 }
0xd83c   :  { %v10340_v63 = vpop.permute.xlu1 %10339 }
0xd83d   :  { %v10342_v36 = vadd.f32 %v10340_v63, %v10332_v39 }
0xd83f   :  { %13114 = vtanh.f32 %v10342_v36 }
0xd84c   :  { %v13115_v42 = vpop.eup %13114 }
0xd84d   :  { %10345 = vrot.lane.b32.xlu0 %v13115_v42, %s13454_s29  ;;  %s13375_s29 = scalar_lea.vmem %s10393_s20, 32 }
0xd84e   :  { %p13376_p6 = scmp.ne.s32.totalorder %s10393_s20, %s13375_s29  ;;  %p13381_p8 = scmp.lt.s32.totalorder %s13375_s29, %s13375_s29 }
0xd850   :  { %p13382_p9 = por %p13381_p8, %p13380_p7 }
0xd852   :  { %p13383_p10 = pnand %p13382_p9, %p13376_p6 }
0xd8bf   :  { %v10346_v53 = vpop.permute.xlu0 %10345 }
0xd8c0   :  { %v10348_v11 = vmul.f32 %v13113_v7, %v10346_v53 }
0xd8c2   :  { %v10349_v34 = vmul.f32 %v10348_v11, %v14648_v29 }
0xd8c4   :  { %10351 = vrot.lane.b32.xlu1 %v10349_v34, %s13451_s27 }
0xd8c8   :  { %10358 = vrot.lane.b32.xlu1 %v15224_v55, %s13474_s4 }
0xd8cc   :  { %10361 = vrot.lane.b32.xlu1 %v15812_v15, %s13475_s0 }
0xd936   :  { %v10352_v0 = vpop.permute.xlu1 %10351 }
0xd937   :  { %v10354_v51 = vsel %vm3255_vm10, %v10352_v0, 0.0 }
0xd938   :  { %10355 = vadd.xlane.f32.xlu0 %v10354_v51 }
0xd939   :  { %13386 = shalt.err (!%p13383_p10)
}
0xd93a   :  { %10395 = dma.vmem_to_hbm [thread:$0]  %s10393_s20, 32, %s16122_s16, [#allocation10]   ;;  %v13354_v55 = vld [vmem:[#allocation4] ss:$0 sm:$0xff]  ;;  %v10359_v21 = vpop.permute.xlu1 %10358  ;;  %vm10368_vm11 = vcmask 7168   ;;  %vm10371_vm12 = vcmask 23552  }
0xd93b   :  { %s13477_s8 = smov 3   ;;  %s13478_s22 = smov [#allocation8]   ;;  %v10369_v3 = vsel %vm10368_vm11, %v14672_v13, %v10359_v21  ;;  %vm10373_vm13 = vcmask 25600  }
0xd93c   :  { %s10382_s13 = sshll.u32 %s13478_s22, 4  ;;  %s10383_s13 = int_to_ptr.vmem [resolvable:$true] %s10382_s13 }
0xd93d   :  { %s13395_s16 = scalar_lea.vmem %s10383_s13, 32  ;;  %p13400_p12 = scmp.lt.s32.totalorder %s10383_s13, %s10383_s13 }
0xd93e   :  { %v10362_v20 = vpop.permute.xlu1 %10361  ;;  %p13396_p11 = scmp.ne.s32.totalorder %s10383_s13, %s13395_s16  ;;  %p13401_p13 = scmp.lt.s32.totalorder %s13395_s16, %s13395_s16 }
0xd93f   :  { %v10370_v4 = vsel %vm887_vm6, %v10369_v3, %v10362_v20 }
0xd940   :  { %p13402_p0 = por %p13401_p13, %p13400_p12 }
0xd942   :  { %p13403_p1 = pnand %p13402_p0, %p13396_p11 }
0xd9c1   :  { %v10356_v29 = vpop.xlane.xlu0 %10355 }
0xd9c2   :  { %v10357_v15 = vadd.f32 %v13354_v55, %v10356_v29 }
0xd9c4   :  { %10365 = vrot.lane.b32.xlu1 %v10357_v15, %s13477_s8 }
0xda36   :  { %v10366_v1 = vpop.permute.xlu1 %10365 }
0xda37   :  { %v10372_v27 = vsel %vm10371_vm12, %v10370_v4, %v10366_v1 }
0xda38   :  { %10374 = vst.msk [vmem:[#allocation8] sm:$0x3] %vm10373_vm13, %v10372_v27 }
0xda39   :  { %13406 = shalt.err (!%p13403_p1)
}
0xda3a   :  { %10385 = dma.vmem_to_hbm [thread:$0]  %s10383_s13, 32, %s16121_s15, [#allocation7]  }
0xda3b   :  { %13429 = dma.done.wait [#allocation7], 32  }
0xda3c   :  { %13430 = vsyncadd [#allocation7], 4294967264 }
0xda3d   :  { %13431 = dma.done.wait [#allocation10], 32  }
0xda3e   :  { %13432 = vsyncadd [#allocation10], 4294967264 }
0xda3f   :  { %10402 = vsyncpa [#allocation6], 1 }
0xda40   :  { %10403 = vsyncpa [#allocation7], 1 }
0xda41   :  { %10404 = vsyncpa [#allocation10], 1 }

</bundles_post_ra>
